<compile_context>
chip_gen: v7x
topology: tpu7x:2x2x1
jax: 0.10.0
libtpu: 0.0.40
codegen_flags: <defaults>
</compile_context>

<pallas_src>
import functools

import jax
import jax.numpy as jnp
from jax import lax
from jax.experimental import pallas as pl
from jax.experimental.pallas import tpu as pltpu

LANE = 128  # TPU lane width: output channels are kept padded to a multiple.


def _round_up(x, m):
    return ((x + m - 1) // m) * m


def _pick_tk(k):
    """K tile: full K when small, else a 128-multiple divisor (bounds VMEM)."""
    if k <= 1536:
        return k
    for t in (1152, 1024, 896, 768, 640, 512, 384, 256, 128):
        if k % t == 0:
            return t
    return k  # odd large K: fall back to full-K residency


# ----------------------------------------------------------------------------
# Pallas kernel: Y = [relu]( A @ W + bias [+ A_sc @ W_sc] [+ residual] )
# ----------------------------------------------------------------------------
def _fused_matmul_kernel(a_ref, w_ref, b_ref, *rest,
                         relu, has_shortcut, has_residual):
    idx = 0
    if has_shortcut:
        ae_ref, we_ref = rest[0], rest[1]
        idx = 2
    if has_residual:
        r_ref = rest[idx]
        idx += 1
    o_ref, acc_ref = rest[idx], rest[idx + 1]

    k = pl.program_id(2)

    @pl.when(k == 0)
    def _init():
        init = jnp.broadcast_to(b_ref[...].astype(jnp.float32), acc_ref.shape)
        if has_shortcut:  # fused 1x1-conv shortcut (second matmul, same acc)
            init = init + jnp.dot(ae_ref[...], we_ref[...],
                                  preferred_element_type=jnp.float32)
        if has_residual:  # identity shortcut
            init = init + r_ref[...].astype(jnp.float32)
        acc_ref[...] = init

    acc_ref[...] += jnp.dot(a_ref[...], w_ref[...],
                            preferred_element_type=jnp.float32)

    @pl.when(k == pl.num_programs(2) - 1)
    def _finalize():
        y = acc_ref[...]
        if relu:
            y = jnp.maximum(y, 0.0)
        o_ref[...] = y.astype(o_ref.dtype)


def fused_matmul(a, w, bias, *, shortcut=None, residual=None, relu=True,
                 out_dtype=jnp.bfloat16):
    """y = [relu]((a @ w) + bias [+ ae @ we] [+ residual]) via one Pallas call."""
    M, K = a.shape
    Kw, C = w.shape
    assert K == Kw and C % LANE == 0, (K, Kw, C)

    TM = 512 if M >= 512 else _round_up(max(M, 1), 8)
    M_pad = _round_up(M, TM)
    TN = 256 if C % 256 == 0 else LANE
    TK = _pick_tk(K)

    def pad_m(x):  # pad only the ragged tail of the M axis
        return x if M_pad == M else jnp.pad(x, ((0, M_pad - M), (0, 0)))

    a = pad_m(a.astype(jnp.bfloat16))
    w = w.astype(jnp.bfloat16)
    bias2 = bias.reshape(1, C).astype(jnp.float32)

    in_specs = [
        pl.BlockSpec((TM, TK), lambda i, j, k: (i, k)),
        pl.BlockSpec((TK, TN), lambda i, j, k: (k, j)),
        pl.BlockSpec((1, TN), lambda i, j, k: (0, j)),
    ]
    args = [a, w, bias2]

    has_shortcut = shortcut is not None
    has_residual = residual is not None
    if has_shortcut:
        ae, we = shortcut
        KE = ae.shape[1]
        args += [pad_m(ae.astype(jnp.bfloat16)), we.astype(jnp.bfloat16)]
        in_specs += [pl.BlockSpec((TM, KE), lambda i, j, k: (i, 0)),
                     pl.BlockSpec((KE, TN), lambda i, j, k: (0, j))]
    if has_residual:
        args += [pad_m(residual.astype(jnp.bfloat16))]
        in_specs += [pl.BlockSpec((TM, TN), lambda i, j, k: (i, j))]

    kernel = functools.partial(_fused_matmul_kernel, relu=relu,
                               has_shortcut=has_shortcut,
                               has_residual=has_residual)

    out = pl.pallas_call(
        kernel,
        out_shape=jax.ShapeDtypeStruct((M_pad, C), out_dtype),
        grid=(M_pad // TM, C // TN, K // TK),
        in_specs=in_specs,
        out_specs=pl.BlockSpec((TM, TN), lambda i, j, k: (i, j)),
        scratch_shapes=[pltpu.VMEM((TM, TN), jnp.float32)],
        compiler_params=pltpu.CompilerParams(
            dimension_semantics=("parallel", "parallel", "arbitrary"),
            vmem_limit_bytes=32 * 1024 * 1024),
    )(*args)
    return out[:M]


# ----------------------------------------------------------------------------
# Plain-JAX glue: im2col patch extraction (NHWC) and weight/BN folding
# ----------------------------------------------------------------------------
def im2col(x_nhwc, kh, kw, stride, pad):
    if pad:
        x_nhwc = jnp.pad(x_nhwc, ((0, 0), (pad, pad), (pad, pad), (0, 0)))
    N, H, W, C = x_nhwc.shape
    OH = (H - kh) // stride + 1
    OW = (W - kw) // stride + 1
    patches = [x_nhwc[:, i:i + OH * stride:stride, j:j + OW * stride:stride, :]
               for i in range(kh) for j in range(kw)]
    A = jnp.concatenate(patches, axis=-1)              # [N, OH, OW, kh*kw*C]
    return A.reshape(N * OH * OW, kh * kw * C), (N, OH, OW)


def prep_conv(w_oihw, conv_b, bn, cin_pad, cout_pad, eps=1e-5):
    """OIHW weight + bias + eval-mode BN -> folded [K, Cout_pad] matrix + bias."""
    gamma, beta, mean, var = bn
    co, ci, kh, kw = w_oihw.shape
    if cin_pad > ci:  # match physically channel-padded activations
        w_oihw = jnp.pad(w_oihw, ((0, 0), (0, cin_pad - ci), (0, 0), (0, 0)))
    w_mat = jnp.transpose(w_oihw, (2, 3, 1, 0)).reshape(kh * kw * cin_pad, co)
    scale = gamma / jnp.sqrt(var + eps)
    w_mat = w_mat * scale[None, :]                     # fold BN scale into W
    bias = (conv_b - mean) * scale + beta              # fold BN shift + conv bias
    if cout_pad > co:                                  # lane-dense output channels
        w_mat = jnp.pad(w_mat, ((0, 0), (0, cout_pad - co)))
        bias = jnp.pad(bias, (0, cout_pad - co))
    return w_mat, bias


def prep_linear(w_oi, b, cout_pad):
    out_f, _ = w_oi.shape
    w_mat = w_oi.T
    if cout_pad > out_f:
        w_mat = jnp.pad(w_mat, ((0, 0), (0, cout_pad - out_f)))
        b = jnp.pad(b, (0, cout_pad - out_f))
    return w_mat, b


# ----------------------------------------------------------------------------
# Resblk / Resnet18 forward (NCHW input, NHWC + padded channels internally)
# ----------------------------------------------------------------------------
def resblk_forward(x_nhwc, p, ch_in, ch_out):
    N, H, W, cin_p = x_nhwc.shape
    cout_p = _round_up(ch_out, LANE)

    # conv1 3x3 stride 2 pad 1 + bn1 + relu
    w1, b1 = prep_conv(p["w1"], p["b1"], p["bn1"], cin_p, cout_p)
    a1, (N, OH, OW) = im2col(x_nhwc, 3, 3, stride=2, pad=1)
    h1 = fused_matmul(a1, w1, b1, relu=True).reshape(N, OH, OW, cout_p)

    # conv2 3x3 stride 1 pad 1 + bn2, shortcut fused, + relu
    w2, b2 = prep_conv(p["w2"], p["b2"], p["bn2"], cout_p, cout_p)
    a2, _ = im2col(h1, 3, 3, stride=1, pad=1)

    if ch_in != ch_out:
        # shortcut: 1x1 conv stride 2 (no pad) + bn, fused as a 2nd matmul
        we, be = prep_conv(p["we"], p["be"], p["bne"], cin_p, cout_p)
        a_e = x_nhwc[:, ::2, ::2, :].reshape(N * OH * OW, cin_p)
        out = fused_matmul(a2, w2, b2 + be, shortcut=(a_e, we), relu=True)
    else:
        # identity shortcut; shape-consistent only at 1x1 spatial (as reached here)
        assert OH == H and OW == W, "identity shortcut needs matching spatial dims"
        # TODO(synk): PyTorch would broadcast mismatched spatial dims; unsupported.
        out = fused_matmul(a2, w2, b2,
                           residual=x_nhwc.reshape(N * H * W, cin_p), relu=True)
    return out.reshape(N, OH, OW, cout_p)


def resnet18_forward(x_nchw, params):
    x = jnp.transpose(x_nchw, (0, 2, 3, 1))            # NCHW -> NHWC

    # stem: conv 3x3 stride 3 pad 0 (3 -> 64) + bn + relu
    w, b = prep_conv(params["conv1_w"], params["conv1_b"], params["conv1_bn"],
                     cin_pad=3, cout_pad=_round_up(64, LANE))
    a, (N, OH, OW) = im2col(x, 3, 3, stride=3, pad=0)
    h = fused_matmul(a, w, b, relu=True).reshape(N, OH, OW, -1)

    h = resblk_forward(h, params["blk1"], 64, 128)
    h = resblk_forward(h, params["blk2"], 128, 256)
    h = resblk_forward(h, params["blk3"], 256, 512)
    h = resblk_forward(h, params["blk4"], 512, 512)

    # adaptive_avg_pool2d([1,1]) + flatten (plain-JAX glue)
    pooled = jnp.mean(h.astype(jnp.float32), axis=(1, 2))        # [N, 512]

    # final linear 512 -> 10 (output lanes padded to 128, sliced after)
    wl, bl = prep_linear(params["fc_w"], params["fc_b"], _round_up(10, LANE))
    logits = fused_matmul(pooled, wl, bl, relu=False, out_dtype=jnp.float32)
    return logits[:, :10]


# ----------------------------------------------------------------------------
# Pure-JAX reference (lax conv, f32) for correctness check
# ----------------------------------------------------------------------------
def resnet18_reference(x_nchw, params, eps=1e-5):
    def conv(x, w, b, stride, pad):
        dn = lax.conv_dimension_numbers(x.shape, w.shape, ("NCHW", "OIHW", "NCHW"))
        y = lax.conv_general_dilated(x, w, (stride, stride),
                                     [(pad, pad), (pad, pad)],
                                     dimension_numbers=dn)
        return y + b.reshape(1, -1, 1, 1)

    def bn(x, p):
        g, beta, m, v = p
        return ((x - m.reshape(1, -1, 1, 1))
                / jnp.sqrt(v.reshape(1, -1, 1, 1) + eps)
                * g.reshape(1, -1, 1, 1) + beta.reshape(1, -1, 1, 1))

    def blk(x, p, has_extra):
        out = jax.nn.relu(bn(conv(x, p["w1"], p["b1"], 2, 1), p["bn1"]))
        out = bn(conv(out, p["w2"], p["b2"], 1, 1), p["bn2"])
        sc = bn(conv(x, p["we"], p["be"], 2, 0), p["bne"]) if has_extra else x
        return jax.nn.relu(sc + out)

    h = jax.nn.relu(bn(conv(x_nchw, params["conv1_w"], params["conv1_b"], 3, 0),
                       params["conv1_bn"]))
    h = blk(h, params["blk1"], True)
    h = blk(h, params["blk2"], True)
    h = blk(h, params["blk3"], True)
    h = blk(h, params["blk4"], False)
    pooled = jnp.mean(h, axis=(2, 3))
    return pooled @ params["fc_w"].T + params["fc_b"]


# ----------------------------------------------------------------------------
def init_params(key):
    keys = iter(jax.random.split(key, 40))

    def conv_p(co, ci, k):
        k1, k2 = jax.random.split(next(keys))
        std = (2.0 / (ci * k * k)) ** 0.5
        return (jax.random.normal(k1, (co, ci, k, k), jnp.float32) * std,
                jax.random.normal(k2, (co,), jnp.float32) * 0.01)

    def bn_p(c):
        k1, k2, k3, k4 = jax.random.split(next(keys), 4)
        return (1.0 + 0.1 * jax.random.normal(k1, (c,), jnp.float32),
                0.1 * jax.random.normal(k2, (c,), jnp.float32),
                0.1 * jax.random.normal(k3, (c,), jnp.float32),
                jax.random.uniform(k4, (c,), jnp.float32, 0.5, 1.5))

    def blk_p(ci, co, extra):
        p = {"bn1": None}
        p["w1"], p["b1"] = conv_p(co, ci, 3)
        p["bn1"] = bn_p(co)
        p["w2"], p["b2"] = conv_p(co, co, 3)
        p["bn2"] = bn_p(co)
        if extra:
            p["we"], p["be"] = conv_p(co, ci, 1)
            p["bne"] = bn_p(co)
        return p

    params = {}
    params["conv1_w"], params["conv1_b"] = conv_p(64, 3, 3)
    params["conv1_bn"] = bn_p(64)
    params["blk1"] = blk_p(64, 128, True)
    params["blk2"] = blk_p(128, 256, True)
    params["blk3"] = blk_p(256, 512, True)
    params["blk4"] = blk_p(512, 512, False)
    kf1, kf2 = jax.random.split(next(keys))
    params["fc_w"] = jax.random.normal(kf1, (10, 512), jnp.float32) * (1.0 / 512) ** 0.5
    params["fc_b"] = jax.random.normal(kf2, (10,), jnp.float32) * 0.01
    return params


if __name__ == "__main__":
    key = jax.random.PRNGKey(0)
    kp, kx = jax.random.split(key)
    params = init_params(kp)

    # 24x24 input -> spatial 8, 4, 2, 1, 1 through the net (so blk4's identity
    # shortcut is shape-consistent, matching the PyTorch module's usage).
    x = jax.random.normal(kx, (2, 3, 24, 24), jnp.float32)

    out = jax.block_until_ready(jax.jit(resnet18_forward)(x, params))
    ref = jax.block_until_ready(jax.jit(resnet18_reference)(x, params))

    assert out.shape == (2, 10), out.shape
    # bf16 operands (f32 accumulation) across ~11 matmul layers -> compare with
    # a relative L2 tolerance instead of the old 1e-4 allclose.
    rel_err = float(jnp.linalg.norm(out - ref) / (jnp.linalg.norm(ref) + 1e-6))
    assert rel_err < 5e-2, rel_err
    print("KERNEL_OK")
</pallas_src>

<mosaic_0001>
module attributes {stable_mosaic.version = 11 : i64} {
  func.func @_fused_matmul_kernel(%arg0: i32, %arg1: i32, %arg2: i32, %arg3: memref<128x27xbf16, #tpu.memory_space<vmem>>, %arg4: memref<27x128xbf16, #tpu.memory_space<vmem>>, %arg5: memref<1x128xf32, #tpu.memory_space<vmem>>, %arg6: memref<128x128xbf16, #tpu.memory_space<vmem>>, %arg7: memref<128x128xf32, #tpu.memory_space<vmem>>) attributes {dimension_semantics = [#tpu.dimension_semantics<parallel>, #tpu.dimension_semantics<parallel>, #tpu.dimension_semantics<arbitrary>], iteration_bounds = array<i64: 1, 1, 1>, scalar_prefetch = 0 : i64, scratch_operands = 1 : i64, tpu.core_type = #tpu.core_type<tc>, window_params = [{transform_indices = @transform_0, window_bounds = array<i64: 128, 27>}, {transform_indices = @transform_1, window_bounds = array<i64: 27, 128>}, {transform_indices = @transform_2, window_bounds = array<i64: 1, 128>}, {transform_indices = @transform_3, window_bounds = array<i64: 128, 128>}]} {
    %c0_i32 = arith.constant 0 : i32
    %0 = arith.cmpi eq, %arg2, %c0_i32 : i32
    %1 = arith.extui %0 : i1 to i32
    %c0_i32_0 = arith.constant 0 : i32
    %2 = arith.cmpi ne, %1, %c0_i32_0 : i32
    scf.if %2 {
      %c0_10 = arith.constant 0 : index
      %c0_11 = arith.constant 0 : index
      %12 = vector.load %arg5[%c0_10, %c0_11] : memref<1x128xf32, #tpu.memory_space<vmem>>, vector<1x128xf32>
      %13 = vector.shape_cast %12 : vector<1x128xf32> to vector<1x128xf32>
      %14 = vector.broadcast %13 : vector<1x128xf32> to vector<128x128xf32>
      %c0_12 = arith.constant 0 : index
      %c0_13 = arith.constant 0 : index
      %15 = vector.load %arg7[%c0_12, %c0_13] : memref<128x128xf32, #tpu.memory_space<vmem>>, vector<128x128xf32>
      tpu.vector_store %arg7[%c0_12, %c0_13], %14 {strides = array<i32>} : memref<128x128xf32, #tpu.memory_space<vmem>>, vector<128x128xf32>,
    } else {
    }
    %c0 = arith.constant 0 : index
    %c0_1 = arith.constant 0 : index
    %3 = vector.load %arg7[%c0, %c0_1] : memref<128x128xf32, #tpu.memory_space<vmem>>, vector<128x128xf32>
    %c0_2 = arith.constant 0 : index
    %c0_3 = arith.constant 0 : index
    %4 = vector.load %arg3[%c0_2, %c0_3] : memref<128x27xbf16, #tpu.memory_space<vmem>>, vector<128x27xbf16>
    %c0_4 = arith.constant 0 : index
    %c0_5 = arith.constant 0 : index
    %5 = vector.load %arg4[%c0_4, %c0_5] : memref<27x128xbf16, #tpu.memory_space<vmem>>, vector<27x128xbf16>
    %cst = arith.constant dense<0.000000e+00> : vector<128x128xf32>
    %6 = tpu.matmul %4, %5, %cst {dimension_numbers = #tpu.dot_dimension_numbers<[1], [0], [0], [1], [0, 0, 1, 1], [], []>} : vector<128x27xbf16>, vector<27x128xbf16>, vector<128x128xf32> -> vector<128x128xf32>
    %7 = arith.addf %3, %6 : vector<128x128xf32>
    %c0_6 = arith.constant 0 : index
    %c0_7 = arith.constant 0 : index
    %8 = vector.load %arg7[%c0_6, %c0_7] : memref<128x128xf32, #tpu.memory_space<vmem>>, vector<128x128xf32>
    tpu.vector_store %arg7[%c0_6, %c0_7], %7 {strides = array<i32>} : memref<128x128xf32, #tpu.memory_space<vmem>>, vector<128x128xf32>,
    %c0_i32_8 = arith.constant 0 : i32
    %9 = arith.cmpi eq, %arg2, %c0_i32_8 : i32
    %10 = arith.extui %9 : i1 to i32
    %c0_i32_9 = arith.constant 0 : i32
    %11 = arith.cmpi ne, %10, %c0_i32_9 : i32
    scf.if %11 {
      %c0_10 = arith.constant 0 : index
      %c0_11 = arith.constant 0 : index
      %12 = vector.load %arg7[%c0_10, %c0_11] : memref<128x128xf32, #tpu.memory_space<vmem>>, vector<128x128xf32>
      %cst_12 = arith.constant 0.000000e+00 : f32
      %13 = vector.broadcast %cst_12 : f32 to vector<128x128xf32>
      %14 = arith.maximumf %12, %13 : vector<128x128xf32>
      %15 = arith.truncf %14 : vector<128x128xf32> to vector<128x128xbf16>
      %c0_13 = arith.constant 0 : index
      %c0_14 = arith.constant 0 : index
      %16 = vector.load %arg6[%c0_13, %c0_14] : memref<128x128xbf16, #tpu.memory_space<vmem>>, vector<128x128xbf16>
      tpu.vector_store %arg6[%c0_13, %c0_14], %15 {strides = array<i32>} : memref<128x128xbf16, #tpu.memory_space<vmem>>, vector<128x128xbf16>,
    } else {
    }
    return
  }
  func.func @transform_0(%arg0: i32, %arg1: i32, %arg2: i32) -> (i32, i32) {
    %c0_i32 = arith.constant 0 : i32
    return %arg0, %arg2 : i32, i32
  }
  func.func @transform_1(%arg0: i32, %arg1: i32, %arg2: i32) -> (i32, i32) {
    %c0_i32 = arith.constant 0 : i32
    return %arg2, %arg1 : i32, i32
  }
  func.func @transform_2(%arg0: i32, %arg1: i32, %arg2: i32) -> (i32, i32) {
    %c0_i32 = arith.constant 0 : i32
    %c0_i32_0 = arith.constant 0 : i32
    return %c0_i32, %arg1 : i32, i32
  }
  func.func @transform_3(%arg0: i32, %arg1: i32, %arg2: i32) -> (i32, i32) {
    %c0_i32 = arith.constant 0 : i32
    return %arg0, %arg1 : i32, i32
  }
}

module attributes {stable_mosaic.version = 11 : i64} {
  func.func @_fused_matmul_kernel(%arg0: i32, %arg1: i32, %arg2: i32, %arg3: memref<32x1152xbf16, #tpu.memory_space<vmem>>, %arg4: memref<1152x128xbf16, #tpu.memory_space<vmem>>, %arg5: memref<1x128xf32, #tpu.memory_space<vmem>>, %arg6: memref<32x128xbf16, #tpu.memory_space<vmem>>, %arg7: memref<32x128xf32, #tpu.memory_space<vmem>>) attributes {dimension_semantics = [#tpu.dimension_semantics<parallel>, #tpu.dimension_semantics<parallel>, #tpu.dimension_semantics<arbitrary>], iteration_bounds = array<i64: 1, 1, 1>, scalar_prefetch = 0 : i64, scratch_operands = 1 : i64, tpu.core_type = #tpu.core_type<tc>, window_params = [{transform_indices = @transform_0, window_bounds = array<i64: 32, 1152>}, {transform_indices = @transform_1, window_bounds = array<i64: 1152, 128>}, {transform_indices = @transform_2, window_bounds = array<i64: 1, 128>}, {transform_indices = @transform_3, window_bounds = array<i64: 32, 128>}]} {
    %c0_i32 = arith.constant 0 : i32
    %0 = arith.cmpi eq, %arg2, %c0_i32 : i32
    %1 = arith.extui %0 : i1 to i32
    %c0_i32_0 = arith.constant 0 : i32
    %2 = arith.cmpi ne, %1, %c0_i32_0 : i32
    scf.if %2 {
      %c0_10 = arith.constant 0 : index
      %c0_11 = arith.constant 0 : index
      %12 = vector.load %arg5[%c0_10, %c0_11] : memref<1x128xf32, #tpu.memory_space<vmem>>, vector<1x128xf32>
      %13 = vector.shape_cast %12 : vector<1x128xf32> to vector<1x128xf32>
      %14 = vector.broadcast %13 : vector<1x128xf32> to vector<32x128xf32>
      %c0_12 = arith.constant 0 : index
      %c0_13 = arith.constant 0 : index
      %15 = vector.load %arg7[%c0_12, %c0_13] : memref<32x128xf32, #tpu.memory_space<vmem>>, vector<32x128xf32>
      tpu.vector_store %arg7[%c0_12, %c0_13], %14 {strides = array<i32>} : memref<32x128xf32, #tpu.memory_space<vmem>>, vector<32x128xf32>,
    } else {
    }
    %c0 = arith.constant 0 : index
    %c0_1 = arith.constant 0 : index
    %3 = vector.load %arg7[%c0, %c0_1] : memref<32x128xf32, #tpu.memory_space<vmem>>, vector<32x128xf32>
    %c0_2 = arith.constant 0 : index
    %c0_3 = arith.constant 0 : index
    %4 = vector.load %arg3[%c0_2, %c0_3] : memref<32x1152xbf16, #tpu.memory_space<vmem>>, vector<32x1152xbf16>
    %c0_4 = arith.constant 0 : index
    %c0_5 = arith.constant 0 : index
    %5 = vector.load %arg4[%c0_4, %c0_5] : memref<1152x128xbf16, #tpu.memory_space<vmem>>, vector<1152x128xbf16>
    %cst = arith.constant dense<0.000000e+00> : vector<32x128xf32>
    %6 = tpu.matmul %4, %5, %cst {dimension_numbers = #tpu.dot_dimension_numbers<[1], [0], [0], [1], [0, 0, 1, 1], [], []>} : vector<32x1152xbf16>, vector<1152x128xbf16>, vector<32x128xf32> -> vector<32x128xf32>
    %7 = arith.addf %3, %6 : vector<32x128xf32>
    %c0_6 = arith.constant 0 : index
    %c0_7 = arith.constant 0 : index
    %8 = vector.load %arg7[%c0_6, %c0_7] : memref<32x128xf32, #tpu.memory_space<vmem>>, vector<32x128xf32>
    tpu.vector_store %arg7[%c0_6, %c0_7], %7 {strides = array<i32>} : memref<32x128xf32, #tpu.memory_space<vmem>>, vector<32x128xf32>,
    %c0_i32_8 = arith.constant 0 : i32
    %9 = arith.cmpi eq, %arg2, %c0_i32_8 : i32
    %10 = arith.extui %9 : i1 to i32
    %c0_i32_9 = arith.constant 0 : i32
    %11 = arith.cmpi ne, %10, %c0_i32_9 : i32
    scf.if %11 {
      %c0_10 = arith.constant 0 : index
      %c0_11 = arith.constant 0 : index
      %12 = vector.load %arg7[%c0_10, %c0_11] : memref<32x128xf32, #tpu.memory_space<vmem>>, vector<32x128xf32>
      %cst_12 = arith.constant 0.000000e+00 : f32
      %13 = vector.broadcast %cst_12 : f32 to vector<32x128xf32>
      %14 = arith.maximumf %12, %13 : vector<32x128xf32>
      %15 = arith.truncf %14 : vector<32x128xf32> to vector<32x128xbf16>
      %c0_13 = arith.constant 0 : index
      %c0_14 = arith.constant 0 : index
      %16 = vector.load %arg6[%c0_13, %c0_14] : memref<32x128xbf16, #tpu.memory_space<vmem>>, vector<32x128xbf16>
      tpu.vector_store %arg6[%c0_13, %c0_14], %15 {strides = array<i32>} : memref<32x128xbf16, #tpu.memory_space<vmem>>, vector<32x128xbf16>,
    } else {
    }
    return
  }
  func.func @transform_0(%arg0: i32, %arg1: i32, %arg2: i32) -> (i32, i32) {
    %c0_i32 = arith.constant 0 : i32
    return %arg0, %arg2 : i32, i32
  }
  func.func @transform_1(%arg0: i32, %arg1: i32, %arg2: i32) -> (i32, i32) {
    %c0_i32 = arith.constant 0 : i32
    return %arg2, %arg1 : i32, i32
  }
  func.func @transform_2(%arg0: i32, %arg1: i32, %arg2: i32) -> (i32, i32) {
    %c0_i32 = arith.constant 0 : i32
    %c0_i32_0 = arith.constant 0 : i32
    return %c0_i32, %arg1 : i32, i32
  }
  func.func @transform_3(%arg0: i32, %arg1: i32, %arg2: i32) -> (i32, i32) {
    %c0_i32 = arith.constant 0 : i32
    return %arg0, %arg1 : i32, i32
  }
}

module attributes {stable_mosaic.version = 11 : i64} {
  func.func @_fused_matmul_kernel(%arg0: i32, %arg1: i32, %arg2: i32, %arg3: memref<32x1152xbf16, #tpu.memory_space<vmem>>, %arg4: memref<1152x128xbf16, #tpu.memory_space<vmem>>, %arg5: memref<1x128xf32, #tpu.memory_space<vmem>>, %arg6: memref<32x128xbf16, #tpu.memory_space<vmem>>, %arg7: memref<128x128xbf16, #tpu.memory_space<vmem>>, %arg8: memref<32x128xbf16, #tpu.memory_space<vmem>>, %arg9: memref<32x128xf32, #tpu.memory_space<vmem>>) attributes {dimension_semantics = [#tpu.dimension_semantics<parallel>, #tpu.dimension_semantics<parallel>, #tpu.dimension_semantics<arbitrary>], iteration_bounds = array<i64: 1, 1, 1>, scalar_prefetch = 0 : i64, scratch_operands = 1 : i64, tpu.core_type = #tpu.core_type<tc>, window_params = [{transform_indices = @transform_0, window_bounds = array<i64: 32, 1152>}, {transform_indices = @transform_1, window_bounds = array<i64: 1152, 128>}, {transform_indices = @transform_2, window_bounds = array<i64: 1, 128>}, {transform_indices = @transform_3, window_bounds = array<i64: 32, 128>}, {transform_indices = @transform_4, window_bounds = array<i64: 128, 128>}, {transform_indices = @transform_5, window_bounds = array<i64: 32, 128>}]} {
    %c0_i32 = arith.constant 0 : i32
    %0 = arith.cmpi eq, %arg2, %c0_i32 : i32
    %1 = arith.extui %0 : i1 to i32
    %c0_i32_0 = arith.constant 0 : i32
    %2 = arith.cmpi ne, %1, %c0_i32_0 : i32
    scf.if %2 {
      %c0_10 = arith.constant 0 : index
      %c0_11 = arith.constant 0 : index
      %12 = vector.load %arg5[%c0_10, %c0_11] : memref<1x128xf32, #tpu.memory_space<vmem>>, vector<1x128xf32>
      %13 = vector.shape_cast %12 : vector<1x128xf32> to vector<1x128xf32>
      %14 = vector.broadcast %13 : vector<1x128xf32> to vector<32x128xf32>
      %c0_12 = arith.constant 0 : index
      %c0_13 = arith.constant 0 : index
      %15 = vector.load %arg6[%c0_12, %c0_13] : memref<32x128xbf16, #tpu.memory_space<vmem>>, vector<32x128xbf16>
      %c0_14 = arith.constant 0 : index
      %c0_15 = arith.constant 0 : index
      %16 = vector.load %arg7[%c0_14, %c0_15] : memref<128x128xbf16, #tpu.memory_space<vmem>>, vector<128x128xbf16>
      %cst_16 = arith.constant dense<0.000000e+00> : vector<32x128xf32>
      %17 = tpu.matmul %15, %16, %cst_16 {dimension_numbers = #tpu.dot_dimension_numbers<[1], [0], [0], [1], [0, 0, 1, 1], [], []>} : vector<32x128xbf16>, vector<128x128xbf16>, vector<32x128xf32> -> vector<32x128xf32>
      %18 = arith.addf %14, %17 : vector<32x128xf32>
      %c0_17 = arith.constant 0 : index
      %c0_18 = arith.constant 0 : index
      %19 = vector.load %arg9[%c0_17, %c0_18] : memref<32x128xf32, #tpu.memory_space<vmem>>, vector<32x128xf32>
      tpu.vector_store %arg9[%c0_17, %c0_18], %18 {strides = array<i32>} : memref<32x128xf32, #tpu.memory_space<vmem>>, vector<32x128xf32>,
    } else {
    }
    %c0 = arith.constant 0 : index
    %c0_1 = arith.constant 0 : index
    %3 = vector.load %arg9[%c0, %c0_1] : memref<32x128xf32, #tpu.memory_space<vmem>>, vector<32x128xf32>
    %c0_2 = arith.constant 0 : index
    %c0_3 = arith.constant 0 : index
    %4 = vector.load %arg3[%c0_2, %c0_3] : memref<32x1152xbf16, #tpu.memory_space<vmem>>, vector<32x1152xbf16>
    %c0_4 = arith.constant 0 : index
    %c0_5 = arith.constant 0 : index
    %5 = vector.load %arg4[%c0_4, %c0_5] : memref<1152x128xbf16, #tpu.memory_space<vmem>>, vector<1152x128xbf16>
    %cst = arith.constant dense<0.000000e+00> : vector<32x128xf32>
    %6 = tpu.matmul %4, %5, %cst {dimension_numbers = #tpu.dot_dimension_numbers<[1], [0], [0], [1], [0, 0, 1, 1], [], []>} : vector<32x1152xbf16>, vector<1152x128xbf16>, vector<32x128xf32> -> vector<32x128xf32>
    %7 = arith.addf %3, %6 : vector<32x128xf32>
    %c0_6 = arith.constant 0 : index
    %c0_7 = arith.constant 0 : index
    %8 = vector.load %arg9[%c0_6, %c0_7] : memref<32x128xf32, #tpu.memory_space<vmem>>, vector<32x128xf32>
    tpu.vector_store %arg9[%c0_6, %c0_7], %7 {strides = array<i32>} : memref<32x128xf32, #tpu.memory_space<vmem>>, vector<32x128xf32>,
    %c0_i32_8 = arith.constant 0 : i32
    %9 = arith.cmpi eq, %arg2, %c0_i32_8 : i32
    %10 = arith.extui %9 : i1 to i32
    %c0_i32_9 = arith.constant 0 : i32
    %11 = arith.cmpi ne, %10, %c0_i32_9 : i32
    scf.if %11 {
      %c0_10 = arith.constant 0 : index
      %c0_11 = arith.constant 0 : index
      %12 = vector.load %arg9[%c0_10, %c0_11] : memref<32x128xf32, #tpu.memory_space<vmem>>, vector<32x128xf32>
      %cst_12 = arith.constant 0.000000e+00 : f32
      %13 = vector.broadcast %cst_12 : f32 to vector<32x128xf32>
      %14 = arith.maximumf %12, %13 : vector<32x128xf32>
      %15 = arith.truncf %14 : vector<32x128xf32> to vector<32x128xbf16>
      %c0_13 = arith.constant 0 : index
      %c0_14 = arith.constant 0 : index
      %16 = vector.load %arg8[%c0_13, %c0_14] : memref<32x128xbf16, #tpu.memory_space<vmem>>, vector<32x128xbf16>
      tpu.vector_store %arg8[%c0_13, %c0_14], %15 {strides = array<i32>} : memref<32x128xbf16, #tpu.memory_space<vmem>>, vector<32x128xbf16>,
    } else {
    }
    return
  }
  func.func @transform_0(%arg0: i32, %arg1: i32, %arg2: i32) -> (i32, i32) {
    %c0_i32 = arith.constant 0 : i32
    return %arg0, %arg2 : i32, i32
  }
  func.func @transform_1(%arg0: i32, %arg1: i32, %arg2: i32) -> (i32, i32) {
    %c0_i32 = arith.constant 0 : i32
    return %arg2, %arg1 : i32, i32
  }
  func.func @transform_2(%arg0: i32, %arg1: i32, %arg2: i32) -> (i32, i32) {
    %c0_i32 = arith.constant 0 : i32
    %c0_i32_0 = arith.constant 0 : i32
    return %c0_i32, %arg1 : i32, i32
  }
  func.func @transform_3(%arg0: i32, %arg1: i32, %arg2: i32) -> (i32, i32) {
    %c0_i32 = arith.constant 0 : i32
    %c0_i32_0 = arith.constant 0 : i32
    return %arg0, %c0_i32 : i32, i32
  }
  func.func @transform_4(%arg0: i32, %arg1: i32, %arg2: i32) -> (i32, i32) {
    %c0_i32 = arith.constant 0 : i32
    %c0_i32_0 = arith.constant 0 : i32
    return %c0_i32, %arg1 : i32, i32
  }
  func.func @transform_5(%arg0: i32, %arg1: i32, %arg2: i32) -> (i32, i32) {
    %c0_i32 = arith.constant 0 : i32
    return %arg0, %arg1 : i32, i32
  }
}

module attributes {stable_mosaic.version = 11 : i64} {
  func.func @_fused_matmul_kernel(%arg0: i32, %arg1: i32, %arg2: i32, %arg3: memref<8x1152xbf16, #tpu.memory_space<vmem>>, %arg4: memref<1152x256xbf16, #tpu.memory_space<vmem>>, %arg5: memref<1x256xf32, #tpu.memory_space<vmem>>, %arg6: memref<8x256xbf16, #tpu.memory_space<vmem>>, %arg7: memref<8x256xf32, #tpu.memory_space<vmem>>) attributes {dimension_semantics = [#tpu.dimension_semantics<parallel>, #tpu.dimension_semantics<parallel>, #tpu.dimension_semantics<arbitrary>], iteration_bounds = array<i64: 1, 1, 1>, scalar_prefetch = 0 : i64, scratch_operands = 1 : i64, tpu.core_type = #tpu.core_type<tc>, window_params = [{transform_indices = @transform_0, window_bounds = array<i64: 8, 1152>}, {transform_indices = @transform_1, window_bounds = array<i64: 1152, 256>}, {transform_indices = @transform_2, window_bounds = array<i64: 1, 256>}, {transform_indices = @transform_3, window_bounds = array<i64: 8, 256>}]} {
    %c0_i32 = arith.constant 0 : i32
    %0 = arith.cmpi eq, %arg2, %c0_i32 : i32
    %1 = arith.extui %0 : i1 to i32
    %c0_i32_0 = arith.constant 0 : i32
    %2 = arith.cmpi ne, %1, %c0_i32_0 : i32
    scf.if %2 {
      %c0_10 = arith.constant 0 : index
      %c0_11 = arith.constant 0 : index
      %12 = vector.load %arg5[%c0_10, %c0_11] : memref<1x256xf32, #tpu.memory_space<vmem>>, vector<1x256xf32>
      %13 = vector.shape_cast %12 : vector<1x256xf32> to vector<1x256xf32>
      %14 = vector.broadcast %13 : vector<1x256xf32> to vector<8x256xf32>
      %c0_12 = arith.constant 0 : index
      %c0_13 = arith.constant 0 : index
      %15 = vector.load %arg7[%c0_12, %c0_13] : memref<8x256xf32, #tpu.memory_space<vmem>>, vector<8x256xf32>
      tpu.vector_store %arg7[%c0_12, %c0_13], %14 {strides = array<i32>} : memref<8x256xf32, #tpu.memory_space<vmem>>, vector<8x256xf32>,
    } else {
    }
    %c0 = arith.constant 0 : index
    %c0_1 = arith.constant 0 : index
    %3 = vector.load %arg7[%c0, %c0_1] : memref<8x256xf32, #tpu.memory_space<vmem>>, vector<8x256xf32>
    %c0_2 = arith.constant 0 : index
    %c0_3 = arith.constant 0 : index
    %4 = vector.load %arg3[%c0_2, %c0_3] : memref<8x1152xbf16, #tpu.memory_space<vmem>>, vector<8x1152xbf16>
    %c0_4 = arith.constant 0 : index
    %c0_5 = arith.constant 0 : index
    %5 = vector.load %arg4[%c0_4, %c0_5] : memref<1152x256xbf16, #tpu.memory_space<vmem>>, vector<1152x256xbf16>
    %cst = arith.constant dense<0.000000e+00> : vector<8x256xf32>
    %6 = tpu.matmul %4, %5, %cst {dimension_numbers = #tpu.dot_dimension_numbers<[1], [0], [0], [1], [0, 0, 1, 1], [], []>} : vector<8x1152xbf16>, vector<1152x256xbf16>, vector<8x256xf32> -> vector<8x256xf32>
    %7 = arith.addf %3, %6 : vector<8x256xf32>
    %c0_6 = arith.constant 0 : index
    %c0_7 = arith.constant 0 : index
    %8 = vector.load %arg7[%c0_6, %c0_7] : memref<8x256xf32, #tpu.memory_space<vmem>>, vector<8x256xf32>
    tpu.vector_store %arg7[%c0_6, %c0_7], %7 {strides = array<i32>} : memref<8x256xf32, #tpu.memory_space<vmem>>, vector<8x256xf32>,
    %c0_i32_8 = arith.constant 0 : i32
    %9 = arith.cmpi eq, %arg2, %c0_i32_8 : i32
    %10 = arith.extui %9 : i1 to i32
    %c0_i32_9 = arith.constant 0 : i32
    %11 = arith.cmpi ne, %10, %c0_i32_9 : i32
    scf.if %11 {
      %c0_10 = arith.constant 0 : index
      %c0_11 = arith.constant 0 : index
      %12 = vector.load %arg7[%c0_10, %c0_11] : memref<8x256xf32, #tpu.memory_space<vmem>>, vector<8x256xf32>
      %cst_12 = arith.constant 0.000000e+00 : f32
      %13 = vector.broadcast %cst_12 : f32 to vector<8x256xf32>
      %14 = arith.maximumf %12, %13 : vector<8x256xf32>
      %15 = arith.truncf %14 : vector<8x256xf32> to vector<8x256xbf16>
      %c0_13 = arith.constant 0 : index
      %c0_14 = arith.constant 0 : index
      %16 = vector.load %arg6[%c0_13, %c0_14] : memref<8x256xbf16, #tpu.memory_space<vmem>>, vector<8x256xbf16>
      tpu.vector_store %arg6[%c0_13, %c0_14], %15 {strides = array<i32>} : memref<8x256xbf16, #tpu.memory_space<vmem>>, vector<8x256xbf16>,
    } else {
    }
    return
  }
  func.func @transform_0(%arg0: i32, %arg1: i32, %arg2: i32) -> (i32, i32) {
    %c0_i32 = arith.constant 0 : i32
    return %arg0, %arg2 : i32, i32
  }
  func.func @transform_1(%arg0: i32, %arg1: i32, %arg2: i32) -> (i32, i32) {
    %c0_i32 = arith.constant 0 : i32
    return %arg2, %arg1 : i32, i32
  }
  func.func @transform_2(%arg0: i32, %arg1: i32, %arg2: i32) -> (i32, i32) {
    %c0_i32 = arith.constant 0 : i32
    %c0_i32_0 = arith.constant 0 : i32
    return %c0_i32, %arg1 : i32, i32
  }
  func.func @transform_3(%arg0: i32, %arg1: i32, %arg2: i32) -> (i32, i32) {
    %c0_i32 = arith.constant 0 : i32
    return %arg0, %arg1 : i32, i32
  }
}

module attributes {stable_mosaic.version = 11 : i64} {
  func.func @_fused_matmul_kernel(%arg0: i32, %arg1: i32, %arg2: i32, %arg3: memref<8x1152xbf16, #tpu.memory_space<vmem>>, %arg4: memref<1152x256xbf16, #tpu.memory_space<vmem>>, %arg5: memref<1x256xf32, #tpu.memory_space<vmem>>, %arg6: memref<8x128xbf16, #tpu.memory_space<vmem>>, %arg7: memref<128x256xbf16, #tpu.memory_space<vmem>>, %arg8: memref<8x256xbf16, #tpu.memory_space<vmem>>, %arg9: memref<8x256xf32, #tpu.memory_space<vmem>>) attributes {dimension_semantics = [#tpu.dimension_semantics<parallel>, #tpu.dimension_semantics<parallel>, #tpu.dimension_semantics<arbitrary>], iteration_bounds = array<i64: 1, 1, 2>, scalar_prefetch = 0 : i64, scratch_operands = 1 : i64, tpu.core_type = #tpu.core_type<tc>, window_params = [{transform_indices = @transform_0, window_bounds = array<i64: 8, 1152>}, {transform_indices = @transform_1, window_bounds = array<i64: 1152, 256>}, {transform_indices = @transform_2, window_bounds = array<i64: 1, 256>}, {transform_indices = @transform_3, window_bounds = array<i64: 8, 128>}, {transform_indices = @transform_4, window_bounds = array<i64: 128, 256>}, {transform_indices = @transform_5, window_bounds = array<i64: 8, 256>}]} {
    %c0_i32 = arith.constant 0 : i32
    %0 = arith.cmpi eq, %arg2, %c0_i32 : i32
    %1 = arith.extui %0 : i1 to i32
    %c0_i32_0 = arith.constant 0 : i32
    %2 = arith.cmpi ne, %1, %c0_i32_0 : i32
    scf.if %2 {
      %c0_9 = arith.constant 0 : index
      %c0_10 = arith.constant 0 : index
      %12 = vector.load %arg5[%c0_9, %c0_10] : memref<1x256xf32, #tpu.memory_space<vmem>>, vector<1x256xf32>
      %13 = vector.shape_cast %12 : vector<1x256xf32> to vector<1x256xf32>
      %14 = vector.broadcast %13 : vector<1x256xf32> to vector<8x256xf32>
      %c0_11 = arith.constant 0 : index
      %c0_12 = arith.constant 0 : index
      %15 = vector.load %arg6[%c0_11, %c0_12] : memref<8x128xbf16, #tpu.memory_space<vmem>>, vector<8x128xbf16>
      %c0_13 = arith.constant 0 : index
      %c0_14 = arith.constant 0 : index
      %16 = vector.load %arg7[%c0_13, %c0_14] : memref<128x256xbf16, #tpu.memory_space<vmem>>, vector<128x256xbf16>
      %cst_15 = arith.constant dense<0.000000e+00> : vector<8x256xf32>
      %17 = tpu.matmul %15, %16, %cst_15 {dimension_numbers = #tpu.dot_dimension_numbers<[1], [0], [0], [1], [0, 0, 1, 1], [], []>} : vector<8x128xbf16>, vector<128x256xbf16>, vector<8x256xf32> -> vector<8x256xf32>
      %18 = arith.addf %14, %17 : vector<8x256xf32>
      %c0_16 = arith.constant 0 : index
      %c0_17 = arith.constant 0 : index
      %19 = vector.load %arg9[%c0_16, %c0_17] : memref<8x256xf32, #tpu.memory_space<vmem>>, vector<8x256xf32>
      tpu.vector_store %arg9[%c0_16, %c0_17], %18 {strides = array<i32>} : memref<8x256xf32, #tpu.memory_space<vmem>>, vector<8x256xf32>,
    } else {
    }
    %c0 = arith.constant 0 : index
    %c0_1 = arith.constant 0 : index
    %3 = vector.load %arg9[%c0, %c0_1] : memref<8x256xf32, #tpu.memory_space<vmem>>, vector<8x256xf32>
    %c0_2 = arith.constant 0 : index
    %c0_3 = arith.constant 0 : index
    %4 = vector.load %arg3[%c0_2, %c0_3] : memref<8x1152xbf16, #tpu.memory_space<vmem>>, vector<8x1152xbf16>
    %c0_4 = arith.constant 0 : index
    %c0_5 = arith.constant 0 : index
    %5 = vector.load %arg4[%c0_4, %c0_5] : memref<1152x256xbf16, #tpu.memory_space<vmem>>, vector<1152x256xbf16>
    %cst = arith.constant dense<0.000000e+00> : vector<8x256xf32>
    %6 = tpu.matmul %4, %5, %cst {dimension_numbers = #tpu.dot_dimension_numbers<[1], [0], [0], [1], [0, 0, 1, 1], [], []>} : vector<8x1152xbf16>, vector<1152x256xbf16>, vector<8x256xf32> -> vector<8x256xf32>
    %7 = arith.addf %3, %6 : vector<8x256xf32>
    %c0_6 = arith.constant 0 : index
    %c0_7 = arith.constant 0 : index
    %8 = vector.load %arg9[%c0_6, %c0_7] : memref<8x256xf32, #tpu.memory_space<vmem>>, vector<8x256xf32>
    tpu.vector_store %arg9[%c0_6, %c0_7], %7 {strides = array<i32>} : memref<8x256xf32, #tpu.memory_space<vmem>>, vector<8x256xf32>,
    %c1_i32 = arith.constant 1 : i32
    %9 = arith.cmpi eq, %arg2, %c1_i32 : i32
    %10 = arith.extui %9 : i1 to i32
    %c0_i32_8 = arith.constant 0 : i32
    %11 = arith.cmpi ne, %10, %c0_i32_8 : i32
    scf.if %11 {
      %c0_9 = arith.constant 0 : index
      %c0_10 = arith.constant 0 : index
      %12 = vector.load %arg9[%c0_9, %c0_10] : memref<8x256xf32, #tpu.memory_space<vmem>>, vector<8x256xf32>
      %cst_11 = arith.constant 0.000000e+00 : f32
      %13 = vector.broadcast %cst_11 : f32 to vector<8x256xf32>
      %14 = arith.maximumf %12, %13 : vector<8x256xf32>
      %15 = arith.truncf %14 : vector<8x256xf32> to vector<8x256xbf16>
      %c0_12 = arith.constant 0 : index
      %c0_13 = arith.constant 0 : index
      %16 = vector.load %arg8[%c0_12, %c0_13] : memref<8x256xbf16, #tpu.memory_space<vmem>>, vector<8x256xbf16>
      tpu.vector_store %arg8[%c0_12, %c0_13], %15 {strides = array<i32>} : memref<8x256xbf16, #tpu.memory_space<vmem>>, vector<8x256xbf16>,
    } else {
    }
    return
  }
  func.func @transform_0(%arg0: i32, %arg1: i32, %arg2: i32) -> (i32, i32) {
    %c0_i32 = arith.constant 0 : i32
    return %arg0, %arg2 : i32, i32
  }
  func.func @transform_1(%arg0: i32, %arg1: i32, %arg2: i32) -> (i32, i32) {
    %c0_i32 = arith.constant 0 : i32
    return %arg2, %arg1 : i32, i32
  }
  func.func @transform_2(%arg0: i32, %arg1: i32, %arg2: i32) -> (i32, i32) {
    %c0_i32 = arith.constant 0 : i32
    %c0_i32_0 = arith.constant 0 : i32
    return %c0_i32, %arg1 : i32, i32
  }
  func.func @transform_3(%arg0: i32, %arg1: i32, %arg2: i32) -> (i32, i32) {
    %c0_i32 = arith.constant 0 : i32
    %c0_i32_0 = arith.constant 0 : i32
    return %arg0, %c0_i32 : i32, i32
  }
  func.func @transform_4(%arg0: i32, %arg1: i32, %arg2: i32) -> (i32, i32) {
    %c0_i32 = arith.constant 0 : i32
    %c0_i32_0 = arith.constant 0 : i32
    return %c0_i32, %arg1 : i32, i32
  }
  func.func @transform_5(%arg0: i32, %arg1: i32, %arg2: i32) -> (i32, i32) {
    %c0_i32 = arith.constant 0 : i32
    return %arg0, %arg1 : i32, i32
  }
}

module attributes {stable_mosaic.version = 11 : i64} {
  func.func @_fused_matmul_kernel(%arg0: i32, %arg1: i32, %arg2: i32, %arg3: memref<8x1152xbf16, #tpu.memory_space<vmem>>, %arg4: memref<1152x256xbf16, #tpu.memory_space<vmem>>, %arg5: memref<1x256xf32, #tpu.memory_space<vmem>>, %arg6: memref<8x256xbf16, #tpu.memory_space<vmem>>, %arg7: memref<8x256xf32, #tpu.memory_space<vmem>>) attributes {dimension_semantics = [#tpu.dimension_semantics<parallel>, #tpu.dimension_semantics<parallel>, #tpu.dimension_semantics<arbitrary>], iteration_bounds = array<i64: 1, 2, 2>, scalar_prefetch = 0 : i64, scratch_operands = 1 : i64, tpu.core_type = #tpu.core_type<tc>, window_params = [{transform_indices = @transform_0, window_bounds = array<i64: 8, 1152>}, {transform_indices = @transform_1, window_bounds = array<i64: 1152, 256>}, {transform_indices = @transform_2, window_bounds = array<i64: 1, 256>}, {transform_indices = @transform_3, window_bounds = array<i64: 8, 256>}]} {
    %c0_i32 = arith.constant 0 : i32
    %0 = arith.cmpi eq, %arg2, %c0_i32 : i32
    %1 = arith.extui %0 : i1 to i32
    %c0_i32_0 = arith.constant 0 : i32
    %2 = arith.cmpi ne, %1, %c0_i32_0 : i32
    scf.if %2 {
      %c0_9 = arith.constant 0 : index
      %c0_10 = arith.constant 0 : index
      %12 = vector.load %arg5[%c0_9, %c0_10] : memref<1x256xf32, #tpu.memory_space<vmem>>, vector<1x256xf32>
      %13 = vector.shape_cast %12 : vector<1x256xf32> to vector<1x256xf32>
      %14 = vector.broadcast %13 : vector<1x256xf32> to vector<8x256xf32>
      %c0_11 = arith.constant 0 : index
      %c0_12 = arith.constant 0 : index
      %15 = vector.load %arg7[%c0_11, %c0_12] : memref<8x256xf32, #tpu.memory_space<vmem>>, vector<8x256xf32>
      tpu.vector_store %arg7[%c0_11, %c0_12], %14 {strides = array<i32>} : memref<8x256xf32, #tpu.memory_space<vmem>>, vector<8x256xf32>,
    } else {
    }
    %c0 = arith.constant 0 : index
    %c0_1 = arith.constant 0 : index
    %3 = vector.load %arg7[%c0, %c0_1] : memref<8x256xf32, #tpu.memory_space<vmem>>, vector<8x256xf32>
    %c0_2 = arith.constant 0 : index
    %c0_3 = arith.constant 0 : index
    %4 = vector.load %arg3[%c0_2, %c0_3] : memref<8x1152xbf16, #tpu.memory_space<vmem>>, vector<8x1152xbf16>
    %c0_4 = arith.constant 0 : index
    %c0_5 = arith.constant 0 : index
    %5 = vector.load %arg4[%c0_4, %c0_5] : memref<1152x256xbf16, #tpu.memory_space<vmem>>, vector<1152x256xbf16>
    %cst = arith.constant dense<0.000000e+00> : vector<8x256xf32>
    %6 = tpu.matmul %4, %5, %cst {dimension_numbers = #tpu.dot_dimension_numbers<[1], [0], [0], [1], [0, 0, 1, 1], [], []>} : vector<8x1152xbf16>, vector<1152x256xbf16>, vector<8x256xf32> -> vector<8x256xf32>
    %7 = arith.addf %3, %6 : vector<8x256xf32>
    %c0_6 = arith.constant 0 : index
    %c0_7 = arith.constant 0 : index
    %8 = vector.load %arg7[%c0_6, %c0_7] : memref<8x256xf32, #tpu.memory_space<vmem>>, vector<8x256xf32>
    tpu.vector_store %arg7[%c0_6, %c0_7], %7 {strides = array<i32>} : memref<8x256xf32, #tpu.memory_space<vmem>>, vector<8x256xf32>,
    %c1_i32 = arith.constant 1 : i32
    %9 = arith.cmpi eq, %arg2, %c1_i32 : i32
    %10 = arith.extui %9 : i1 to i32
    %c0_i32_8 = arith.constant 0 : i32
    %11 = arith.cmpi ne, %10, %c0_i32_8 : i32
    scf.if %11 {
      %c0_9 = arith.constant 0 : index
      %c0_10 = arith.constant 0 : index
      %12 = vector.load %arg7[%c0_9, %c0_10] : memref<8x256xf32, #tpu.memory_space<vmem>>, vector<8x256xf32>
      %cst_11 = arith.constant 0.000000e+00 : f32
      %13 = vector.broadcast %cst_11 : f32 to vector<8x256xf32>
      %14 = arith.maximumf %12, %13 : vector<8x256xf32>
      %15 = arith.truncf %14 : vector<8x256xf32> to vector<8x256xbf16>
      %c0_12 = arith.constant 0 : index
      %c0_13 = arith.constant 0 : index
      %16 = vector.load %arg6[%c0_12, %c0_13] : memref<8x256xbf16, #tpu.memory_space<vmem>>, vector<8x256xbf16>
      tpu.vector_store %arg6[%c0_12, %c0_13], %15 {strides = array<i32>} : memref<8x256xbf16, #tpu.memory_space<vmem>>, vector<8x256xbf16>,
    } else {
    }
    return
  }
  func.func @transform_0(%arg0: i32, %arg1: i32, %arg2: i32) -> (i32, i32) {
    %c0_i32 = arith.constant 0 : i32
    return %arg0, %arg2 : i32, i32
  }
  func.func @transform_1(%arg0: i32, %arg1: i32, %arg2: i32) -> (i32, i32) {
    %c0_i32 = arith.constant 0 : i32
    return %arg2, %arg1 : i32, i32
  }
  func.func @transform_2(%arg0: i32, %arg1: i32, %arg2: i32) -> (i32, i32) {
    %c0_i32 = arith.constant 0 : i32
    %c0_i32_0 = arith.constant 0 : i32
    return %c0_i32, %arg1 : i32, i32
  }
  func.func @transform_3(%arg0: i32, %arg1: i32, %arg2: i32) -> (i32, i32) {
    %c0_i32 = arith.constant 0 : i32
    return %arg0, %arg1 : i32, i32
  }
}

module attributes {stable_mosaic.version = 11 : i64} {
  func.func @_fused_matmul_kernel(%arg0: i32, %arg1: i32, %arg2: i32, %arg3: memref<8x1152xbf16, #tpu.memory_space<vmem>>, %arg4: memref<1152x256xbf16, #tpu.memory_space<vmem>>, %arg5: memref<1x256xf32, #tpu.memory_space<vmem>>, %arg6: memref<8x256xbf16, #tpu.memory_space<vmem>>, %arg7: memref<256x256xbf16, #tpu.memory_space<vmem>>, %arg8: memref<8x256xbf16, #tpu.memory_space<vmem>>, %arg9: memref<8x256xf32, #tpu.memory_space<vmem>>) attributes {dimension_semantics = [#tpu.dimension_semantics<parallel>, #tpu.dimension_semantics<parallel>, #tpu.dimension_semantics<arbitrary>], iteration_bounds = array<i64: 1, 2, 4>, scalar_prefetch = 0 : i64, scratch_operands = 1 : i64, tpu.core_type = #tpu.core_type<tc>, window_params = [{transform_indices = @transform_0, window_bounds = array<i64: 8, 1152>}, {transform_indices = @transform_1, window_bounds = array<i64: 1152, 256>}, {transform_indices = @transform_2, window_bounds = array<i64: 1, 256>}, {transform_indices = @transform_3, window_bounds = array<i64: 8, 256>}, {transform_indices = @transform_4, window_bounds = array<i64: 256, 256>}, {transform_indices = @transform_5, window_bounds = array<i64: 8, 256>}]} {
    %c0_i32 = arith.constant 0 : i32
    %0 = arith.cmpi eq, %arg2, %c0_i32 : i32
    %1 = arith.extui %0 : i1 to i32
    %c0_i32_0 = arith.constant 0 : i32
    %2 = arith.cmpi ne, %1, %c0_i32_0 : i32
    scf.if %2 {
      %c0_9 = arith.constant 0 : index
      %c0_10 = arith.constant 0 : index
      %12 = vector.load %arg5[%c0_9, %c0_10] : memref<1x256xf32, #tpu.memory_space<vmem>>, vector<1x256xf32>
      %13 = vector.shape_cast %12 : vector<1x256xf32> to vector<1x256xf32>
      %14 = vector.broadcast %13 : vector<1x256xf32> to vector<8x256xf32>
      %c0_11 = arith.constant 0 : index
      %c0_12 = arith.constant 0 : index
      %15 = vector.load %arg6[%c0_11, %c0_12] : memref<8x256xbf16, #tpu.memory_space<vmem>>, vector<8x256xbf16>
      %c0_13 = arith.constant 0 : index
      %c0_14 = arith.constant 0 : index
      %16 = vector.load %arg7[%c0_13, %c0_14] : memref<256x256xbf16, #tpu.memory_space<vmem>>, vector<256x256xbf16>
      %cst_15 = arith.constant dense<0.000000e+00> : vector<8x256xf32>
      %17 = tpu.matmul %15, %16, %cst_15 {dimension_numbers = #tpu.dot_dimension_numbers<[1], [0], [0], [1], [0, 0, 1, 1], [], []>} : vector<8x256xbf16>, vector<256x256xbf16>, vector<8x256xf32> -> vector<8x256xf32>
      %18 = arith.addf %14, %17 : vector<8x256xf32>
      %c0_16 = arith.constant 0 : index
      %c0_17 = arith.constant 0 : index
      %19 = vector.load %arg9[%c0_16, %c0_17] : memref<8x256xf32, #tpu.memory_space<vmem>>, vector<8x256xf32>
      tpu.vector_store %arg9[%c0_16, %c0_17], %18 {strides = array<i32>} : memref<8x256xf32, #tpu.memory_space<vmem>>, vector<8x256xf32>,
    } else {
    }
    %c0 = arith.constant 0 : index
    %c0_1 = arith.constant 0 : index
    %3 = vector.load %arg9[%c0, %c0_1] : memref<8x256xf32, #tpu.memory_space<vmem>>, vector<8x256xf32>
    %c0_2 = arith.constant 0 : index
    %c0_3 = arith.constant 0 : index
    %4 = vector.load %arg3[%c0_2, %c0_3] : memref<8x1152xbf16, #tpu.memory_space<vmem>>, vector<8x1152xbf16>
    %c0_4 = arith.constant 0 : index
    %c0_5 = arith.constant 0 : index
    %5 = vector.load %arg4[%c0_4, %c0_5] : memref<1152x256xbf16, #tpu.memory_space<vmem>>, vector<1152x256xbf16>
    %cst = arith.constant dense<0.000000e+00> : vector<8x256xf32>
    %6 = tpu.matmul %4, %5, %cst {dimension_numbers = #tpu.dot_dimension_numbers<[1], [0], [0], [1], [0, 0, 1, 1], [], []>} : vector<8x1152xbf16>, vector<1152x256xbf16>, vector<8x256xf32> -> vector<8x256xf32>
    %7 = arith.addf %3, %6 : vector<8x256xf32>
    %c0_6 = arith.constant 0 : index
    %c0_7 = arith.constant 0 : index
    %8 = vector.load %arg9[%c0_6, %c0_7] : memref<8x256xf32, #tpu.memory_space<vmem>>, vector<8x256xf32>
    tpu.vector_store %arg9[%c0_6, %c0_7], %7 {strides = array<i32>} : memref<8x256xf32, #tpu.memory_space<vmem>>, vector<8x256xf32>,
    %c3_i32 = arith.constant 3 : i32
    %9 = arith.cmpi eq, %arg2, %c3_i32 : i32
    %10 = arith.extui %9 : i1 to i32
    %c0_i32_8 = arith.constant 0 : i32
    %11 = arith.cmpi ne, %10, %c0_i32_8 : i32
    scf.if %11 {
      %c0_9 = arith.constant 0 : index
      %c0_10 = arith.constant 0 : index
      %12 = vector.load %arg9[%c0_9, %c0_10] : memref<8x256xf32, #tpu.memory_space<vmem>>, vector<8x256xf32>
      %cst_11 = arith.constant 0.000000e+00 : f32
      %13 = vector.broadcast %cst_11 : f32 to vector<8x256xf32>
      %14 = arith.maximumf %12, %13 : vector<8x256xf32>
      %15 = arith.truncf %14 : vector<8x256xf32> to vector<8x256xbf16>
      %c0_12 = arith.constant 0 : index
      %c0_13 = arith.constant 0 : index
      %16 = vector.load %arg8[%c0_12, %c0_13] : memref<8x256xbf16, #tpu.memory_space<vmem>>, vector<8x256xbf16>
      tpu.vector_store %arg8[%c0_12, %c0_13], %15 {strides = array<i32>} : memref<8x256xbf16, #tpu.memory_space<vmem>>, vector<8x256xbf16>,
    } else {
    }
    return
  }
  func.func @transform_0(%arg0: i32, %arg1: i32, %arg2: i32) -> (i32, i32) {
    %c0_i32 = arith.constant 0 : i32
    return %arg0, %arg2 : i32, i32
  }
  func.func @transform_1(%arg0: i32, %arg1: i32, %arg2: i32) -> (i32, i32) {
    %c0_i32 = arith.constant 0 : i32
    return %arg2, %arg1 : i32, i32
  }
  func.func @transform_2(%arg0: i32, %arg1: i32, %arg2: i32) -> (i32, i32) {
    %c0_i32 = arith.constant 0 : i32
    %c0_i32_0 = arith.constant 0 : i32
    return %c0_i32, %arg1 : i32, i32
  }
  func.func @transform_3(%arg0: i32, %arg1: i32, %arg2: i32) -> (i32, i32) {
    %c0_i32 = arith.constant 0 : i32
    %c0_i32_0 = arith.constant 0 : i32
    return %arg0, %c0_i32 : i32, i32
  }
  func.func @transform_4(%arg0: i32, %arg1: i32, %arg2: i32) -> (i32, i32) {
    %c0_i32 = arith.constant 0 : i32
    %c0_i32_0 = arith.constant 0 : i32
    return %c0_i32, %arg1 : i32, i32
  }
  func.func @transform_5(%arg0: i32, %arg1: i32, %arg2: i32) -> (i32, i32) {
    %c0_i32 = arith.constant 0 : i32
    return %arg0, %arg1 : i32, i32
  }
}

module attributes {stable_mosaic.version = 11 : i64} {
  func.func @_fused_matmul_kernel(%arg0: i32, %arg1: i32, %arg2: i32, %arg3: memref<8x1152xbf16, #tpu.memory_space<vmem>>, %arg4: memref<1152x256xbf16, #tpu.memory_space<vmem>>, %arg5: memref<1x256xf32, #tpu.memory_space<vmem>>, %arg6: memref<8x256xbf16, #tpu.memory_space<vmem>>, %arg7: memref<8x256xf32, #tpu.memory_space<vmem>>) attributes {dimension_semantics = [#tpu.dimension_semantics<parallel>, #tpu.dimension_semantics<parallel>, #tpu.dimension_semantics<arbitrary>], iteration_bounds = array<i64: 1, 2, 4>, scalar_prefetch = 0 : i64, scratch_operands = 1 : i64, tpu.core_type = #tpu.core_type<tc>, window_params = [{transform_indices = @transform_0, window_bounds = array<i64: 8, 1152>}, {transform_indices = @transform_1, window_bounds = array<i64: 1152, 256>}, {transform_indices = @transform_2, window_bounds = array<i64: 1, 256>}, {transform_indices = @transform_3, window_bounds = array<i64: 8, 256>}]} {
    %c0_i32 = arith.constant 0 : i32
    %0 = arith.cmpi eq, %arg2, %c0_i32 : i32
    %1 = arith.extui %0 : i1 to i32
    %c0_i32_0 = arith.constant 0 : i32
    %2 = arith.cmpi ne, %1, %c0_i32_0 : i32
    scf.if %2 {
      %c0_9 = arith.constant 0 : index
      %c0_10 = arith.constant 0 : index
      %12 = vector.load %arg5[%c0_9, %c0_10] : memref<1x256xf32, #tpu.memory_space<vmem>>, vector<1x256xf32>
      %13 = vector.shape_cast %12 : vector<1x256xf32> to vector<1x256xf32>
      %14 = vector.broadcast %13 : vector<1x256xf32> to vector<8x256xf32>
      %c0_11 = arith.constant 0 : index
      %c0_12 = arith.constant 0 : index
      %15 = vector.load %arg7[%c0_11, %c0_12] : memref<8x256xf32, #tpu.memory_space<vmem>>, vector<8x256xf32>
      tpu.vector_store %arg7[%c0_11, %c0_12], %14 {strides = array<i32>} : memref<8x256xf32, #tpu.memory_space<vmem>>, vector<8x256xf32>,
    } else {
    }
    %c0 = arith.constant 0 : index
    %c0_1 = arith.constant 0 : index
    %3 = vector.load %arg7[%c0, %c0_1] : memref<8x256xf32, #tpu.memory_space<vmem>>, vector<8x256xf32>
    %c0_2 = arith.constant 0 : index
    %c0_3 = arith.constant 0 : index
    %4 = vector.load %arg3[%c0_2, %c0_3] : memref<8x1152xbf16, #tpu.memory_space<vmem>>, vector<8x1152xbf16>
    %c0_4 = arith.constant 0 : index
    %c0_5 = arith.constant 0 : index
    %5 = vector.load %arg4[%c0_4, %c0_5] : memref<1152x256xbf16, #tpu.memory_space<vmem>>, vector<1152x256xbf16>
    %cst = arith.constant dense<0.000000e+00> : vector<8x256xf32>
    %6 = tpu.matmul %4, %5, %cst {dimension_numbers = #tpu.dot_dimension_numbers<[1], [0], [0], [1], [0, 0, 1, 1], [], []>} : vector<8x1152xbf16>, vector<1152x256xbf16>, vector<8x256xf32> -> vector<8x256xf32>
    %7 = arith.addf %3, %6 : vector<8x256xf32>
    %c0_6 = arith.constant 0 : index
    %c0_7 = arith.constant 0 : index
    %8 = vector.load %arg7[%c0_6, %c0_7] : memref<8x256xf32, #tpu.memory_space<vmem>>, vector<8x256xf32>
    tpu.vector_store %arg7[%c0_6, %c0_7], %7 {strides = array<i32>} : memref<8x256xf32, #tpu.memory_space<vmem>>, vector<8x256xf32>,
    %c3_i32 = arith.constant 3 : i32
    %9 = arith.cmpi eq, %arg2, %c3_i32 : i32
    %10 = arith.extui %9 : i1 to i32
    %c0_i32_8 = arith.constant 0 : i32
    %11 = arith.cmpi ne, %10, %c0_i32_8 : i32
    scf.if %11 {
      %c0_9 = arith.constant 0 : index
      %c0_10 = arith.constant 0 : index
      %12 = vector.load %arg7[%c0_9, %c0_10] : memref<8x256xf32, #tpu.memory_space<vmem>>, vector<8x256xf32>
      %cst_11 = arith.constant 0.000000e+00 : f32
      %13 = vector.broadcast %cst_11 : f32 to vector<8x256xf32>
      %14 = arith.maximumf %12, %13 : vector<8x256xf32>
      %15 = arith.truncf %14 : vector<8x256xf32> to vector<8x256xbf16>
      %c0_12 = arith.constant 0 : index
      %c0_13 = arith.constant 0 : index
      %16 = vector.load %arg6[%c0_12, %c0_13] : memref<8x256xbf16, #tpu.memory_space<vmem>>, vector<8x256xbf16>
      tpu.vector_store %arg6[%c0_12, %c0_13], %15 {strides = array<i32>} : memref<8x256xbf16, #tpu.memory_space<vmem>>, vector<8x256xbf16>,
    } else {
    }
    return
  }
  func.func @transform_0(%arg0: i32, %arg1: i32, %arg2: i32) -> (i32, i32) {
    %c0_i32 = arith.constant 0 : i32
    return %arg0, %arg2 : i32, i32
  }
  func.func @transform_1(%arg0: i32, %arg1: i32, %arg2: i32) -> (i32, i32) {
    %c0_i32 = arith.constant 0 : i32
    return %arg2, %arg1 : i32, i32
  }
  func.func @transform_2(%arg0: i32, %arg1: i32, %arg2: i32) -> (i32, i32) {
    %c0_i32 = arith.constant 0 : i32
    %c0_i32_0 = arith.constant 0 : i32
    return %c0_i32, %arg1 : i32, i32
  }
  func.func @transform_3(%arg0: i32, %arg1: i32, %arg2: i32) -> (i32, i32) {
    %c0_i32 = arith.constant 0 : i32
    return %arg0, %arg1 : i32, i32
  }
}

module attributes {stable_mosaic.version = 11 : i64} {
  func.func @_fused_matmul_kernel(%arg0: i32, %arg1: i32, %arg2: i32, %arg3: memref<8x1152xbf16, #tpu.memory_space<vmem>>, %arg4: memref<1152x256xbf16, #tpu.memory_space<vmem>>, %arg5: memref<1x256xf32, #tpu.memory_space<vmem>>, %arg6: memref<8x256xbf16, #tpu.memory_space<vmem>>, %arg7: memref<8x256xbf16, #tpu.memory_space<vmem>>, %arg8: memref<8x256xf32, #tpu.memory_space<vmem>>) attributes {dimension_semantics = [#tpu.dimension_semantics<parallel>, #tpu.dimension_semantics<parallel>, #tpu.dimension_semantics<arbitrary>], iteration_bounds = array<i64: 1, 2, 4>, scalar_prefetch = 0 : i64, scratch_operands = 1 : i64, tpu.core_type = #tpu.core_type<tc>, window_params = [{transform_indices = @transform_0, window_bounds = array<i64: 8, 1152>}, {transform_indices = @transform_1, window_bounds = array<i64: 1152, 256>}, {transform_indices = @transform_2, window_bounds = array<i64: 1, 256>}, {transform_indices = @transform_3, window_bounds = array<i64: 8, 256>}, {transform_indices = @transform_4, window_bounds = array<i64: 8, 256>}]} {
    %c0_i32 = arith.constant 0 : i32
    %0 = arith.cmpi eq, %arg2, %c0_i32 : i32
    %1 = arith.extui %0 : i1 to i32
    %c0_i32_0 = arith.constant 0 : i32
    %2 = arith.cmpi ne, %1, %c0_i32_0 : i32
    scf.if %2 {
      %c0_9 = arith.constant 0 : index
      %c0_10 = arith.constant 0 : index
      %12 = vector.load %arg5[%c0_9, %c0_10] : memref<1x256xf32, #tpu.memory_space<vmem>>, vector<1x256xf32>
      %13 = vector.shape_cast %12 : vector<1x256xf32> to vector<1x256xf32>
      %14 = vector.broadcast %13 : vector<1x256xf32> to vector<8x256xf32>
      %c0_11 = arith.constant 0 : index
      %c0_12 = arith.constant 0 : index
      %15 = vector.load %arg6[%c0_11, %c0_12] : memref<8x256xbf16, #tpu.memory_space<vmem>>, vector<8x256xbf16>
      %16 = arith.extf %15 : vector<8x256xbf16> to vector<8x256xf32>
      %17 = arith.addf %14, %16 : vector<8x256xf32>
      %c0_13 = arith.constant 0 : index
      %c0_14 = arith.constant 0 : index
      %18 = vector.load %arg8[%c0_13, %c0_14] : memref<8x256xf32, #tpu.memory_space<vmem>>, vector<8x256xf32>
      tpu.vector_store %arg8[%c0_13, %c0_14], %17 {strides = array<i32>} : memref<8x256xf32, #tpu.memory_space<vmem>>, vector<8x256xf32>,
    } else {
    }
    %c0 = arith.constant 0 : index
    %c0_1 = arith.constant 0 : index
    %3 = vector.load %arg8[%c0, %c0_1] : memref<8x256xf32, #tpu.memory_space<vmem>>, vector<8x256xf32>
    %c0_2 = arith.constant 0 : index
    %c0_3 = arith.constant 0 : index
    %4 = vector.load %arg3[%c0_2, %c0_3] : memref<8x1152xbf16, #tpu.memory_space<vmem>>, vector<8x1152xbf16>
    %c0_4 = arith.constant 0 : index
    %c0_5 = arith.constant 0 : index
    %5 = vector.load %arg4[%c0_4, %c0_5] : memref<1152x256xbf16, #tpu.memory_space<vmem>>, vector<1152x256xbf16>
    %cst = arith.constant dense<0.000000e+00> : vector<8x256xf32>
    %6 = tpu.matmul %4, %5, %cst {dimension_numbers = #tpu.dot_dimension_numbers<[1], [0], [0], [1], [0, 0, 1, 1], [], []>} : vector<8x1152xbf16>, vector<1152x256xbf16>, vector<8x256xf32> -> vector<8x256xf32>
    %7 = arith.addf %3, %6 : vector<8x256xf32>
    %c0_6 = arith.constant 0 : index
    %c0_7 = arith.constant 0 : index
    %8 = vector.load %arg8[%c0_6, %c0_7] : memref<8x256xf32, #tpu.memory_space<vmem>>, vector<8x256xf32>
    tpu.vector_store %arg8[%c0_6, %c0_7], %7 {strides = array<i32>} : memref<8x256xf32, #tpu.memory_space<vmem>>, vector<8x256xf32>,
    %c3_i32 = arith.constant 3 : i32
    %9 = arith.cmpi eq, %arg2, %c3_i32 : i32
    %10 = arith.extui %9 : i1 to i32
    %c0_i32_8 = arith.constant 0 : i32
    %11 = arith.cmpi ne, %10, %c0_i32_8 : i32
    scf.if %11 {
      %c0_9 = arith.constant 0 : index
      %c0_10 = arith.constant 0 : index
      %12 = vector.load %arg8[%c0_9, %c0_10] : memref<8x256xf32, #tpu.memory_space<vmem>>, vector<8x256xf32>
      %cst_11 = arith.constant 0.000000e+00 : f32
      %13 = vector.broadcast %cst_11 : f32 to vector<8x256xf32>
      %14 = arith.maximumf %12, %13 : vector<8x256xf32>
      %15 = arith.truncf %14 : vector<8x256xf32> to vector<8x256xbf16>
      %c0_12 = arith.constant 0 : index
      %c0_13 = arith.constant 0 : index
      %16 = vector.load %arg7[%c0_12, %c0_13] : memref<8x256xbf16, #tpu.memory_space<vmem>>, vector<8x256xbf16>
      tpu.vector_store %arg7[%c0_12, %c0_13], %15 {strides = array<i32>} : memref<8x256xbf16, #tpu.memory_space<vmem>>, vector<8x256xbf16>,
    } else {
    }
    return
  }
  func.func @transform_0(%arg0: i32, %arg1: i32, %arg2: i32) -> (i32, i32) {
    %c0_i32 = arith.constant 0 : i32
    return %arg0, %arg2 : i32, i32
  }
  func.func @transform_1(%arg0: i32, %arg1: i32, %arg2: i32) -> (i32, i32) {
    %c0_i32 = arith.constant 0 : i32
    return %arg2, %arg1 : i32, i32
  }
  func.func @transform_2(%arg0: i32, %arg1: i32, %arg2: i32) -> (i32, i32) {
    %c0_i32 = arith.constant 0 : i32
    %c0_i32_0 = arith.constant 0 : i32
    return %c0_i32, %arg1 : i32, i32
  }
  func.func @transform_3(%arg0: i32, %arg1: i32, %arg2: i32) -> (i32, i32) {
    %c0_i32 = arith.constant 0 : i32
    return %arg0, %arg1 : i32, i32
  }
  func.func @transform_4(%arg0: i32, %arg1: i32, %arg2: i32) -> (i32, i32) {
    %c0_i32 = arith.constant 0 : i32
    return %arg0, %arg1 : i32, i32
  }
}

module attributes {stable_mosaic.version = 11 : i64} {
  func.func @_fused_matmul_kernel(%arg0: i32, %arg1: i32, %arg2: i32, %arg3: memref<8x512xbf16, #tpu.memory_space<vmem>>, %arg4: memref<512x128xbf16, #tpu.memory_space<vmem>>, %arg5: memref<1x128xf32, #tpu.memory_space<vmem>>, %arg6: memref<8x128xf32, #tpu.memory_space<vmem>>, %arg7: memref<8x128xf32, #tpu.memory_space<vmem>>) attributes {dimension_semantics = [#tpu.dimension_semantics<parallel>, #tpu.dimension_semantics<parallel>, #tpu.dimension_semantics<arbitrary>], iteration_bounds = array<i64: 1, 1, 1>, scalar_prefetch = 0 : i64, scratch_operands = 1 : i64, tpu.core_type = #tpu.core_type<tc>, window_params = [{transform_indices = @transform_0, window_bounds = array<i64: 8, 512>}, {transform_indices = @transform_1, window_bounds = array<i64: 512, 128>}, {transform_indices = @transform_2, window_bounds = array<i64: 1, 128>}, {transform_indices = @transform_3, window_bounds = array<i64: 8, 128>}]} {
    %c0_i32 = arith.constant 0 : i32
    %0 = arith.cmpi eq, %arg2, %c0_i32 : i32
    %1 = arith.extui %0 : i1 to i32
    %c0_i32_0 = arith.constant 0 : i32
    %2 = arith.cmpi ne, %1, %c0_i32_0 : i32
    scf.if %2 {
      %c0_10 = arith.constant 0 : index
      %c0_11 = arith.constant 0 : index
      %12 = vector.load %arg5[%c0_10, %c0_11] : memref<1x128xf32, #tpu.memory_space<vmem>>, vector<1x128xf32>
      %13 = vector.shape_cast %12 : vector<1x128xf32> to vector<1x128xf32>
      %14 = vector.broadcast %13 : vector<1x128xf32> to vector<8x128xf32>
      %c0_12 = arith.constant 0 : index
      %c0_13 = arith.constant 0 : index
      %15 = vector.load %arg7[%c0_12, %c0_13] : memref<8x128xf32, #tpu.memory_space<vmem>>, vector<8x128xf32>
      tpu.vector_store %arg7[%c0_12, %c0_13], %14 {strides = array<i32>} : memref<8x128xf32, #tpu.memory_space<vmem>>, vector<8x128xf32>,
    } else {
    }
    %c0 = arith.constant 0 : index
    %c0_1 = arith.constant 0 : index
    %3 = vector.load %arg7[%c0, %c0_1] : memref<8x128xf32, #tpu.memory_space<vmem>>, vector<8x128xf32>
    %c0_2 = arith.constant 0 : index
    %c0_3 = arith.constant 0 : index
    %4 = vector.load %arg3[%c0_2, %c0_3] : memref<8x512xbf16, #tpu.memory_space<vmem>>, vector<8x512xbf16>
    %c0_4 = arith.constant 0 : index
    %c0_5 = arith.constant 0 : index
    %5 = vector.load %arg4[%c0_4, %c0_5] : memref<512x128xbf16, #tpu.memory_space<vmem>>, vector<512x128xbf16>
    %cst = arith.constant dense<0.000000e+00> : vector<8x128xf32>
    %6 = tpu.matmul %4, %5, %cst {dimension_numbers = #tpu.dot_dimension_numbers<[1], [0], [0], [1], [0, 0, 1, 1], [], []>} : vector<8x512xbf16>, vector<512x128xbf16>, vector<8x128xf32> -> vector<8x128xf32>
    %7 = arith.addf %3, %6 : vector<8x128xf32>
    %c0_6 = arith.constant 0 : index
    %c0_7 = arith.constant 0 : index
    %8 = vector.load %arg7[%c0_6, %c0_7] : memref<8x128xf32, #tpu.memory_space<vmem>>, vector<8x128xf32>
    tpu.vector_store %arg7[%c0_6, %c0_7], %7 {strides = array<i32>} : memref<8x128xf32, #tpu.memory_space<vmem>>, vector<8x128xf32>,
    %c0_i32_8 = arith.constant 0 : i32
    %9 = arith.cmpi eq, %arg2, %c0_i32_8 : i32
    %10 = arith.extui %9 : i1 to i32
    %c0_i32_9 = arith.constant 0 : i32
    %11 = arith.cmpi ne, %10, %c0_i32_9 : i32
    scf.if %11 {
      %c0_10 = arith.constant 0 : index
      %c0_11 = arith.constant 0 : index
      %12 = vector.load %arg7[%c0_10, %c0_11] : memref<8x128xf32, #tpu.memory_space<vmem>>, vector<8x128xf32>
      %c0_12 = arith.constant 0 : index
      %c0_13 = arith.constant 0 : index
      %13 = vector.load %arg6[%c0_12, %c0_13] : memref<8x128xf32, #tpu.memory_space<vmem>>, vector<8x128xf32>
      tpu.vector_store %arg6[%c0_12, %c0_13], %12 {strides = array<i32>} : memref<8x128xf32, #tpu.memory_space<vmem>>, vector<8x128xf32>,
    } else {
    }
    return
  }
  func.func @transform_0(%arg0: i32, %arg1: i32, %arg2: i32) -> (i32, i32) {
    %c0_i32 = arith.constant 0 : i32
    return %arg0, %arg2 : i32, i32
  }
  func.func @transform_1(%arg0: i32, %arg1: i32, %arg2: i32) -> (i32, i32) {
    %c0_i32 = arith.constant 0 : i32
    return %arg2, %arg1 : i32, i32
  }
  func.func @transform_2(%arg0: i32, %arg1: i32, %arg2: i32) -> (i32, i32) {
    %c0_i32 = arith.constant 0 : i32
    %c0_i32_0 = arith.constant 0 : i32
    return %c0_i32, %arg1 : i32, i32
  }
  func.func @transform_3(%arg0: i32, %arg1: i32, %arg2: i32) -> (i32, i32) {
    %c0_i32 = arith.constant 0 : i32
    return %arg0, %arg1 : i32, i32
  }
}

</mosaic_0001>

<bundles_post_ra>
// kernel: resnet18_forward.10
= control target key start
LH: loop header
LB: loop body
LE: loop exit
PB: predicated region body
PF: predicated region fallthrough
CT: control target
= control target key end

     0   :  { %vm154_vm0 = vcmask 1044480   ;;  %vm155_vm1 = vcmask 1045504   ;;  %vm129_vm2 = vcmask 220160   ;;  %v552_v1 = vmov 65535   ;;  %s638_s1 = inlined_call_operand.vmem [shape: bf16[27,128], index: 1, kind: input, shape index: {}]   ;;  %s639_s0 = inlined_call_operand.vmem [shape: bf16[128,27], index: 0, kind: input, shape index: {}]   ;;  %s640_s2 = inlined_call_operand.vmem [shape: f32[1,128], index: 2, kind: input, shape index: {}]   ;;  %s641_s3 = inlined_call_operand.vmem [shape: bf16[128,128], index: 3, kind: output, shape index: {}]  }
   0x1   :  { %v542_v0 = vld [vmem:[%s638_s1] sm:$0xff]   ;;  %v156_v2 = vsel %vm154_vm0, 4294967295, %v552_v1  ;;  %v543_v3 = vld [vmem:[%s638_s1 + $0x8] sm:$0x3f]   ;;  %v548_v10 = vld [vmem:[%s639_s0 + $0x10] sm:$0xff]  }
   0x2   :  { %517 = vmatprep.subr.bf16.mxu0 %v542_v0  ;;  %537 = vmatprep.subr.bf16.mxu1 %v542_v0  ;;  %v157_v4 = vsel %vm155_vm1, %v156_v2, 0  ;;  %v544_v5 = vld [vmem:[%s639_s0] sm:$0xff]   ;;  %v546_v8 = vld [vmem:[%s639_s0 + $0x8] sm:$0xff]   ;;  %v549_v11 = vld [vmem:[%s639_s0 + $0x30] sm:$0xff]  }
   0x3   :  { %518 = vmatpush3.bf16.msra.mxu0 %v542_v0  ;;  %539 = vmatpush3.bf16.msra.mxu1 %v542_v0  ;;  %v159_v6 = vand.u32 %v543_v3, %v157_v4  ;;  %v545_v7 = vld [vmem:[%s639_s0 + $0x20] sm:$0xff]   ;;  %v547_v9 = vld [vmem:[%s639_s0 + $0x28] sm:$0xff]   ;;  %v550_v12 = vld [vmem:[%s639_s0 + $0x18] sm:$0xff]  }
   0x4   :  { %521 = vmatprep.mubr.msk.bf16.mxu0 %vm129_vm2, %v544_v5  ;;  %529 = vmatprep.mubr.msk.bf16.mxu1 %vm129_vm2, %v545_v7  ;;  %v551_v13 = vld [vmem:[%s639_s0 + $0x38] sm:$0xff]   ;;  %v409_v14 = vld [vmem:[%s640_s2] ss:$0 sm:$0xff] }
   0x5   :  { %519 = vmatprep.subr.bf16.mxu0 %v159_v6  ;;  %538 = vmatprep.subr.bf16.mxu1 %v159_v6 }
   0x7   :  { %520 = vmatpush3.bf16.msra.mxu0 %v159_v6  ;;  %540 = vmatpush3.bf16.msra.mxu1 %v159_v6 }
   0xa   :  { %522 = vmatmul.mubr.msk.bf16.vlgmr.msra.gmra.mrb[0].mxu0 %vm129_vm2, %v546_v8  ;;  %530 = vmatmul.mubr.msk.bf16.vlgmr.msra.gmra.mrb[0].mxu1 %vm129_vm2, %v547_v9 }
   0xb   :  { %525 = vmatprep.mubr.msk.bf16.mxu0 %vm129_vm2, %v548_v10  ;;  %533 = vmatprep.mubr.msk.bf16.mxu1 %vm129_vm2, %v549_v11 }
  0x12   :  { %526 = vmatmul.mubr.msk.bf16.gmra.mrb[4].mxu0 %vm129_vm2, %v550_v12  ;;  %534 = vmatmul.mubr.msk.bf16.gmra.mrb[4].mxu1 %vm129_vm2, %v551_v13 }
  0xdd   :  { %v523_v15 = vpop.f32.mrb[0].mxu0  ;;  %v531_v16 = vpop.f32.mrb[0].mxu1 }
  0xde   :  { %v260_v17 = vadd.f32 %v523_v15, %v409_v14  ;;  %v268_v18 = vadd.f32 %v531_v16, %v409_v14  ;;  %v195_v19 = vpop.f32.mrb[1].mxu0  ;;  %v227_v20 = vpop.f32.mrb[1].mxu1 }
  0xdf   :  { %v258_v21 = vadd.f32 %v409_v14, %v195_v19  ;;  %v266_v22 = vadd.f32 %v409_v14, %v227_v20  ;;  %v524_v23 = vpop.f32.mrb[2].mxu0  ;;  %v532_v24 = vpop.f32.mrb[2].mxu1 }
  0xe0   :  { %v261_v25 = vadd.f32 %v524_v23, %v409_v14  ;;  %v269_v26 = vadd.f32 %v532_v24, %v409_v14  ;;  %v198_v27 = vpop.f32.mrb[3].mxu0  ;;  %v230_v28 = vpop.f32.mrb[3].mxu1  ;;  %v311_v31 = vmax.f32 %v260_v17, 0.0  ;;  %v319_v32 = vmax.f32 %v268_v18, 0.0 }
  0xe1   :  { %v259_v29 = vadd.f32 %v409_v14, %v198_v27  ;;  %v267_v30 = vadd.f32 %v409_v14, %v230_v28  ;;  %v309_v35 = vmax.f32 %v258_v21, 0.0  ;;  %v317_v36 = vmax.f32 %v266_v22, 0.0 }
  0xe2   :  { %v312_v33 = vmax.f32 %v261_v25, 0.0  ;;  %v320_v34 = vmax.f32 %v269_v26, 0.0 }
  0xe3   :  { %v310_v37 = vmax.f32 %v259_v29, 0.0  ;;  %v318_v38 = vmax.f32 %v267_v30, 0.0 }
  0xe4   :  { %v468_v39 = vpack.c.bf16 %v312_v33, %v311_v31  ;;  %v488_v40 = vpack.c.bf16 %v320_v34, %v319_v32 }
  0xe5   :  { %v463_v41 = vpack.c.bf16 %v310_v37, %v309_v35  ;;  %v483_v42 = vpack.c.bf16 %v318_v38, %v317_v36  ;;  %v527_v43 = vpop.f32.mrb[4].mxu0  ;;  %v535_v44 = vpop.f32.mrb[4].mxu1 }
  0xe6   :  { %500 = vst [vmem:[%s641_s3 + $0x8] sm:$0xff] %v468_v39   ;;  %504 = vst [vmem:[%s641_s3 + $0x28] sm:$0xff] %v488_v40   ;;  %v264_v45 = vadd.f32 %v527_v43, %v409_v14  ;;  %v272_v46 = vadd.f32 %v535_v44, %v409_v14  ;;  %v211_v47 = vpop.f32.mrb[5].mxu0  ;;  %v243_v48 = vpop.f32.mrb[5].mxu1 }
  0xe7   :  { %464 = vst [vmem:[%s641_s3] sm:$0xff] %v463_v41   ;;  %503 = vst [vmem:[%s641_s3 + $0x20] sm:$0xff] %v483_v42   ;;  %v262_v49 = vadd.f32 %v409_v14, %v211_v47  ;;  %v270_v50 = vadd.f32 %v409_v14, %v243_v48  ;;  %v528_v51 = vpop.f32.mrb[6].mxu0  ;;  %v536_v52 = vpop.f32.mrb[6].mxu1 }
  0xe8   :  { %v265_v53 = vadd.f32 %v528_v51, %v409_v14  ;;  %v273_v54 = vadd.f32 %v536_v52, %v409_v14  ;;  %v214_v55 = vpop.f32.mrb[7].mxu0  ;;  %v246_v56 = vpop.f32.mrb[7].mxu1  ;;  %v315_v59 = vmax.f32 %v264_v45, 0.0  ;;  %v323_v60 = vmax.f32 %v272_v46, 0.0 }
  0xe9   :  { %v263_v57 = vadd.f32 %v409_v14, %v214_v55  ;;  %v271_v58 = vadd.f32 %v409_v14, %v246_v56  ;;  %v313_v63 = vmax.f32 %v262_v49, 0.0  ;;  %v321_v0 = vmax.f32 %v270_v50, 0.0 }
  0xea   :  { %v316_v61 = vmax.f32 %v265_v53, 0.0  ;;  %v324_v62 = vmax.f32 %v273_v54, 0.0 }
  0xeb   :  { %v314_v1 = vmax.f32 %v263_v57, 0.0  ;;  %v322_v2 = vmax.f32 %v271_v58, 0.0 }
  0xec   :  { %v478_v3 = vpack.c.bf16 %v316_v61, %v315_v59  ;;  %v498_v4 = vpack.c.bf16 %v324_v62, %v323_v60 }
  0xed   :  { %v473_v5 = vpack.c.bf16 %v314_v1, %v313_v63  ;;  %v493_v6 = vpack.c.bf16 %v322_v2, %v321_v0 }
  0xee   :  { %502 = vst [vmem:[%s641_s3 + $0x18] sm:$0xff] %v478_v3   ;;  %506 = vst [vmem:[%s641_s3 + $0x38] sm:$0xff] %v498_v4  }
  0xef   :  { %501 = vst [vmem:[%s641_s3 + $0x10] sm:$0xff] %v473_v5   ;;  %505 = vst [vmem:[%s641_s3 + $0x30] sm:$0xff] %v493_v6  }

// kernel: resnet18_forward.12
= control target key start
LH: loop header
LB: loop body
LE: loop exit
PB: predicated region body
PF: predicated region fallthrough
CT: control target
= control target key end

     0   :  { %s1906_s4 = inlined_call_operand.vmem [shape: bf16[128,128], index: 4, kind: input, shape index: {}]   ;;  %s1907_s1 = inlined_call_operand.vmem [shape: bf16[1152,128], index: 1, kind: input, shape index: {}]   ;;  %s1908_s3 = inlined_call_operand.vmem [shape: bf16[32,128], index: 3, kind: input, shape index: {}]   ;;  %s1909_s0 = inlined_call_operand.vmem [shape: bf16[32,1152], index: 0, kind: input, shape index: {}]   ;;  %s1910_s2 = inlined_call_operand.vmem [shape: f32[1,128], index: 2, kind: input, shape index: {}]   ;;  %s1911_s5 = inlined_call_operand.vmem [shape: bf16[32,128], index: 5, kind: output, shape index: {}]  }
   0x1   :  { %v1453_v0 = vld [vmem:[%s1906_s4] sm:$0xff]   ;;  %v1454_v1 = vld [vmem:[%s1906_s4 + $0x8] sm:$0xff]   ;;  %v1455_v2 = vld [vmem:[%s1906_s4 + $0x10] sm:$0xff]  }
   0x2   :  { %1401 = vmatprep.subr.bf16.mxu1 %v1453_v0  ;;  %v1456_v3 = vld [vmem:[%s1907_s1 + $0xc0] sm:$0xff]   ;;  %v1459_v5 = vld [vmem:[%s1907_s1 + $0xc8] sm:$0xff]   ;;  %v1458_v7 = vld [vmem:[%s1906_s4 + $0x18] sm:$0xff]  }
   0x3   :  { %1402 = vmatpush3.bf16.msra.mxu1 %v1453_v0  ;;  %v1457_v4 = vld [vmem:[%s1907_s1 + $0x80] sm:$0xff]   ;;  %1307 = vmatprep.subr.bf16.mxu0 %v1456_v3  ;;  %v1460_v6 = vld [vmem:[%s1907_s1 + $0x88] sm:$0xff]   ;;  %v1462_v8 = vld [vmem:[%s1907_s1 + $0xd0] sm:$0xff]  }
   0x4   :  { %1403 = vmatprep.subr.bf16.mxu1 %v1454_v1  ;;  %1308 = vmatpush3.bf16.msra.mxu0 %v1457_v4  ;;  %v1463_v9 = vld [vmem:[%s1907_s1 + $0x90] sm:$0xff]   ;;  %v1461_v10 = vld [vmem:[%s1906_s4 + $0x20] sm:$0xff]   ;;  %v1465_v11 = vld [vmem:[%s1907_s1 + $0xd8] sm:$0xff]  }
   0x5   :  { %1309 = vmatprep.subr.bf16.mxu0 %v1459_v5  ;;  %v1466_v12 = vld [vmem:[%s1907_s1 + $0x98] sm:$0xff]   ;;  %v1468_v13 = vld [vmem:[%s1907_s1 + $0xe0] sm:$0xff]   ;;  %v1464_v14 = vld [vmem:[%s1906_s4 + $0x28] sm:$0xff]  }
   0x6   :  { %v1467_v15 = vld [vmem:[%s1906_s4 + $0x30] sm:$0xff]   ;;  %v1469_v16 = vld [vmem:[%s1907_s1 + $0xa0] sm:$0xff]   ;;  %v1471_v17 = vld [vmem:[%s1907_s1 + $0xe8] sm:$0xff]  }
   0x7   :  { %1404 = vmatpush3.bf16.msra.mxu1 %v1454_v1  ;;  %v1473_v18 = vld [vmem:[%s1908_s3] sm:$0xff]   ;;  %v1472_v19 = vld [vmem:[%s1907_s1 + $0xa8] sm:$0xff]   ;;  %v1476_v20 = vld [vmem:[%s1907_s1 + $0xf0] sm:$0xff]  }
   0x8   :  { %1405 = vmatprep.subr.bf16.mxu1 %v1455_v2  ;;  %1310 = vmatpush3.bf16.msra.mxu0 %v1460_v6  ;;  %v1470_v21 = vld [vmem:[%s1906_s4 + $0x38] sm:$0xff]   ;;  %v1478_v22 = vld [vmem:[%s1907_s1 + $0xb0] sm:$0xff]   ;;  %v1474_v24 = vld [vmem:[%s1908_s3 + $0x8] sm:$0xff]  }
   0x9   :  { %1311 = vmatprep.subr.bf16.mxu0 %v1462_v8  ;;  %1417 = vmatprep.mubr.bf16.mxu1 %v1473_v18  ;;  %v1480_v23 = vld [vmem:[%s1907_s1 + $0xf8] sm:$0xff]   ;;  %v1475_v25 = vld [vmem:[%s1907_s1 + $0x40] sm:$0xff]   ;;  %v1479_v27 = vld [vmem:[%s1907_s1 + $0x48] sm:$0xff]  }
   0xa   :  { %v1477_v26 = vld [vmem:[%s1907_s1] sm:$0xff]   ;;  %v1482_v28 = vld [vmem:[%s1907_s1 + $0xb8] sm:$0xff]   ;;  %v1484_v29 = vld [vmem:[%s1909_s0 + $0x8] ss:$36 sps:$4 sm:$0xff]  }
   0xb   :  { %1406 = vmatpush3.bf16.msra.mxu1 %v1455_v2  ;;  %v1486_v30 = vld [vmem:[%s1909_s0 + $0xc] ss:$36 sps:$4 sm:$0xff]   ;;  %v1487_v31 = vld [vmem:[%s1907_s1 + $0x1c0] sm:$0xff]   ;;  %v1490_v38 = vld [vmem:[%s1907_s1 + $0x58] sm:$0xff]  }
   0xc   :  { %1407 = vmatprep.subr.bf16.mxu1 %v1458_v7  ;;  %1312 = vmatpush3.bf16.msra.mxu0 %v1463_v9  ;;  %v1481_v32 = vld [vmem:[%s1907_s1 + $0x8] sm:$0xff]   ;;  %v1489_v33 = vld [vmem:[%s1907_s1 + $0x180] sm:$0xff]   ;;  %v1483_v34 = vld [vmem:[%s1907_s1 + $0x50] sm:$0xff]  }
   0xd   :  { %1313 = vmatprep.subr.bf16.mxu0 %v1465_v11  ;;  %942 = vmatprep.mubr.bf16.mxu0 %v1486_v30  ;;  %v1491_v35 = vld [vmem:[%s1907_s1 + $0x1c8] sm:$0xff]   ;;  %v1488_v36 = vld [vmem:[%s1907_s1 + $0x10] sm:$0xff]   ;;  %v1492_v40 = vld [vmem:[%s1907_s1 + $0x18] sm:$0xff]  }
   0xe   :  { %v1493_v37 = vld [vmem:[%s1907_s1 + $0x188] sm:$0xff]   ;;  %v1495_v39 = vld [vmem:[%s1907_s1 + $0x1d0] sm:$0xff]   ;;  %v1494_v42 = vld [vmem:[%s1907_s1 + $0x60] sm:$0xff]  }
   0xf   :  { %1408 = vmatpush3.bf16.msra.mxu1 %v1458_v7  ;;  %v1497_v41 = vld [vmem:[%s1907_s1 + $0x190] sm:$0xff]   ;;  %v1499_v43 = vld [vmem:[%s1907_s1 + $0x1d8] sm:$0xff]   ;;  %v1496_v44 = vld [vmem:[%s1907_s1 + $0x20] sm:$0xff]  }
  0x10   :  { %1409 = vmatprep.subr.bf16.mxu1 %v1461_v10  ;;  %1314 = vmatpush3.bf16.msra.mxu0 %v1466_v12  ;;  %v1501_v45 = vld [vmem:[%s1907_s1 + $0x198] sm:$0xff]   ;;  %v1498_v46 = vld [vmem:[%s1907_s1 + $0x68] sm:$0xff]   ;;  %v1503_v47 = vld [vmem:[%s1907_s1 + $0x1e0] sm:$0xff]  }
  0x11   :  { %1315 = vmatprep.subr.bf16.mxu0 %v1468_v13  ;;  %v1500_v48 = vld [vmem:[%s1907_s1 + $0x28] sm:$0xff]   ;;  %v1505_v49 = vld [vmem:[%s1907_s1 + $0x1a0] sm:$0xff]   ;;  %v1502_v50 = vld [vmem:[%s1907_s1 + $0x70] sm:$0xff]  }
  0x12   :  { %v1507_v51 = vld [vmem:[%s1907_s1 + $0x1e8] sm:$0xff]   ;;  %v1504_v52 = vld [vmem:[%s1907_s1 + $0x30] sm:$0xff]   ;;  %v1506_v54 = vld [vmem:[%s1907_s1 + $0x78] sm:$0xff]  }
  0x13   :  { %1410 = vmatpush3.bf16.msra.mxu1 %v1461_v10  ;;  %v1509_v53 = vld [vmem:[%s1907_s1 + $0x1a8] sm:$0xff]   ;;  %v1513_v56 = vld [vmem:[%s1909_s0 + $0x54] ss:$36 sps:$4 sm:$0xff]   ;;  %v1510_v60 = vld [vmem:[%s1909_s0] ss:$36 sps:$4 sm:$0xff]  }
  0x14   :  { %1411 = vmatprep.subr.bf16.mxu1 %v1464_v14  ;;  %1316 = vmatpush3.bf16.msra.mxu0 %v1469_v16  ;;  %v1512_v55 = vld [vmem:[%s1909_s0 + $0x4] ss:$36 sps:$4 sm:$0xff]   ;;  %v1508_v57 = vld [vmem:[%s1907_s1 + $0x38] sm:$0xff]   ;;  %v1516_v58 = vld [vmem:[%s1907_s1 + $0x1f0] sm:$0xff]  }
  0x15   :  { %1317 = vmatprep.subr.bf16.mxu0 %v1471_v17  ;;  %v1517_v59 = vld [vmem:[%s1909_s0 + $0x50] ss:$36 sps:$4 sm:$0xff]   ;;  %v1515_v61 = vld [vmem:[%s1907_s1 + $0x140] sm:$0xff]   ;;  %v1521_v0 = vld [vmem:[%s1907_s1 + $0x1f8] sm:$0xff]  }
  0x16   :  { %v1519_v62 = vld [vmem:[%s1907_s1 + $0x1b0] sm:$0xff]   ;;  %v1518_v63 = vld [vmem:[%s1907_s1 + $0x100] sm:$0xff]   ;;  %v1520_v1 = vld [vmem:[%s1907_s1 + $0x148] sm:$0xff]  }
  0x17   :  { %1412 = vmatpush3.bf16.msra.mxu1 %v1464_v14  ;;  %v1523_v2 = vld [vmem:[%s1907_s1 + $0x1b8] sm:$0xff]   ;;  %v1524_v3 = vld [vmem:[%s1909_s0 + $0x4c] ss:$36 sps:$4 sm:$0xff]   ;;  %v1531_v9 = vld [vmem:[%s1907_s1 + $0x200] sm:$0xff]  }
  0x18   :  { %1413 = vmatprep.subr.bf16.mxu1 %v1467_v15  ;;  %1318 = vmatpush3.bf16.msra.mxu0 %v1472_v19  ;;  %v1522_v4 = vld [vmem:[%s1907_s1 + $0x108] sm:$0xff]   ;;  %v1527_v6 = vld [vmem:[%s1907_s1 + $0x150] sm:$0xff]   ;;  %v1528_v7 = vld [vmem:[%s1909_s0 + $0x18] ss:$36 sps:$4 sm:$0xff]  }
  0x19   :  { %1319 = vmatprep.subr.bf16.mxu0 %v1476_v20  ;;  %v1526_v5 = vld [vmem:[%s1909_s0 + $0x48] ss:$36 sps:$4 sm:$0xff]   ;;  %v1530_v8 = vld [vmem:[%s1909_s0 + $0x1c] ss:$36 sps:$4 sm:$0xff]   ;;  %v1532_v10 = vld [vmem:[%s1907_s1 + $0x110] sm:$0xff]  }
  0x1a   :  { %v1533_v11 = vld [vmem:[%s1907_s1 + $0x158] sm:$0xff]   ;;  %v1534_v12 = vld [vmem:[%s1907_s1 + $0x208] sm:$0xff]   ;;  %v1536_v14 = vld [vmem:[%s1907_s1 + $0x160] sm:$0xff]  }
  0x1b   :  { %1414 = vmatpush3.bf16.msra.mxu1 %v1467_v15  ;;  %v1535_v13 = vld [vmem:[%s1907_s1 + $0x118] sm:$0xff]   ;;  %v1537_v15 = vld [vmem:[%s1907_s1 + $0x210] sm:$0xff]   ;;  %v1538_v16 = vld [vmem:[%s1907_s1 + $0x120] sm:$0xff]  }
  0x1c   :  { %1415 = vmatprep.subr.bf16.mxu1 %v1470_v21  ;;  %1320 = vmatpush3.bf16.msra.mxu0 %v1478_v22  ;;  %v1540_v17 = vld [vmem:[%s1907_s1 + $0x218] sm:$0xff]   ;;  %v1539_v18 = vld [vmem:[%s1907_s1 + $0x168] sm:$0xff]   ;;  %v1543_v20 = vld [vmem:[%s1907_s1 + $0x220] sm:$0xff]  }
  0x1d   :  { %1321 = vmatprep.subr.bf16.mxu0 %v1480_v23  ;;  %v1541_v19 = vld [vmem:[%s1907_s1 + $0x128] sm:$0xff]   ;;  %v1544_v22 = vld [vmem:[%s1907_s1 + $0x130] sm:$0xff]   ;;  %v1545_v23 = vld [vmem:[%s1907_s1 + $0x178] sm:$0xff]  }
  0x1e   :  { %v1558_v30 = vld [vmem:[%s1909_s0 + $0x20] ss:$36 sps:$4 sm:$0xff]  }
  0x1f   :  { %1416 = vmatpush3.bf16.msra.mxu1 %v1470_v21  ;;  %v1542_v21 = vld [vmem:[%s1907_s1 + $0x170] sm:$0xff]  }
  0x20   :  { %1279 = vmatprep.subr.bf16.mxu1 %v1475_v25  ;;  %1322 = vmatpush3.bf16.msra.mxu0 %v1482_v28  ;;  %v1550_v25 = vld [vmem:[%s1909_s0 + $0x14] ss:$36 sps:$4 sm:$0xff]  }
  0x21   :  { %1363 = vmatprep.subr.bf16.mxu0 %v1487_v31  ;;  %v1547_v28 = vld [vmem:[%s1907_s1 + $0x138] sm:$0xff]   ;;  %v1548_v31 = vld [vmem:[%s1909_s0 + $0x10] ss:$36 sps:$4 sm:$0xff]  }
  0x22   :  { %1418 = vmatmul.mubr.bf16.vlgmr.msra.gmra.mrb[0].mxu1 %v1474_v24  ;;  %v1546_v24 = vld [vmem:[%s1907_s1 + $0x228] sm:$0xff]  }
  0x23   :  { %1280 = vmatpush3.bf16.msra.mxu1 %v1477_v26  ;;  %943 = vmatmul.mubr.bf16.vlgmr.msra.gmra.mrb[0].mxu0 %v1484_v29  ;;  %v1551_v26 = vld [vmem:[%s1909_s0 + $0x64] ss:$36 sps:$4 sm:$0xff]   ;;  %v1554_v29 = vld [vmem:[%s1907_s1 + $0x230] sm:$0xff]  }
  0x24   :  { %1281 = vmatprep.subr.bf16.mxu1 %v1479_v27  ;;  %1364 = vmatpush3.bf16.msra.mxu0 %v1489_v33  ;;  %v1553_v27 = vld [vmem:[%s1909_s0 + $0x60] ss:$36 sps:$4 sm:$0xff]  }
  0x25   :  { %1365 = vmatprep.subr.bf16.mxu0 %v1491_v35  ;;  %893 = vmatprep.mubr.bf16.mxu1 %v1512_v55  ;;  %v1556_v33 = vld [vmem:[%s1909_s0 + $0x5c] ss:$36 sps:$4 sm:$0xff]  }
  0x26   :  { %950 = vmatprep.mubr.bf16.mxu0 %v1513_v56  ;;  %v1559_v35 = vld [vmem:[%s1909_s0 + $0x58] ss:$36 sps:$4 sm:$0xff]  }
  0x27   :  { %1282 = vmatpush3.bf16.msra.mxu1 %v1481_v32  ;;  %v1555_v32 = vld [vmem:[%s1907_s1 + $0x238] sm:$0xff]  }
  0x28   :  { %1283 = vmatprep.subr.bf16.mxu1 %v1483_v34  ;;  %1366 = vmatpush3.bf16.msra.mxu0 %v1493_v37  ;;  %v1560_v34 = vld [vmem:[%s1909_s0 + $0x68] ss:$36 sps:$4 sm:$0xff]  }
  0x29   :  { %1367 = vmatprep.subr.bf16.mxu0 %v1495_v39 }
  0x2b   :  { %1284 = vmatpush3.bf16.msra.mxu1 %v1488_v36  ;;  %951 = vmatmul.mubr.bf16.gmra.mrb[4].mxu0 %v1517_v59 }
  0x2c   :  { %1285 = vmatprep.subr.bf16.mxu1 %v1490_v38  ;;  %1368 = vmatpush3.bf16.msra.mxu0 %v1497_v41 }
  0x2d   :  { %1369 = vmatprep.subr.bf16.mxu0 %v1499_v43  ;;  %1040 = vmatprep.mubr.bf16.mxu0 %v1530_v8 }
  0x2f   :  { %1286 = vmatpush3.bf16.msra.mxu1 %v1492_v40 }
  0x30   :  { %1287 = vmatprep.subr.bf16.mxu1 %v1494_v42  ;;  %1370 = vmatpush3.bf16.msra.mxu0 %v1501_v45 }
  0x31   :  { %1371 = vmatprep.subr.bf16.mxu0 %v1503_v47 }
  0x33   :  { %1288 = vmatpush3.bf16.msra.mxu1 %v1496_v44 }
  0x34   :  { %1289 = vmatprep.subr.bf16.mxu1 %v1498_v46  ;;  %1372 = vmatpush3.bf16.msra.mxu0 %v1505_v49 }
  0x35   :  { %1373 = vmatprep.subr.bf16.mxu0 %v1507_v51 }
  0x37   :  { %1290 = vmatpush3.bf16.msra.mxu1 %v1500_v48 }
  0x38   :  { %1291 = vmatprep.subr.bf16.mxu1 %v1502_v50  ;;  %1374 = vmatpush3.bf16.msra.mxu0 %v1509_v53 }
  0x39   :  { %1375 = vmatprep.subr.bf16.mxu0 %v1516_v58 }
  0x3b   :  { %1292 = vmatpush3.bf16.msra.mxu1 %v1504_v52 }
  0x3c   :  { %1293 = vmatprep.subr.bf16.mxu1 %v1506_v54  ;;  %1376 = vmatpush3.bf16.msra.mxu0 %v1519_v62 }
  0x3d   :  { %1377 = vmatprep.subr.bf16.mxu0 %v1521_v0 }
  0x3f   :  { %1294 = vmatpush3.bf16.msra.mxu1 %v1508_v57 }
  0x40   :  { %1335 = vmatprep.subr.bf16.mxu1 %v1515_v61  ;;  %1378 = vmatpush3.bf16.msra.mxu0 %v1523_v2 }
  0x41   :  { %1421 = vmatprep.subr.bf16.mxu0 %v1531_v9 }
  0x42   :  { %894 = vmatmul.mubr.bf16.vlgmr.msra.gmra.mrb[4].mxu1 %v1510_v60 }
  0x43   :  { %1336 = vmatpush3.bf16.msra.mxu1 %v1518_v63  ;;  %901 = vmatprep.mubr.bf16.mxu1 %v1524_v3 }
  0x44   :  { %1337 = vmatprep.subr.bf16.mxu1 %v1520_v1  ;;  %1041 = vmatmul.mubr.bf16.vlgmr.msra.gmra.mrb[8].mxu0 %v1528_v7 }
  0x45   :  { %1422 = vmatpush3.bf16.msra.mxu0 %v1531_v9  ;;  %1048 = vmatprep.mubr.bf16.mxu0 %v1551_v26 }
  0x46   :  { %1423 = vmatprep.subr.bf16.mxu0 %v1534_v12 }
  0x47   :  { %1338 = vmatpush3.bf16.msra.mxu1 %v1522_v4 }
  0x48   :  { %1339 = vmatprep.subr.bf16.mxu1 %v1527_v6 }
  0x49   :  { %1424 = vmatpush3.bf16.msra.mxu0 %v1534_v12 }
  0x4a   :  { %902 = vmatmul.mubr.bf16.gmra.mrb[8].mxu1 %v1526_v5  ;;  %1425 = vmatprep.subr.bf16.mxu0 %v1537_v15 }
  0x4b   :  { %1340 = vmatpush3.bf16.msra.mxu1 %v1532_v10  ;;  %991 = vmatprep.mubr.bf16.mxu1 %v1550_v25 }
  0x4c   :  { %1341 = vmatprep.subr.bf16.mxu1 %v1533_v11  ;;  %1049 = vmatmul.mubr.bf16.gmra.mrb[12].mxu0 %v1553_v27 }
  0x4d   :  { %1426 = vmatpush3.bf16.msra.mxu0 %v1537_v15  ;;  %1437 = vmatprep.mubr.bf16.mxu0 %v1558_v30 }
  0x4e   :  { %1427 = vmatprep.subr.bf16.mxu0 %v1540_v17 }
  0x4f   :  { %1342 = vmatpush3.bf16.msra.mxu1 %v1535_v13 }
  0x50   :  { %1343 = vmatprep.subr.bf16.mxu1 %v1536_v14 }
  0x51   :  { %1428 = vmatpush3.bf16.msra.mxu0 %v1540_v17 }
  0x52   :  { %1429 = vmatprep.subr.bf16.mxu0 %v1543_v20 }
  0x53   :  { %1344 = vmatpush3.bf16.msra.mxu1 %v1538_v16 }
  0x54   :  { %1345 = vmatprep.subr.bf16.mxu1 %v1539_v18 }
  0x55   :  { %1430 = vmatpush3.bf16.msra.mxu0 %v1543_v20  ;;  %v1149_v20 = vld [vmem:[%s1910_s2] ss:$0 sm:$0xff] }
  0x56   :  { %1431 = vmatprep.subr.bf16.mxu0 %v1546_v24 }
  0x57   :  { %1346 = vmatpush3.bf16.msra.mxu1 %v1541_v19 }
  0x58   :  { %1347 = vmatprep.subr.bf16.mxu1 %v1542_v21 }
  0x59   :  { %1432 = vmatpush3.bf16.msra.mxu0 %v1546_v24 }
  0x5a   :  { %1433 = vmatprep.subr.bf16.mxu0 %v1554_v29 }
  0x5b   :  { %1348 = vmatpush3.bf16.msra.mxu1 %v1544_v22 }
  0x5c   :  { %1349 = vmatprep.subr.bf16.mxu1 %v1545_v23 }
  0x5d   :  { %1434 = vmatpush3.bf16.msra.mxu0 %v1554_v29 }
  0x5e   :  { %1435 = vmatprep.subr.bf16.mxu0 %v1555_v32 }
  0x5f   :  { %1350 = vmatpush3.bf16.msra.mxu1 %v1547_v28 }
  0x61   :  { %1436 = vmatpush3.bf16.msra.mxu0 %v1555_v32 }
  0x62   :  { %992 = vmatmul.mubr.bf16.vlgmr.msra.gmra.mrb[12].mxu1 %v1548_v31 }
  0x63   :  { %999 = vmatprep.mubr.bf16.mxu1 %v1556_v33 }
  0x64   :  { %1438 = vmatmul.mubr.bf16.vlgmr.msra.gmra.mrb[16].mxu0 %v1560_v34 }
  0x6a   :  { %1000 = vmatmul.mubr.bf16.gmra.mrb[16].mxu1 %v1559_v35 }
  0xf5   :  { %v1891_v36 = vpop.f32.mrb[0].mxu1 }
  0xf6   :  { %v146_v37 = vpop.f32.mrb[1].mxu1  ;;  %v1323_v40 = vpop.f32.mrb[0].mxu0 }
  0xf7   :  { %v1893_v38 = vpop.f32.mrb[2].mxu1  ;;  %v1324_v41 = vpop.f32.mrb[1].mxu0  ;;  %v161_v24 = vadd.f32 %v1149_v20, %v146_v37  ;;  %v163_v37 = vadd.f32 %v1891_v36, %v1149_v20 }
  0xf8   :  { %v149_v39 = vpop.f32.mrb[3].mxu1  ;;  %v1325_v42 = vadd.f32 %v1324_v41, %v1323_v40  ;;  %v1326_v43 = vpop.f32.mrb[2].mxu0 }
  0xf9   :  { %v1327_v44 = vpop.f32.mrb[3].mxu0  ;;  %v162_v28 = vadd.f32 %v1149_v20, %v149_v39 }
  0xfa   :  { %v1328_v45 = vadd.f32 %v1327_v44, %v1326_v43 }
  0xfe   :  { %v1329_v46 = vpop.f32.mrb[4].mxu0 }
  0xff   :  { %v1330_v47 = vpop.f32.mrb[5].mxu0 }
 0x100   :  { %v1331_v48 = vadd.f32 %v1330_v47, %v1329_v46  ;;  %v1332_v49 = vpop.f32.mrb[6].mxu0 }
 0x101   :  { %v1333_v50 = vpop.f32.mrb[7].mxu0 }
 0x102   :  { %v1334_v51 = vadd.f32 %v1333_v50, %v1332_v49 }
 0x115   :  { %v1295_v52 = vpop.f32.mrb[4].mxu1 }
 0x116   :  { %v1296_v53 = vpop.f32.mrb[5].mxu1 }
 0x117   :  { %v1297_v54 = vadd.f32 %v1296_v53, %v1295_v52  ;;  %v1298_v55 = vpop.f32.mrb[6].mxu1  ;;  %v1379_v60 = vpop.f32.mrb[8].mxu0 }
 0x118   :  { %v1299_v56 = vpop.f32.mrb[7].mxu1  ;;  %v1380_v62 = vpop.f32.mrb[9].mxu0 }
 0x119   :  { %v945_v57 = vadd.f32 %v1325_v42, %v1297_v54  ;;  %v1300_v58 = vadd.f32 %v1299_v56, %v1298_v55  ;;  %v1381_v0 = vadd.f32 %v1380_v62, %v1379_v60  ;;  %v1382_v1 = vpop.f32.mrb[10].mxu0 }
 0x11a   :  { %v1383_v4 = vpop.f32.mrb[11].mxu0 }
 0x11b   :  { %v948_v59 = vadd.f32 %v1328_v45, %v1300_v58  ;;  %v1384_v6 = vadd.f32 %v1383_v4, %v1382_v1 }
 0x11d   :  { %v1301_v61 = vpop.f32.mrb[8].mxu1 }
 0x11e   :  { %v1302_v63 = vpop.f32.mrb[9].mxu1 }
 0x11f   :  { %v1303_v2 = vadd.f32 %v1302_v63, %v1301_v61  ;;  %v1304_v3 = vpop.f32.mrb[10].mxu1  ;;  %v1385_v10 = vpop.f32.mrb[12].mxu0 }
 0x120   :  { %v1305_v5 = vpop.f32.mrb[11].mxu1  ;;  %v1386_v11 = vpop.f32.mrb[13].mxu0 }
 0x121   :  { %v953_v7 = vadd.f32 %v1331_v48, %v1303_v2  ;;  %v1306_v8 = vadd.f32 %v1305_v5, %v1304_v3  ;;  %v1387_v12 = vadd.f32 %v1386_v11, %v1385_v10  ;;  %v1388_v13 = vpop.f32.mrb[14].mxu0 }
 0x122   :  { %v1389_v14 = vpop.f32.mrb[15].mxu0 }
 0x123   :  { %v956_v9 = vadd.f32 %v1334_v51, %v1306_v8  ;;  %v1390_v15 = vadd.f32 %v1389_v14, %v1388_v13  ;;  %v164_v51 = vadd.f32 %v1893_v38, %v1149_v20 }
 0x135   :  { %v1351_v16 = vpop.f32.mrb[12].mxu1 }
 0x136   :  { %v1352_v17 = vpop.f32.mrb[13].mxu1 }
 0x137   :  { %v1353_v18 = vadd.f32 %v1352_v17, %v1351_v16  ;;  %v1354_v19 = vpop.f32.mrb[14].mxu1  ;;  %v1439_v27 = vpop.f32.mrb[16].mxu0 }
 0x138   :  { %v1355_v21 = vpop.f32.mrb[15].mxu1  ;;  %v1091_v30 = vpop.f32.mrb[17].mxu0 }
 0x139   :  { %v994_v22 = vadd.f32 %v1353_v18, %v945_v57  ;;  %v1356_v23 = vadd.f32 %v1355_v21, %v1354_v19  ;;  %v1440_v34 = vpop.f32.mrb[18].mxu0 }
 0x13a   :  { %v1094_v42 = vpop.f32.mrb[19].mxu0 }
 0x13b   :  { %v997_v25 = vadd.f32 %v1356_v23, %v948_v59  ;;  %v1043_v26 = vadd.f32 %v1381_v0, %v994_v22 }
 0x13d   :  { %v1357_v29 = vpop.f32.mrb[16].mxu1  ;;  %v1445_v31 = vadd.f32 %v1043_v26, %v161_v24  ;;  %v1046_v32 = vadd.f32 %v1384_v6, %v997_v25 }
 0x13e   :  { %v1358_v33 = vpop.f32.mrb[17].mxu1 }
 0x13f   :  { %v1359_v35 = vadd.f32 %v1358_v33, %v1357_v29  ;;  %v1446_v40 = vadd.f32 %v1445_v31, %v1091_v30  ;;  %v1360_v41 = vpop.f32.mrb[18].mxu1  ;;  %v1451_v43 = vadd.f32 %v1046_v32, %v162_v28 }
 0x140   :  { %v1361_v44 = vpop.f32.mrb[19].mxu1 }
 0x141   :  { %v1002_v45 = vadd.f32 %v1359_v35, %v953_v7  ;;  %v1362_v46 = vadd.f32 %v1361_v44, %v1360_v41  ;;  %v1452_v47 = vadd.f32 %v1451_v43, %v1094_v42  ;;  %v1121_v49 = vmax.f32 %v1446_v40, 0.0 }
 0x143   :  { %v1051_v48 = vadd.f32 %v1387_v12, %v1002_v45  ;;  %v1005_v39 = vadd.f32 %v1362_v46, %v956_v9  ;;  %v1122_v50 = vmax.f32 %v1452_v47, 0.0 }
 0x145   :  { %v1442_v52 = vadd.f32 %v1051_v48, %v163_v37  ;;  %v1054_v53 = vadd.f32 %v1390_v15, %v1005_v39  ;;  %v1261_v54 = vpack.c.bf16 %v1122_v50, %v1121_v49 }
 0x147   :  { %v1443_v55 = vadd.f32 %v1442_v52, %v1439_v27  ;;  %v1448_v56 = vadd.f32 %v1054_v53, %v164_v51  ;;  %1262 = vst [vmem:[%s1911_s5] sm:$0xff] %v1261_v54  }
 0x149   :  { %v1449_v57 = vadd.f32 %v1448_v56, %v1440_v34  ;;  %v1123_v58 = vmax.f32 %v1443_v55, 0.0 }
 0x14b   :  { %v1124_v59 = vmax.f32 %v1449_v57, 0.0 }
 0x14d   :  { %v1266_v60 = vpack.c.bf16 %v1124_v59, %v1123_v58 }
 0x14f   :  { %1268 = vst [vmem:[%s1911_s5 + $0x8] sm:$0xff] %v1266_v60  }

// kernel: resnet18_forward.11
= control target key start
LH: loop header
LB: loop body
LE: loop exit
PB: predicated region body
PF: predicated region fallthrough
CT: control target
= control target key end

     0   :  { %s1659_s1 = inlined_call_operand.vmem [shape: bf16[1152,128], index: 1, kind: input, shape index: {}]   ;;  %s1660_s0 = inlined_call_operand.vmem [shape: bf16[32,1152], index: 0, kind: input, shape index: {}]   ;;  %s1661_s2 = inlined_call_operand.vmem [shape: f32[1,128], index: 2, kind: input, shape index: {}]   ;;  %s1662_s3 = inlined_call_operand.vmem [shape: bf16[32,128], index: 3, kind: output, shape index: {}]  }
   0x1   :  { %v1262_v0 = vld [vmem:[%s1659_s1 + $0x40] sm:$0xff]   ;;  %v1266_v4 = vld [vmem:[%s1659_s1 + $0x48] sm:$0xff]   ;;  %v1270_v8 = vld [vmem:[%s1659_s1 + $0x50] sm:$0xff]  }
   0x2   :  { %v1263_v1 = vld [vmem:[%s1659_s1 + $0xc0] sm:$0xff]   ;;  %1120 = vmatprep.subr.bf16.mxu0 %v1262_v0  ;;  %v1267_v5 = vld [vmem:[%s1659_s1 + $0xc8] sm:$0xff]   ;;  %v1271_v9 = vld [vmem:[%s1659_s1 + $0xd0] sm:$0xff]  }
   0x3   :  { %v1264_v2 = vld [vmem:[%s1659_s1] sm:$0xff]   ;;  %1148 = vmatprep.subr.bf16.mxu1 %v1263_v1  ;;  %v1268_v6 = vld [vmem:[%s1659_s1 + $0x8] sm:$0xff]   ;;  %v1272_v10 = vld [vmem:[%s1659_s1 + $0x10] sm:$0xff]  }
   0x4   :  { %v1265_v3 = vld [vmem:[%s1659_s1 + $0x80] sm:$0xff]   ;;  %1121 = vmatpush3.bf16.msra.mxu0 %v1264_v2  ;;  %v1269_v7 = vld [vmem:[%s1659_s1 + $0x88] sm:$0xff]   ;;  %v1273_v11 = vld [vmem:[%s1659_s1 + $0x90] sm:$0xff]  }
   0x5   :  { %1149 = vmatpush3.bf16.msra.mxu1 %v1265_v3  ;;  %1122 = vmatprep.subr.bf16.mxu0 %v1266_v4  ;;  %v1274_v12 = vld [vmem:[%s1659_s1 + $0x58] sm:$0xff]   ;;  %v1278_v16 = vld [vmem:[%s1659_s1 + $0x60] sm:$0xff]   ;;  %v1282_v20 = vld [vmem:[%s1659_s1 + $0x68] sm:$0xff]  }
   0x6   :  { %1150 = vmatprep.subr.bf16.mxu1 %v1267_v5  ;;  %v1275_v13 = vld [vmem:[%s1659_s1 + $0xd8] sm:$0xff]   ;;  %v1279_v17 = vld [vmem:[%s1659_s1 + $0xe0] sm:$0xff]   ;;  %v1283_v21 = vld [vmem:[%s1659_s1 + $0xe8] sm:$0xff]  }
   0x7   :  { %v1276_v14 = vld [vmem:[%s1659_s1 + $0x18] sm:$0xff]   ;;  %v1280_v18 = vld [vmem:[%s1659_s1 + $0x20] sm:$0xff]   ;;  %v1284_v22 = vld [vmem:[%s1659_s1 + $0x28] sm:$0xff]  }
   0x8   :  { %1123 = vmatpush3.bf16.msra.mxu0 %v1268_v6  ;;  %v1277_v15 = vld [vmem:[%s1659_s1 + $0x98] sm:$0xff]   ;;  %v1281_v19 = vld [vmem:[%s1659_s1 + $0xa0] sm:$0xff]   ;;  %v1285_v23 = vld [vmem:[%s1659_s1 + $0xa8] sm:$0xff]  }
   0x9   :  { %1151 = vmatpush3.bf16.msra.mxu1 %v1269_v7  ;;  %1124 = vmatprep.subr.bf16.mxu0 %v1270_v8  ;;  %v1286_v24 = vld [vmem:[%s1659_s1 + $0x70] sm:$0xff]   ;;  %v1290_v28 = vld [vmem:[%s1659_s1 + $0x78] sm:$0xff]   ;;  %v1294_v32 = vld [vmem:[%s1660_s0] ss:$36 sps:$4 sm:$0xff]  }
   0xa   :  { %1152 = vmatprep.subr.bf16.mxu1 %v1271_v9  ;;  %v1287_v25 = vld [vmem:[%s1659_s1 + $0xf0] sm:$0xff]   ;;  %v1291_v29 = vld [vmem:[%s1659_s1 + $0xf8] sm:$0xff]   ;;  %v1296_v33 = vld [vmem:[%s1660_s0 + $0x4] ss:$36 sps:$4 sm:$0xff]  }
   0xb   :  { %v1288_v26 = vld [vmem:[%s1659_s1 + $0x30] sm:$0xff]   ;;  %v1292_v30 = vld [vmem:[%s1659_s1 + $0x38] sm:$0xff]   ;;  %v1297_v34 = vld [vmem:[%s1660_s0 + $0x8] ss:$36 sps:$4 sm:$0xff]   ;;  %754 = vmatprep.mubr.bf16.mxu0 %v1296_v33 }
   0xc   :  { %1125 = vmatpush3.bf16.msra.mxu0 %v1272_v10  ;;  %v1289_v27 = vld [vmem:[%s1659_s1 + $0xb0] sm:$0xff]   ;;  %v1293_v31 = vld [vmem:[%s1659_s1 + $0xb8] sm:$0xff]   ;;  %v1300_v36 = vld [vmem:[%s1659_s1 + $0x140] sm:$0xff]  }
   0xd   :  { %1153 = vmatpush3.bf16.msra.mxu1 %v1273_v11  ;;  %1126 = vmatprep.subr.bf16.mxu0 %v1274_v12  ;;  %v1299_v35 = vld [vmem:[%s1660_s0 + $0xc] ss:$36 sps:$4 sm:$0xff]   ;;  %v1301_v37 = vld [vmem:[%s1659_s1 + $0x100] sm:$0xff]   ;;  %v1312_v48 = vld [vmem:[%s1659_s1 + $0x158] sm:$0xff]  }
   0xe   :  { %1154 = vmatprep.subr.bf16.mxu1 %v1275_v13  ;;  %803 = vmatprep.mubr.bf16.mxu1 %v1299_v35  ;;  %v1302_v38 = vld [vmem:[%s1659_s1 + $0x1c0] sm:$0xff]   ;;  %v1304_v40 = vld [vmem:[%s1659_s1 + $0x148] sm:$0xff]   ;;  %v1308_v44 = vld [vmem:[%s1659_s1 + $0x150] sm:$0xff]  }
   0xf   :  { %v1303_v39 = vld [vmem:[%s1659_s1 + $0x180] sm:$0xff]   ;;  %v1305_v41 = vld [vmem:[%s1659_s1 + $0x108] sm:$0xff]   ;;  %v1309_v45 = vld [vmem:[%s1659_s1 + $0x110] sm:$0xff]  }
  0x10   :  { %1127 = vmatpush3.bf16.msra.mxu0 %v1276_v14  ;;  %v1306_v42 = vld [vmem:[%s1659_s1 + $0x1c8] sm:$0xff]   ;;  %v1310_v46 = vld [vmem:[%s1659_s1 + $0x1d0] sm:$0xff]   ;;  %v1313_v49 = vld [vmem:[%s1659_s1 + $0x118] sm:$0xff]  }
  0x11   :  { %1155 = vmatpush3.bf16.msra.mxu1 %v1277_v15  ;;  %1128 = vmatprep.subr.bf16.mxu0 %v1278_v16  ;;  %v1307_v43 = vld [vmem:[%s1659_s1 + $0x188] sm:$0xff]   ;;  %v1311_v47 = vld [vmem:[%s1659_s1 + $0x190] sm:$0xff]   ;;  %v1314_v50 = vld [vmem:[%s1659_s1 + $0x1d8] sm:$0xff]  }
  0x12   :  { %1156 = vmatprep.subr.bf16.mxu1 %v1279_v17  ;;  %v1315_v51 = vld [vmem:[%s1659_s1 + $0x198] sm:$0xff]   ;;  %v1316_v52 = vld [vmem:[%s1659_s1 + $0x160] sm:$0xff]   ;;  %v1320_v56 = vld [vmem:[%s1659_s1 + $0x168] sm:$0xff]  }
  0x13   :  { %v1317_v53 = vld [vmem:[%s1659_s1 + $0x120] sm:$0xff]   ;;  %v1321_v57 = vld [vmem:[%s1660_s0 + $0x4c] ss:$36 sps:$4 sm:$0xff]   ;;  %v1323_v58 = vld [vmem:[%s1660_s0 + $0x54] ss:$36 sps:$4 sm:$0xff]  }
  0x14   :  { %1129 = vmatpush3.bf16.msra.mxu0 %v1280_v18  ;;  %v1318_v54 = vld [vmem:[%s1659_s1 + $0x1e0] sm:$0xff]   ;;  %v1325_v59 = vld [vmem:[%s1659_s1 + $0x128] sm:$0xff]   ;;  %v1327_v61 = vld [vmem:[%s1660_s0 + $0x50] ss:$36 sps:$4 sm:$0xff]  }
  0x15   :  { %1157 = vmatpush3.bf16.msra.mxu1 %v1281_v19  ;;  %1130 = vmatprep.subr.bf16.mxu0 %v1282_v20  ;;  %v1319_v55 = vld [vmem:[%s1659_s1 + $0x1a0] sm:$0xff]   ;;  %v1326_v60 = vld [vmem:[%s1660_s0 + $0x48] ss:$36 sps:$4 sm:$0xff]   ;;  %v1330_v0 = vld [vmem:[%s1659_s1 + $0x170] sm:$0xff]  }
  0x16   :  { %1158 = vmatprep.subr.bf16.mxu1 %v1283_v21  ;;  %v1328_v62 = vld [vmem:[%s1659_s1 + $0x1e8] sm:$0xff]   ;;  %v1331_v1 = vld [vmem:[%s1659_s1 + $0x130] sm:$0xff]   ;;  %v1334_v4 = vld [vmem:[%s1659_s1 + $0x178] sm:$0xff]  }
  0x17   :  { %v1329_v63 = vld [vmem:[%s1659_s1 + $0x1a8] sm:$0xff]   ;;  %v1332_v2 = vld [vmem:[%s1659_s1 + $0x1f0] sm:$0xff]   ;;  %v1335_v5 = vld [vmem:[%s1659_s1 + $0x138] sm:$0xff]  }
  0x18   :  { %1131 = vmatpush3.bf16.msra.mxu0 %v1284_v22  ;;  %v1333_v3 = vld [vmem:[%s1659_s1 + $0x1b0] sm:$0xff]   ;;  %v1336_v6 = vld [vmem:[%s1659_s1 + $0x1f8] sm:$0xff]   ;;  %v1341_v10 = vld [vmem:[%s1659_s1 + $0x200] sm:$0xff]  }
  0x19   :  { %1159 = vmatpush3.bf16.msra.mxu1 %v1285_v23  ;;  %1132 = vmatprep.subr.bf16.mxu0 %v1286_v24  ;;  %v1337_v7 = vld [vmem:[%s1660_s0 + $0x10] ss:$36 sps:$4 sm:$0xff]   ;;  %v1340_v9 = vld [vmem:[%s1659_s1 + $0x1b8] sm:$0xff]   ;;  %v1345_v13 = vld [vmem:[%s1659_s1 + $0x208] sm:$0xff]  }
  0x1a   :  { %1160 = vmatprep.subr.bf16.mxu1 %v1287_v25  ;;  %v1339_v8 = vld [vmem:[%s1660_s0 + $0x14] ss:$36 sps:$4 sm:$0xff]   ;;  %v1344_v12 = vld [vmem:[%s1660_s0 + $0x1c] ss:$36 sps:$4 sm:$0xff]   ;;  %v1350_v17 = vld [vmem:[%s1660_s0 + $0x64] ss:$36 sps:$4 sm:$0xff]  }
  0x1b   :  { %v1342_v11 = vld [vmem:[%s1660_s0 + $0x18] ss:$36 sps:$4 sm:$0xff]   ;;  %v1349_v16 = vld [vmem:[%s1659_s1 + $0x210] sm:$0xff]   ;;  %v1352_v18 = vld [vmem:[%s1660_s0 + $0x60] ss:$36 sps:$4 sm:$0xff]  }
  0x1c   :  { %1133 = vmatpush3.bf16.msra.mxu0 %v1288_v26  ;;  %v1346_v14 = vld [vmem:[%s1660_s0 + $0x5c] ss:$36 sps:$4 sm:$0xff]   ;;  %v1355_v22 = vld [vmem:[%s1659_s1 + $0x228] sm:$0xff]   ;;  %v1356_v23 = vld [vmem:[%s1659_s1 + $0x230] sm:$0xff]  }
  0x1d   :  { %1161 = vmatpush3.bf16.msra.mxu1 %v1289_v27  ;;  %1134 = vmatprep.subr.bf16.mxu0 %v1290_v28  ;;  %v1348_v15 = vld [vmem:[%s1660_s0 + $0x58] ss:$36 sps:$4 sm:$0xff]   ;;  %v1354_v20 = vld [vmem:[%s1659_s1 + $0x220] sm:$0xff]   ;;  %v1359_v25 = vld [vmem:[%s1660_s0 + $0x68] ss:$36 sps:$4 sm:$0xff]  }
  0x1e   :  { %1162 = vmatprep.subr.bf16.mxu1 %v1291_v29  ;;  %v1353_v19 = vld [vmem:[%s1659_s1 + $0x218] sm:$0xff]   ;;  %v1358_v21 = vld [vmem:[%s1660_s0 + $0x20] ss:$36 sps:$4 sm:$0xff]  }
  0x1f   :  { %v1357_v24 = vld [vmem:[%s1659_s1 + $0x238] sm:$0xff]  }
  0x20   :  { %1135 = vmatpush3.bf16.msra.mxu0 %v1292_v30 }
  0x21   :  { %1163 = vmatpush3.bf16.msra.mxu1 %v1293_v31  ;;  %1176 = vmatprep.subr.bf16.mxu0 %v1300_v36 }
  0x22   :  { %1204 = vmatprep.subr.bf16.mxu1 %v1302_v38 }
  0x23   :  { %755 = vmatmul.mubr.bf16.vlgmr.msra.gmra.mrb[0].mxu0 %v1294_v32 }
  0x24   :  { %804 = vmatmul.mubr.bf16.vlgmr.msra.gmra.mrb[0].mxu1 %v1297_v34  ;;  %1177 = vmatpush3.bf16.msra.mxu0 %v1301_v37 }
  0x25   :  { %1205 = vmatpush3.bf16.msra.mxu1 %v1303_v39  ;;  %1178 = vmatprep.subr.bf16.mxu0 %v1304_v40 }
  0x26   :  { %1206 = vmatprep.subr.bf16.mxu1 %v1306_v42  ;;  %762 = vmatprep.mubr.bf16.mxu0 %v1321_v57 }
  0x27   :  { %811 = vmatprep.mubr.bf16.mxu1 %v1323_v58 }
  0x28   :  { %1179 = vmatpush3.bf16.msra.mxu0 %v1305_v41 }
  0x29   :  { %1207 = vmatpush3.bf16.msra.mxu1 %v1307_v43  ;;  %1180 = vmatprep.subr.bf16.mxu0 %v1308_v44 }
  0x2a   :  { %1208 = vmatprep.subr.bf16.mxu1 %v1310_v46 }
  0x2b   :  { %763 = vmatmul.mubr.bf16.gmra.mrb[4].mxu0 %v1326_v60 }
  0x2c   :  { %1181 = vmatpush3.bf16.msra.mxu0 %v1309_v45  ;;  %812 = vmatmul.mubr.bf16.gmra.mrb[4].mxu1 %v1327_v61 }
  0x2d   :  { %1209 = vmatpush3.bf16.msra.mxu1 %v1311_v47  ;;  %1182 = vmatprep.subr.bf16.mxu0 %v1312_v48 }
  0x2e   :  { %1210 = vmatprep.subr.bf16.mxu1 %v1314_v50  ;;  %852 = vmatprep.mubr.bf16.mxu0 %v1339_v8 }
  0x2f   :  { %901 = vmatprep.mubr.bf16.mxu1 %v1344_v12 }
  0x30   :  { %1183 = vmatpush3.bf16.msra.mxu0 %v1313_v49 }
  0x31   :  { %1211 = vmatpush3.bf16.msra.mxu1 %v1315_v51  ;;  %1184 = vmatprep.subr.bf16.mxu0 %v1316_v52 }
  0x32   :  { %1212 = vmatprep.subr.bf16.mxu1 %v1318_v54 }
  0x34   :  { %1185 = vmatpush3.bf16.msra.mxu0 %v1317_v53 }
  0x35   :  { %1213 = vmatpush3.bf16.msra.mxu1 %v1319_v55  ;;  %1186 = vmatprep.subr.bf16.mxu0 %v1320_v56 }
  0x36   :  { %1214 = vmatprep.subr.bf16.mxu1 %v1328_v62 }
  0x38   :  { %1187 = vmatpush3.bf16.msra.mxu0 %v1325_v59 }
  0x39   :  { %1215 = vmatpush3.bf16.msra.mxu1 %v1329_v63  ;;  %1188 = vmatprep.subr.bf16.mxu0 %v1330_v0 }
  0x3a   :  { %1216 = vmatprep.subr.bf16.mxu1 %v1332_v2 }
  0x3c   :  { %1189 = vmatpush3.bf16.msra.mxu0 %v1331_v1 }
  0x3d   :  { %1217 = vmatpush3.bf16.msra.mxu1 %v1333_v3  ;;  %1190 = vmatprep.subr.bf16.mxu0 %v1334_v4 }
  0x3e   :  { %1218 = vmatprep.subr.bf16.mxu1 %v1336_v6 }
  0x40   :  { %1191 = vmatpush3.bf16.msra.mxu0 %v1335_v5 }
  0x41   :  { %1219 = vmatpush3.bf16.msra.mxu1 %v1340_v9  ;;  %1242 = vmatprep.subr.bf16.mxu0 %v1341_v10 }
  0x43   :  { %853 = vmatmul.mubr.bf16.vlgmr.msra.gmra.mrb[8].mxu0 %v1337_v7 }
  0x44   :  { %1243 = vmatpush3.bf16.msra.mxu0 %v1341_v10  ;;  %902 = vmatmul.mubr.bf16.vlgmr.msra.gmra.mrb[8].mxu1 %v1342_v11 }
  0x45   :  { %1244 = vmatprep.subr.bf16.mxu0 %v1345_v13  ;;  %860 = vmatprep.mubr.bf16.mxu0 %v1346_v14 }
  0x46   :  { %909 = vmatprep.mubr.bf16.mxu1 %v1350_v17 }
  0x48   :  { %1245 = vmatpush3.bf16.msra.mxu0 %v1345_v13 }
  0x49   :  { %1246 = vmatprep.subr.bf16.mxu0 %v1349_v16 }
  0x4b   :  { %861 = vmatmul.mubr.bf16.gmra.mrb[12].mxu0 %v1348_v15 }
  0x4c   :  { %1247 = vmatpush3.bf16.msra.mxu0 %v1349_v16  ;;  %910 = vmatmul.mubr.bf16.gmra.mrb[12].mxu1 %v1352_v18 }
  0x4d   :  { %1248 = vmatprep.subr.bf16.mxu0 %v1353_v19  ;;  %1258 = vmatprep.mubr.bf16.mxu0 %v1358_v21 }
  0x50   :  { %1249 = vmatpush3.bf16.msra.mxu0 %v1353_v19 }
  0x51   :  { %1250 = vmatprep.subr.bf16.mxu0 %v1354_v20 }
  0x54   :  { %1251 = vmatpush3.bf16.msra.mxu0 %v1354_v20 }
  0x55   :  { %1252 = vmatprep.subr.bf16.mxu0 %v1355_v22 }
  0x58   :  { %1253 = vmatpush3.bf16.msra.mxu0 %v1355_v22  ;;  %v1010_v22 = vld [vmem:[%s1661_s2] ss:$0 sm:$0xff] }
  0x59   :  { %1254 = vmatprep.subr.bf16.mxu0 %v1356_v23 }
  0x5c   :  { %1255 = vmatpush3.bf16.msra.mxu0 %v1356_v23 }
  0x5d   :  { %1256 = vmatprep.subr.bf16.mxu0 %v1357_v24 }
  0x60   :  { %1257 = vmatpush3.bf16.msra.mxu0 %v1357_v24 }
  0x63   :  { %1259 = vmatmul.mubr.bf16.vlgmr.msra.gmra.mrb[16].mxu0 %v1359_v25 }
  0xf6   :  { %v1136_v26 = vpop.f32.mrb[0].mxu0 }
  0xf7   :  { %v1164_v27 = vpop.f32.mrb[0].mxu1  ;;  %v1137_v28 = vpop.f32.mrb[1].mxu0 }
  0xf8   :  { %v1138_v29 = vadd.f32 %v1137_v28, %v1136_v26  ;;  %v1165_v30 = vpop.f32.mrb[1].mxu1  ;;  %v1139_v31 = vpop.f32.mrb[2].mxu0 }
  0xf9   :  { %v1166_v32 = vadd.f32 %v1165_v30, %v1164_v27  ;;  %v1167_v33 = vpop.f32.mrb[2].mxu1  ;;  %v1140_v34 = vpop.f32.mrb[3].mxu0 }
  0xfa   :  { %v1141_v35 = vadd.f32 %v1140_v34, %v1139_v31  ;;  %v1168_v36 = vpop.f32.mrb[3].mxu1 }
  0xfb   :  { %v806_v37 = vadd.f32 %v1166_v32, %v1138_v29  ;;  %v1169_v38 = vadd.f32 %v1168_v36, %v1167_v33 }
  0xfd   :  { %v809_v39 = vadd.f32 %v1169_v38, %v1141_v35 }
  0xfe   :  { %v1142_v40 = vpop.f32.mrb[4].mxu0 }
  0xff   :  { %v1170_v41 = vpop.f32.mrb[4].mxu1  ;;  %v1143_v42 = vpop.f32.mrb[5].mxu0 }
 0x100   :  { %v1171_v43 = vpop.f32.mrb[5].mxu1  ;;  %v1144_v44 = vadd.f32 %v1143_v42, %v1142_v40  ;;  %v1145_v46 = vpop.f32.mrb[6].mxu0 }
 0x101   :  { %v1172_v45 = vadd.f32 %v1171_v43, %v1170_v41  ;;  %v1173_v47 = vpop.f32.mrb[6].mxu1  ;;  %v1146_v48 = vpop.f32.mrb[7].mxu0 }
 0x102   :  { %v1174_v49 = vpop.f32.mrb[7].mxu1  ;;  %v1147_v51 = vadd.f32 %v1146_v48, %v1145_v46 }
 0x103   :  { %v814_v50 = vadd.f32 %v1172_v45, %v1144_v44  ;;  %v1175_v52 = vadd.f32 %v1174_v49, %v1173_v47 }
 0x105   :  { %v817_v53 = vadd.f32 %v1175_v52, %v1147_v51 }
 0x116   :  { %v1192_v54 = vpop.f32.mrb[8].mxu0 }
 0x117   :  { %v1193_v55 = vpop.f32.mrb[9].mxu0  ;;  %v1220_v58 = vpop.f32.mrb[8].mxu1 }
 0x118   :  { %v1194_v56 = vadd.f32 %v1193_v55, %v1192_v54  ;;  %v1195_v57 = vpop.f32.mrb[10].mxu0  ;;  %v1221_v62 = vpop.f32.mrb[9].mxu1 }
 0x119   :  { %v1196_v59 = vpop.f32.mrb[11].mxu0  ;;  %v1222_v63 = vadd.f32 %v1221_v62, %v1220_v58  ;;  %v1223_v0 = vpop.f32.mrb[10].mxu1 }
 0x11a   :  { %v855_v60 = vadd.f32 %v1194_v56, %v806_v37  ;;  %v1197_v61 = vadd.f32 %v1196_v59, %v1195_v57  ;;  %v1224_v2 = vpop.f32.mrb[11].mxu1 }
 0x11b   :  { %v1225_v3 = vadd.f32 %v1224_v2, %v1223_v0 }
 0x11c   :  { %v858_v1 = vadd.f32 %v1197_v61, %v809_v39  ;;  %v904_v4 = vadd.f32 %v1222_v63, %v855_v60 }
 0x11e   :  { %v1198_v5 = vpop.f32.mrb[12].mxu0  ;;  %v907_v7 = vadd.f32 %v1225_v3, %v858_v1 }
 0x11f   :  { %v1199_v6 = vpop.f32.mrb[13].mxu0  ;;  %v1226_v10 = vpop.f32.mrb[12].mxu1 }
 0x120   :  { %v1200_v8 = vadd.f32 %v1199_v6, %v1198_v5  ;;  %v1201_v9 = vpop.f32.mrb[14].mxu0  ;;  %v1227_v14 = vpop.f32.mrb[13].mxu1 }
 0x121   :  { %v1202_v11 = vpop.f32.mrb[15].mxu0  ;;  %v1228_v15 = vadd.f32 %v1227_v14, %v1226_v10  ;;  %v1229_v16 = vpop.f32.mrb[14].mxu1 }
 0x122   :  { %v863_v12 = vadd.f32 %v1200_v8, %v814_v50  ;;  %v1203_v13 = vadd.f32 %v1202_v11, %v1201_v9  ;;  %v1230_v18 = vpop.f32.mrb[15].mxu1 }
 0x123   :  { %v1231_v19 = vadd.f32 %v1230_v18, %v1229_v16 }
 0x124   :  { %v866_v17 = vadd.f32 %v1203_v13, %v817_v53  ;;  %v912_v20 = vadd.f32 %v1228_v15, %v863_v12 }
 0x126   :  { %v915_v21 = vadd.f32 %v1231_v19, %v866_v17 }
 0x136   :  { %v1260_v23 = vpop.f32.mrb[16].mxu0 }
 0x137   :  { %v961_v24 = vadd.f32 %v1260_v23, %v912_v20  ;;  %v952_v25 = vpop.f32.mrb[17].mxu0 }
 0x138   :  { %v953_v26 = vadd.f32 %v952_v25, %v904_v4  ;;  %v1261_v27 = vpop.f32.mrb[18].mxu0 }
 0x139   :  { %v969_v28 = vadd.f32 %v1010_v22, %v961_v24  ;;  %v964_v29 = vadd.f32 %v1261_v27, %v915_v21  ;;  %v955_v30 = vpop.f32.mrb[19].mxu0 }
 0x13a   :  { %v967_v31 = vadd.f32 %v1010_v22, %v953_v26  ;;  %v956_v32 = vadd.f32 %v955_v30, %v907_v7 }
 0x13b   :  { %v970_v33 = vadd.f32 %v1010_v22, %v964_v29  ;;  %v984_v35 = vmax.f32 %v969_v28, 0.0 }
 0x13c   :  { %v968_v34 = vadd.f32 %v1010_v22, %v956_v32  ;;  %v982_v37 = vmax.f32 %v967_v31, 0.0 }
 0x13d   :  { %v985_v36 = vmax.f32 %v970_v33, 0.0 }
 0x13e   :  { %v983_v38 = vmax.f32 %v968_v34, 0.0 }
 0x13f   :  { %v1117_v39 = vpack.c.bf16 %v985_v36, %v984_v35 }
 0x140   :  { %v1112_v40 = vpack.c.bf16 %v983_v38, %v982_v37 }
 0x141   :  { %1119 = vst [vmem:[%s1662_s3 + $0x8] sm:$0xff] %v1117_v39  }
 0x142   :  { %1113 = vst [vmem:[%s1662_s3] sm:$0xff] %v1112_v40  }

// kernel: resnet18_forward.13
= control target key start
LH: loop header
LB: loop body
LE: loop exit
PB: predicated region body
PF: predicated region fallthrough
CT: control target
= control target key end

     0   :  { %s2032_s1 = inlined_call_operand.vmem [shape: bf16[1152,256], index: 1, kind: input, shape index: {}]   ;;  %s2033_s0 = inlined_call_operand.vmem [shape: bf16[8,1152], index: 0, kind: input, shape index: {}]   ;;  %s2034_s2 = inlined_call_operand.vmem [shape: f32[1,256], index: 2, kind: input, shape index: {}]   ;;  %s2035_s3 = inlined_call_operand.vmem [shape: bf16[8,256], index: 3, kind: output, shape index: {}]  }
   0x1   :  { %v1321_v0 = vld [vmem:[%s2032_s1 + $0x4] ss:$8 sps:$4 sm:$0xff]   ;;  %v1325_v2 = vld [vmem:[%s2032_s1] ss:$8 sps:$4 sm:$0xff]   ;;  %v1327_v4 = vld [vmem:[%s2032_s1 + $0x14] ss:$8 sps:$4 sm:$0xff]  }
   0x2   :  { %v1323_v1 = vld [vmem:[%s2032_s1 + $0x104] ss:$8 sps:$4 sm:$0xff]   ;;  %936 = vmatprep.subr.bf16.mxu0 %v1321_v0  ;;  %v1326_v3 = vld [vmem:[%s2032_s1 + $0x100] ss:$8 sps:$4 sm:$0xff]   ;;  %v1329_v5 = vld [vmem:[%s2032_s1 + $0x114] ss:$8 sps:$4 sm:$0xff]  }
   0x3   :  { %977 = vmatprep.subr.bf16.mxu1 %v1323_v1  ;;  %937 = vmatpush1.bf16.msra.mxu0 %v1325_v2  ;;  %v1331_v6 = vld [vmem:[%s2032_s1 + $0x10] ss:$8 sps:$4 sm:$0xff]   ;;  %v1333_v8 = vld [vmem:[%s2032_s1 + $0x24] ss:$8 sps:$4 sm:$0xff]   ;;  %v1337_v10 = vld [vmem:[%s2032_s1 + $0x20] ss:$8 sps:$4 sm:$0xff]  }
   0x4   :  { %978 = vmatpush1.bf16.msra.mxu1 %v1326_v3  ;;  %938 = vmatprep.subr.bf16.mxu0 %v1327_v4  ;;  %v1332_v7 = vld [vmem:[%s2032_s1 + $0x110] ss:$8 sps:$4 sm:$0xff]   ;;  %v1335_v9 = vld [vmem:[%s2032_s1 + $0x124] ss:$8 sps:$4 sm:$0xff]   ;;  %v1338_v11 = vld [vmem:[%s2032_s1 + $0x120] ss:$8 sps:$4 sm:$0xff]  }
   0x5   :  { %979 = vmatprep.subr.bf16.mxu1 %v1329_v5  ;;  %v1339_v12 = vld [vmem:[%s2032_s1 + $0x34] ss:$8 sps:$4 sm:$0xff]   ;;  %v1343_v14 = vld [vmem:[%s2032_s1 + $0x30] ss:$8 sps:$4 sm:$0xff]   ;;  %v1345_v16 = vld [vmem:[%s2032_s1 + $0x44] ss:$8 sps:$4 sm:$0xff]  }
   0x6   :  { %v1341_v13 = vld [vmem:[%s2032_s1 + $0x134] ss:$8 sps:$4 sm:$0xff]   ;;  %v1344_v15 = vld [vmem:[%s2032_s1 + $0x130] ss:$8 sps:$4 sm:$0xff]   ;;  %v1347_v17 = vld [vmem:[%s2032_s1 + $0x144] ss:$8 sps:$4 sm:$0xff]  }
   0x7   :  { %939 = vmatpush1.bf16.msra.mxu0 %v1331_v6  ;;  %v1349_v18 = vld [vmem:[%s2032_s1 + $0x40] ss:$8 sps:$4 sm:$0xff]   ;;  %v1351_v20 = vld [vmem:[%s2032_s1 + $0x54] ss:$8 sps:$4 sm:$0xff]   ;;  %v1355_v22 = vld [vmem:[%s2032_s1 + $0x50] ss:$8 sps:$4 sm:$0xff]  }
   0x8   :  { %980 = vmatpush1.bf16.msra.mxu1 %v1332_v7  ;;  %940 = vmatprep.subr.bf16.mxu0 %v1333_v8  ;;  %v1350_v19 = vld [vmem:[%s2032_s1 + $0x140] ss:$8 sps:$4 sm:$0xff]   ;;  %v1353_v21 = vld [vmem:[%s2032_s1 + $0x154] ss:$8 sps:$4 sm:$0xff]   ;;  %v1356_v23 = vld [vmem:[%s2032_s1 + $0x150] ss:$8 sps:$4 sm:$0xff]  }
   0x9   :  { %981 = vmatprep.subr.bf16.mxu1 %v1335_v9  ;;  %v1357_v24 = vld [vmem:[%s2032_s1 + $0x64] ss:$8 sps:$4 sm:$0xff]   ;;  %v1361_v26 = vld [vmem:[%s2032_s1 + $0x60] ss:$8 sps:$4 sm:$0xff]   ;;  %v1363_v28 = vld [vmem:[%s2032_s1 + $0x74] ss:$8 sps:$4 sm:$0xff]  }
   0xa   :  { %v1359_v25 = vld [vmem:[%s2032_s1 + $0x164] ss:$8 sps:$4 sm:$0xff]   ;;  %v1362_v27 = vld [vmem:[%s2032_s1 + $0x160] ss:$8 sps:$4 sm:$0xff]   ;;  %v1365_v29 = vld [vmem:[%s2032_s1 + $0x174] ss:$8 sps:$4 sm:$0xff]  }
   0xb   :  { %941 = vmatpush1.bf16.msra.mxu0 %v1337_v10  ;;  %v1367_v30 = vld [vmem:[%s2032_s1 + $0x70] ss:$8 sps:$4 sm:$0xff]   ;;  %v1369_v32 = vld [vmem:[%s2032_s1 + $0x84] ss:$8 sps:$4 sm:$0xff]   ;;  %v1373_v34 = vld [vmem:[%s2032_s1 + $0x80] ss:$8 sps:$4 sm:$0xff]  }
   0xc   :  { %982 = vmatpush1.bf16.msra.mxu1 %v1338_v11  ;;  %942 = vmatprep.subr.bf16.mxu0 %v1339_v12  ;;  %v1368_v31 = vld [vmem:[%s2032_s1 + $0x170] ss:$8 sps:$4 sm:$0xff]   ;;  %v1371_v33 = vld [vmem:[%s2032_s1 + $0x184] ss:$8 sps:$4 sm:$0xff]   ;;  %v1374_v35 = vld [vmem:[%s2032_s1 + $0x180] ss:$8 sps:$4 sm:$0xff]  }
   0xd   :  { %983 = vmatprep.subr.bf16.mxu1 %v1341_v13  ;;  %v1375_v36 = vld [vmem:[%s2032_s1 + $0x94] ss:$8 sps:$4 sm:$0xff]   ;;  %v1379_v38 = vld [vmem:[%s2032_s1 + $0x90] ss:$8 sps:$4 sm:$0xff]   ;;  %v1381_v40 = vld [vmem:[%s2032_s1 + $0xa4] ss:$8 sps:$4 sm:$0xff]  }
   0xe   :  { %v1377_v37 = vld [vmem:[%s2032_s1 + $0x194] ss:$8 sps:$4 sm:$0xff]   ;;  %v1380_v39 = vld [vmem:[%s2032_s1 + $0x190] ss:$8 sps:$4 sm:$0xff]   ;;  %v1383_v41 = vld [vmem:[%s2032_s1 + $0x1a4] ss:$8 sps:$4 sm:$0xff]  }
   0xf   :  { %943 = vmatpush1.bf16.msra.mxu0 %v1343_v14  ;;  %v1385_v42 = vld [vmem:[%s2032_s1 + $0xa0] ss:$8 sps:$4 sm:$0xff]   ;;  %v1387_v44 = vld [vmem:[%s2032_s1 + $0xb4] ss:$8 sps:$4 sm:$0xff]   ;;  %v1391_v49 = vld [vmem:[%s2032_s1 + $0xb0] ss:$8 sps:$4 sm:$0xff]  }
  0x10   :  { %984 = vmatpush1.bf16.msra.mxu1 %v1344_v15  ;;  %944 = vmatprep.subr.bf16.mxu0 %v1345_v16  ;;  %v1386_v43 = vld [vmem:[%s2032_s1 + $0x1a0] ss:$8 sps:$4 sm:$0xff]   ;;  %v1389_v45 = vld [vmem:[%s2032_s1 + $0x1b4] ss:$8 sps:$4 sm:$0xff]   ;;  %v1392_v50 = vld [vmem:[%s2032_s1 + $0x1b0] ss:$8 sps:$4 sm:$0xff]  }
  0x11   :  { %985 = vmatprep.subr.bf16.mxu1 %v1347_v17  ;;  %v35_v46 = vld [vmem:[%s2033_s0] sm:$0xff]  ;;  %v36_v48 = vld [vmem:[%s2033_s0 + $0x8] sm:$0xff]  ;;  %v1399_v56 = vld [vmem:[%s2032_s1 + $0xd4] ss:$8 sps:$4 sm:$0xff]  }
  0x12   :  { %v1166_v47 = vcombine.high %v35_v46, %v35_v46  ;;  %v1168_v51 = vcombine.high %v36_v48, %v36_v48  ;;  %v1393_v52 = vld [vmem:[%s2032_s1 + $0xc4] ss:$8 sps:$4 sm:$0xff]   ;;  %v1397_v54 = vld [vmem:[%s2032_s1 + $0xc0] ss:$8 sps:$4 sm:$0xff]   ;;  %v1401_v57 = vld [vmem:[%s2032_s1 + $0x1d4] ss:$8 sps:$4 sm:$0xff]   ;;  %v1165_v6 = vcombine.low %v35_v46, %v35_v46  ;;  %v1167_v7 = vcombine.low %v36_v48, %v36_v48 }
  0x13   :  { %945 = vmatpush1.bf16.msra.mxu0 %v1349_v18  ;;  %v1395_v53 = vld [vmem:[%s2032_s1 + $0x1c4] ss:$8 sps:$4 sm:$0xff]   ;;  %v1398_v55 = vld [vmem:[%s2032_s1 + $0x1c0] ss:$8 sps:$4 sm:$0xff]   ;;  %v1403_v58 = vld [vmem:[%s2032_s1 + $0xd0] ss:$8 sps:$4 sm:$0xff]  }
  0x14   :  { %986 = vmatpush1.bf16.msra.mxu1 %v1350_v19  ;;  %946 = vmatprep.subr.bf16.mxu0 %v1351_v20  ;;  %v1404_v59 = vld [vmem:[%s2032_s1 + $0x1d0] ss:$8 sps:$4 sm:$0xff]   ;;  %v1405_v60 = vld [vmem:[%s2032_s1 + $0xe4] ss:$8 sps:$4 sm:$0xff]   ;;  %v1409_v62 = vld [vmem:[%s2032_s1 + $0xe0] ss:$8 sps:$4 sm:$0xff]  }
  0x15   :  { %987 = vmatprep.subr.bf16.mxu1 %v1353_v21  ;;  %968 = vmatprep.mubr.bf16.mxu0 %v1166_v47  ;;  %v1407_v61 = vld [vmem:[%s2032_s1 + $0x1e4] ss:$8 sps:$4 sm:$0xff]   ;;  %v1410_v63 = vld [vmem:[%s2032_s1 + $0x1e0] ss:$8 sps:$4 sm:$0xff]   ;;  %v1411_v0 = vld [vmem:[%s2032_s1 + $0xf4] ss:$8 sps:$4 sm:$0xff]  }
  0x16   :  { %1009 = vmatprep.mubr.bf16.mxu1 %v1168_v51  ;;  %v1413_v1 = vld [vmem:[%s2032_s1 + $0x1f4] ss:$8 sps:$4 sm:$0xff]   ;;  %v1415_v2 = vld [vmem:[%s2032_s1 + $0xf0] ss:$8 sps:$4 sm:$0xff]   ;;  %v1423_v4 = vld [vmem:[%s2032_s1 + $0x204] ss:$8 sps:$4 sm:$0xff]  }
  0x17   :  { %947 = vmatpush1.bf16.msra.mxu0 %v1355_v22  ;;  %v1416_v3 = vld [vmem:[%s2032_s1 + $0x1f0] ss:$8 sps:$4 sm:$0xff]   ;;  %v1426_v5 = vld [vmem:[%s2032_s1 + $0x304] ss:$8 sps:$4 sm:$0xff]   ;;  %v1421_v8 = vld [vmem:[%s2032_s1 + $0x200] ss:$8 sps:$4 sm:$0xff]  }
  0x18   :  { %988 = vmatpush1.bf16.msra.mxu1 %v1356_v23  ;;  %948 = vmatprep.subr.bf16.mxu0 %v1357_v24  ;;  %v1424_v9 = vld [vmem:[%s2032_s1 + $0x300] ss:$8 sps:$4 sm:$0xff]   ;;  %v1429_v10 = vld [vmem:[%s2032_s1 + $0x214] ss:$8 sps:$4 sm:$0xff]   ;;  %v1427_v12 = vld [vmem:[%s2032_s1 + $0x210] ss:$8 sps:$4 sm:$0xff]  }
  0x19   :  { %989 = vmatprep.subr.bf16.mxu1 %v1359_v25  ;;  %v1432_v11 = vld [vmem:[%s2032_s1 + $0x314] ss:$8 sps:$4 sm:$0xff]   ;;  %v1430_v13 = vld [vmem:[%s2032_s1 + $0x310] ss:$8 sps:$4 sm:$0xff]   ;;  %v1435_v14 = vld [vmem:[%s2032_s1 + $0x224] ss:$8 sps:$4 sm:$0xff]  }
  0x1a   :  { %v1438_v15 = vld [vmem:[%s2032_s1 + $0x324] ss:$8 sps:$4 sm:$0xff]   ;;  %v1433_v16 = vld [vmem:[%s2032_s1 + $0x220] ss:$8 sps:$4 sm:$0xff]   ;;  %v1441_v18 = vld [vmem:[%s2032_s1 + $0x234] ss:$8 sps:$4 sm:$0xff]  }
  0x1b   :  { %949 = vmatpush1.bf16.msra.mxu0 %v1361_v26  ;;  %v1436_v17 = vld [vmem:[%s2032_s1 + $0x320] ss:$8 sps:$4 sm:$0xff]   ;;  %v1444_v19 = vld [vmem:[%s2032_s1 + $0x334] ss:$8 sps:$4 sm:$0xff]   ;;  %v1439_v20 = vld [vmem:[%s2032_s1 + $0x230] ss:$8 sps:$4 sm:$0xff]  }
  0x1c   :  { %990 = vmatpush1.bf16.msra.mxu1 %v1362_v27  ;;  %950 = vmatprep.subr.bf16.mxu0 %v1363_v28  ;;  %v1442_v21 = vld [vmem:[%s2032_s1 + $0x330] ss:$8 sps:$4 sm:$0xff]   ;;  %v1447_v22 = vld [vmem:[%s2032_s1 + $0x244] ss:$8 sps:$4 sm:$0xff]   ;;  %v1445_v24 = vld [vmem:[%s2032_s1 + $0x240] ss:$8 sps:$4 sm:$0xff]  }
  0x1d   :  { %991 = vmatprep.subr.bf16.mxu1 %v1365_v29  ;;  %v1450_v23 = vld [vmem:[%s2032_s1 + $0x344] ss:$8 sps:$4 sm:$0xff]   ;;  %v1448_v25 = vld [vmem:[%s2032_s1 + $0x340] ss:$8 sps:$4 sm:$0xff]   ;;  %v1453_v26 = vld [vmem:[%s2032_s1 + $0x254] ss:$8 sps:$4 sm:$0xff]  }
  0x1e   :  { %v1456_v27 = vld [vmem:[%s2032_s1 + $0x354] ss:$8 sps:$4 sm:$0xff]   ;;  %v1451_v28 = vld [vmem:[%s2032_s1 + $0x250] ss:$8 sps:$4 sm:$0xff]   ;;  %v1486_v51 = vld [vmem:[%s2032_s1 + $0x3a4] ss:$8 sps:$4 sm:$0xff]  }
  0x1f   :  { %951 = vmatpush1.bf16.msra.mxu0 %v1367_v30  ;;  %v1454_v29 = vld [vmem:[%s2032_s1 + $0x350] ss:$8 sps:$4 sm:$0xff]   ;;  %v1459_v30 = vld [vmem:[%s2032_s1 + $0x264] ss:$8 sps:$4 sm:$0xff]   ;;  %v1477_v46 = vld [vmem:[%s2032_s1 + $0x294] ss:$8 sps:$4 sm:$0xff]  }
  0x20   :  { %992 = vmatpush1.bf16.msra.mxu1 %v1368_v31  ;;  %952 = vmatprep.subr.bf16.mxu0 %v1369_v32  ;;  %v1462_v31 = vld [vmem:[%s2032_s1 + $0x364] ss:$8 sps:$4 sm:$0xff]   ;;  %v1846_v32 = vld [vmem:[%s2033_s0 + $0x10] sm:$0xff] }
  0x21   :  { %993 = vmatprep.subr.bf16.mxu1 %v1371_v33  ;;  %v1457_v33 = vld [vmem:[%s2032_s1 + $0x260] ss:$8 sps:$4 sm:$0xff]   ;;  %v1480_v47 = vld [vmem:[%s2032_s1 + $0x394] ss:$8 sps:$4 sm:$0xff]   ;;  %v1475_v48 = vld [vmem:[%s2032_s1 + $0x290] ss:$8 sps:$4 sm:$0xff]  }
  0x23   :  { %953 = vmatpush1.bf16.msra.mxu0 %v1373_v34  ;;  %v1460_v34 = vld [vmem:[%s2032_s1 + $0x360] ss:$8 sps:$4 sm:$0xff]  }
  0x24   :  { %994 = vmatpush1.bf16.msra.mxu1 %v1374_v35  ;;  %954 = vmatprep.subr.bf16.mxu0 %v1375_v36  ;;  %v1170_v35 = vcombine.high %v1846_v32, %v1846_v32  ;;  %v1859_v36 = vld [vmem:[%s2033_s0 + $0x18] sm:$0xff] }
  0x25   :  { %995 = vmatprep.subr.bf16.mxu1 %v1377_v37  ;;  %v1465_v37 = vld [vmem:[%s2032_s1 + $0x274] ss:$8 sps:$4 sm:$0xff]  }
  0x27   :  { %955 = vmatpush1.bf16.msra.mxu0 %v1379_v38  ;;  %v1172_v38 = vcombine.high %v1859_v36, %v1859_v36 }
  0x28   :  { %996 = vmatpush1.bf16.msra.mxu1 %v1380_v39  ;;  %956 = vmatprep.subr.bf16.mxu0 %v1381_v40  ;;  %v1468_v39 = vld [vmem:[%s2032_s1 + $0x374] ss:$8 sps:$4 sm:$0xff]   ;;  %v1463_v40 = vld [vmem:[%s2032_s1 + $0x270] ss:$8 sps:$4 sm:$0xff]  }
  0x29   :  { %997 = vmatprep.subr.bf16.mxu1 %v1383_v41  ;;  %v1466_v41 = vld [vmem:[%s2032_s1 + $0x370] ss:$8 sps:$4 sm:$0xff]  }
  0x2b   :  { %957 = vmatpush1.bf16.msra.mxu0 %v1385_v42  ;;  %v1471_v42 = vld [vmem:[%s2032_s1 + $0x284] ss:$8 sps:$4 sm:$0xff]  }
  0x2c   :  { %998 = vmatpush1.bf16.msra.mxu1 %v1386_v43  ;;  %958 = vmatprep.subr.bf16.mxu0 %v1387_v44  ;;  %v1474_v43 = vld [vmem:[%s2032_s1 + $0x384] ss:$8 sps:$4 sm:$0xff]   ;;  %v1469_v44 = vld [vmem:[%s2032_s1 + $0x280] ss:$8 sps:$4 sm:$0xff]  }
  0x2d   :  { %999 = vmatprep.subr.bf16.mxu1 %v1389_v45  ;;  %v1472_v45 = vld [vmem:[%s2032_s1 + $0x380] ss:$8 sps:$4 sm:$0xff]  }
  0x2f   :  { %959 = vmatpush1.bf16.msra.mxu0 %v1391_v49  ;;  %v1478_v49 = vld [vmem:[%s2032_s1 + $0x390] ss:$8 sps:$4 sm:$0xff]  }
  0x30   :  { %1000 = vmatpush1.bf16.msra.mxu1 %v1392_v50  ;;  %960 = vmatprep.subr.bf16.mxu0 %v1393_v52  ;;  %v1483_v50 = vld [vmem:[%s2032_s1 + $0x2a4] ss:$8 sps:$4 sm:$0xff]   ;;  %v1481_v52 = vld [vmem:[%s2032_s1 + $0x2a0] ss:$8 sps:$4 sm:$0xff]  }
  0x31   :  { %1001 = vmatprep.subr.bf16.mxu1 %v1395_v53  ;;  %v1484_v53 = vld [vmem:[%s2032_s1 + $0x3a0] ss:$8 sps:$4 sm:$0xff]  }
  0x33   :  { %961 = vmatpush1.bf16.msra.mxu0 %v1397_v54  ;;  %v1489_v54 = vld [vmem:[%s2032_s1 + $0x2b4] ss:$8 sps:$4 sm:$0xff]  }
  0x34   :  { %1002 = vmatpush1.bf16.msra.mxu1 %v1398_v55  ;;  %962 = vmatprep.subr.bf16.mxu0 %v1399_v56  ;;  %v1492_v55 = vld [vmem:[%s2032_s1 + $0x3b4] ss:$8 sps:$4 sm:$0xff]   ;;  %v1487_v56 = vld [vmem:[%s2032_s1 + $0x2b0] ss:$8 sps:$4 sm:$0xff]  }
  0x35   :  { %1003 = vmatprep.subr.bf16.mxu1 %v1401_v57  ;;  %v1490_v57 = vld [vmem:[%s2032_s1 + $0x3b0] ss:$8 sps:$4 sm:$0xff]  }
  0x37   :  { %963 = vmatpush1.bf16.msra.mxu0 %v1403_v58  ;;  %v1495_v58 = vld [vmem:[%s2032_s1 + $0x2c4] ss:$8 sps:$4 sm:$0xff]  }
  0x38   :  { %1004 = vmatpush1.bf16.msra.mxu1 %v1404_v59  ;;  %964 = vmatprep.subr.bf16.mxu0 %v1405_v60  ;;  %v1498_v59 = vld [vmem:[%s2032_s1 + $0x3c4] ss:$8 sps:$4 sm:$0xff]   ;;  %v1493_v60 = vld [vmem:[%s2032_s1 + $0x2c0] ss:$8 sps:$4 sm:$0xff]  }
  0x39   :  { %1005 = vmatprep.subr.bf16.mxu1 %v1407_v61  ;;  %v1496_v61 = vld [vmem:[%s2032_s1 + $0x3c0] ss:$8 sps:$4 sm:$0xff]  }
  0x3b   :  { %965 = vmatpush1.bf16.msra.mxu0 %v1409_v62  ;;  %v1501_v62 = vld [vmem:[%s2032_s1 + $0x2d4] ss:$8 sps:$4 sm:$0xff]  }
  0x3c   :  { %1006 = vmatpush1.bf16.msra.mxu1 %v1410_v63  ;;  %966 = vmatprep.subr.bf16.mxu0 %v1411_v0  ;;  %v1504_v63 = vld [vmem:[%s2032_s1 + $0x3d4] ss:$8 sps:$4 sm:$0xff]   ;;  %v1499_v0 = vld [vmem:[%s2032_s1 + $0x2d0] ss:$8 sps:$4 sm:$0xff]  }
  0x3d   :  { %1007 = vmatprep.subr.bf16.mxu1 %v1413_v1  ;;  %v1502_v1 = vld [vmem:[%s2032_s1 + $0x3d0] ss:$8 sps:$4 sm:$0xff]  }
  0x3f   :  { %967 = vmatpush1.bf16.msra.mxu0 %v1415_v2  ;;  %v1507_v2 = vld [vmem:[%s2032_s1 + $0x2e4] ss:$8 sps:$4 sm:$0xff]  }
  0x40   :  { %1008 = vmatpush1.bf16.msra.mxu1 %v1416_v3  ;;  %1018 = vmatprep.subr.bf16.mxu0 %v1423_v4  ;;  %v1510_v3 = vld [vmem:[%s2032_s1 + $0x3e4] ss:$8 sps:$4 sm:$0xff]   ;;  %v1505_v4 = vld [vmem:[%s2032_s1 + $0x2e0] ss:$8 sps:$4 sm:$0xff]  }
  0x41   :  { %1059 = vmatprep.subr.bf16.mxu1 %v1426_v5  ;;  %v1508_v5 = vld [vmem:[%s2032_s1 + $0x3e0] ss:$8 sps:$4 sm:$0xff]  }
  0x42   :  { %969 = vmatmul.mubr.bf16.vlgmr.msra.gmra.mrb[0].mxu0 %v1165_v6  ;;  %v1513_v6 = vld [vmem:[%s2032_s1 + $0x2f4] ss:$8 sps:$4 sm:$0xff]  }
  0x43   :  { %1010 = vmatmul.mubr.bf16.vlgmr.msra.gmra.mrb[0].mxu1 %v1167_v7  ;;  %1019 = vmatpush1.bf16.msra.mxu0 %v1421_v8  ;;  %v1516_v7 = vld [vmem:[%s2032_s1 + $0x3f4] ss:$8 sps:$4 sm:$0xff]   ;;  %v1511_v8 = vld [vmem:[%s2032_s1 + $0x2f0] ss:$8 sps:$4 sm:$0xff]  }
  0x44   :  { %1060 = vmatpush1.bf16.msra.mxu1 %v1424_v9  ;;  %1020 = vmatprep.subr.bf16.mxu0 %v1429_v10  ;;  %v1514_v9 = vld [vmem:[%s2032_s1 + $0x3f0] ss:$8 sps:$4 sm:$0xff]   ;;  %v1521_v10 = vld [vmem:[%s2032_s1 + $0x404] ss:$8 sps:$4 sm:$0xff]  }
  0x45   :  { %1061 = vmatprep.subr.bf16.mxu1 %v1432_v11  ;;  %1050 = vmatprep.mubr.bf16.mxu0 %v1170_v35  ;;  %v1169_v11 = vcombine.low %v1846_v32, %v1846_v32 }
  0x46   :  { %1091 = vmatprep.mubr.bf16.mxu1 %v1172_v38 }
  0x47   :  { %1021 = vmatpush1.bf16.msra.mxu0 %v1427_v12  ;;  %v1171_v12 = vcombine.low %v1859_v36, %v1859_v36 }
  0x48   :  { %1062 = vmatpush1.bf16.msra.mxu1 %v1430_v13  ;;  %1022 = vmatprep.subr.bf16.mxu0 %v1435_v14  ;;  %v1519_v13 = vld [vmem:[%s2032_s1 + $0x400] ss:$8 sps:$4 sm:$0xff]   ;;  %v1526_v14 = vld [vmem:[%s2032_s1 + $0x414] ss:$8 sps:$4 sm:$0xff]  }
  0x49   :  { %1063 = vmatprep.subr.bf16.mxu1 %v1438_v15  ;;  %v1524_v15 = vld [vmem:[%s2032_s1 + $0x410] ss:$8 sps:$4 sm:$0xff]  }
  0x4b   :  { %1023 = vmatpush1.bf16.msra.mxu0 %v1433_v16  ;;  %v1546_v16 = vmov 0  }
  0x4c   :  { %1064 = vmatpush1.bf16.msra.mxu1 %v1436_v17  ;;  %1024 = vmatprep.subr.bf16.mxu0 %v1441_v18  ;;  %v1529_v17 = vld [vmem:[%s2032_s1 + $0x424] ss:$8 sps:$4 sm:$0xff]   ;;  %v1527_v18 = vld [vmem:[%s2032_s1 + $0x420] ss:$8 sps:$4 sm:$0xff]  }
  0x4d   :  { %1065 = vmatprep.subr.bf16.mxu1 %v1444_v19  ;;  %v1532_v19 = vld [vmem:[%s2032_s1 + $0x434] ss:$8 sps:$4 sm:$0xff]  }
  0x4f   :  { %1025 = vmatpush1.bf16.msra.mxu0 %v1439_v20  ;;  %v1530_v20 = vld [vmem:[%s2032_s1 + $0x430] ss:$8 sps:$4 sm:$0xff]  }
  0x50   :  { %1066 = vmatpush1.bf16.msra.mxu1 %v1442_v21  ;;  %1026 = vmatprep.subr.bf16.mxu0 %v1447_v22  ;;  %v1535_v21 = vld [vmem:[%s2032_s1 + $0x444] ss:$8 sps:$4 sm:$0xff]   ;;  %v1533_v22 = vld [vmem:[%s2032_s1 + $0x440] ss:$8 sps:$4 sm:$0xff]  }
  0x51   :  { %1067 = vmatprep.subr.bf16.mxu1 %v1450_v23  ;;  %v1538_v23 = vld [vmem:[%s2032_s1 + $0x454] ss:$8 sps:$4 sm:$0xff]  }
  0x53   :  { %1027 = vmatpush1.bf16.msra.mxu0 %v1445_v24  ;;  %v1536_v24 = vld [vmem:[%s2032_s1 + $0x450] ss:$8 sps:$4 sm:$0xff]  }
  0x54   :  { %1068 = vmatpush1.bf16.msra.mxu1 %v1448_v25  ;;  %1028 = vmatprep.subr.bf16.mxu0 %v1453_v26  ;;  %v1541_v25 = vld [vmem:[%s2032_s1 + $0x464] ss:$8 sps:$4 sm:$0xff]   ;;  %v1539_v26 = vld [vmem:[%s2032_s1 + $0x460] ss:$8 sps:$4 sm:$0xff]  }
  0x55   :  { %1069 = vmatprep.subr.bf16.mxu1 %v1456_v27  ;;  %v1544_v27 = vld [vmem:[%s2032_s1 + $0x474] ss:$8 sps:$4 sm:$0xff]  }
  0x57   :  { %1029 = vmatpush1.bf16.msra.mxu0 %v1451_v28  ;;  %v1542_v28 = vld [vmem:[%s2032_s1 + $0x470] ss:$8 sps:$4 sm:$0xff]  }
  0x58   :  { %1070 = vmatpush1.bf16.msra.mxu1 %v1454_v29  ;;  %1030 = vmatprep.subr.bf16.mxu0 %v1459_v30  ;;  %v1545_v29 = vld [vmem:[%s2033_s0 + $0x20] ss:$0 sps:$4 sm:$0xff]  }
  0x59   :  { %1071 = vmatprep.subr.bf16.mxu1 %v1462_v31 }
  0x5b   :  { %1031 = vmatpush1.bf16.msra.mxu0 %v1457_v33 }
  0x5c   :  { %1072 = vmatpush1.bf16.msra.mxu1 %v1460_v34  ;;  %1032 = vmatprep.subr.bf16.mxu0 %v1465_v37 }
  0x5d   :  { %1073 = vmatprep.subr.bf16.mxu1 %v1468_v39 }
  0x5f   :  { %1033 = vmatpush1.bf16.msra.mxu0 %v1463_v40 }
  0x60   :  { %1074 = vmatpush1.bf16.msra.mxu1 %v1466_v41  ;;  %1034 = vmatprep.subr.bf16.mxu0 %v1471_v42 }
  0x61   :  { %1075 = vmatprep.subr.bf16.mxu1 %v1474_v43 }
  0x63   :  { %1035 = vmatpush1.bf16.msra.mxu0 %v1469_v44 }
  0x64   :  { %1076 = vmatpush1.bf16.msra.mxu1 %v1472_v45  ;;  %1036 = vmatprep.subr.bf16.mxu0 %v1477_v46 }
  0x65   :  { %1077 = vmatprep.subr.bf16.mxu1 %v1480_v47 }
  0x67   :  { %1037 = vmatpush1.bf16.msra.mxu0 %v1475_v48 }
  0x68   :  { %1078 = vmatpush1.bf16.msra.mxu1 %v1478_v49  ;;  %1038 = vmatprep.subr.bf16.mxu0 %v1483_v50 }
  0x69   :  { %1079 = vmatprep.subr.bf16.mxu1 %v1486_v51 }
  0x6b   :  { %1039 = vmatpush1.bf16.msra.mxu0 %v1481_v52  ;;  %v21_v52 = vlaneseq }
  0x6c   :  { %1080 = vmatpush1.bf16.msra.mxu1 %v1484_v53  ;;  %1040 = vmatprep.subr.bf16.mxu0 %v1489_v54 }
  0x6d   :  { %1081 = vmatprep.subr.bf16.mxu1 %v1492_v55  ;;  %v22_v53 = vshrl.u32 %v21_v52, 7  ;;  %v19_v55 = vld [vmem:[%s2034_s2] sm:$0x3] }
  0x6f   :  { %1041 = vmatpush1.bf16.msra.mxu0 %v1487_v56  ;;  %v23_v54 = vsub.s32 0, %v22_v53  ;;  %v27_v56 = vsub.s32 1, %v22_v53 }
  0x70   :  { %1082 = vmatpush1.bf16.msra.mxu1 %v1490_v57  ;;  %1042 = vmatprep.subr.bf16.mxu0 %v1495_v58 }
  0x71   :  { %1083 = vmatprep.subr.bf16.mxu1 %v1498_v59  ;;  %v24_v57 = vrot.slane %v19_v55, %v23_v54  ;;  %v28_v59 = vrot.slane %v19_v55, %v27_v56 }
  0x73   :  { %1043 = vmatpush1.bf16.msra.mxu0 %v1493_v60 }
  0x74   :  { %1084 = vmatpush1.bf16.msra.mxu1 %v1496_v61  ;;  %1044 = vmatprep.subr.bf16.mxu0 %v1501_v62 }
  0x75   :  { %1085 = vmatprep.subr.bf16.mxu1 %v1504_v63 }
  0x77   :  { %1045 = vmatpush1.bf16.msra.mxu0 %v1499_v0 }
  0x78   :  { %1086 = vmatpush1.bf16.msra.mxu1 %v1502_v1  ;;  %1046 = vmatprep.subr.bf16.mxu0 %v1507_v2 }
  0x79   :  { %1087 = vmatprep.subr.bf16.mxu1 %v1510_v3 }
  0x7b   :  { %1047 = vmatpush1.bf16.msra.mxu0 %v1505_v4 }
  0x7c   :  { %1088 = vmatpush1.bf16.msra.mxu1 %v1508_v5  ;;  %1048 = vmatprep.subr.bf16.mxu0 %v1513_v6 }
  0x7d   :  { %1089 = vmatprep.subr.bf16.mxu1 %v1516_v7 }
  0x7f   :  { %1049 = vmatpush1.bf16.msra.mxu0 %v1511_v8 }
  0x80   :  { %1090 = vmatpush1.bf16.msra.mxu1 %v1514_v9  ;;  %1100 = vmatprep.subr.bf16.mxu0 %v1521_v10 }
  0x82   :  { %1051 = vmatmul.mubr.bf16.vlgmr.msra.gmra.mrb[4].mxu0 %v1169_v11 }
  0x83   :  { %1092 = vmatmul.mubr.bf16.vlgmr.msra.gmra.mrb[4].mxu1 %v1171_v12  ;;  %1101 = vmatpush1.bf16.msra.mxu0 %v1519_v13 }
  0x84   :  { %1132 = vmatprep.mubr.bf16.mxu0 %v1546_v16  ;;  %1102 = vmatprep.subr.bf16.mxu0 %v1526_v14 }
  0x87   :  { %1103 = vmatpush1.bf16.msra.mxu0 %v1524_v15 }
  0x88   :  { %1104 = vmatprep.subr.bf16.mxu0 %v1529_v17 }
  0x8b   :  { %1105 = vmatpush1.bf16.msra.mxu0 %v1527_v18 }
  0x8c   :  { %1106 = vmatprep.subr.bf16.mxu0 %v1532_v19 }
  0x8f   :  { %1107 = vmatpush1.bf16.msra.mxu0 %v1530_v20 }
  0x90   :  { %1108 = vmatprep.subr.bf16.mxu0 %v1535_v21 }
  0x93   :  { %1109 = vmatpush1.bf16.msra.mxu0 %v1533_v22 }
  0x94   :  { %1110 = vmatprep.subr.bf16.mxu0 %v1538_v23 }
  0x97   :  { %1111 = vmatpush1.bf16.msra.mxu0 %v1536_v24 }
  0x98   :  { %1112 = vmatprep.subr.bf16.mxu0 %v1541_v25 }
  0x9b   :  { %1113 = vmatpush1.bf16.msra.mxu0 %v1539_v26 }
  0x9c   :  { %1114 = vmatprep.subr.bf16.mxu0 %v1544_v27 }
  0x9f   :  { %1115 = vmatpush1.bf16.msra.mxu0 %v1542_v28 }
  0xa2   :  { %1133 = vmatmul.mubr.bf16.vlgmr.msra.gmra.mrb[8].mxu0 %v1545_v29 }
 0x115   :  { %v970_v30 = vpop.f32.mrb[0].mxu0 }
 0x116   :  { %v1011_v31 = vpop.f32.mrb[0].mxu1  ;;  %v972_v33 = vpop.f32.mrb[1].mxu0 }
 0x117   :  { %v1012_v32 = vadd.f32 %v1011_v31, %v970_v30  ;;  %v1013_v34 = vpop.f32.mrb[1].mxu1  ;;  %v974_v36 = vpop.f32.mrb[2].mxu0 }
 0x118   :  { %v1014_v35 = vadd.f32 %v1013_v34, %v972_v33  ;;  %v1015_v37 = vpop.f32.mrb[2].mxu1  ;;  %v975_v38 = vpop.f32.mrb[3].mxu0 }
 0x119   :  { %v1016_v39 = vpop.f32.mrb[3].mxu1 }
 0x155   :  { %v1052_v40 = vpop.f32.mrb[4].mxu0 }
 0x156   :  { %v1093_v41 = vpop.f32.mrb[4].mxu1  ;;  %v1053_v42 = vadd.f32 %v1052_v40, %v1012_v32  ;;  %v1054_v43 = vpop.f32.mrb[5].mxu0 }
 0x157   :  { %v1095_v44 = vpop.f32.mrb[5].mxu1  ;;  %v1055_v45 = vadd.f32 %v1054_v43, %v1014_v35  ;;  %v1056_v46 = vpop.f32.mrb[6].mxu0 }
 0x158   :  { %v1097_v47 = vpop.f32.mrb[6].mxu1  ;;  %v1094_v48 = vadd.f32 %v1093_v41, %v1053_v42  ;;  %v1057_v49 = vpop.f32.mrb[7].mxu0 }
 0x159   :  { %v1098_v50 = vpop.f32.mrb[7].mxu1  ;;  %v1096_v51 = vadd.f32 %v1095_v44, %v1055_v45 }
 0x175   :  { %v1134_v58 = vpop.f32.mrb[8].mxu0 }
 0x176   :  { %v1135_v60 = vadd.f32 %v1134_v58, %v1094_v48  ;;  %v1136_v61 = vpop.f32.mrb[9].mxu0 }
 0x177   :  { %v1137_v62 = vadd.f32 %v1136_v61, %v1096_v51  ;;  %v1138_v63 = vpop.f32.mrb[10].mxu0 }
 0x178   :  { %v1141_v0 = vadd.f32 %v1135_v60, %v24_v57  ;;  %v1139_v1 = vpop.f32.mrb[11].mxu0 }
 0x179   :  { %v1142_v2 = vadd.f32 %v1137_v62, %v28_v59 }
 0x17a   :  { %v1150_v3 = vmax.f32 %v1141_v0, 0.0 }
 0x17b   :  { %v1151_v4 = vmax.f32 %v1142_v2, 0.0 }
 0x17d   :  { %v1319_v5 = vpack.c.bf16 %v1151_v4, %v1150_v3 }
 0x17f   :  { %1160 = vst [vmem:[%s2035_s3] sm:$0xff] %v1319_v5 }

// kernel: resnet18_forward.14
= control target key start
LH: loop header
LB: loop body
LE: loop exit
PB: predicated region body
PF: predicated region fallthrough
CT: control target
= control target key end

     0   :  { %s2324_s18 = smov 0   ;;  %s2326_s19 = smov 0   ;;  %s2585_s0 = inlined_call_operand.vmem [shape: bf16[8,2304], index: 0, kind: input, shape index: {}]   ;;  %s2586_s1 = inlined_call_operand.vmem [shape: bf16[2304,256], index: 1, kind: input, shape index: {}]   ;;  %s2587_s2 = inlined_call_operand.vmem [shape: f32[1,256], index: 2, kind: input, shape index: {}]   ;;  %s2588_s3 = inlined_call_operand.vmem [shape: bf16[8,128], index: 3, kind: input, shape index: {}]   ;;  %s2589_s4 = inlined_call_operand.vmem [shape: bf16[128,256], index: 4, kind: input, shape index: {}]   ;;  %s2590_s5 = inlined_call_operand.vmem [shape: bf16[8,256], index: 5, kind: output, shape index: {}]  }
   0x1   :  { %s2328_s20 = smov 0  }
   0x2 LB: > { %s27_s21 = sadd.s32 1, %s2286_s19  ;;  %p1811_p0 = scmp.ge.s32.totalorder %s2290_s20, 1  ;;  %s2290_s20 = sphi %s2328_s20, %s15_s20   ;;  %s2286_s19 = sphi %s2326_s19, %s2592_s19   ;;  %s2282_s18 = sphi %s2324_s18, %s2591_s18  }
   0x3   : > { %p28_p1 = scmp.ge.s32.totalorder %s27_s21, 2  ;;  %p264_p2 = scmp.lt.s32.totalorder %s2290_s20, 3 }
   0x5   : > { %s2594_s21 = smov (%p28_p1, %s27_s21), 0  ;;  %p265_p3 = pnand %p1811_p0, %p264_p2 }
   0x6   : > { %s323_s22 = smul.u32 (!%p265_p3), 9, %s2282_s18  ;;  %p1815_p6 = scmp.ne.s32.totalorder (!%p265_p3), %s2282_s18, 0 }
   0x7   : > { %268 = sbr.rel (%p265_p3) target bundleno = 655 (0x28f), region = 40 }
   0x8   : > { %s333_s23 = smul.u32 (!%p265_p3), 144, %s2282_s18  ;;  %p326_p4 = scmp.lt.s32.totalorder (!%p265_p3), %s323_s22, 17 }
   0xa   : > { %p335_p5 = scmp.lt.s32.totalorder (!%p265_p3), %s333_s23, 287 }
   0xe   : > { %s2596_s22 = smov (!%p326_p4, %s323_s22), 17  ;;  %s2598_s23 = smov (!%p335_p5, %s333_s23), 287 }
   0xf   : > { %s1812_s24 = sshll.u32 %s2596_s22, 2  ;;  %s1991_s28 = sshll.u32 %s2598_s23, 3  ;;  %v2019_v0 = vld [vmem:[%s2589_s4 + $0x4] ss:$8 sps:$4 sm:$0xff] (!%p1815_p6)   ;;  %v2021_v1 = vld [vmem:[%s2589_s4] ss:$8 sps:$4 sm:$0xff] (!%p1815_p6)   ;;  %v377_v18 = vlaneseq (!%p1815_p6) }
  0x10   : > { %s2349_s27 = scalar_lea.vmem %s2585_s0, %s1812_s24  ;;  %s2354_s6 = scalar_lea.vmem %s2586_s1, %s1991_s28  ;;  %v2292_v2 = vmov (!%p1815_p6), 0   ;;  %484 = vmatprep.subr.bf16.mxu0 (!%p1815_p6), %v2019_v0  ;;  %v2022_v3 = vld [vmem:[%s2589_s4 + $0x14] ss:$8 sps:$4 sm:$0xff] (!%p1815_p6)   ;;  %v2024_v4 = vld [vmem:[%s2589_s4 + $0x10] ss:$8 sps:$4 sm:$0xff] (!%p1815_p6)  }
  0x11   : > { %374 = sbr.rel (%p1815_p6) target bundleno = 264 (0x108), region = 44  ;;  %516 = vmatprep.mubr.bf16.mxu0 (!%p1815_p6), %v2292_v2  ;;  %485 = vmatpush1.bf16.msra.mxu0 (!%p1815_p6), %v2021_v1  ;;  %v2025_v5 = vld [vmem:[%s2589_s4 + $0x24] ss:$8 sps:$4 sm:$0xff] (!%p1815_p6)   ;;  %v2027_v6 = vld [vmem:[%s2589_s4 + $0x20] ss:$8 sps:$4 sm:$0xff] (!%p1815_p6)   ;;  %v378_v19 = vshrl.u32 (!%p1815_p6), %v377_v18, 7 }
  0x12   : > { %486 = vmatprep.subr.bf16.mxu0 (!%p1815_p6), %v2022_v3  ;;  %v2028_v7 = vld [vmem:[%s2589_s4 + $0x34] ss:$8 sps:$4 sm:$0xff] (!%p1815_p6)   ;;  %v2030_v8 = vld [vmem:[%s2589_s4 + $0x30] ss:$8 sps:$4 sm:$0xff] (!%p1815_p6)   ;;  %v2031_v9 = vld [vmem:[%s2589_s4 + $0x44] ss:$8 sps:$4 sm:$0xff] (!%p1815_p6)  }
  0x13   : > { %v2033_v10 = vld [vmem:[%s2589_s4 + $0x40] ss:$8 sps:$4 sm:$0xff] (!%p1815_p6)   ;;  %v2034_v11 = vld [vmem:[%s2589_s4 + $0x54] ss:$8 sps:$4 sm:$0xff] (!%p1815_p6)   ;;  %v2036_v12 = vld [vmem:[%s2589_s4 + $0x50] ss:$8 sps:$4 sm:$0xff] (!%p1815_p6)  }
  0x14   : > { %v2037_v13 = vld [vmem:[%s2589_s4 + $0x64] ss:$8 sps:$4 sm:$0xff] (!%p1815_p6)   ;;  %v2039_v14 = vld [vmem:[%s2589_s4 + $0x60] ss:$8 sps:$4 sm:$0xff] (!%p1815_p6)   ;;  %v2040_v15 = vld [vmem:[%s2589_s4 + $0x74] ss:$8 sps:$4 sm:$0xff] (!%p1815_p6)  }
  0x15   : > { %487 = vmatpush1.bf16.msra.mxu0 (!%p1815_p6), %v2024_v4  ;;  %v2042_v16 = vld [vmem:[%s2589_s4 + $0x70] ss:$8 sps:$4 sm:$0xff] (!%p1815_p6)   ;;  %v387_v17 = vld [vmem:[%s2588_s3] sm:$0xf] (!%p1815_p6)  ;;  %v379_v20 = vsub.s32 (!%p1815_p6), 0, %v378_v19  ;;  %v383_v22 = vsub.s32 (!%p1815_p6), 1, %v378_v19 }
  0x16   : > { %488 = vmatprep.subr.bf16.mxu0 (!%p1815_p6), %v2025_v5  ;;  %v375_v21 = vld [vmem:[%s2587_s2] sm:$0x3] (!%p1815_p6) }
  0x17   : > { %v380_v23 = vrot.slane (!%p1815_p6), %v375_v21, %v379_v20  ;;  %v384_v24 = vrot.slane (!%p1815_p6), %v375_v21, %v383_v22 }
  0x19   : > { %489 = vmatpush1.bf16.msra.mxu0 %v2027_v6 }
  0x1a   : > { %490 = vmatprep.subr.bf16.mxu0 %v2028_v7 }
  0x1d   : > { %491 = vmatpush1.bf16.msra.mxu0 %v2030_v8 }
  0x1e   : > { %492 = vmatprep.subr.bf16.mxu0 %v2031_v9 }
  0x21   : > { %493 = vmatpush1.bf16.msra.mxu0 %v2033_v10 }
  0x22   : > { %494 = vmatprep.subr.bf16.mxu0 %v2034_v11 }
  0x25   : > { %495 = vmatpush1.bf16.msra.mxu0 %v2036_v12 }
  0x26   : > { %496 = vmatprep.subr.bf16.mxu0 %v2037_v13 }
  0x29   : > { %497 = vmatpush1.bf16.msra.mxu0 %v2039_v14 }
  0x2a   : > { %498 = vmatprep.subr.bf16.mxu0 %v2040_v15 }
  0x2d   : > { %499 = vmatpush1.bf16.msra.mxu0 %v2042_v16 }
  0x30   : > { %517 = vmatmul.mubr.bf16.vlgmr.msra.gmra.mrb[0].mxu0 %v387_v17 }
 0x103   : > { %v518_v25 = vpop.f32.mrb[0].mxu0 }
 0x104   : > { %v525_v26 = vadd.f32 %v518_v25, %v380_v23  ;;  %v520_v27 = vpop.f32.mrb[1].mxu0 }
 0x105   : > { %v526_v28 = vadd.f32 %v520_v27, %v384_v24  ;;  %v522_v29 = vpop.f32.mrb[2].mxu0 }
 0x106   : > { %527 = vst [vmem:[#allocation2] sm:$0xff] %v525_v26  ;;  %v523_v30 = vpop.f32.mrb[3].mxu0 }
 0x107   : > { %528 = vst [vmem:[#allocation2 + $0x8] sm:$0xff] %v526_v28 }
 0x108 PF: > { %v2043_v31 = vld [vmem:[%s2354_s6 + $0x4] ss:$8 sps:$4 sm:$0xff]   ;;  %v2047_v33 = vld [vmem:[%s2354_s6] ss:$8 sps:$4 sm:$0xff]   ;;  %v2049_v35 = vld [vmem:[%s2354_s6 + $0x14] ss:$8 sps:$4 sm:$0xff]  }
 0x109   : > { %v2045_v32 = vld [vmem:[%s2354_s6 + $0x104] ss:$8 sps:$4 sm:$0xff]   ;;  %1432 = vmatprep.subr.bf16.mxu0 %v2043_v31  ;;  %v2048_v34 = vld [vmem:[%s2354_s6 + $0x100] ss:$8 sps:$4 sm:$0xff]   ;;  %v2051_v36 = vld [vmem:[%s2354_s6 + $0x114] ss:$8 sps:$4 sm:$0xff]  }
 0x10a   : > { %1473 = vmatprep.subr.bf16.mxu1 %v2045_v32  ;;  %1433 = vmatpush1.bf16.msra.mxu0 %v2047_v33  ;;  %v2053_v37 = vld [vmem:[%s2354_s6 + $0x10] ss:$8 sps:$4 sm:$0xff]   ;;  %v2055_v39 = vld [vmem:[%s2354_s6 + $0x24] ss:$8 sps:$4 sm:$0xff]   ;;  %v2059_v41 = vld [vmem:[%s2354_s6 + $0x20] ss:$8 sps:$4 sm:$0xff]  }
 0x10b   : > { %1474 = vmatpush1.bf16.msra.mxu1 %v2048_v34  ;;  %1434 = vmatprep.subr.bf16.mxu0 %v2049_v35  ;;  %v2054_v38 = vld [vmem:[%s2354_s6 + $0x110] ss:$8 sps:$4 sm:$0xff]   ;;  %v2057_v40 = vld [vmem:[%s2354_s6 + $0x124] ss:$8 sps:$4 sm:$0xff]   ;;  %v2060_v42 = vld [vmem:[%s2354_s6 + $0x120] ss:$8 sps:$4 sm:$0xff]  }
 0x10c   : > { %1475 = vmatprep.subr.bf16.mxu1 %v2051_v36  ;;  %v2061_v43 = vld [vmem:[%s2354_s6 + $0x34] ss:$8 sps:$4 sm:$0xff]   ;;  %v2065_v45 = vld [vmem:[%s2354_s6 + $0x30] ss:$8 sps:$4 sm:$0xff]   ;;  %v2067_v47 = vld [vmem:[%s2354_s6 + $0x44] ss:$8 sps:$4 sm:$0xff]  }
 0x10d   : > { %v2063_v44 = vld [vmem:[%s2354_s6 + $0x134] ss:$8 sps:$4 sm:$0xff]   ;;  %v2066_v46 = vld [vmem:[%s2354_s6 + $0x130] ss:$8 sps:$4 sm:$0xff]   ;;  %v2069_v48 = vld [vmem:[%s2354_s6 + $0x144] ss:$8 sps:$4 sm:$0xff]  }
 0x10e   : > { %1435 = vmatpush1.bf16.msra.mxu0 %v2053_v37  ;;  %v2071_v49 = vld [vmem:[%s2354_s6 + $0x40] ss:$8 sps:$4 sm:$0xff]   ;;  %v2073_v51 = vld [vmem:[%s2354_s6 + $0x54] ss:$8 sps:$4 sm:$0xff]   ;;  %v2077_v53 = vld [vmem:[%s2354_s6 + $0x50] ss:$8 sps:$4 sm:$0xff]  }
 0x10f   : > { %1476 = vmatpush1.bf16.msra.mxu1 %v2054_v38  ;;  %1436 = vmatprep.subr.bf16.mxu0 %v2055_v39  ;;  %v2072_v50 = vld [vmem:[%s2354_s6 + $0x140] ss:$8 sps:$4 sm:$0xff]   ;;  %v2075_v52 = vld [vmem:[%s2354_s6 + $0x154] ss:$8 sps:$4 sm:$0xff]   ;;  %v2078_v54 = vld [vmem:[%s2354_s6 + $0x150] ss:$8 sps:$4 sm:$0xff]  }
 0x110   : > { %1477 = vmatprep.subr.bf16.mxu1 %v2057_v40  ;;  %v2079_v55 = vld [vmem:[%s2354_s6 + $0x64] ss:$8 sps:$4 sm:$0xff]   ;;  %v2083_v57 = vld [vmem:[%s2354_s6 + $0x60] ss:$8 sps:$4 sm:$0xff]   ;;  %v2085_v59 = vld [vmem:[%s2354_s6 + $0x74] ss:$8 sps:$4 sm:$0xff]  }
 0x111   : > { %v2081_v56 = vld [vmem:[%s2354_s6 + $0x164] ss:$8 sps:$4 sm:$0xff]   ;;  %v2084_v58 = vld [vmem:[%s2354_s6 + $0x160] ss:$8 sps:$4 sm:$0xff]   ;;  %v2087_v60 = vld [vmem:[%s2354_s6 + $0x174] ss:$8 sps:$4 sm:$0xff]  }
 0x112   : > { %1437 = vmatpush1.bf16.msra.mxu0 %v2059_v41  ;;  %v2089_v61 = vld [vmem:[%s2354_s6 + $0x70] ss:$8 sps:$4 sm:$0xff]   ;;  %v2091_v63 = vld [vmem:[%s2354_s6 + $0x84] ss:$8 sps:$4 sm:$0xff]   ;;  %v2095_v1 = vld [vmem:[%s2354_s6 + $0x80] ss:$8 sps:$4 sm:$0xff]  }
 0x113   : > { %1478 = vmatpush1.bf16.msra.mxu1 %v2060_v42  ;;  %1438 = vmatprep.subr.bf16.mxu0 %v2061_v43  ;;  %v2090_v62 = vld [vmem:[%s2354_s6 + $0x170] ss:$8 sps:$4 sm:$0xff]   ;;  %v2093_v0 = vld [vmem:[%s2354_s6 + $0x184] ss:$8 sps:$4 sm:$0xff]   ;;  %v2096_v2 = vld [vmem:[%s2354_s6 + $0x180] ss:$8 sps:$4 sm:$0xff]  }
 0x114   : > { %1479 = vmatprep.subr.bf16.mxu1 %v2063_v44  ;;  %v2097_v3 = vld [vmem:[%s2354_s6 + $0x94] ss:$8 sps:$4 sm:$0xff]   ;;  %v2101_v5 = vld [vmem:[%s2354_s6 + $0x90] ss:$8 sps:$4 sm:$0xff]   ;;  %v2103_v7 = vld [vmem:[%s2354_s6 + $0xa4] ss:$8 sps:$4 sm:$0xff]  }
 0x115   : > { %v2099_v4 = vld [vmem:[%s2354_s6 + $0x194] ss:$8 sps:$4 sm:$0xff]   ;;  %v2102_v6 = vld [vmem:[%s2354_s6 + $0x190] ss:$8 sps:$4 sm:$0xff]   ;;  %v2105_v8 = vld [vmem:[%s2354_s6 + $0x1a4] ss:$8 sps:$4 sm:$0xff]  }
 0x116   : > { %1439 = vmatpush1.bf16.msra.mxu0 %v2065_v45  ;;  %v2107_v9 = vld [vmem:[%s2354_s6 + $0xa0] ss:$8 sps:$4 sm:$0xff]   ;;  %v2109_v11 = vld [vmem:[%s2354_s6 + $0xb4] ss:$8 sps:$4 sm:$0xff]   ;;  %v2113_v16 = vld [vmem:[%s2354_s6 + $0xb0] ss:$8 sps:$4 sm:$0xff]  }
 0x117   : > { %1480 = vmatpush1.bf16.msra.mxu1 %v2066_v46  ;;  %1440 = vmatprep.subr.bf16.mxu0 %v2067_v47  ;;  %v2108_v10 = vld [vmem:[%s2354_s6 + $0x1a0] ss:$8 sps:$4 sm:$0xff]   ;;  %v2111_v12 = vld [vmem:[%s2354_s6 + $0x1b4] ss:$8 sps:$4 sm:$0xff]   ;;  %v2114_v17 = vld [vmem:[%s2354_s6 + $0x1b0] ss:$8 sps:$4 sm:$0xff]  }
 0x118   : > { %1481 = vmatprep.subr.bf16.mxu1 %v2069_v48  ;;  %v531_v13 = vld [vmem:[%s2349_s27] sm:$0xff]  ;;  %v532_v15 = vld [vmem:[%s2349_s27 + $0x8] sm:$0xff]  ;;  %v2121_v23 = vld [vmem:[%s2354_s6 + $0xd4] ss:$8 sps:$4 sm:$0xff]   ;;  %p1985_p7 = scmp.ne.s32.totalorder %s2282_s18, 1 }
 0x119   : > { %v1833_v14 = vcombine.high %v531_v13, %v531_v13  ;;  %v1835_v18 = vcombine.high %v532_v15, %v532_v15  ;;  %v2115_v19 = vld [vmem:[%s2354_s6 + $0xc4] ss:$8 sps:$4 sm:$0xff]   ;;  %v2119_v21 = vld [vmem:[%s2354_s6 + $0xc0] ss:$8 sps:$4 sm:$0xff]   ;;  %v2123_v24 = vld [vmem:[%s2354_s6 + $0x1d4] ss:$8 sps:$4 sm:$0xff]   ;;  %v1832_v37 = vcombine.low %v531_v13, %v531_v13  ;;  %v1834_v38 = vcombine.low %v532_v15, %v532_v15 }
 0x11a   : > { %1441 = vmatpush1.bf16.msra.mxu0 %v2071_v49  ;;  %v2117_v20 = vld [vmem:[%s2354_s6 + $0x1c4] ss:$8 sps:$4 sm:$0xff]   ;;  %v2120_v22 = vld [vmem:[%s2354_s6 + $0x1c0] ss:$8 sps:$4 sm:$0xff]   ;;  %v2125_v25 = vld [vmem:[%s2354_s6 + $0xd0] ss:$8 sps:$4 sm:$0xff]  }
 0x11b   : > { %1482 = vmatpush1.bf16.msra.mxu1 %v2072_v50  ;;  %1442 = vmatprep.subr.bf16.mxu0 %v2073_v51  ;;  %v2126_v26 = vld [vmem:[%s2354_s6 + $0x1d0] ss:$8 sps:$4 sm:$0xff]   ;;  %v2127_v27 = vld [vmem:[%s2354_s6 + $0xe4] ss:$8 sps:$4 sm:$0xff]   ;;  %v2131_v29 = vld [vmem:[%s2354_s6 + $0xe0] ss:$8 sps:$4 sm:$0xff]  }
 0x11c   : > { %1483 = vmatprep.subr.bf16.mxu1 %v2075_v52  ;;  %1464 = vmatprep.mubr.bf16.mxu0 %v1833_v14  ;;  %v2129_v28 = vld [vmem:[%s2354_s6 + $0x1e4] ss:$8 sps:$4 sm:$0xff]   ;;  %v2132_v30 = vld [vmem:[%s2354_s6 + $0x1e0] ss:$8 sps:$4 sm:$0xff]   ;;  %v2133_v31 = vld [vmem:[%s2354_s6 + $0xf4] ss:$8 sps:$4 sm:$0xff]  }
 0x11d   : > { %1505 = vmatprep.mubr.bf16.mxu1 %v1835_v18  ;;  %v2135_v32 = vld [vmem:[%s2354_s6 + $0x1f4] ss:$8 sps:$4 sm:$0xff]   ;;  %v2137_v33 = vld [vmem:[%s2354_s6 + $0xf0] ss:$8 sps:$4 sm:$0xff]   ;;  %v2145_v35 = vld [vmem:[%s2354_s6 + $0x204] ss:$8 sps:$4 sm:$0xff]  }
 0x11e   : > { %1443 = vmatpush1.bf16.msra.mxu0 %v2077_v53  ;;  %v2138_v34 = vld [vmem:[%s2354_s6 + $0x1f0] ss:$8 sps:$4 sm:$0xff]   ;;  %v2148_v36 = vld [vmem:[%s2354_s6 + $0x304] ss:$8 sps:$4 sm:$0xff]   ;;  %v2143_v39 = vld [vmem:[%s2354_s6 + $0x200] ss:$8 sps:$4 sm:$0xff]  }
 0x11f   : > { %1484 = vmatpush1.bf16.msra.mxu1 %v2078_v54  ;;  %1444 = vmatprep.subr.bf16.mxu0 %v2079_v55  ;;  %v2146_v40 = vld [vmem:[%s2354_s6 + $0x300] ss:$8 sps:$4 sm:$0xff]   ;;  %v2151_v41 = vld [vmem:[%s2354_s6 + $0x214] ss:$8 sps:$4 sm:$0xff]   ;;  %v2149_v43 = vld [vmem:[%s2354_s6 + $0x210] ss:$8 sps:$4 sm:$0xff]  }
 0x120   : > { %1485 = vmatprep.subr.bf16.mxu1 %v2081_v56  ;;  %v2154_v42 = vld [vmem:[%s2354_s6 + $0x314] ss:$8 sps:$4 sm:$0xff]   ;;  %v2152_v44 = vld [vmem:[%s2354_s6 + $0x310] ss:$8 sps:$4 sm:$0xff]   ;;  %v2157_v45 = vld [vmem:[%s2354_s6 + $0x224] ss:$8 sps:$4 sm:$0xff]  }
 0x121   : > { %v2160_v46 = vld [vmem:[%s2354_s6 + $0x324] ss:$8 sps:$4 sm:$0xff]   ;;  %v2155_v47 = vld [vmem:[%s2354_s6 + $0x220] ss:$8 sps:$4 sm:$0xff]   ;;  %v2163_v49 = vld [vmem:[%s2354_s6 + $0x234] ss:$8 sps:$4 sm:$0xff]  }
 0x122   : > { %1445 = vmatpush1.bf16.msra.mxu0 %v2083_v57  ;;  %v2158_v48 = vld [vmem:[%s2354_s6 + $0x320] ss:$8 sps:$4 sm:$0xff]   ;;  %v2166_v50 = vld [vmem:[%s2354_s6 + $0x334] ss:$8 sps:$4 sm:$0xff]   ;;  %v2161_v51 = vld [vmem:[%s2354_s6 + $0x230] ss:$8 sps:$4 sm:$0xff]  }
 0x123   : > { %1486 = vmatpush1.bf16.msra.mxu1 %v2084_v58  ;;  %1446 = vmatprep.subr.bf16.mxu0 %v2085_v59  ;;  %v2164_v52 = vld [vmem:[%s2354_s6 + $0x330] ss:$8 sps:$4 sm:$0xff]   ;;  %v2169_v53 = vld [vmem:[%s2354_s6 + $0x244] ss:$8 sps:$4 sm:$0xff]   ;;  %v2167_v55 = vld [vmem:[%s2354_s6 + $0x240] ss:$8 sps:$4 sm:$0xff]  }
 0x124   : > { %1487 = vmatprep.subr.bf16.mxu1 %v2087_v60  ;;  %v2172_v54 = vld [vmem:[%s2354_s6 + $0x344] ss:$8 sps:$4 sm:$0xff]   ;;  %v2170_v56 = vld [vmem:[%s2354_s6 + $0x340] ss:$8 sps:$4 sm:$0xff]   ;;  %v2175_v57 = vld [vmem:[%s2354_s6 + $0x254] ss:$8 sps:$4 sm:$0xff]  }
 0x125   : > { %v2178_v58 = vld [vmem:[%s2354_s6 + $0x354] ss:$8 sps:$4 sm:$0xff]   ;;  %v2173_v59 = vld [vmem:[%s2354_s6 + $0x250] ss:$8 sps:$4 sm:$0xff]   ;;  %v2208_v18 = vld [vmem:[%s2354_s6 + $0x3a4] ss:$8 sps:$4 sm:$0xff]  }
 0x126   : > { %1447 = vmatpush1.bf16.msra.mxu0 %v2089_v61  ;;  %v2176_v60 = vld [vmem:[%s2354_s6 + $0x350] ss:$8 sps:$4 sm:$0xff]   ;;  %v2181_v61 = vld [vmem:[%s2354_s6 + $0x264] ss:$8 sps:$4 sm:$0xff]   ;;  %v2199_v13 = vld [vmem:[%s2354_s6 + $0x294] ss:$8 sps:$4 sm:$0xff]  }
 0x127   : > { %1488 = vmatpush1.bf16.msra.mxu1 %v2090_v62  ;;  %1448 = vmatprep.subr.bf16.mxu0 %v2091_v63  ;;  %v2184_v62 = vld [vmem:[%s2354_s6 + $0x364] ss:$8 sps:$4 sm:$0xff]   ;;  %v2504_v63 = vld [vmem:[%s2349_s27 + $0x10] sm:$0xff] }
 0x128   : > { %1489 = vmatprep.subr.bf16.mxu1 %v2093_v0  ;;  %v2179_v0 = vld [vmem:[%s2354_s6 + $0x260] ss:$8 sps:$4 sm:$0xff]   ;;  %v2202_v14 = vld [vmem:[%s2354_s6 + $0x394] ss:$8 sps:$4 sm:$0xff]   ;;  %v2197_v15 = vld [vmem:[%s2354_s6 + $0x290] ss:$8 sps:$4 sm:$0xff]  }
 0x12a   : > { %1449 = vmatpush1.bf16.msra.mxu0 %v2095_v1  ;;  %v2182_v1 = vld [vmem:[%s2354_s6 + $0x360] ss:$8 sps:$4 sm:$0xff]  }
 0x12b   : > { %1490 = vmatpush1.bf16.msra.mxu1 %v2096_v2  ;;  %1450 = vmatprep.subr.bf16.mxu0 %v2097_v3  ;;  %v1837_v2 = vcombine.high %v2504_v63, %v2504_v63  ;;  %v2511_v3 = vld [vmem:[%s2349_s27 + $0x18] sm:$0xff] }
 0x12c   : > { %1491 = vmatprep.subr.bf16.mxu1 %v2099_v4  ;;  %v2187_v4 = vld [vmem:[%s2354_s6 + $0x274] ss:$8 sps:$4 sm:$0xff]  }
 0x12e   : > { %1451 = vmatpush1.bf16.msra.mxu0 %v2101_v5  ;;  %v1839_v5 = vcombine.high %v2511_v3, %v2511_v3 }
 0x12f   : > { %1492 = vmatpush1.bf16.msra.mxu1 %v2102_v6  ;;  %1452 = vmatprep.subr.bf16.mxu0 %v2103_v7  ;;  %v2190_v6 = vld [vmem:[%s2354_s6 + $0x374] ss:$8 sps:$4 sm:$0xff]   ;;  %v2185_v7 = vld [vmem:[%s2354_s6 + $0x270] ss:$8 sps:$4 sm:$0xff]  }
 0x130   : > { %1493 = vmatprep.subr.bf16.mxu1 %v2105_v8  ;;  %v2188_v8 = vld [vmem:[%s2354_s6 + $0x370] ss:$8 sps:$4 sm:$0xff]  }
 0x132   : > { %1453 = vmatpush1.bf16.msra.mxu0 %v2107_v9  ;;  %v2193_v9 = vld [vmem:[%s2354_s6 + $0x284] ss:$8 sps:$4 sm:$0xff]  }
 0x133   : > { %1494 = vmatpush1.bf16.msra.mxu1 %v2108_v10  ;;  %1454 = vmatprep.subr.bf16.mxu0 %v2109_v11  ;;  %v2196_v10 = vld [vmem:[%s2354_s6 + $0x384] ss:$8 sps:$4 sm:$0xff]   ;;  %v2191_v11 = vld [vmem:[%s2354_s6 + $0x280] ss:$8 sps:$4 sm:$0xff]  }
 0x134   : > { %1495 = vmatprep.subr.bf16.mxu1 %v2111_v12  ;;  %v2194_v12 = vld [vmem:[%s2354_s6 + $0x380] ss:$8 sps:$4 sm:$0xff]  }
 0x136   : > { %1455 = vmatpush1.bf16.msra.mxu0 %v2113_v16  ;;  %v2200_v16 = vld [vmem:[%s2354_s6 + $0x390] ss:$8 sps:$4 sm:$0xff]  }
 0x137   : > { %1496 = vmatpush1.bf16.msra.mxu1 %v2114_v17  ;;  %1456 = vmatprep.subr.bf16.mxu0 %v2115_v19  ;;  %v2205_v17 = vld [vmem:[%s2354_s6 + $0x2a4] ss:$8 sps:$4 sm:$0xff]   ;;  %v2203_v19 = vld [vmem:[%s2354_s6 + $0x2a0] ss:$8 sps:$4 sm:$0xff]  }
 0x138   : > { %1497 = vmatprep.subr.bf16.mxu1 %v2117_v20  ;;  %v2206_v20 = vld [vmem:[%s2354_s6 + $0x3a0] ss:$8 sps:$4 sm:$0xff]  }
 0x13a   : > { %1457 = vmatpush1.bf16.msra.mxu0 %v2119_v21  ;;  %v2211_v21 = vld [vmem:[%s2354_s6 + $0x2b4] ss:$8 sps:$4 sm:$0xff]  }
 0x13b   : > { %1498 = vmatpush1.bf16.msra.mxu1 %v2120_v22  ;;  %1458 = vmatprep.subr.bf16.mxu0 %v2121_v23  ;;  %v2214_v22 = vld [vmem:[%s2354_s6 + $0x3b4] ss:$8 sps:$4 sm:$0xff]   ;;  %v2209_v23 = vld [vmem:[%s2354_s6 + $0x2b0] ss:$8 sps:$4 sm:$0xff]  }
 0x13c   : > { %1499 = vmatprep.subr.bf16.mxu1 %v2123_v24  ;;  %v2212_v24 = vld [vmem:[%s2354_s6 + $0x3b0] ss:$8 sps:$4 sm:$0xff]  }
 0x13e   : > { %1459 = vmatpush1.bf16.msra.mxu0 %v2125_v25  ;;  %v2217_v25 = vld [vmem:[%s2354_s6 + $0x2c4] ss:$8 sps:$4 sm:$0xff]  }
 0x13f   : > { %1500 = vmatpush1.bf16.msra.mxu1 %v2126_v26  ;;  %1460 = vmatprep.subr.bf16.mxu0 %v2127_v27  ;;  %v2220_v26 = vld [vmem:[%s2354_s6 + $0x3c4] ss:$8 sps:$4 sm:$0xff]   ;;  %v2215_v27 = vld [vmem:[%s2354_s6 + $0x2c0] ss:$8 sps:$4 sm:$0xff]  }
 0x140   : > { %1501 = vmatprep.subr.bf16.mxu1 %v2129_v28  ;;  %v2218_v28 = vld [vmem:[%s2354_s6 + $0x3c0] ss:$8 sps:$4 sm:$0xff]  }
 0x142   : > { %1461 = vmatpush1.bf16.msra.mxu0 %v2131_v29  ;;  %v2223_v29 = vld [vmem:[%s2354_s6 + $0x2d4] ss:$8 sps:$4 sm:$0xff]  }
 0x143   : > { %1502 = vmatpush1.bf16.msra.mxu1 %v2132_v30  ;;  %1462 = vmatprep.subr.bf16.mxu0 %v2133_v31  ;;  %v2226_v30 = vld [vmem:[%s2354_s6 + $0x3d4] ss:$8 sps:$4 sm:$0xff]   ;;  %v2221_v31 = vld [vmem:[%s2354_s6 + $0x2d0] ss:$8 sps:$4 sm:$0xff]  }
 0x144   : > { %1503 = vmatprep.subr.bf16.mxu1 %v2135_v32  ;;  %v2224_v32 = vld [vmem:[%s2354_s6 + $0x3d0] ss:$8 sps:$4 sm:$0xff]  }
 0x146   : > { %1463 = vmatpush1.bf16.msra.mxu0 %v2137_v33  ;;  %v2229_v33 = vld [vmem:[%s2354_s6 + $0x2e4] ss:$8 sps:$4 sm:$0xff]  }
 0x147   : > { %1504 = vmatpush1.bf16.msra.mxu1 %v2138_v34  ;;  %1514 = vmatprep.subr.bf16.mxu0 %v2145_v35  ;;  %v2232_v34 = vld [vmem:[%s2354_s6 + $0x3e4] ss:$8 sps:$4 sm:$0xff]   ;;  %v2227_v35 = vld [vmem:[%s2354_s6 + $0x2e0] ss:$8 sps:$4 sm:$0xff]  }
 0x148   : > { %1555 = vmatprep.subr.bf16.mxu1 %v2148_v36  ;;  %v2230_v36 = vld [vmem:[%s2354_s6 + $0x3e0] ss:$8 sps:$4 sm:$0xff]  }
 0x149   : > { %1465 = vmatmul.mubr.bf16.vlgmr.msra.gmra.mrb[0].mxu0 %v1832_v37  ;;  %v2235_v37 = vld [vmem:[%s2354_s6 + $0x2f4] ss:$8 sps:$4 sm:$0xff]  }
 0x14a   : > { %1506 = vmatmul.mubr.bf16.vlgmr.msra.gmra.mrb[0].mxu1 %v1834_v38  ;;  %1515 = vmatpush1.bf16.msra.mxu0 %v2143_v39  ;;  %v2238_v38 = vld [vmem:[%s2354_s6 + $0x3f4] ss:$8 sps:$4 sm:$0xff]   ;;  %v2233_v39 = vld [vmem:[%s2354_s6 + $0x2f0] ss:$8 sps:$4 sm:$0xff]  }
 0x14b   : > { %1556 = vmatpush1.bf16.msra.mxu1 %v2146_v40  ;;  %1516 = vmatprep.subr.bf16.mxu0 %v2151_v41  ;;  %v2236_v40 = vld [vmem:[%s2354_s6 + $0x3f0] ss:$8 sps:$4 sm:$0xff]   ;;  %v2243_v41 = vld [vmem:[%s2354_s6 + $0x404] ss:$8 sps:$4 sm:$0xff]  }
 0x14c   : > { %1557 = vmatprep.subr.bf16.mxu1 %v2154_v42  ;;  %1546 = vmatprep.mubr.bf16.mxu0 %v1837_v2  ;;  %v1836_v42 = vcombine.low %v2504_v63, %v2504_v63 }
 0x14d   : > { %1587 = vmatprep.mubr.bf16.mxu1 %v1839_v5 }
 0x14e   : > { %1517 = vmatpush1.bf16.msra.mxu0 %v2149_v43  ;;  %v1838_v43 = vcombine.low %v2511_v3, %v2511_v3 }
 0x14f   : > { %1558 = vmatpush1.bf16.msra.mxu1 %v2152_v44  ;;  %1518 = vmatprep.subr.bf16.mxu0 %v2157_v45  ;;  %v2241_v44 = vld [vmem:[%s2354_s6 + $0x400] ss:$8 sps:$4 sm:$0xff]   ;;  %v2248_v45 = vld [vmem:[%s2354_s6 + $0x414] ss:$8 sps:$4 sm:$0xff]  }
 0x150   : > { %1559 = vmatprep.subr.bf16.mxu1 %v2160_v46  ;;  %v2246_v46 = vld [vmem:[%s2354_s6 + $0x410] ss:$8 sps:$4 sm:$0xff]  }
 0x152   : > { %1519 = vmatpush1.bf16.msra.mxu0 %v2155_v47  ;;  %v2293_v47 = vmov 0  }
 0x153   : > { %1560 = vmatpush1.bf16.msra.mxu1 %v2158_v48  ;;  %1520 = vmatprep.subr.bf16.mxu0 %v2163_v49  ;;  %v2251_v48 = vld [vmem:[%s2354_s6 + $0x424] ss:$8 sps:$4 sm:$0xff]   ;;  %v2249_v49 = vld [vmem:[%s2354_s6 + $0x420] ss:$8 sps:$4 sm:$0xff]  }
 0x154   : > { %1561 = vmatprep.subr.bf16.mxu1 %v2166_v50  ;;  %v2254_v50 = vld [vmem:[%s2354_s6 + $0x434] ss:$8 sps:$4 sm:$0xff]  }
 0x156   : > { %1521 = vmatpush1.bf16.msra.mxu0 %v2161_v51  ;;  %v2252_v51 = vld [vmem:[%s2354_s6 + $0x430] ss:$8 sps:$4 sm:$0xff]  }
 0x157   : > { %1562 = vmatpush1.bf16.msra.mxu1 %v2164_v52  ;;  %1522 = vmatprep.subr.bf16.mxu0 %v2169_v53  ;;  %v2257_v52 = vld [vmem:[%s2354_s6 + $0x444] ss:$8 sps:$4 sm:$0xff]   ;;  %v2255_v53 = vld [vmem:[%s2354_s6 + $0x440] ss:$8 sps:$4 sm:$0xff]  }
 0x158   : > { %1563 = vmatprep.subr.bf16.mxu1 %v2172_v54  ;;  %v2260_v54 = vld [vmem:[%s2354_s6 + $0x454] ss:$8 sps:$4 sm:$0xff]  }
 0x15a   : > { %1523 = vmatpush1.bf16.msra.mxu0 %v2167_v55  ;;  %v2258_v55 = vld [vmem:[%s2354_s6 + $0x450] ss:$8 sps:$4 sm:$0xff]  }
 0x15b   : > { %1564 = vmatpush1.bf16.msra.mxu1 %v2170_v56  ;;  %1524 = vmatprep.subr.bf16.mxu0 %v2175_v57  ;;  %v2263_v56 = vld [vmem:[%s2354_s6 + $0x464] ss:$8 sps:$4 sm:$0xff]   ;;  %v2261_v57 = vld [vmem:[%s2354_s6 + $0x460] ss:$8 sps:$4 sm:$0xff]  }
 0x15c   : > { %1565 = vmatprep.subr.bf16.mxu1 %v2178_v58  ;;  %v2266_v58 = vld [vmem:[%s2354_s6 + $0x474] ss:$8 sps:$4 sm:$0xff]  }
 0x15e   : > { %1525 = vmatpush1.bf16.msra.mxu0 %v2173_v59  ;;  %v2264_v59 = vld [vmem:[%s2354_s6 + $0x470] ss:$8 sps:$4 sm:$0xff]  }
 0x15f   : > { %1566 = vmatpush1.bf16.msra.mxu1 %v2176_v60  ;;  %1526 = vmatprep.subr.bf16.mxu0 %v2181_v61  ;;  %v2267_v60 = vld [vmem:[%s2349_s27 + $0x20] ss:$0 sps:$4 sm:$0xff]  }
 0x160   : > { %1567 = vmatprep.subr.bf16.mxu1 %v2184_v62 }
 0x162   : > { %1527 = vmatpush1.bf16.msra.mxu0 %v2179_v0 }
 0x163   : > { %1568 = vmatpush1.bf16.msra.mxu1 %v2182_v1  ;;  %1528 = vmatprep.subr.bf16.mxu0 %v2187_v4 }
 0x164   : > { %1569 = vmatprep.subr.bf16.mxu1 %v2190_v6 }
 0x166   : > { %1529 = vmatpush1.bf16.msra.mxu0 %v2185_v7 }
 0x167   : > { %1570 = vmatpush1.bf16.msra.mxu1 %v2188_v8  ;;  %1530 = vmatprep.subr.bf16.mxu0 %v2193_v9 }
 0x168   : > { %1571 = vmatprep.subr.bf16.mxu1 %v2196_v10 }
 0x16a   : > { %1531 = vmatpush1.bf16.msra.mxu0 %v2191_v11 }
 0x16b   : > { %1572 = vmatpush1.bf16.msra.mxu1 %v2194_v12  ;;  %1532 = vmatprep.subr.bf16.mxu0 %v2199_v13 }
 0x16c   : > { %1573 = vmatprep.subr.bf16.mxu1 %v2202_v14 }
 0x16e   : > { %1533 = vmatpush1.bf16.msra.mxu0 %v2197_v15 }
 0x16f   : > { %1574 = vmatpush1.bf16.msra.mxu1 %v2200_v16  ;;  %1534 = vmatprep.subr.bf16.mxu0 %v2205_v17 }
 0x170   : > { %1575 = vmatprep.subr.bf16.mxu1 %v2208_v18 }
 0x172   : > { %1535 = vmatpush1.bf16.msra.mxu0 %v2203_v19  ;;  %v529_v19 = vld [vmem:[#allocation2] sm:$0xff] }
 0x173   : > { %1576 = vmatpush1.bf16.msra.mxu1 %v2206_v20  ;;  %1536 = vmatprep.subr.bf16.mxu0 %v2211_v21 }
 0x174   : > { %1577 = vmatprep.subr.bf16.mxu1 %v2214_v22  ;;  %v530_v22 = vld [vmem:[#allocation2 + $0x8] sm:$0xff] }
 0x176   : > { %1537 = vmatpush1.bf16.msra.mxu0 %v2209_v23 }
 0x177   : > { %1578 = vmatpush1.bf16.msra.mxu1 %v2212_v24  ;;  %1538 = vmatprep.subr.bf16.mxu0 %v2217_v25 }
 0x178   : > { %1579 = vmatprep.subr.bf16.mxu1 %v2220_v26 }
 0x17a   : > { %1539 = vmatpush1.bf16.msra.mxu0 %v2215_v27 }
 0x17b   : > { %1580 = vmatpush1.bf16.msra.mxu1 %v2218_v28  ;;  %1540 = vmatprep.subr.bf16.mxu0 %v2223_v29 }
 0x17c   : > { %1581 = vmatprep.subr.bf16.mxu1 %v2226_v30 }
 0x17e   : > { %1541 = vmatpush1.bf16.msra.mxu0 %v2221_v31 }
 0x17f   : > { %1582 = vmatpush1.bf16.msra.mxu1 %v2224_v32  ;;  %1542 = vmatprep.subr.bf16.mxu0 %v2229_v33 }
 0x180   : > { %1583 = vmatprep.subr.bf16.mxu1 %v2232_v34 }
 0x182   : > { %1543 = vmatpush1.bf16.msra.mxu0 %v2227_v35 }
 0x183   : > { %1584 = vmatpush1.bf16.msra.mxu1 %v2230_v36  ;;  %1544 = vmatprep.subr.bf16.mxu0 %v2235_v37 }
 0x184   : > { %1585 = vmatprep.subr.bf16.mxu1 %v2238_v38 }
 0x186   : > { %1545 = vmatpush1.bf16.msra.mxu0 %v2233_v39 }
 0x187   : > { %1586 = vmatpush1.bf16.msra.mxu1 %v2236_v40  ;;  %1596 = vmatprep.subr.bf16.mxu0 %v2243_v41 }
 0x189   : > { %1547 = vmatmul.mubr.bf16.vlgmr.msra.gmra.mrb[4].mxu0 %v1836_v42 }
 0x18a   : > { %1588 = vmatmul.mubr.bf16.vlgmr.msra.gmra.mrb[4].mxu1 %v1838_v43  ;;  %1597 = vmatpush1.bf16.msra.mxu0 %v2241_v44 }
 0x18b   : > { %1628 = vmatprep.mubr.bf16.mxu0 %v2293_v47  ;;  %1598 = vmatprep.subr.bf16.mxu0 %v2248_v45 }
 0x18e   : > { %1599 = vmatpush1.bf16.msra.mxu0 %v2246_v46 }
 0x18f   : > { %1600 = vmatprep.subr.bf16.mxu0 %v2251_v48 }
 0x192   : > { %1601 = vmatpush1.bf16.msra.mxu0 %v2249_v49 }
 0x193   : > { %1602 = vmatprep.subr.bf16.mxu0 %v2254_v50 }
 0x196   : > { %1603 = vmatpush1.bf16.msra.mxu0 %v2252_v51 }
 0x197   : > { %1604 = vmatprep.subr.bf16.mxu0 %v2257_v52 }
 0x19a   : > { %1605 = vmatpush1.bf16.msra.mxu0 %v2255_v53 }
 0x19b   : > { %1606 = vmatprep.subr.bf16.mxu0 %v2260_v54 }
 0x19e   : > { %1607 = vmatpush1.bf16.msra.mxu0 %v2258_v55 }
 0x19f   : > { %1608 = vmatprep.subr.bf16.mxu0 %v2263_v56 }
 0x1a2   : > { %1609 = vmatpush1.bf16.msra.mxu0 %v2261_v57 }
 0x1a3   : > { %1610 = vmatprep.subr.bf16.mxu0 %v2266_v58 }
 0x1a6   : > { %1611 = vmatpush1.bf16.msra.mxu0 %v2264_v59 }
 0x1a9   : > { %1629 = vmatmul.mubr.bf16.vlgmr.msra.gmra.mrb[8].mxu0 %v2267_v60 }
 0x21c   : > { %v1466_v61 = vpop.f32.mrb[0].mxu0 }
 0x21d   : > { %v1507_v62 = vpop.f32.mrb[0].mxu1  ;;  %v1468_v0 = vpop.f32.mrb[1].mxu0 }
 0x21e   : > { %v1508_v63 = vadd.f32 %v1507_v62, %v1466_v61  ;;  %v1509_v1 = vpop.f32.mrb[1].mxu1  ;;  %v1470_v3 = vpop.f32.mrb[2].mxu0 }
 0x21f   : > { %v1510_v2 = vadd.f32 %v1509_v1, %v1468_v0  ;;  %v1511_v4 = vpop.f32.mrb[2].mxu1  ;;  %v1471_v5 = vpop.f32.mrb[3].mxu0 }
 0x220   : > { %v1512_v6 = vpop.f32.mrb[3].mxu1 }
 0x25c   : > { %v1548_v7 = vpop.f32.mrb[4].mxu0 }
 0x25d   : > { %v1589_v8 = vpop.f32.mrb[4].mxu1  ;;  %v1549_v9 = vadd.f32 %v1548_v7, %v1508_v63  ;;  %v1550_v10 = vpop.f32.mrb[5].mxu0 }
 0x25e   : > { %v1591_v11 = vpop.f32.mrb[5].mxu1  ;;  %v1551_v12 = vadd.f32 %v1550_v10, %v1510_v2  ;;  %v1552_v13 = vpop.f32.mrb[6].mxu0 }
 0x25f   : > { %v1593_v14 = vpop.f32.mrb[6].mxu1  ;;  %v1590_v15 = vadd.f32 %v1589_v8, %v1549_v9  ;;  %v1553_v16 = vpop.f32.mrb[7].mxu0 }
 0x260   : > { %v1594_v17 = vpop.f32.mrb[7].mxu1  ;;  %v1592_v18 = vadd.f32 %v1591_v11, %v1551_v12 }
 0x27c   : > { %v1630_v20 = vpop.f32.mrb[8].mxu0  ;;  %1644 = sbr.rel (%p1985_p7) target bundleno = 655 (0x28f), region = 48 }
 0x27d   : > { %v1631_v21 = vadd.f32 %v1630_v20, %v1590_v15  ;;  %v1632_v23 = vpop.f32.mrb[9].mxu0 }
 0x27e   : > { %v1633_v24 = vadd.f32 %v1632_v23, %v1592_v18  ;;  %v1634_v25 = vpop.f32.mrb[10].mxu0 }
 0x27f   : > { %v1637_v26 = vadd.f32 %v1631_v21, %v529_v19  ;;  %v1635_v27 = vpop.f32.mrb[11].mxu0 }
 0x280   : > { %v1638_v28 = vadd.f32 %v1633_v24, %v530_v22 }
 0x281   : > { %1639 = vst [vmem:[#allocation2] sm:$0xff] %v1637_v26 }
 0x282   : > { %1640 = vst [vmem:[#allocation2 + $0x8] sm:$0xff] %v1638_v28 }
 0x288   : > { %v1645_v29 = vld [vmem:[#allocation2] sm:$0xff] }
 0x289   : > { %v1646_v30 = vld [vmem:[#allocation2 + $0x8] sm:$0xff]  ;;  %v1647_v31 = vmax.f32 %v1645_v29, 0.0 }
 0x28a   : > { %v1648_v32 = vmax.f32 %v1646_v30, 0.0 }
 0x28c   : > { %v1992_v33 = vpack.c.bf16 %v1648_v32, %v1647_v31 }
 0x28e   : > { %1657 = vst [vmem:[%s2590_s5] sm:$0xff] %v1992_v33 }
 0x28f PF: > { %s15_s20 = sadd.s32 1, %s2290_s20   ;;  %s2591_s18 = smov %s2286_s19 }
 0x290   : > { %p12_p8 = scmp.ge.s32.totalorder %s15_s20, 4   ;;  %s2592_s19 = smov %s2594_s21 }
 0x292   :  { %14 = sbr.rel (!%p12_p8) target bundleno = 2 (0x2), region = 90 }

// kernel: resnet18_forward.15
= control target key start
LH: loop header
LB: loop body
LE: loop exit
PB: predicated region body
PF: predicated region fallthrough
CT: control target
= control target key end

     0   :  { %s2674_s12 = smov 0   ;;  %s2676_s13 = smov 0   ;;  %s3231_s0 = inlined_call_operand.vmem [shape: bf16[8,2304], index: 0, kind: input, shape index: {}]   ;;  %s3232_s1 = inlined_call_operand.vmem [shape: bf16[2304,512], index: 1, kind: input, shape index: {}]   ;;  %s3233_s2 = inlined_call_operand.vmem [shape: f32[1,512], index: 2, kind: input, shape index: {}]   ;;  %s3234_s3 = inlined_call_operand.vmem [shape: bf16[8,512], index: 3, kind: output, shape index: {}]  }
   0x1   :  { %s2678_s14 = smov 0   ;;  %s2680_s15 = smov 0  }
   0x2   :  { %s2682_s16 = smov 0   ;;  %s2684_s17 = smov 0  }
   0x3   :  { %s2686_s18 = smov 0  }
   0x4 LB: > { %s25_s19 = sadd.s32 1, %s2643_s16  ;;  %s28_s20 = sadd.s32 1, %s2647_s17  ;;  %s2651_s18 = sphi %s2686_s18, %s13_s18   ;;  %s2647_s17 = sphi %s2684_s17, %s3240_s17   ;;  %s2643_s16 = sphi %s2682_s16, %s3239_s16   ;;  %s2639_s15 = sphi %s2680_s15, %s3238_s15   ;;  %s2635_s14 = sphi %s2678_s14, %s3237_s14   ;;  %s2631_s13 = sphi %s2676_s13, %s3236_s13   ;;  %s2627_s12 = sphi %s2674_s12, %s3235_s12  }
   0x5   : > { %p26_p0 = scmp.ge.s32.totalorder %s25_s19, 2  ;;  %p76_p1 = scmp.ne.s32.totalorder %s2631_s13, %s2627_s12 }
   0x6   : > { %p77_p2 = scmp.eq.s32.totalorder %s2651_s18, 0  ;;  %s69_s24 = sadd.s32 1, %s2631_s13 }
   0x7   : > { %s3242_s19 = smov (%p26_p0, %s25_s19), 0  ;;  %s3244_s20 = smov (!%p26_p0, %s28_s20), %s2647_s17 }
   0x8   : > { %p78_p3 = por %p77_p2, %p76_p1  ;;  %p30_p4 = scmp.ge.s32.totalorder %s3244_s20, 2 }
   0x9   : > { %s64_s21 = ssub.s32 %s2643_s16, %s3242_s19  ;;  %p2144_p6 = scmp.ge.s32.totalorder %s2651_s18, 4 }
   0xa   : > { %s3246_s20 = smov (%p30_p4, %s3244_s20), 0 }
   0xb   : > { %s65_s22 = ssub.s32 %s2647_s17, %s3246_s20  ;;  %156 = sbr.rel (%p2144_p6) target bundleno = 98 (0x62), region = 16 }
   0xc   : > { %s66_s23 = sor.u32 %s65_s22, %s64_s21 }
   0xd   : > { %p67_p5 = scmp.eq.s32.totalorder %s66_s23, 0 }
   0xf   : > { %s2725_s25 = scalar_select %p67_p5, %s2631_s13, %s69_s24  }
  0x12   : > { %172 = sbr.rel (!%p78_p3) target bundleno = 98 (0x62), region = 24  ;;  %s174_s26 = sand.u32 (%p78_p3), 1, %s2631_s13  }
  0x13   : > { %s2313_s27 = smul.u32 (%p78_p3), 1152, %s174_s26  ;;  %s2145_s28 = sshll.u32 (%p78_p3), %s2647_s17, 1 }
  0x14   : > { %s2311_s29 = smul.u32 (%p78_p3), 576, %s2643_s16 }
  0x15   : > { %s2739_s8 = scalar_lea.vmem (%p78_p3), [#allocation3], %s2313_s27 }
  0x16   : > { %s180_s30 = sadd.s32 (%p78_p3), %s2311_s29, %s2145_s28 }
  0x17   : > { %s2147_s4 = sshll.u32 (%p78_p3), %s180_s30, 2 }
  0x18   : > { %s2734_s7 = scalar_lea.vmem (%p78_p3), %s3232_s1, %s2147_s4 }
  0x19   : > { %v496_v0 = vld [vmem:[%s2734_s7] sm:$0xff]  ;;  %v498_v1 = vld [vmem:[%s2734_s7 + $0x10] sm:$0xff] }
  0x1a   : > { %v500_v2 = vld [vmem:[%s2734_s7 + $0x20] sm:$0xff]  ;;  %497 = vst [vmem:[%s2739_s8] sm:$0xff] %v496_v0  ;;  %499 = vst [vmem:[%s2739_s8 + $0x8] sm:$0xff] %v498_v1  ;;  %v502_v3 = vld [vmem:[%s2734_s7 + $0x30] sm:$0xff] }
  0x1b   : > { %501 = vst [vmem:[%s2739_s8 + $0x10] sm:$0xff] %v500_v2  ;;  %v504_v4 = vld [vmem:[%s2734_s7 + $0x40] sm:$0xff]  ;;  %v506_v5 = vld [vmem:[%s2734_s7 + $0x50] sm:$0xff]  ;;  %503 = vst [vmem:[%s2739_s8 + $0x18] sm:$0xff] %v502_v3 }
  0x1c   : > { %505 = vst [vmem:[%s2739_s8 + $0x20] sm:$0xff] %v504_v4  ;;  %507 = vst [vmem:[%s2739_s8 + $0x28] sm:$0xff] %v506_v5  ;;  %v508_v6 = vld [vmem:[%s2734_s7 + $0x60] sm:$0xff]  ;;  %v510_v7 = vld [vmem:[%s2734_s7 + $0x70] sm:$0xff] }
  0x1d   : > { %v512_v8 = vld [vmem:[%s2734_s7 + $0x80] sm:$0xff]  ;;  %509 = vst [vmem:[%s2739_s8 + $0x30] sm:$0xff] %v508_v6  ;;  %511 = vst [vmem:[%s2739_s8 + $0x38] sm:$0xff] %v510_v7  ;;  %v514_v9 = vld [vmem:[%s2734_s7 + $0x90] sm:$0xff] }
  0x1e   : > { %513 = vst [vmem:[%s2739_s8 + $0x40] sm:$0xff] %v512_v8  ;;  %v516_v10 = vld [vmem:[%s2734_s7 + $0xa0] sm:$0xff]  ;;  %v518_v11 = vld [vmem:[%s2734_s7 + $0xb0] sm:$0xff]  ;;  %515 = vst [vmem:[%s2739_s8 + $0x48] sm:$0xff] %v514_v9 }
  0x1f   : > { %517 = vst [vmem:[%s2739_s8 + $0x50] sm:$0xff] %v516_v10  ;;  %519 = vst [vmem:[%s2739_s8 + $0x58] sm:$0xff] %v518_v11  ;;  %v520_v12 = vld [vmem:[%s2734_s7 + $0xc0] sm:$0xff]  ;;  %v522_v13 = vld [vmem:[%s2734_s7 + $0xd0] sm:$0xff] }
  0x20   : > { %v524_v14 = vld [vmem:[%s2734_s7 + $0xe0] sm:$0xff]  ;;  %521 = vst [vmem:[%s2739_s8 + $0x60] sm:$0xff] %v520_v12  ;;  %523 = vst [vmem:[%s2739_s8 + $0x68] sm:$0xff] %v522_v13  ;;  %v526_v15 = vld [vmem:[%s2734_s7 + $0xf0] sm:$0xff] }
  0x21   : > { %525 = vst [vmem:[%s2739_s8 + $0x70] sm:$0xff] %v524_v14  ;;  %v528_v16 = vld [vmem:[%s2734_s7 + $0x100] sm:$0xff]  ;;  %v530_v17 = vld [vmem:[%s2734_s7 + $0x110] sm:$0xff]  ;;  %527 = vst [vmem:[%s2739_s8 + $0x78] sm:$0xff] %v526_v15 }
  0x22   : > { %529 = vst [vmem:[%s2739_s8 + $0x80] sm:$0xff] %v528_v16  ;;  %531 = vst [vmem:[%s2739_s8 + $0x88] sm:$0xff] %v530_v17  ;;  %v532_v18 = vld [vmem:[%s2734_s7 + $0x120] sm:$0xff]  ;;  %v534_v19 = vld [vmem:[%s2734_s7 + $0x130] sm:$0xff] }
  0x23   : > { %v536_v20 = vld [vmem:[%s2734_s7 + $0x140] sm:$0xff]  ;;  %533 = vst [vmem:[%s2739_s8 + $0x90] sm:$0xff] %v532_v18  ;;  %535 = vst [vmem:[%s2739_s8 + $0x98] sm:$0xff] %v534_v19  ;;  %v538_v21 = vld [vmem:[%s2734_s7 + $0x150] sm:$0xff] }
  0x24   : > { %537 = vst [vmem:[%s2739_s8 + $0xa0] sm:$0xff] %v536_v20  ;;  %v540_v22 = vld [vmem:[%s2734_s7 + $0x160] sm:$0xff]  ;;  %v542_v23 = vld [vmem:[%s2734_s7 + $0x170] sm:$0xff]  ;;  %539 = vst [vmem:[%s2739_s8 + $0xa8] sm:$0xff] %v538_v21 }
  0x25   : > { %541 = vst [vmem:[%s2739_s8 + $0xb0] sm:$0xff] %v540_v22  ;;  %543 = vst [vmem:[%s2739_s8 + $0xb8] sm:$0xff] %v542_v23  ;;  %v544_v24 = vld [vmem:[%s2734_s7 + $0x180] sm:$0xff]  ;;  %v546_v25 = vld [vmem:[%s2734_s7 + $0x190] sm:$0xff] }
  0x26   : > { %v548_v26 = vld [vmem:[%s2734_s7 + $0x1a0] sm:$0xff]  ;;  %545 = vst [vmem:[%s2739_s8 + $0xc0] sm:$0xff] %v544_v24  ;;  %547 = vst [vmem:[%s2739_s8 + $0xc8] sm:$0xff] %v546_v25  ;;  %v550_v27 = vld [vmem:[%s2734_s7 + $0x1b0] sm:$0xff] }
  0x27   : > { %549 = vst [vmem:[%s2739_s8 + $0xd0] sm:$0xff] %v548_v26  ;;  %v552_v28 = vld [vmem:[%s2734_s7 + $0x1c0] sm:$0xff]  ;;  %v554_v29 = vld [vmem:[%s2734_s7 + $0x1d0] sm:$0xff]  ;;  %551 = vst [vmem:[%s2739_s8 + $0xd8] sm:$0xff] %v550_v27 }
  0x28   : > { %553 = vst [vmem:[%s2739_s8 + $0xe0] sm:$0xff] %v552_v28  ;;  %555 = vst [vmem:[%s2739_s8 + $0xe8] sm:$0xff] %v554_v29  ;;  %v556_v30 = vld [vmem:[%s2734_s7 + $0x1e0] sm:$0xff]  ;;  %v558_v31 = vld [vmem:[%s2734_s7 + $0x1f0] sm:$0xff] }
  0x29   : > { %v560_v32 = vld [vmem:[%s2734_s7 + $0x200] sm:$0xff]  ;;  %557 = vst [vmem:[%s2739_s8 + $0xf0] sm:$0xff] %v556_v30  ;;  %559 = vst [vmem:[%s2739_s8 + $0xf8] sm:$0xff] %v558_v31  ;;  %v562_v33 = vld [vmem:[%s2734_s7 + $0x210] sm:$0xff] }
  0x2a   : > { %561 = vst [vmem:[%s2739_s8 + $0x100] sm:$0xff] %v560_v32  ;;  %v564_v34 = vld [vmem:[%s2734_s7 + $0x220] sm:$0xff]  ;;  %v566_v35 = vld [vmem:[%s2734_s7 + $0x230] sm:$0xff]  ;;  %563 = vst [vmem:[%s2739_s8 + $0x108] sm:$0xff] %v562_v33 }
  0x2b   : > { %565 = vst [vmem:[%s2739_s8 + $0x110] sm:$0xff] %v564_v34  ;;  %567 = vst [vmem:[%s2739_s8 + $0x118] sm:$0xff] %v566_v35  ;;  %v568_v36 = vld [vmem:[%s2734_s7 + $0x240] sm:$0xff]  ;;  %v570_v37 = vld [vmem:[%s2734_s7 + $0x250] sm:$0xff] }
  0x2c   : > { %v572_v38 = vld [vmem:[%s2734_s7 + $0x260] sm:$0xff]  ;;  %569 = vst [vmem:[%s2739_s8 + $0x120] sm:$0xff] %v568_v36  ;;  %571 = vst [vmem:[%s2739_s8 + $0x128] sm:$0xff] %v570_v37  ;;  %v574_v39 = vld [vmem:[%s2734_s7 + $0x270] sm:$0xff] }
  0x2d   : > { %573 = vst [vmem:[%s2739_s8 + $0x130] sm:$0xff] %v572_v38  ;;  %v576_v40 = vld [vmem:[%s2734_s7 + $0x280] sm:$0xff]  ;;  %v578_v41 = vld [vmem:[%s2734_s7 + $0x290] sm:$0xff]  ;;  %575 = vst [vmem:[%s2739_s8 + $0x138] sm:$0xff] %v574_v39 }
  0x2e   : > { %577 = vst [vmem:[%s2739_s8 + $0x140] sm:$0xff] %v576_v40  ;;  %579 = vst [vmem:[%s2739_s8 + $0x148] sm:$0xff] %v578_v41  ;;  %v580_v42 = vld [vmem:[%s2734_s7 + $0x2a0] sm:$0xff]  ;;  %v582_v43 = vld [vmem:[%s2734_s7 + $0x2b0] sm:$0xff] }
  0x2f   : > { %v584_v44 = vld [vmem:[%s2734_s7 + $0x2c0] sm:$0xff]  ;;  %581 = vst [vmem:[%s2739_s8 + $0x150] sm:$0xff] %v580_v42  ;;  %583 = vst [vmem:[%s2739_s8 + $0x158] sm:$0xff] %v582_v43  ;;  %v586_v45 = vld [vmem:[%s2734_s7 + $0x2d0] sm:$0xff] }
  0x30   : > { %585 = vst [vmem:[%s2739_s8 + $0x160] sm:$0xff] %v584_v44  ;;  %v588_v46 = vld [vmem:[%s2734_s7 + $0x2e0] sm:$0xff]  ;;  %v590_v47 = vld [vmem:[%s2734_s7 + $0x2f0] sm:$0xff]  ;;  %587 = vst [vmem:[%s2739_s8 + $0x168] sm:$0xff] %v586_v45 }
  0x31   : > { %589 = vst [vmem:[%s2739_s8 + $0x170] sm:$0xff] %v588_v46  ;;  %591 = vst [vmem:[%s2739_s8 + $0x178] sm:$0xff] %v590_v47  ;;  %v592_v48 = vld [vmem:[%s2734_s7 + $0x300] sm:$0xff]  ;;  %v594_v49 = vld [vmem:[%s2734_s7 + $0x310] sm:$0xff] }
  0x32   : > { %v596_v50 = vld [vmem:[%s2734_s7 + $0x320] sm:$0xff]  ;;  %593 = vst [vmem:[%s2739_s8 + $0x180] sm:$0xff] %v592_v48  ;;  %595 = vst [vmem:[%s2739_s8 + $0x188] sm:$0xff] %v594_v49  ;;  %v598_v51 = vld [vmem:[%s2734_s7 + $0x330] sm:$0xff] }
  0x33   : > { %597 = vst [vmem:[%s2739_s8 + $0x190] sm:$0xff] %v596_v50  ;;  %v600_v52 = vld [vmem:[%s2734_s7 + $0x340] sm:$0xff]  ;;  %v602_v53 = vld [vmem:[%s2734_s7 + $0x350] sm:$0xff]  ;;  %599 = vst [vmem:[%s2739_s8 + $0x198] sm:$0xff] %v598_v51 }
  0x34   : > { %601 = vst [vmem:[%s2739_s8 + $0x1a0] sm:$0xff] %v600_v52  ;;  %603 = vst [vmem:[%s2739_s8 + $0x1a8] sm:$0xff] %v602_v53  ;;  %v604_v54 = vld [vmem:[%s2734_s7 + $0x360] sm:$0xff]  ;;  %v606_v55 = vld [vmem:[%s2734_s7 + $0x370] sm:$0xff] }
  0x35   : > { %v608_v56 = vld [vmem:[%s2734_s7 + $0x380] sm:$0xff]  ;;  %605 = vst [vmem:[%s2739_s8 + $0x1b0] sm:$0xff] %v604_v54  ;;  %607 = vst [vmem:[%s2739_s8 + $0x1b8] sm:$0xff] %v606_v55  ;;  %v610_v57 = vld [vmem:[%s2734_s7 + $0x390] sm:$0xff] }
  0x36   : > { %609 = vst [vmem:[%s2739_s8 + $0x1c0] sm:$0xff] %v608_v56  ;;  %v612_v58 = vld [vmem:[%s2734_s7 + $0x3a0] sm:$0xff]  ;;  %v614_v59 = vld [vmem:[%s2734_s7 + $0x3b0] sm:$0xff]  ;;  %611 = vst [vmem:[%s2739_s8 + $0x1c8] sm:$0xff] %v610_v57 }
  0x37   : > { %613 = vst [vmem:[%s2739_s8 + $0x1d0] sm:$0xff] %v612_v58  ;;  %615 = vst [vmem:[%s2739_s8 + $0x1d8] sm:$0xff] %v614_v59  ;;  %v616_v60 = vld [vmem:[%s2734_s7 + $0x3c0] sm:$0xff]  ;;  %v618_v61 = vld [vmem:[%s2734_s7 + $0x3d0] sm:$0xff] }
  0x38   : > { %v620_v62 = vld [vmem:[%s2734_s7 + $0x3e0] sm:$0xff]  ;;  %617 = vst [vmem:[%s2739_s8 + $0x1e0] sm:$0xff] %v616_v60  ;;  %619 = vst [vmem:[%s2739_s8 + $0x1e8] sm:$0xff] %v618_v61  ;;  %v622_v63 = vld [vmem:[%s2734_s7 + $0x3f0] sm:$0xff] }
  0x39   : > { %621 = vst [vmem:[%s2739_s8 + $0x1f0] sm:$0xff] %v620_v62  ;;  %v624_v0 = vld [vmem:[%s2734_s7 + $0x400] sm:$0xff]  ;;  %v626_v1 = vld [vmem:[%s2734_s7 + $0x410] sm:$0xff]  ;;  %623 = vst [vmem:[%s2739_s8 + $0x1f8] sm:$0xff] %v622_v63 }
  0x3a   : > { %625 = vst [vmem:[%s2739_s8 + $0x200] sm:$0xff] %v624_v0  ;;  %627 = vst [vmem:[%s2739_s8 + $0x208] sm:$0xff] %v626_v1  ;;  %v628_v2 = vld [vmem:[%s2734_s7 + $0x420] sm:$0xff]  ;;  %v630_v3 = vld [vmem:[%s2734_s7 + $0x430] sm:$0xff] }
  0x3b   : > { %v632_v4 = vld [vmem:[%s2734_s7 + $0x440] sm:$0xff]  ;;  %629 = vst [vmem:[%s2739_s8 + $0x210] sm:$0xff] %v628_v2  ;;  %631 = vst [vmem:[%s2739_s8 + $0x218] sm:$0xff] %v630_v3  ;;  %v634_v5 = vld [vmem:[%s2734_s7 + $0x450] sm:$0xff] }
  0x3c   : > { %633 = vst [vmem:[%s2739_s8 + $0x220] sm:$0xff] %v632_v4  ;;  %v636_v6 = vld [vmem:[%s2734_s7 + $0x460] sm:$0xff]  ;;  %v638_v7 = vld [vmem:[%s2734_s7 + $0x470] sm:$0xff]  ;;  %635 = vst [vmem:[%s2739_s8 + $0x228] sm:$0xff] %v634_v5 }
  0x3d   : > { %637 = vst [vmem:[%s2739_s8 + $0x230] sm:$0xff] %v636_v6  ;;  %639 = vst [vmem:[%s2739_s8 + $0x238] sm:$0xff] %v638_v7  ;;  %v640_v8 = vld [vmem:[%s2734_s7 + $0x480] sm:$0xff]  ;;  %v642_v9 = vld [vmem:[%s2734_s7 + $0x490] sm:$0xff] }
  0x3e   : > { %v644_v10 = vld [vmem:[%s2734_s7 + $0x4a0] sm:$0xff]  ;;  %641 = vst [vmem:[%s2739_s8 + $0x240] sm:$0xff] %v640_v8  ;;  %643 = vst [vmem:[%s2739_s8 + $0x248] sm:$0xff] %v642_v9  ;;  %v646_v11 = vld [vmem:[%s2734_s7 + $0x4b0] sm:$0xff] }
  0x3f   : > { %645 = vst [vmem:[%s2739_s8 + $0x250] sm:$0xff] %v644_v10  ;;  %v648_v12 = vld [vmem:[%s2734_s7 + $0x4c0] sm:$0xff]  ;;  %v650_v13 = vld [vmem:[%s2734_s7 + $0x4d0] sm:$0xff]  ;;  %647 = vst [vmem:[%s2739_s8 + $0x258] sm:$0xff] %v646_v11 }
  0x40   : > { %649 = vst [vmem:[%s2739_s8 + $0x260] sm:$0xff] %v648_v12  ;;  %651 = vst [vmem:[%s2739_s8 + $0x268] sm:$0xff] %v650_v13  ;;  %v652_v14 = vld [vmem:[%s2734_s7 + $0x4e0] sm:$0xff]  ;;  %v654_v15 = vld [vmem:[%s2734_s7 + $0x4f0] sm:$0xff] }
  0x41   : > { %v656_v16 = vld [vmem:[%s2734_s7 + $0x500] sm:$0xff]  ;;  %653 = vst [vmem:[%s2739_s8 + $0x270] sm:$0xff] %v652_v14  ;;  %655 = vst [vmem:[%s2739_s8 + $0x278] sm:$0xff] %v654_v15  ;;  %v658_v17 = vld [vmem:[%s2734_s7 + $0x510] sm:$0xff] }
  0x42   : > { %657 = vst [vmem:[%s2739_s8 + $0x280] sm:$0xff] %v656_v16  ;;  %v660_v18 = vld [vmem:[%s2734_s7 + $0x520] sm:$0xff]  ;;  %v662_v19 = vld [vmem:[%s2734_s7 + $0x530] sm:$0xff]  ;;  %659 = vst [vmem:[%s2739_s8 + $0x288] sm:$0xff] %v658_v17 }
  0x43   : > { %661 = vst [vmem:[%s2739_s8 + $0x290] sm:$0xff] %v660_v18  ;;  %663 = vst [vmem:[%s2739_s8 + $0x298] sm:$0xff] %v662_v19  ;;  %v664_v20 = vld [vmem:[%s2734_s7 + $0x540] sm:$0xff]  ;;  %v666_v21 = vld [vmem:[%s2734_s7 + $0x550] sm:$0xff] }
  0x44   : > { %v668_v22 = vld [vmem:[%s2734_s7 + $0x560] sm:$0xff]  ;;  %665 = vst [vmem:[%s2739_s8 + $0x2a0] sm:$0xff] %v664_v20  ;;  %667 = vst [vmem:[%s2739_s8 + $0x2a8] sm:$0xff] %v666_v21  ;;  %v670_v23 = vld [vmem:[%s2734_s7 + $0x570] sm:$0xff] }
  0x45   : > { %669 = vst [vmem:[%s2739_s8 + $0x2b0] sm:$0xff] %v668_v22  ;;  %v672_v24 = vld [vmem:[%s2734_s7 + $0x580] sm:$0xff]  ;;  %v674_v25 = vld [vmem:[%s2734_s7 + $0x590] sm:$0xff]  ;;  %671 = vst [vmem:[%s2739_s8 + $0x2b8] sm:$0xff] %v670_v23 }
  0x46   : > { %673 = vst [vmem:[%s2739_s8 + $0x2c0] sm:$0xff] %v672_v24  ;;  %675 = vst [vmem:[%s2739_s8 + $0x2c8] sm:$0xff] %v674_v25  ;;  %v676_v26 = vld [vmem:[%s2734_s7 + $0x5a0] sm:$0xff]  ;;  %v678_v27 = vld [vmem:[%s2734_s7 + $0x5b0] sm:$0xff] }
  0x47   : > { %v680_v28 = vld [vmem:[%s2734_s7 + $0x5c0] sm:$0xff]  ;;  %677 = vst [vmem:[%s2739_s8 + $0x2d0] sm:$0xff] %v676_v26  ;;  %679 = vst [vmem:[%s2739_s8 + $0x2d8] sm:$0xff] %v678_v27  ;;  %v682_v29 = vld [vmem:[%s2734_s7 + $0x5d0] sm:$0xff] }
  0x48   : > { %681 = vst [vmem:[%s2739_s8 + $0x2e0] sm:$0xff] %v680_v28  ;;  %v684_v30 = vld [vmem:[%s2734_s7 + $0x5e0] sm:$0xff]  ;;  %v686_v31 = vld [vmem:[%s2734_s7 + $0x5f0] sm:$0xff]  ;;  %683 = vst [vmem:[%s2739_s8 + $0x2e8] sm:$0xff] %v682_v29 }
  0x49   : > { %685 = vst [vmem:[%s2739_s8 + $0x2f0] sm:$0xff] %v684_v30  ;;  %687 = vst [vmem:[%s2739_s8 + $0x2f8] sm:$0xff] %v686_v31  ;;  %v688_v32 = vld [vmem:[%s2734_s7 + $0x600] sm:$0xff]  ;;  %v690_v33 = vld [vmem:[%s2734_s7 + $0x610] sm:$0xff] }
  0x4a   : > { %v692_v34 = vld [vmem:[%s2734_s7 + $0x620] sm:$0xff]  ;;  %689 = vst [vmem:[%s2739_s8 + $0x300] sm:$0xff] %v688_v32  ;;  %691 = vst [vmem:[%s2739_s8 + $0x308] sm:$0xff] %v690_v33  ;;  %v694_v35 = vld [vmem:[%s2734_s7 + $0x630] sm:$0xff] }
  0x4b   : > { %693 = vst [vmem:[%s2739_s8 + $0x310] sm:$0xff] %v692_v34  ;;  %v696_v36 = vld [vmem:[%s2734_s7 + $0x640] sm:$0xff]  ;;  %v698_v37 = vld [vmem:[%s2734_s7 + $0x650] sm:$0xff]  ;;  %695 = vst [vmem:[%s2739_s8 + $0x318] sm:$0xff] %v694_v35 }
  0x4c   : > { %697 = vst [vmem:[%s2739_s8 + $0x320] sm:$0xff] %v696_v36  ;;  %699 = vst [vmem:[%s2739_s8 + $0x328] sm:$0xff] %v698_v37  ;;  %v700_v38 = vld [vmem:[%s2734_s7 + $0x660] sm:$0xff]  ;;  %v702_v39 = vld [vmem:[%s2734_s7 + $0x670] sm:$0xff] }
  0x4d   : > { %v704_v40 = vld [vmem:[%s2734_s7 + $0x680] sm:$0xff]  ;;  %701 = vst [vmem:[%s2739_s8 + $0x330] sm:$0xff] %v700_v38  ;;  %703 = vst [vmem:[%s2739_s8 + $0x338] sm:$0xff] %v702_v39  ;;  %v706_v41 = vld [vmem:[%s2734_s7 + $0x690] sm:$0xff] }
  0x4e   : > { %705 = vst [vmem:[%s2739_s8 + $0x340] sm:$0xff] %v704_v40  ;;  %v708_v42 = vld [vmem:[%s2734_s7 + $0x6a0] sm:$0xff]  ;;  %v710_v43 = vld [vmem:[%s2734_s7 + $0x6b0] sm:$0xff]  ;;  %707 = vst [vmem:[%s2739_s8 + $0x348] sm:$0xff] %v706_v41 }
  0x4f   : > { %709 = vst [vmem:[%s2739_s8 + $0x350] sm:$0xff] %v708_v42  ;;  %711 = vst [vmem:[%s2739_s8 + $0x358] sm:$0xff] %v710_v43  ;;  %v712_v44 = vld [vmem:[%s2734_s7 + $0x6c0] sm:$0xff]  ;;  %v714_v45 = vld [vmem:[%s2734_s7 + $0x6d0] sm:$0xff] }
  0x50   : > { %v716_v46 = vld [vmem:[%s2734_s7 + $0x6e0] sm:$0xff]  ;;  %713 = vst [vmem:[%s2739_s8 + $0x360] sm:$0xff] %v712_v44  ;;  %715 = vst [vmem:[%s2739_s8 + $0x368] sm:$0xff] %v714_v45  ;;  %v718_v47 = vld [vmem:[%s2734_s7 + $0x6f0] sm:$0xff] }
  0x51   : > { %717 = vst [vmem:[%s2739_s8 + $0x370] sm:$0xff] %v716_v46  ;;  %v720_v48 = vld [vmem:[%s2734_s7 + $0x700] sm:$0xff]  ;;  %v722_v49 = vld [vmem:[%s2734_s7 + $0x710] sm:$0xff]  ;;  %719 = vst [vmem:[%s2739_s8 + $0x378] sm:$0xff] %v718_v47 }
  0x52   : > { %721 = vst [vmem:[%s2739_s8 + $0x380] sm:$0xff] %v720_v48  ;;  %723 = vst [vmem:[%s2739_s8 + $0x388] sm:$0xff] %v722_v49  ;;  %v724_v50 = vld [vmem:[%s2734_s7 + $0x720] sm:$0xff]  ;;  %v726_v51 = vld [vmem:[%s2734_s7 + $0x730] sm:$0xff] }
  0x53   : > { %v728_v52 = vld [vmem:[%s2734_s7 + $0x740] sm:$0xff]  ;;  %725 = vst [vmem:[%s2739_s8 + $0x390] sm:$0xff] %v724_v50  ;;  %727 = vst [vmem:[%s2739_s8 + $0x398] sm:$0xff] %v726_v51  ;;  %v730_v53 = vld [vmem:[%s2734_s7 + $0x750] sm:$0xff] }
  0x54   : > { %729 = vst [vmem:[%s2739_s8 + $0x3a0] sm:$0xff] %v728_v52  ;;  %v732_v54 = vld [vmem:[%s2734_s7 + $0x760] sm:$0xff]  ;;  %v734_v55 = vld [vmem:[%s2734_s7 + $0x770] sm:$0xff]  ;;  %731 = vst [vmem:[%s2739_s8 + $0x3a8] sm:$0xff] %v730_v53 }
  0x55   : > { %733 = vst [vmem:[%s2739_s8 + $0x3b0] sm:$0xff] %v732_v54  ;;  %735 = vst [vmem:[%s2739_s8 + $0x3b8] sm:$0xff] %v734_v55  ;;  %v736_v56 = vld [vmem:[%s2734_s7 + $0x780] sm:$0xff]  ;;  %v738_v57 = vld [vmem:[%s2734_s7 + $0x790] sm:$0xff] }
  0x56   : > { %v740_v58 = vld [vmem:[%s2734_s7 + $0x7a0] sm:$0xff]  ;;  %737 = vst [vmem:[%s2739_s8 + $0x3c0] sm:$0xff] %v736_v56  ;;  %739 = vst [vmem:[%s2739_s8 + $0x3c8] sm:$0xff] %v738_v57  ;;  %v742_v59 = vld [vmem:[%s2734_s7 + $0x7b0] sm:$0xff] }
  0x57   : > { %741 = vst [vmem:[%s2739_s8 + $0x3d0] sm:$0xff] %v740_v58  ;;  %v744_v60 = vld [vmem:[%s2734_s7 + $0x7c0] sm:$0xff]  ;;  %v746_v61 = vld [vmem:[%s2734_s7 + $0x7d0] sm:$0xff]  ;;  %743 = vst [vmem:[%s2739_s8 + $0x3d8] sm:$0xff] %v742_v59 }
  0x58   : > { %745 = vst [vmem:[%s2739_s8 + $0x3e0] sm:$0xff] %v744_v60  ;;  %747 = vst [vmem:[%s2739_s8 + $0x3e8] sm:$0xff] %v746_v61  ;;  %v748_v62 = vld [vmem:[%s2734_s7 + $0x7e0] sm:$0xff]  ;;  %v750_v63 = vld [vmem:[%s2734_s7 + $0x7f0] sm:$0xff] }
  0x59   : > { %v752_v0 = vld [vmem:[%s2734_s7 + $0x800] sm:$0xff]  ;;  %749 = vst [vmem:[%s2739_s8 + $0x3f0] sm:$0xff] %v748_v62  ;;  %751 = vst [vmem:[%s2739_s8 + $0x3f8] sm:$0xff] %v750_v63  ;;  %v754_v1 = vld [vmem:[%s2734_s7 + $0x810] sm:$0xff] }
  0x5a   : > { %753 = vst [vmem:[%s2739_s8 + $0x400] sm:$0xff] %v752_v0  ;;  %v756_v2 = vld [vmem:[%s2734_s7 + $0x820] sm:$0xff]  ;;  %v758_v3 = vld [vmem:[%s2734_s7 + $0x830] sm:$0xff]  ;;  %755 = vst [vmem:[%s2739_s8 + $0x408] sm:$0xff] %v754_v1 }
  0x5b   : > { %757 = vst [vmem:[%s2739_s8 + $0x410] sm:$0xff] %v756_v2  ;;  %759 = vst [vmem:[%s2739_s8 + $0x418] sm:$0xff] %v758_v3  ;;  %v760_v4 = vld [vmem:[%s2734_s7 + $0x840] sm:$0xff]  ;;  %v762_v5 = vld [vmem:[%s2734_s7 + $0x850] sm:$0xff] }
  0x5c   : > { %v764_v6 = vld [vmem:[%s2734_s7 + $0x860] sm:$0xff]  ;;  %761 = vst [vmem:[%s2739_s8 + $0x420] sm:$0xff] %v760_v4  ;;  %763 = vst [vmem:[%s2739_s8 + $0x428] sm:$0xff] %v762_v5  ;;  %v766_v7 = vld [vmem:[%s2734_s7 + $0x870] sm:$0xff] }
  0x5d   : > { %765 = vst [vmem:[%s2739_s8 + $0x430] sm:$0xff] %v764_v6  ;;  %v768_v8 = vld [vmem:[%s2734_s7 + $0x880] sm:$0xff]  ;;  %v770_v9 = vld [vmem:[%s2734_s7 + $0x890] sm:$0xff]  ;;  %767 = vst [vmem:[%s2739_s8 + $0x438] sm:$0xff] %v766_v7 }
  0x5e   : > { %769 = vst [vmem:[%s2739_s8 + $0x440] sm:$0xff] %v768_v8  ;;  %771 = vst [vmem:[%s2739_s8 + $0x448] sm:$0xff] %v770_v9  ;;  %v772_v10 = vld [vmem:[%s2734_s7 + $0x8a0] sm:$0xff]  ;;  %v774_v11 = vld [vmem:[%s2734_s7 + $0x8b0] sm:$0xff] }
  0x5f   : > { %v776_v12 = vld [vmem:[%s2734_s7 + $0x8c0] sm:$0xff]  ;;  %773 = vst [vmem:[%s2739_s8 + $0x450] sm:$0xff] %v772_v10  ;;  %775 = vst [vmem:[%s2739_s8 + $0x458] sm:$0xff] %v774_v11  ;;  %v778_v13 = vld [vmem:[%s2734_s7 + $0x8d0] sm:$0xff] }
  0x60   : > { %777 = vst [vmem:[%s2739_s8 + $0x460] sm:$0xff] %v776_v12  ;;  %v780_v14 = vld [vmem:[%s2734_s7 + $0x8e0] sm:$0xff]  ;;  %v782_v15 = vld [vmem:[%s2734_s7 + $0x8f0] sm:$0xff]  ;;  %779 = vst [vmem:[%s2739_s8 + $0x468] sm:$0xff] %v778_v13 }
  0x61   : > { %781 = vst [vmem:[%s2739_s8 + $0x470] sm:$0xff] %v780_v14  ;;  %783 = vst [vmem:[%s2739_s8 + $0x478] sm:$0xff] %v782_v15 }
  0x62 PF: > { %p2148_p7 = scmp.ge.s32.totalorder %s2651_s18, 1  ;;  %p796_p8 = scmp.lt.s32.totalorder %s2651_s18, 5 }
  0x64   : > { %p797_p9 = pnand %p2148_p7, %p796_p8 }
  0x65   : > { %s803_s9 = sand.u32 (!%p797_p9), 1, %s2627_s12   ;;  %s843_s10 = smul.u32 (!%p797_p9), 9, %s2635_s14 }
  0x66   : > { %800 = sbr.rel (%p797_p9) target bundleno = 510 (0x1fe), region = 66  ;;  %s2150_s21 = sshll.u32 (!%p797_p9), %s2639_s15, 1 }
  0x67   : > { %s2314_s11 = smul.u32 (!%p797_p9), 1152, %s803_s9  ;;  %p846_p10 = scmp.lt.s32.totalorder (!%p797_p9), %s843_s10, 17 }
  0x68   : > { %p856_p11 = scmp.lt.s32.totalorder (!%p797_p9), %s2150_s21, 3  ;;  %p2153_p12 = scmp.ne.s32.totalorder (!%p797_p9), %s2635_s14, 0 }
  0x69   : > { %s3044_s15 = scalar_lea.vmem (!%p797_p9), [#allocation3], %s2314_s11 }
  0x6d   : > { %s3248_s10 = smov (!%p846_p10, %s843_s10), 17  ;;  %s3250_s21 = smov (!%p856_p11, %s2150_s21), 3 }
  0x6e   : > { %s2149_s22 = sshll.u32 %s3248_s10, 2  ;;  %s858_s29 = scalar_lea.vmem %s3233_s2, %s3250_s21  ;;  %v877_v16 = vlaneseq (!%p2153_p12) }
  0x6f   : > { %s3034_s26 = scalar_lea.vmem %s3231_s0, %s2149_s22  ;;  %s2152_s30 = sshll.u32 %s3250_s21, 2  ;;  %v875_v18 = vld [vmem:[%s858_s29] sm:$0x3] (!%p2153_p12) }
  0x70   : > { %s3042_s5 = scalar_lea.vmem %s3234_s3, %s2152_s30  ;;  %874 = sbr.rel (%p2153_p12) target bundleno = 119 (0x77), region = 74  ;;  %v878_v17 = vshrl.u32 (!%p2153_p12), %v877_v16, 7 }
  0x72   : > { %v879_v19 = vsub.s32 (!%p2153_p12), 0, %v878_v17  ;;  %v883_v20 = vsub.s32 (!%p2153_p12), 1, %v878_v17 }
  0x74   : > { %v880_v21 = vrot.slane (!%p2153_p12), %v875_v18, %v879_v19  ;;  %v884_v22 = vrot.slane (!%p2153_p12), %v875_v18, %v883_v20 }
  0x76   : > { %887 = vst [vmem:[#allocation2] sm:$0xff] (!%p2153_p12), %v880_v21  ;;  %888 = vst [vmem:[#allocation2 + $0x8] sm:$0xff] (!%p2153_p12), %v884_v22 }
  0x77 PF: > { %v2372_v23 = vld [vmem:[%s3044_s15 + $0x4] ss:$8 sps:$4 sm:$0xff]   ;;  %v2376_v25 = vld [vmem:[%s3044_s15] ss:$8 sps:$4 sm:$0xff]   ;;  %v2378_v27 = vld [vmem:[%s3044_s15 + $0x14] ss:$8 sps:$4 sm:$0xff]  }
  0x78   : > { %v2374_v24 = vld [vmem:[%s3044_s15 + $0x104] ss:$8 sps:$4 sm:$0xff]   ;;  %1792 = vmatprep.subr.bf16.mxu0 %v2372_v23  ;;  %v2377_v26 = vld [vmem:[%s3044_s15 + $0x100] ss:$8 sps:$4 sm:$0xff]   ;;  %v2380_v28 = vld [vmem:[%s3044_s15 + $0x114] ss:$8 sps:$4 sm:$0xff]  }
  0x79   : > { %1833 = vmatprep.subr.bf16.mxu1 %v2374_v24  ;;  %1793 = vmatpush1.bf16.msra.mxu0 %v2376_v25  ;;  %v2382_v29 = vld [vmem:[%s3044_s15 + $0x10] ss:$8 sps:$4 sm:$0xff]   ;;  %v2384_v31 = vld [vmem:[%s3044_s15 + $0x24] ss:$8 sps:$4 sm:$0xff]   ;;  %v2388_v33 = vld [vmem:[%s3044_s15 + $0x20] ss:$8 sps:$4 sm:$0xff]  }
  0x7a   : > { %1834 = vmatpush1.bf16.msra.mxu1 %v2377_v26  ;;  %1794 = vmatprep.subr.bf16.mxu0 %v2378_v27  ;;  %v2383_v30 = vld [vmem:[%s3044_s15 + $0x110] ss:$8 sps:$4 sm:$0xff]   ;;  %v2386_v32 = vld [vmem:[%s3044_s15 + $0x124] ss:$8 sps:$4 sm:$0xff]   ;;  %v2389_v34 = vld [vmem:[%s3044_s15 + $0x120] ss:$8 sps:$4 sm:$0xff]  }
  0x7b   : > { %1835 = vmatprep.subr.bf16.mxu1 %v2380_v28  ;;  %v2390_v35 = vld [vmem:[%s3044_s15 + $0x34] ss:$8 sps:$4 sm:$0xff]   ;;  %v2394_v37 = vld [vmem:[%s3044_s15 + $0x30] ss:$8 sps:$4 sm:$0xff]   ;;  %v2396_v39 = vld [vmem:[%s3044_s15 + $0x44] ss:$8 sps:$4 sm:$0xff]  }
  0x7c   : > { %v2392_v36 = vld [vmem:[%s3044_s15 + $0x134] ss:$8 sps:$4 sm:$0xff]   ;;  %v2395_v38 = vld [vmem:[%s3044_s15 + $0x130] ss:$8 sps:$4 sm:$0xff]   ;;  %v2398_v40 = vld [vmem:[%s3044_s15 + $0x144] ss:$8 sps:$4 sm:$0xff]  }
  0x7d   : > { %1795 = vmatpush1.bf16.msra.mxu0 %v2382_v29  ;;  %v2400_v41 = vld [vmem:[%s3044_s15 + $0x40] ss:$8 sps:$4 sm:$0xff]   ;;  %v2402_v43 = vld [vmem:[%s3044_s15 + $0x54] ss:$8 sps:$4 sm:$0xff]   ;;  %v2406_v45 = vld [vmem:[%s3044_s15 + $0x50] ss:$8 sps:$4 sm:$0xff]  }
  0x7e   : > { %1836 = vmatpush1.bf16.msra.mxu1 %v2383_v30  ;;  %1796 = vmatprep.subr.bf16.mxu0 %v2384_v31  ;;  %v2401_v42 = vld [vmem:[%s3044_s15 + $0x140] ss:$8 sps:$4 sm:$0xff]   ;;  %v2404_v44 = vld [vmem:[%s3044_s15 + $0x154] ss:$8 sps:$4 sm:$0xff]   ;;  %v2407_v46 = vld [vmem:[%s3044_s15 + $0x150] ss:$8 sps:$4 sm:$0xff]  }
  0x7f   : > { %1837 = vmatprep.subr.bf16.mxu1 %v2386_v32  ;;  %v2408_v47 = vld [vmem:[%s3044_s15 + $0x64] ss:$8 sps:$4 sm:$0xff]   ;;  %v2412_v49 = vld [vmem:[%s3044_s15 + $0x60] ss:$8 sps:$4 sm:$0xff]   ;;  %v2414_v51 = vld [vmem:[%s3044_s15 + $0x74] ss:$8 sps:$4 sm:$0xff]  }
  0x80   : > { %v2410_v48 = vld [vmem:[%s3044_s15 + $0x164] ss:$8 sps:$4 sm:$0xff]   ;;  %v2413_v50 = vld [vmem:[%s3044_s15 + $0x160] ss:$8 sps:$4 sm:$0xff]   ;;  %v2416_v52 = vld [vmem:[%s3044_s15 + $0x174] ss:$8 sps:$4 sm:$0xff]  }
  0x81   : > { %1797 = vmatpush1.bf16.msra.mxu0 %v2388_v33  ;;  %v2418_v53 = vld [vmem:[%s3044_s15 + $0x70] ss:$8 sps:$4 sm:$0xff]   ;;  %v2420_v55 = vld [vmem:[%s3044_s15 + $0x84] ss:$8 sps:$4 sm:$0xff]   ;;  %v2424_v57 = vld [vmem:[%s3044_s15 + $0x80] ss:$8 sps:$4 sm:$0xff]  }
  0x82   : > { %1838 = vmatpush1.bf16.msra.mxu1 %v2389_v34  ;;  %1798 = vmatprep.subr.bf16.mxu0 %v2390_v35  ;;  %v2419_v54 = vld [vmem:[%s3044_s15 + $0x170] ss:$8 sps:$4 sm:$0xff]   ;;  %v2422_v56 = vld [vmem:[%s3044_s15 + $0x184] ss:$8 sps:$4 sm:$0xff]   ;;  %v2425_v58 = vld [vmem:[%s3044_s15 + $0x180] ss:$8 sps:$4 sm:$0xff]  }
  0x83   : > { %1839 = vmatprep.subr.bf16.mxu1 %v2392_v36  ;;  %v2426_v59 = vld [vmem:[%s3044_s15 + $0x94] ss:$8 sps:$4 sm:$0xff]   ;;  %v2430_v61 = vld [vmem:[%s3044_s15 + $0x90] ss:$8 sps:$4 sm:$0xff]   ;;  %v2432_v63 = vld [vmem:[%s3044_s15 + $0xa4] ss:$8 sps:$4 sm:$0xff]  }
  0x84   : > { %v2428_v60 = vld [vmem:[%s3044_s15 + $0x194] ss:$8 sps:$4 sm:$0xff]   ;;  %v2431_v62 = vld [vmem:[%s3044_s15 + $0x190] ss:$8 sps:$4 sm:$0xff]   ;;  %v2434_v0 = vld [vmem:[%s3044_s15 + $0x1a4] ss:$8 sps:$4 sm:$0xff]  }
  0x85   : > { %1799 = vmatpush1.bf16.msra.mxu0 %v2394_v37  ;;  %v2436_v1 = vld [vmem:[%s3044_s15 + $0xa0] ss:$8 sps:$4 sm:$0xff]   ;;  %v2438_v3 = vld [vmem:[%s3044_s15 + $0xb4] ss:$8 sps:$4 sm:$0xff]   ;;  %v2442_v8 = vld [vmem:[%s3044_s15 + $0xb0] ss:$8 sps:$4 sm:$0xff]  }
  0x86   : > { %1840 = vmatpush1.bf16.msra.mxu1 %v2395_v38  ;;  %1800 = vmatprep.subr.bf16.mxu0 %v2396_v39  ;;  %v2437_v2 = vld [vmem:[%s3044_s15 + $0x1a0] ss:$8 sps:$4 sm:$0xff]   ;;  %v2440_v4 = vld [vmem:[%s3044_s15 + $0x1b4] ss:$8 sps:$4 sm:$0xff]   ;;  %v2443_v9 = vld [vmem:[%s3044_s15 + $0x1b0] ss:$8 sps:$4 sm:$0xff]  }
  0x87   : > { %1841 = vmatprep.subr.bf16.mxu1 %v2398_v40  ;;  %v891_v5 = vld [vmem:[%s3034_s26] sm:$0xff]  ;;  %v892_v7 = vld [vmem:[%s3034_s26 + $0x8] sm:$0xff]  ;;  %v2444_v11 = vld [vmem:[%s3044_s15 + $0xc4] ss:$8 sps:$4 sm:$0xff]   ;;  %p2307_p13 = scmp.ne.s32.totalorder %s2635_s14, 1 }
  0x88   : > { %v2155_v6 = vcombine.high %v891_v5, %v891_v5  ;;  %v2157_v10 = vcombine.high %v892_v7, %v892_v7  ;;  %v2446_v12 = vld [vmem:[%s3044_s15 + $0x1c4] ss:$8 sps:$4 sm:$0xff]   ;;  %v2448_v13 = vld [vmem:[%s3044_s15 + $0xc0] ss:$8 sps:$4 sm:$0xff]   ;;  %v2450_v15 = vld [vmem:[%s3044_s15 + $0xd4] ss:$8 sps:$4 sm:$0xff]   ;;  %v2154_v29 = vcombine.low %v891_v5, %v891_v5  ;;  %v2156_v30 = vcombine.low %v892_v7, %v892_v7 }
  0x89   : > { %1801 = vmatpush1.bf16.msra.mxu0 %v2400_v41  ;;  %v2449_v14 = vld [vmem:[%s3044_s15 + $0x1c0] ss:$8 sps:$4 sm:$0xff]   ;;  %v2452_v16 = vld [vmem:[%s3044_s15 + $0x1d4] ss:$8 sps:$4 sm:$0xff]   ;;  %v2454_v17 = vld [vmem:[%s3044_s15 + $0xd0] ss:$8 sps:$4 sm:$0xff]  }
  0x8a   : > { %1842 = vmatpush1.bf16.msra.mxu1 %v2401_v42  ;;  %1802 = vmatprep.subr.bf16.mxu0 %v2402_v43  ;;  %v2455_v18 = vld [vmem:[%s3044_s15 + $0x1d0] ss:$8 sps:$4 sm:$0xff]   ;;  %v2456_v19 = vld [vmem:[%s3044_s15 + $0xe4] ss:$8 sps:$4 sm:$0xff]   ;;  %v2460_v21 = vld [vmem:[%s3044_s15 + $0xe0] ss:$8 sps:$4 sm:$0xff]  }
  0x8b   : > { %1843 = vmatprep.subr.bf16.mxu1 %v2404_v44  ;;  %1824 = vmatprep.mubr.bf16.mxu0 %v2155_v6  ;;  %v2458_v20 = vld [vmem:[%s3044_s15 + $0x1e4] ss:$8 sps:$4 sm:$0xff]   ;;  %v2461_v22 = vld [vmem:[%s3044_s15 + $0x1e0] ss:$8 sps:$4 sm:$0xff]   ;;  %v2462_v23 = vld [vmem:[%s3044_s15 + $0xf4] ss:$8 sps:$4 sm:$0xff]  }
  0x8c   : > { %1865 = vmatprep.mubr.bf16.mxu1 %v2157_v10  ;;  %v2464_v24 = vld [vmem:[%s3044_s15 + $0x1f4] ss:$8 sps:$4 sm:$0xff]   ;;  %v2466_v25 = vld [vmem:[%s3044_s15 + $0xf0] ss:$8 sps:$4 sm:$0xff]   ;;  %v2474_v27 = vld [vmem:[%s3044_s15 + $0x204] ss:$8 sps:$4 sm:$0xff]  }
  0x8d   : > { %1803 = vmatpush1.bf16.msra.mxu0 %v2406_v45  ;;  %v2467_v26 = vld [vmem:[%s3044_s15 + $0x1f0] ss:$8 sps:$4 sm:$0xff]   ;;  %v2477_v28 = vld [vmem:[%s3044_s15 + $0x304] ss:$8 sps:$4 sm:$0xff]   ;;  %v2472_v31 = vld [vmem:[%s3044_s15 + $0x200] ss:$8 sps:$4 sm:$0xff]  }
  0x8e   : > { %1844 = vmatpush1.bf16.msra.mxu1 %v2407_v46  ;;  %1804 = vmatprep.subr.bf16.mxu0 %v2408_v47  ;;  %v2475_v32 = vld [vmem:[%s3044_s15 + $0x300] ss:$8 sps:$4 sm:$0xff]   ;;  %v2480_v33 = vld [vmem:[%s3044_s15 + $0x214] ss:$8 sps:$4 sm:$0xff]   ;;  %v2478_v35 = vld [vmem:[%s3044_s15 + $0x210] ss:$8 sps:$4 sm:$0xff]  }
  0x8f   : > { %1845 = vmatprep.subr.bf16.mxu1 %v2410_v48  ;;  %v2483_v34 = vld [vmem:[%s3044_s15 + $0x314] ss:$8 sps:$4 sm:$0xff]   ;;  %v2481_v36 = vld [vmem:[%s3044_s15 + $0x310] ss:$8 sps:$4 sm:$0xff]   ;;  %v2486_v37 = vld [vmem:[%s3044_s15 + $0x224] ss:$8 sps:$4 sm:$0xff]  }
  0x90   : > { %v2489_v38 = vld [vmem:[%s3044_s15 + $0x324] ss:$8 sps:$4 sm:$0xff]   ;;  %v2484_v39 = vld [vmem:[%s3044_s15 + $0x220] ss:$8 sps:$4 sm:$0xff]   ;;  %v2492_v41 = vld [vmem:[%s3044_s15 + $0x234] ss:$8 sps:$4 sm:$0xff]  }
  0x91   : > { %1805 = vmatpush1.bf16.msra.mxu0 %v2412_v49  ;;  %v2487_v40 = vld [vmem:[%s3044_s15 + $0x320] ss:$8 sps:$4 sm:$0xff]   ;;  %v2495_v42 = vld [vmem:[%s3044_s15 + $0x334] ss:$8 sps:$4 sm:$0xff]   ;;  %v2490_v43 = vld [vmem:[%s3044_s15 + $0x230] ss:$8 sps:$4 sm:$0xff]  }
  0x92   : > { %1846 = vmatpush1.bf16.msra.mxu1 %v2413_v50  ;;  %1806 = vmatprep.subr.bf16.mxu0 %v2414_v51  ;;  %v2493_v44 = vld [vmem:[%s3044_s15 + $0x330] ss:$8 sps:$4 sm:$0xff]   ;;  %v2498_v45 = vld [vmem:[%s3044_s15 + $0x244] ss:$8 sps:$4 sm:$0xff]   ;;  %v2496_v47 = vld [vmem:[%s3044_s15 + $0x240] ss:$8 sps:$4 sm:$0xff]  }
  0x93   : > { %1847 = vmatprep.subr.bf16.mxu1 %v2416_v52  ;;  %v2501_v46 = vld [vmem:[%s3044_s15 + $0x344] ss:$8 sps:$4 sm:$0xff]   ;;  %v2499_v48 = vld [vmem:[%s3044_s15 + $0x340] ss:$8 sps:$4 sm:$0xff]   ;;  %v2504_v49 = vld [vmem:[%s3044_s15 + $0x254] ss:$8 sps:$4 sm:$0xff]  }
  0x94   : > { %v2507_v50 = vld [vmem:[%s3044_s15 + $0x354] ss:$8 sps:$4 sm:$0xff]   ;;  %v2502_v51 = vld [vmem:[%s3044_s15 + $0x250] ss:$8 sps:$4 sm:$0xff]   ;;  %v2537_v10 = vld [vmem:[%s3044_s15 + $0x3a4] ss:$8 sps:$4 sm:$0xff]  }
  0x95   : > { %1807 = vmatpush1.bf16.msra.mxu0 %v2418_v53  ;;  %v2505_v52 = vld [vmem:[%s3044_s15 + $0x350] ss:$8 sps:$4 sm:$0xff]   ;;  %v2510_v53 = vld [vmem:[%s3044_s15 + $0x264] ss:$8 sps:$4 sm:$0xff]   ;;  %v2528_v5 = vld [vmem:[%s3044_s15 + $0x294] ss:$8 sps:$4 sm:$0xff]  }
  0x96   : > { %1848 = vmatpush1.bf16.msra.mxu1 %v2419_v54  ;;  %1808 = vmatprep.subr.bf16.mxu0 %v2420_v55  ;;  %v2513_v54 = vld [vmem:[%s3044_s15 + $0x364] ss:$8 sps:$4 sm:$0xff]   ;;  %v2531_v6 = vld [vmem:[%s3044_s15 + $0x394] ss:$8 sps:$4 sm:$0xff]   ;;  %v2526_v7 = vld [vmem:[%s3044_s15 + $0x290] ss:$8 sps:$4 sm:$0xff]  }
  0x97   : > { %1849 = vmatprep.subr.bf16.mxu1 %v2422_v56  ;;  %v3140_v55 = vld [vmem:[%s3034_s26 + $0x10] sm:$0xff] }
  0x98   : > { %v2508_v56 = vld [vmem:[%s3044_s15 + $0x260] ss:$8 sps:$4 sm:$0xff]  }
  0x99   : > { %1809 = vmatpush1.bf16.msra.mxu0 %v2424_v57  ;;  %v2511_v57 = vld [vmem:[%s3044_s15 + $0x360] ss:$8 sps:$4 sm:$0xff]  }
  0x9a   : > { %1850 = vmatpush1.bf16.msra.mxu1 %v2425_v58  ;;  %1810 = vmatprep.subr.bf16.mxu0 %v2426_v59  ;;  %v2159_v58 = vcombine.high %v3140_v55, %v3140_v55  ;;  %v3147_v59 = vld [vmem:[%s3034_s26 + $0x18] sm:$0xff] }
  0x9b   : > { %1851 = vmatprep.subr.bf16.mxu1 %v2428_v60  ;;  %v2516_v60 = vld [vmem:[%s3044_s15 + $0x274] ss:$8 sps:$4 sm:$0xff]  }
  0x9d   : > { %1811 = vmatpush1.bf16.msra.mxu0 %v2430_v61  ;;  %v2161_v61 = vcombine.high %v3147_v59, %v3147_v59 }
  0x9e   : > { %1852 = vmatpush1.bf16.msra.mxu1 %v2431_v62  ;;  %1812 = vmatprep.subr.bf16.mxu0 %v2432_v63  ;;  %v2519_v62 = vld [vmem:[%s3044_s15 + $0x374] ss:$8 sps:$4 sm:$0xff]   ;;  %v2514_v63 = vld [vmem:[%s3044_s15 + $0x270] ss:$8 sps:$4 sm:$0xff]  }
  0x9f   : > { %1853 = vmatprep.subr.bf16.mxu1 %v2434_v0  ;;  %v2517_v0 = vld [vmem:[%s3044_s15 + $0x370] ss:$8 sps:$4 sm:$0xff]  }
  0xa1   : > { %1813 = vmatpush1.bf16.msra.mxu0 %v2436_v1  ;;  %v2522_v1 = vld [vmem:[%s3044_s15 + $0x284] ss:$8 sps:$4 sm:$0xff]  }
  0xa2   : > { %1854 = vmatpush1.bf16.msra.mxu1 %v2437_v2  ;;  %1814 = vmatprep.subr.bf16.mxu0 %v2438_v3  ;;  %v2525_v2 = vld [vmem:[%s3044_s15 + $0x384] ss:$8 sps:$4 sm:$0xff]   ;;  %v2520_v3 = vld [vmem:[%s3044_s15 + $0x280] ss:$8 sps:$4 sm:$0xff]  }
  0xa3   : > { %1855 = vmatprep.subr.bf16.mxu1 %v2440_v4  ;;  %v2523_v4 = vld [vmem:[%s3044_s15 + $0x380] ss:$8 sps:$4 sm:$0xff]  }
  0xa5   : > { %1815 = vmatpush1.bf16.msra.mxu0 %v2442_v8  ;;  %v2529_v8 = vld [vmem:[%s3044_s15 + $0x390] ss:$8 sps:$4 sm:$0xff]  }
  0xa6   : > { %1856 = vmatpush1.bf16.msra.mxu1 %v2443_v9  ;;  %1816 = vmatprep.subr.bf16.mxu0 %v2444_v11  ;;  %v2534_v9 = vld [vmem:[%s3044_s15 + $0x2a4] ss:$8 sps:$4 sm:$0xff]   ;;  %v2532_v11 = vld [vmem:[%s3044_s15 + $0x2a0] ss:$8 sps:$4 sm:$0xff]  }
  0xa7   : > { %1857 = vmatprep.subr.bf16.mxu1 %v2446_v12  ;;  %v2535_v12 = vld [vmem:[%s3044_s15 + $0x3a0] ss:$8 sps:$4 sm:$0xff]  }
  0xa9   : > { %1817 = vmatpush1.bf16.msra.mxu0 %v2448_v13  ;;  %v2540_v13 = vld [vmem:[%s3044_s15 + $0x2b4] ss:$8 sps:$4 sm:$0xff]  }
  0xaa   : > { %1858 = vmatpush1.bf16.msra.mxu1 %v2449_v14  ;;  %1818 = vmatprep.subr.bf16.mxu0 %v2450_v15  ;;  %v2543_v14 = vld [vmem:[%s3044_s15 + $0x3b4] ss:$8 sps:$4 sm:$0xff]   ;;  %v2538_v15 = vld [vmem:[%s3044_s15 + $0x2b0] ss:$8 sps:$4 sm:$0xff]  }
  0xab   : > { %1859 = vmatprep.subr.bf16.mxu1 %v2452_v16  ;;  %v2541_v16 = vld [vmem:[%s3044_s15 + $0x3b0] ss:$8 sps:$4 sm:$0xff]  }
  0xad   : > { %1819 = vmatpush1.bf16.msra.mxu0 %v2454_v17  ;;  %v2546_v17 = vld [vmem:[%s3044_s15 + $0x2c4] ss:$8 sps:$4 sm:$0xff]  }
  0xae   : > { %1860 = vmatpush1.bf16.msra.mxu1 %v2455_v18  ;;  %1820 = vmatprep.subr.bf16.mxu0 %v2456_v19  ;;  %v2549_v18 = vld [vmem:[%s3044_s15 + $0x3c4] ss:$8 sps:$4 sm:$0xff]   ;;  %v2544_v19 = vld [vmem:[%s3044_s15 + $0x2c0] ss:$8 sps:$4 sm:$0xff]  }
  0xaf   : > { %1861 = vmatprep.subr.bf16.mxu1 %v2458_v20  ;;  %v2547_v20 = vld [vmem:[%s3044_s15 + $0x3c0] ss:$8 sps:$4 sm:$0xff]  }
  0xb1   : > { %1821 = vmatpush1.bf16.msra.mxu0 %v2460_v21  ;;  %v2552_v21 = vld [vmem:[%s3044_s15 + $0x2d4] ss:$8 sps:$4 sm:$0xff]  }
  0xb2   : > { %1862 = vmatpush1.bf16.msra.mxu1 %v2461_v22  ;;  %1822 = vmatprep.subr.bf16.mxu0 %v2462_v23  ;;  %v2555_v22 = vld [vmem:[%s3044_s15 + $0x3d4] ss:$8 sps:$4 sm:$0xff]   ;;  %v2550_v23 = vld [vmem:[%s3044_s15 + $0x2d0] ss:$8 sps:$4 sm:$0xff]  }
  0xb3   : > { %1863 = vmatprep.subr.bf16.mxu1 %v2464_v24  ;;  %v2553_v24 = vld [vmem:[%s3044_s15 + $0x3d0] ss:$8 sps:$4 sm:$0xff]  }
  0xb5   : > { %1823 = vmatpush1.bf16.msra.mxu0 %v2466_v25  ;;  %v2558_v25 = vld [vmem:[%s3044_s15 + $0x2e4] ss:$8 sps:$4 sm:$0xff]  }
  0xb6   : > { %1864 = vmatpush1.bf16.msra.mxu1 %v2467_v26  ;;  %1874 = vmatprep.subr.bf16.mxu0 %v2474_v27  ;;  %v2561_v26 = vld [vmem:[%s3044_s15 + $0x3e4] ss:$8 sps:$4 sm:$0xff]   ;;  %v2556_v27 = vld [vmem:[%s3044_s15 + $0x2e0] ss:$8 sps:$4 sm:$0xff]  }
  0xb7   : > { %1915 = vmatprep.subr.bf16.mxu1 %v2477_v28  ;;  %v2559_v28 = vld [vmem:[%s3044_s15 + $0x3e0] ss:$8 sps:$4 sm:$0xff]  }
  0xb8   : > { %1825 = vmatmul.mubr.bf16.vlgmr.msra.gmra.mrb[0].mxu0 %v2154_v29  ;;  %v2564_v29 = vld [vmem:[%s3044_s15 + $0x2f4] ss:$8 sps:$4 sm:$0xff]  }
  0xb9   : > { %1866 = vmatmul.mubr.bf16.vlgmr.msra.gmra.mrb[0].mxu1 %v2156_v30  ;;  %1875 = vmatpush1.bf16.msra.mxu0 %v2472_v31  ;;  %v2567_v30 = vld [vmem:[%s3044_s15 + $0x3f4] ss:$8 sps:$4 sm:$0xff]   ;;  %v2562_v31 = vld [vmem:[%s3044_s15 + $0x2f0] ss:$8 sps:$4 sm:$0xff]  }
  0xba   : > { %1916 = vmatpush1.bf16.msra.mxu1 %v2475_v32  ;;  %1876 = vmatprep.subr.bf16.mxu0 %v2480_v33  ;;  %v2565_v32 = vld [vmem:[%s3044_s15 + $0x3f0] ss:$8 sps:$4 sm:$0xff]   ;;  %v2572_v33 = vld [vmem:[%s3044_s15 + $0x404] ss:$8 sps:$4 sm:$0xff]  }
  0xbb   : > { %1917 = vmatprep.subr.bf16.mxu1 %v2483_v34  ;;  %1906 = vmatprep.mubr.bf16.mxu0 %v2159_v58  ;;  %v2158_v34 = vcombine.low %v3140_v55, %v3140_v55 }
  0xbc   : > { %1947 = vmatprep.mubr.bf16.mxu1 %v2161_v61 }
  0xbd   : > { %1877 = vmatpush1.bf16.msra.mxu0 %v2478_v35  ;;  %v2160_v35 = vcombine.low %v3147_v59, %v3147_v59 }
  0xbe   : > { %1918 = vmatpush1.bf16.msra.mxu1 %v2481_v36  ;;  %1878 = vmatprep.subr.bf16.mxu0 %v2486_v37  ;;  %v2570_v36 = vld [vmem:[%s3044_s15 + $0x400] ss:$8 sps:$4 sm:$0xff]   ;;  %v2577_v37 = vld [vmem:[%s3044_s15 + $0x414] ss:$8 sps:$4 sm:$0xff]  }
  0xbf   : > { %1919 = vmatprep.subr.bf16.mxu1 %v2489_v38  ;;  %v2575_v38 = vld [vmem:[%s3044_s15 + $0x410] ss:$8 sps:$4 sm:$0xff]  }
  0xc1   : > { %1879 = vmatpush1.bf16.msra.mxu0 %v2484_v39  ;;  %v2653_v39 = vmov 0  }
  0xc2   : > { %1920 = vmatpush1.bf16.msra.mxu1 %v2487_v40  ;;  %1880 = vmatprep.subr.bf16.mxu0 %v2492_v41  ;;  %v2580_v40 = vld [vmem:[%s3044_s15 + $0x424] ss:$8 sps:$4 sm:$0xff]   ;;  %v2578_v41 = vld [vmem:[%s3044_s15 + $0x420] ss:$8 sps:$4 sm:$0xff]  }
  0xc3   : > { %1921 = vmatprep.subr.bf16.mxu1 %v2495_v42  ;;  %v2583_v42 = vld [vmem:[%s3044_s15 + $0x434] ss:$8 sps:$4 sm:$0xff]  }
  0xc5   : > { %1881 = vmatpush1.bf16.msra.mxu0 %v2490_v43  ;;  %v2581_v43 = vld [vmem:[%s3044_s15 + $0x430] ss:$8 sps:$4 sm:$0xff]  }
  0xc6   : > { %1922 = vmatpush1.bf16.msra.mxu1 %v2493_v44  ;;  %1882 = vmatprep.subr.bf16.mxu0 %v2498_v45  ;;  %v2586_v44 = vld [vmem:[%s3044_s15 + $0x444] ss:$8 sps:$4 sm:$0xff]   ;;  %v2584_v45 = vld [vmem:[%s3044_s15 + $0x440] ss:$8 sps:$4 sm:$0xff]  }
  0xc7   : > { %1923 = vmatprep.subr.bf16.mxu1 %v2501_v46  ;;  %v2589_v46 = vld [vmem:[%s3044_s15 + $0x454] ss:$8 sps:$4 sm:$0xff]  }
  0xc9   : > { %1883 = vmatpush1.bf16.msra.mxu0 %v2496_v47  ;;  %v2587_v47 = vld [vmem:[%s3044_s15 + $0x450] ss:$8 sps:$4 sm:$0xff]  }
  0xca   : > { %1924 = vmatpush1.bf16.msra.mxu1 %v2499_v48  ;;  %1884 = vmatprep.subr.bf16.mxu0 %v2504_v49  ;;  %v2592_v48 = vld [vmem:[%s3044_s15 + $0x464] ss:$8 sps:$4 sm:$0xff]   ;;  %v2590_v49 = vld [vmem:[%s3044_s15 + $0x460] ss:$8 sps:$4 sm:$0xff]  }
  0xcb   : > { %1925 = vmatprep.subr.bf16.mxu1 %v2507_v50  ;;  %v2595_v50 = vld [vmem:[%s3044_s15 + $0x474] ss:$8 sps:$4 sm:$0xff]  }
  0xcd   : > { %1885 = vmatpush1.bf16.msra.mxu0 %v2502_v51  ;;  %v2593_v51 = vld [vmem:[%s3044_s15 + $0x470] ss:$8 sps:$4 sm:$0xff]  }
  0xce   : > { %1926 = vmatpush1.bf16.msra.mxu1 %v2505_v52  ;;  %1886 = vmatprep.subr.bf16.mxu0 %v2510_v53  ;;  %v2596_v52 = vld [vmem:[%s3034_s26 + $0x20] ss:$0 sps:$4 sm:$0xff]  }
  0xcf   : > { %1927 = vmatprep.subr.bf16.mxu1 %v2513_v54 }
  0xd1   : > { %1887 = vmatpush1.bf16.msra.mxu0 %v2508_v56 }
  0xd2   : > { %1928 = vmatpush1.bf16.msra.mxu1 %v2511_v57  ;;  %1888 = vmatprep.subr.bf16.mxu0 %v2516_v60 }
  0xd3   : > { %1929 = vmatprep.subr.bf16.mxu1 %v2519_v62 }
  0xd5   : > { %1889 = vmatpush1.bf16.msra.mxu0 %v2514_v63 }
  0xd6   : > { %1930 = vmatpush1.bf16.msra.mxu1 %v2517_v0  ;;  %1890 = vmatprep.subr.bf16.mxu0 %v2522_v1 }
  0xd7   : > { %1931 = vmatprep.subr.bf16.mxu1 %v2525_v2 }
  0xd9   : > { %1891 = vmatpush1.bf16.msra.mxu0 %v2520_v3 }
  0xda   : > { %1932 = vmatpush1.bf16.msra.mxu1 %v2523_v4  ;;  %1892 = vmatprep.subr.bf16.mxu0 %v2528_v5 }
  0xdb   : > { %1933 = vmatprep.subr.bf16.mxu1 %v2531_v6 }
  0xdd   : > { %1893 = vmatpush1.bf16.msra.mxu0 %v2526_v7 }
  0xde   : > { %1934 = vmatpush1.bf16.msra.mxu1 %v2529_v8  ;;  %1894 = vmatprep.subr.bf16.mxu0 %v2534_v9 }
  0xdf   : > { %1935 = vmatprep.subr.bf16.mxu1 %v2537_v10 }
  0xe1   : > { %1895 = vmatpush1.bf16.msra.mxu0 %v2532_v11  ;;  %v889_v11 = vld [vmem:[#allocation2] sm:$0xff] }
  0xe2   : > { %1936 = vmatpush1.bf16.msra.mxu1 %v2535_v12  ;;  %1896 = vmatprep.subr.bf16.mxu0 %v2540_v13 }
  0xe3   : > { %1937 = vmatprep.subr.bf16.mxu1 %v2543_v14  ;;  %v890_v14 = vld [vmem:[#allocation2 + $0x8] sm:$0xff] }
  0xe5   : > { %1897 = vmatpush1.bf16.msra.mxu0 %v2538_v15 }
  0xe6   : > { %1938 = vmatpush1.bf16.msra.mxu1 %v2541_v16  ;;  %1898 = vmatprep.subr.bf16.mxu0 %v2546_v17 }
  0xe7   : > { %1939 = vmatprep.subr.bf16.mxu1 %v2549_v18 }
  0xe9   : > { %1899 = vmatpush1.bf16.msra.mxu0 %v2544_v19 }
  0xea   : > { %1940 = vmatpush1.bf16.msra.mxu1 %v2547_v20  ;;  %1900 = vmatprep.subr.bf16.mxu0 %v2552_v21 }
  0xeb   : > { %1941 = vmatprep.subr.bf16.mxu1 %v2555_v22 }
  0xed   : > { %1901 = vmatpush1.bf16.msra.mxu0 %v2550_v23 }
  0xee   : > { %1942 = vmatpush1.bf16.msra.mxu1 %v2553_v24  ;;  %1902 = vmatprep.subr.bf16.mxu0 %v2558_v25 }
  0xef   : > { %1943 = vmatprep.subr.bf16.mxu1 %v2561_v26 }
  0xf1   : > { %1903 = vmatpush1.bf16.msra.mxu0 %v2556_v27 }
  0xf2   : > { %1944 = vmatpush1.bf16.msra.mxu1 %v2559_v28  ;;  %1904 = vmatprep.subr.bf16.mxu0 %v2564_v29 }
  0xf3   : > { %1945 = vmatprep.subr.bf16.mxu1 %v2567_v30 }
  0xf5   : > { %1905 = vmatpush1.bf16.msra.mxu0 %v2562_v31 }
  0xf6   : > { %1946 = vmatpush1.bf16.msra.mxu1 %v2565_v32  ;;  %1956 = vmatprep.subr.bf16.mxu0 %v2572_v33 }
  0xf8   : > { %1907 = vmatmul.mubr.bf16.vlgmr.msra.gmra.mrb[4].mxu0 %v2158_v34 }
  0xf9   : > { %1948 = vmatmul.mubr.bf16.vlgmr.msra.gmra.mrb[4].mxu1 %v2160_v35  ;;  %1957 = vmatpush1.bf16.msra.mxu0 %v2570_v36 }
  0xfa   : > { %1988 = vmatprep.mubr.bf16.mxu0 %v2653_v39  ;;  %1958 = vmatprep.subr.bf16.mxu0 %v2577_v37 }
  0xfd   : > { %1959 = vmatpush1.bf16.msra.mxu0 %v2575_v38 }
  0xfe   : > { %1960 = vmatprep.subr.bf16.mxu0 %v2580_v40 }
 0x101   : > { %1961 = vmatpush1.bf16.msra.mxu0 %v2578_v41 }
 0x102   : > { %1962 = vmatprep.subr.bf16.mxu0 %v2583_v42 }
 0x105   : > { %1963 = vmatpush1.bf16.msra.mxu0 %v2581_v43 }
 0x106   : > { %1964 = vmatprep.subr.bf16.mxu0 %v2586_v44 }
 0x109   : > { %1965 = vmatpush1.bf16.msra.mxu0 %v2584_v45 }
 0x10a   : > { %1966 = vmatprep.subr.bf16.mxu0 %v2589_v46 }
 0x10d   : > { %1967 = vmatpush1.bf16.msra.mxu0 %v2587_v47 }
 0x10e   : > { %1968 = vmatprep.subr.bf16.mxu0 %v2592_v48 }
 0x111   : > { %1969 = vmatpush1.bf16.msra.mxu0 %v2590_v49 }
 0x112   : > { %1970 = vmatprep.subr.bf16.mxu0 %v2595_v50 }
 0x115   : > { %1971 = vmatpush1.bf16.msra.mxu0 %v2593_v51 }
 0x118   : > { %1989 = vmatmul.mubr.bf16.vlgmr.msra.gmra.mrb[8].mxu0 %v2596_v52 }
 0x18b   : > { %v1826_v53 = vpop.f32.mrb[0].mxu0 }
 0x18c   : > { %v1867_v54 = vpop.f32.mrb[0].mxu1  ;;  %v1828_v56 = vpop.f32.mrb[1].mxu0 }
 0x18d   : > { %v1868_v55 = vadd.f32 %v1867_v54, %v1826_v53  ;;  %v1869_v57 = vpop.f32.mrb[1].mxu1  ;;  %v1830_v59 = vpop.f32.mrb[2].mxu0 }
 0x18e   : > { %v1870_v58 = vadd.f32 %v1869_v57, %v1828_v56  ;;  %v1871_v60 = vpop.f32.mrb[2].mxu1  ;;  %v1831_v61 = vpop.f32.mrb[3].mxu0 }
 0x18f   : > { %v1872_v62 = vpop.f32.mrb[3].mxu1 }
 0x1cb   : > { %v1908_v63 = vpop.f32.mrb[4].mxu0 }
 0x1cc   : > { %v1949_v0 = vpop.f32.mrb[4].mxu1  ;;  %v1909_v1 = vadd.f32 %v1908_v63, %v1868_v55  ;;  %v1910_v2 = vpop.f32.mrb[5].mxu0 }
 0x1cd   : > { %v1951_v3 = vpop.f32.mrb[5].mxu1  ;;  %v1911_v4 = vadd.f32 %v1910_v2, %v1870_v58  ;;  %v1912_v5 = vpop.f32.mrb[6].mxu0 }
 0x1ce   : > { %v1953_v6 = vpop.f32.mrb[6].mxu1  ;;  %v1950_v7 = vadd.f32 %v1949_v0, %v1909_v1  ;;  %v1913_v8 = vpop.f32.mrb[7].mxu0 }
 0x1cf   : > { %v1954_v9 = vpop.f32.mrb[7].mxu1  ;;  %v1952_v10 = vadd.f32 %v1951_v3, %v1911_v4 }
 0x1eb   : > { %v1990_v12 = vpop.f32.mrb[8].mxu0  ;;  %2004 = sbr.rel (%p2307_p13) target bundleno = 510 (0x1fe), region = 78 }
 0x1ec   : > { %v1991_v13 = vadd.f32 %v1990_v12, %v1950_v7  ;;  %v1992_v15 = vpop.f32.mrb[9].mxu0 }
 0x1ed   : > { %v1993_v16 = vadd.f32 %v1992_v15, %v1952_v10  ;;  %v1994_v17 = vpop.f32.mrb[10].mxu0 }
 0x1ee   : > { %v1997_v18 = vadd.f32 %v1991_v13, %v889_v11  ;;  %v1995_v19 = vpop.f32.mrb[11].mxu0 }
 0x1ef   : > { %v1998_v20 = vadd.f32 %v1993_v16, %v890_v14 }
 0x1f0   : > { %1999 = vst [vmem:[#allocation2] sm:$0xff] %v1997_v18 }
 0x1f1   : > { %2000 = vst [vmem:[#allocation2 + $0x8] sm:$0xff] %v1998_v20 }
 0x1f7   : > { %v2005_v21 = vld [vmem:[#allocation2] sm:$0xff] }
 0x1f8   : > { %v2006_v22 = vld [vmem:[#allocation2 + $0x8] sm:$0xff]  ;;  %v2007_v23 = vmax.f32 %v2005_v21, 0.0 }
 0x1f9   : > { %v2008_v24 = vmax.f32 %v2006_v22, 0.0 }
 0x1fb   : > { %v2312_v25 = vpack.c.bf16 %v2008_v24, %v2007_v23 }
 0x1fd   : > { %2017 = vst [vmem:[%s3042_s5] sm:$0xff] %v2312_v25 }
 0x1fe PF: > { %s13_s18 = sadd.s32 1, %s2651_s18   ;;  %s3235_s12 = smov %s2631_s13 }
 0x1ff   : > { %p10_p0 = scmp.ge.s32.totalorder %s13_s18, 6   ;;  %s3236_s13 = smov %s2725_s25 }
 0x200   : > { %s3237_s14 = smov %s2643_s16  ;;  %s3238_s15 = smov %s2647_s17 }
 0x201   : > { %s3239_s16 = smov %s3242_s19  ;;  %s3240_s17 = smov %s3246_s20 }
 0x202   :  { %12 = sbr.rel (!%p10_p0) target bundleno = 4 (0x4), region = 119 }

// kernel: resnet18_forward.16
= control target key start
LH: loop header
LB: loop body
LE: loop exit
PB: predicated region body
PF: predicated region fallthrough
CT: control target
= control target key end

     0   :  { %s4047_s0 = inlined_call_operand.vmem [shape: bf16[8,4608], index: 0, kind: input, shape index: {}]   ;;  %s4048_s1 = inlined_call_operand.vmem [shape: bf16[4608,512], index: 1, kind: input, shape index: {}]   ;;  %s4049_s2 = inlined_call_operand.vmem [shape: f32[1,512], index: 2, kind: input, shape index: {}]   ;;  %s4050_s3 = inlined_call_operand.vmem [shape: bf16[8,256], index: 3, kind: input, shape index: {}]   ;;  %s4051_s4 = inlined_call_operand.vmem [shape: bf16[256,512], index: 4, kind: input, shape index: {}]   ;;  %s4052_s5 = inlined_call_operand.vmem [shape: bf16[8,512], index: 5, kind: output, shape index: {}]  }
   0x1   :  { %4053 = sst [smem:[#allocation5_spill]] %s4048_s1 }
   0x2   :  { %4054 = sst [smem:[#allocation6_spill]] %s4051_s4 }
   0x3   :  { %s3336_s18 = smov 0   ;;  %s3338_s19 = smov 0  }
   0x4   :  { %s3340_s20 = smov 0   ;;  %s3342_s21 = smov 0  }
   0x5   :  { %s3344_s22 = smov 0   ;;  %s3346_s23 = smov 0  }
   0x6   :  { %s3348_s24 = smov 0   ;;  %s3350_s25 = smov 0  }
   0x7   :  { %s3352_s26 = smov 0  }
   0x8 LB: > { %s27_s27 = sadd.s32 1, %s3295_s24  ;;  %s30_s28 = sadd.s32 1, %s3299_s25  ;;  %s3303_s26 = sphi %s3352_s26, %s15_s26   ;;  %s3299_s25 = sphi %s3350_s25, %s4066_s25   ;;  %s3295_s24 = sphi %s3348_s24, %s4065_s24   ;;  %s3291_s23 = sphi %s3346_s23, %s4064_s23   ;;  %s3287_s22 = sphi %s3344_s22, %s4063_s22   ;;  %s3283_s21 = sphi %s3342_s21, %s4062_s21   ;;  %s3279_s20 = sphi %s3340_s20, %s4061_s20   ;;  %s3275_s19 = sphi %s3338_s19, %s4060_s19   ;;  %s3271_s18 = sphi %s3336_s18, %s4059_s18  }
   0x9   : > { %p28_p0 = scmp.ge.s32.totalorder %s27_s27, 4  ;;  %p78_p1 = scmp.ne.s32.totalorder %s3283_s21, %s3279_s20 }
   0xa   : > { %p79_p2 = scmp.eq.s32.totalorder %s3303_s26, 0  ;;  %p156_p5 = scmp.ne.s32.totalorder %s3275_s19, %s3271_s18 }
   0xb   : > { %s4068_s27 = smov (%p28_p0, %s27_s27), 0  ;;  %s4070_s28 = smov (!%p28_p0, %s30_s28), %s3299_s25 }
   0xc   : > { %p3389_p3 = por %p79_p2, %p78_p1  ;;  %p32_p4 = scmp.ge.s32.totalorder %s4070_s28, 2 }
   0xd   : > { %s66_s30 = ssub.s32 %s3295_s24, %s4068_s27  ;;  %s71_s6 = sadd.s32 1, %s3283_s21 }
   0xe   : > { %s4072_s28 = smov (%p32_p4, %s4070_s28), 0  ;;  %p3400_p6 = por %p156_p5, %p79_p2 }
   0xf   : > { %s67_s8 = ssub.s32 %s3299_s25, %s4072_s28  ;;  %s149_s9 = sadd.s32 1, %s3275_s19 }
  0x10   : > { %s68_s10 = sor.u32 %s67_s8, %s66_s30  ;;  %p147_p7 = scmp.eq.s32.totalorder %s67_s8, 0 }
  0x11   : > { %p69_p8 = scmp.eq.s32.totalorder %s68_s10, 0  ;;  %p2675_p9 = scmp.ge.s32.totalorder %s3303_s26, 8 }
  0x12   : > { %s3408_s11 = scalar_select %p147_p7, %s3275_s19, %s149_s9  }
  0x13   : > { %s3411_s12 = scalar_select %p69_p8, %s3283_s21, %s71_s6  }
  0x14   : > { %218 = sbr.rel (%p2675_p9) target bundleno = 135 (0x87), region = 20 }
  0x1b   : > { %234 = sbr.rel (!%p3389_p3) target bundleno = 109 (0x6d), region = 28  ;;  %s236_s13 = sand.u32 (%p3389_p3), 1, %s3283_s21  }
  0x1c   : > { %s2883_s14 = smul.u32 (%p3389_p3), 1152, %s236_s13  ;;  %s2676_s15 = sshll.u32 (%p3389_p3), %s3299_s25, 1 }
  0x1d   : > { %s2880_s16 = smul.u32 (%p3389_p3), 576, %s3295_s24  ;;  %s4057_s1 = sld [smem:[#allocation5_spill]] (%p3389_p3) }
  0x1e   : > { %s3427_s29 = scalar_lea.vmem (%p3389_p3), [#allocation3], %s2883_s14 }
  0x1f   : > { %s242_s17 = sadd.s32 (%p3389_p3), %s2880_s16, %s2676_s15 }
  0x20   : > { %s2678_s30 = sshll.u32 (%p3389_p3), %s242_s17, 2 }
  0x23   : > { %s3422_s6 = scalar_lea.vmem %s4057_s1, %s2678_s30 }
  0x24   : > { %v558_v0 = vld [vmem:[%s3422_s6] sm:$0xff]  ;;  %v560_v1 = vld [vmem:[%s3422_s6 + $0x10] sm:$0xff] }
  0x25   : > { %v562_v2 = vld [vmem:[%s3422_s6 + $0x20] sm:$0xff]  ;;  %559 = vst [vmem:[%s3427_s29] sm:$0xff] %v558_v0  ;;  %561 = vst [vmem:[%s3427_s29 + $0x8] sm:$0xff] %v560_v1  ;;  %v564_v3 = vld [vmem:[%s3422_s6 + $0x30] sm:$0xff] }
  0x26   : > { %563 = vst [vmem:[%s3427_s29 + $0x10] sm:$0xff] %v562_v2  ;;  %v566_v4 = vld [vmem:[%s3422_s6 + $0x40] sm:$0xff]  ;;  %v568_v5 = vld [vmem:[%s3422_s6 + $0x50] sm:$0xff]  ;;  %565 = vst [vmem:[%s3427_s29 + $0x18] sm:$0xff] %v564_v3 }
  0x27   : > { %567 = vst [vmem:[%s3427_s29 + $0x20] sm:$0xff] %v566_v4  ;;  %569 = vst [vmem:[%s3427_s29 + $0x28] sm:$0xff] %v568_v5  ;;  %v570_v6 = vld [vmem:[%s3422_s6 + $0x60] sm:$0xff]  ;;  %v572_v7 = vld [vmem:[%s3422_s6 + $0x70] sm:$0xff] }
  0x28   : > { %v574_v8 = vld [vmem:[%s3422_s6 + $0x80] sm:$0xff]  ;;  %571 = vst [vmem:[%s3427_s29 + $0x30] sm:$0xff] %v570_v6  ;;  %573 = vst [vmem:[%s3427_s29 + $0x38] sm:$0xff] %v572_v7  ;;  %v576_v9 = vld [vmem:[%s3422_s6 + $0x90] sm:$0xff] }
  0x29   : > { %575 = vst [vmem:[%s3427_s29 + $0x40] sm:$0xff] %v574_v8  ;;  %v578_v10 = vld [vmem:[%s3422_s6 + $0xa0] sm:$0xff]  ;;  %v580_v11 = vld [vmem:[%s3422_s6 + $0xb0] sm:$0xff]  ;;  %577 = vst [vmem:[%s3427_s29 + $0x48] sm:$0xff] %v576_v9 }
  0x2a   : > { %579 = vst [vmem:[%s3427_s29 + $0x50] sm:$0xff] %v578_v10  ;;  %581 = vst [vmem:[%s3427_s29 + $0x58] sm:$0xff] %v580_v11  ;;  %v582_v12 = vld [vmem:[%s3422_s6 + $0xc0] sm:$0xff]  ;;  %v584_v13 = vld [vmem:[%s3422_s6 + $0xd0] sm:$0xff] }
  0x2b   : > { %v586_v14 = vld [vmem:[%s3422_s6 + $0xe0] sm:$0xff]  ;;  %583 = vst [vmem:[%s3427_s29 + $0x60] sm:$0xff] %v582_v12  ;;  %585 = vst [vmem:[%s3427_s29 + $0x68] sm:$0xff] %v584_v13  ;;  %v588_v15 = vld [vmem:[%s3422_s6 + $0xf0] sm:$0xff] }
  0x2c   : > { %587 = vst [vmem:[%s3427_s29 + $0x70] sm:$0xff] %v586_v14  ;;  %v590_v16 = vld [vmem:[%s3422_s6 + $0x100] sm:$0xff]  ;;  %v592_v17 = vld [vmem:[%s3422_s6 + $0x110] sm:$0xff]  ;;  %589 = vst [vmem:[%s3427_s29 + $0x78] sm:$0xff] %v588_v15 }
  0x2d   : > { %591 = vst [vmem:[%s3427_s29 + $0x80] sm:$0xff] %v590_v16  ;;  %593 = vst [vmem:[%s3427_s29 + $0x88] sm:$0xff] %v592_v17  ;;  %v594_v18 = vld [vmem:[%s3422_s6 + $0x120] sm:$0xff]  ;;  %v596_v19 = vld [vmem:[%s3422_s6 + $0x130] sm:$0xff] }
  0x2e   : > { %v598_v20 = vld [vmem:[%s3422_s6 + $0x140] sm:$0xff]  ;;  %595 = vst [vmem:[%s3427_s29 + $0x90] sm:$0xff] %v594_v18  ;;  %597 = vst [vmem:[%s3427_s29 + $0x98] sm:$0xff] %v596_v19  ;;  %v600_v21 = vld [vmem:[%s3422_s6 + $0x150] sm:$0xff] }
  0x2f   : > { %599 = vst [vmem:[%s3427_s29 + $0xa0] sm:$0xff] %v598_v20  ;;  %v602_v22 = vld [vmem:[%s3422_s6 + $0x160] sm:$0xff]  ;;  %v604_v23 = vld [vmem:[%s3422_s6 + $0x170] sm:$0xff]  ;;  %601 = vst [vmem:[%s3427_s29 + $0xa8] sm:$0xff] %v600_v21 }
  0x30   : > { %603 = vst [vmem:[%s3427_s29 + $0xb0] sm:$0xff] %v602_v22  ;;  %605 = vst [vmem:[%s3427_s29 + $0xb8] sm:$0xff] %v604_v23  ;;  %v606_v24 = vld [vmem:[%s3422_s6 + $0x180] sm:$0xff]  ;;  %v608_v25 = vld [vmem:[%s3422_s6 + $0x190] sm:$0xff] }
  0x31   : > { %v610_v26 = vld [vmem:[%s3422_s6 + $0x1a0] sm:$0xff]  ;;  %607 = vst [vmem:[%s3427_s29 + $0xc0] sm:$0xff] %v606_v24  ;;  %609 = vst [vmem:[%s3427_s29 + $0xc8] sm:$0xff] %v608_v25  ;;  %v612_v27 = vld [vmem:[%s3422_s6 + $0x1b0] sm:$0xff] }
  0x32   : > { %611 = vst [vmem:[%s3427_s29 + $0xd0] sm:$0xff] %v610_v26  ;;  %v614_v28 = vld [vmem:[%s3422_s6 + $0x1c0] sm:$0xff]  ;;  %v616_v29 = vld [vmem:[%s3422_s6 + $0x1d0] sm:$0xff]  ;;  %613 = vst [vmem:[%s3427_s29 + $0xd8] sm:$0xff] %v612_v27 }
  0x33   : > { %615 = vst [vmem:[%s3427_s29 + $0xe0] sm:$0xff] %v614_v28  ;;  %617 = vst [vmem:[%s3427_s29 + $0xe8] sm:$0xff] %v616_v29  ;;  %v618_v30 = vld [vmem:[%s3422_s6 + $0x1e0] sm:$0xff]  ;;  %v620_v31 = vld [vmem:[%s3422_s6 + $0x1f0] sm:$0xff] }
  0x34   : > { %v622_v32 = vld [vmem:[%s3422_s6 + $0x200] sm:$0xff]  ;;  %619 = vst [vmem:[%s3427_s29 + $0xf0] sm:$0xff] %v618_v30  ;;  %621 = vst [vmem:[%s3427_s29 + $0xf8] sm:$0xff] %v620_v31  ;;  %v624_v33 = vld [vmem:[%s3422_s6 + $0x210] sm:$0xff] }
  0x35   : > { %623 = vst [vmem:[%s3427_s29 + $0x100] sm:$0xff] %v622_v32  ;;  %v626_v34 = vld [vmem:[%s3422_s6 + $0x220] sm:$0xff]  ;;  %v628_v35 = vld [vmem:[%s3422_s6 + $0x230] sm:$0xff]  ;;  %625 = vst [vmem:[%s3427_s29 + $0x108] sm:$0xff] %v624_v33 }
  0x36   : > { %627 = vst [vmem:[%s3427_s29 + $0x110] sm:$0xff] %v626_v34  ;;  %629 = vst [vmem:[%s3427_s29 + $0x118] sm:$0xff] %v628_v35  ;;  %v630_v36 = vld [vmem:[%s3422_s6 + $0x240] sm:$0xff]  ;;  %v632_v37 = vld [vmem:[%s3422_s6 + $0x250] sm:$0xff] }
  0x37   : > { %v634_v38 = vld [vmem:[%s3422_s6 + $0x260] sm:$0xff]  ;;  %631 = vst [vmem:[%s3427_s29 + $0x120] sm:$0xff] %v630_v36  ;;  %633 = vst [vmem:[%s3427_s29 + $0x128] sm:$0xff] %v632_v37  ;;  %v636_v39 = vld [vmem:[%s3422_s6 + $0x270] sm:$0xff] }
  0x38   : > { %635 = vst [vmem:[%s3427_s29 + $0x130] sm:$0xff] %v634_v38  ;;  %v638_v40 = vld [vmem:[%s3422_s6 + $0x280] sm:$0xff]  ;;  %v640_v41 = vld [vmem:[%s3422_s6 + $0x290] sm:$0xff]  ;;  %637 = vst [vmem:[%s3427_s29 + $0x138] sm:$0xff] %v636_v39 }
  0x39   : > { %639 = vst [vmem:[%s3427_s29 + $0x140] sm:$0xff] %v638_v40  ;;  %641 = vst [vmem:[%s3427_s29 + $0x148] sm:$0xff] %v640_v41  ;;  %v642_v42 = vld [vmem:[%s3422_s6 + $0x2a0] sm:$0xff]  ;;  %v644_v43 = vld [vmem:[%s3422_s6 + $0x2b0] sm:$0xff] }
  0x3a   : > { %v646_v44 = vld [vmem:[%s3422_s6 + $0x2c0] sm:$0xff]  ;;  %643 = vst [vmem:[%s3427_s29 + $0x150] sm:$0xff] %v642_v42  ;;  %645 = vst [vmem:[%s3427_s29 + $0x158] sm:$0xff] %v644_v43  ;;  %v648_v45 = vld [vmem:[%s3422_s6 + $0x2d0] sm:$0xff] }
  0x3b   : > { %647 = vst [vmem:[%s3427_s29 + $0x160] sm:$0xff] %v646_v44  ;;  %v650_v46 = vld [vmem:[%s3422_s6 + $0x2e0] sm:$0xff]  ;;  %v652_v47 = vld [vmem:[%s3422_s6 + $0x2f0] sm:$0xff]  ;;  %649 = vst [vmem:[%s3427_s29 + $0x168] sm:$0xff] %v648_v45 }
  0x3c   : > { %651 = vst [vmem:[%s3427_s29 + $0x170] sm:$0xff] %v650_v46  ;;  %653 = vst [vmem:[%s3427_s29 + $0x178] sm:$0xff] %v652_v47  ;;  %v654_v48 = vld [vmem:[%s3422_s6 + $0x300] sm:$0xff]  ;;  %v656_v49 = vld [vmem:[%s3422_s6 + $0x310] sm:$0xff] }
  0x3d   : > { %v658_v50 = vld [vmem:[%s3422_s6 + $0x320] sm:$0xff]  ;;  %655 = vst [vmem:[%s3427_s29 + $0x180] sm:$0xff] %v654_v48  ;;  %657 = vst [vmem:[%s3427_s29 + $0x188] sm:$0xff] %v656_v49  ;;  %v660_v51 = vld [vmem:[%s3422_s6 + $0x330] sm:$0xff] }
  0x3e   : > { %659 = vst [vmem:[%s3427_s29 + $0x190] sm:$0xff] %v658_v50  ;;  %v662_v52 = vld [vmem:[%s3422_s6 + $0x340] sm:$0xff]  ;;  %v664_v53 = vld [vmem:[%s3422_s6 + $0x350] sm:$0xff]  ;;  %661 = vst [vmem:[%s3427_s29 + $0x198] sm:$0xff] %v660_v51 }
  0x3f   : > { %663 = vst [vmem:[%s3427_s29 + $0x1a0] sm:$0xff] %v662_v52  ;;  %665 = vst [vmem:[%s3427_s29 + $0x1a8] sm:$0xff] %v664_v53  ;;  %v666_v54 = vld [vmem:[%s3422_s6 + $0x360] sm:$0xff]  ;;  %v668_v55 = vld [vmem:[%s3422_s6 + $0x370] sm:$0xff] }
  0x40   : > { %v670_v56 = vld [vmem:[%s3422_s6 + $0x380] sm:$0xff]  ;;  %667 = vst [vmem:[%s3427_s29 + $0x1b0] sm:$0xff] %v666_v54  ;;  %669 = vst [vmem:[%s3427_s29 + $0x1b8] sm:$0xff] %v668_v55  ;;  %v672_v57 = vld [vmem:[%s3422_s6 + $0x390] sm:$0xff] }
  0x41   : > { %671 = vst [vmem:[%s3427_s29 + $0x1c0] sm:$0xff] %v670_v56  ;;  %v674_v58 = vld [vmem:[%s3422_s6 + $0x3a0] sm:$0xff]  ;;  %v676_v59 = vld [vmem:[%s3422_s6 + $0x3b0] sm:$0xff]  ;;  %673 = vst [vmem:[%s3427_s29 + $0x1c8] sm:$0xff] %v672_v57 }
  0x42   : > { %675 = vst [vmem:[%s3427_s29 + $0x1d0] sm:$0xff] %v674_v58  ;;  %677 = vst [vmem:[%s3427_s29 + $0x1d8] sm:$0xff] %v676_v59  ;;  %v678_v60 = vld [vmem:[%s3422_s6 + $0x3c0] sm:$0xff]  ;;  %v680_v61 = vld [vmem:[%s3422_s6 + $0x3d0] sm:$0xff] }
  0x43   : > { %v682_v62 = vld [vmem:[%s3422_s6 + $0x3e0] sm:$0xff]  ;;  %679 = vst [vmem:[%s3427_s29 + $0x1e0] sm:$0xff] %v678_v60  ;;  %681 = vst [vmem:[%s3427_s29 + $0x1e8] sm:$0xff] %v680_v61  ;;  %v684_v63 = vld [vmem:[%s3422_s6 + $0x3f0] sm:$0xff] }
  0x44   : > { %683 = vst [vmem:[%s3427_s29 + $0x1f0] sm:$0xff] %v682_v62  ;;  %v686_v0 = vld [vmem:[%s3422_s6 + $0x400] sm:$0xff]  ;;  %v688_v1 = vld [vmem:[%s3422_s6 + $0x410] sm:$0xff]  ;;  %685 = vst [vmem:[%s3427_s29 + $0x1f8] sm:$0xff] %v684_v63 }
  0x45   : > { %687 = vst [vmem:[%s3427_s29 + $0x200] sm:$0xff] %v686_v0  ;;  %689 = vst [vmem:[%s3427_s29 + $0x208] sm:$0xff] %v688_v1  ;;  %v690_v2 = vld [vmem:[%s3422_s6 + $0x420] sm:$0xff]  ;;  %v692_v3 = vld [vmem:[%s3422_s6 + $0x430] sm:$0xff] }
  0x46   : > { %v694_v4 = vld [vmem:[%s3422_s6 + $0x440] sm:$0xff]  ;;  %691 = vst [vmem:[%s3427_s29 + $0x210] sm:$0xff] %v690_v2  ;;  %693 = vst [vmem:[%s3427_s29 + $0x218] sm:$0xff] %v692_v3  ;;  %v696_v5 = vld [vmem:[%s3422_s6 + $0x450] sm:$0xff] }
  0x47   : > { %695 = vst [vmem:[%s3427_s29 + $0x220] sm:$0xff] %v694_v4  ;;  %v698_v6 = vld [vmem:[%s3422_s6 + $0x460] sm:$0xff]  ;;  %v700_v7 = vld [vmem:[%s3422_s6 + $0x470] sm:$0xff]  ;;  %697 = vst [vmem:[%s3427_s29 + $0x228] sm:$0xff] %v696_v5 }
  0x48   : > { %699 = vst [vmem:[%s3427_s29 + $0x230] sm:$0xff] %v698_v6  ;;  %701 = vst [vmem:[%s3427_s29 + $0x238] sm:$0xff] %v700_v7  ;;  %v702_v8 = vld [vmem:[%s3422_s6 + $0x480] sm:$0xff]  ;;  %v704_v9 = vld [vmem:[%s3422_s6 + $0x490] sm:$0xff] }
  0x49   : > { %v706_v10 = vld [vmem:[%s3422_s6 + $0x4a0] sm:$0xff]  ;;  %703 = vst [vmem:[%s3427_s29 + $0x240] sm:$0xff] %v702_v8  ;;  %705 = vst [vmem:[%s3427_s29 + $0x248] sm:$0xff] %v704_v9  ;;  %v708_v11 = vld [vmem:[%s3422_s6 + $0x4b0] sm:$0xff] }
  0x4a   : > { %707 = vst [vmem:[%s3427_s29 + $0x250] sm:$0xff] %v706_v10  ;;  %v710_v12 = vld [vmem:[%s3422_s6 + $0x4c0] sm:$0xff]  ;;  %v712_v13 = vld [vmem:[%s3422_s6 + $0x4d0] sm:$0xff]  ;;  %709 = vst [vmem:[%s3427_s29 + $0x258] sm:$0xff] %v708_v11 }
  0x4b   : > { %711 = vst [vmem:[%s3427_s29 + $0x260] sm:$0xff] %v710_v12  ;;  %713 = vst [vmem:[%s3427_s29 + $0x268] sm:$0xff] %v712_v13  ;;  %v714_v14 = vld [vmem:[%s3422_s6 + $0x4e0] sm:$0xff]  ;;  %v716_v15 = vld [vmem:[%s3422_s6 + $0x4f0] sm:$0xff] }
  0x4c   : > { %v718_v16 = vld [vmem:[%s3422_s6 + $0x500] sm:$0xff]  ;;  %715 = vst [vmem:[%s3427_s29 + $0x270] sm:$0xff] %v714_v14  ;;  %717 = vst [vmem:[%s3427_s29 + $0x278] sm:$0xff] %v716_v15  ;;  %v720_v17 = vld [vmem:[%s3422_s6 + $0x510] sm:$0xff] }
  0x4d   : > { %719 = vst [vmem:[%s3427_s29 + $0x280] sm:$0xff] %v718_v16  ;;  %v722_v18 = vld [vmem:[%s3422_s6 + $0x520] sm:$0xff]  ;;  %v724_v19 = vld [vmem:[%s3422_s6 + $0x530] sm:$0xff]  ;;  %721 = vst [vmem:[%s3427_s29 + $0x288] sm:$0xff] %v720_v17 }
  0x4e   : > { %723 = vst [vmem:[%s3427_s29 + $0x290] sm:$0xff] %v722_v18  ;;  %725 = vst [vmem:[%s3427_s29 + $0x298] sm:$0xff] %v724_v19  ;;  %v726_v20 = vld [vmem:[%s3422_s6 + $0x540] sm:$0xff]  ;;  %v728_v21 = vld [vmem:[%s3422_s6 + $0x550] sm:$0xff] }
  0x4f   : > { %v730_v22 = vld [vmem:[%s3422_s6 + $0x560] sm:$0xff]  ;;  %727 = vst [vmem:[%s3427_s29 + $0x2a0] sm:$0xff] %v726_v20  ;;  %729 = vst [vmem:[%s3427_s29 + $0x2a8] sm:$0xff] %v728_v21  ;;  %v732_v23 = vld [vmem:[%s3422_s6 + $0x570] sm:$0xff] }
  0x50   : > { %731 = vst [vmem:[%s3427_s29 + $0x2b0] sm:$0xff] %v730_v22  ;;  %v734_v24 = vld [vmem:[%s3422_s6 + $0x580] sm:$0xff]  ;;  %v736_v25 = vld [vmem:[%s3422_s6 + $0x590] sm:$0xff]  ;;  %733 = vst [vmem:[%s3427_s29 + $0x2b8] sm:$0xff] %v732_v23 }
  0x51   : > { %735 = vst [vmem:[%s3427_s29 + $0x2c0] sm:$0xff] %v734_v24  ;;  %737 = vst [vmem:[%s3427_s29 + $0x2c8] sm:$0xff] %v736_v25  ;;  %v738_v26 = vld [vmem:[%s3422_s6 + $0x5a0] sm:$0xff]  ;;  %v740_v27 = vld [vmem:[%s3422_s6 + $0x5b0] sm:$0xff] }
  0x52   : > { %v742_v28 = vld [vmem:[%s3422_s6 + $0x5c0] sm:$0xff]  ;;  %739 = vst [vmem:[%s3427_s29 + $0x2d0] sm:$0xff] %v738_v26  ;;  %741 = vst [vmem:[%s3427_s29 + $0x2d8] sm:$0xff] %v740_v27  ;;  %v744_v29 = vld [vmem:[%s3422_s6 + $0x5d0] sm:$0xff] }
  0x53   : > { %743 = vst [vmem:[%s3427_s29 + $0x2e0] sm:$0xff] %v742_v28  ;;  %v746_v30 = vld [vmem:[%s3422_s6 + $0x5e0] sm:$0xff]  ;;  %v748_v31 = vld [vmem:[%s3422_s6 + $0x5f0] sm:$0xff]  ;;  %745 = vst [vmem:[%s3427_s29 + $0x2e8] sm:$0xff] %v744_v29 }
  0x54   : > { %747 = vst [vmem:[%s3427_s29 + $0x2f0] sm:$0xff] %v746_v30  ;;  %749 = vst [vmem:[%s3427_s29 + $0x2f8] sm:$0xff] %v748_v31  ;;  %v750_v32 = vld [vmem:[%s3422_s6 + $0x600] sm:$0xff]  ;;  %v752_v33 = vld [vmem:[%s3422_s6 + $0x610] sm:$0xff] }
  0x55   : > { %v754_v34 = vld [vmem:[%s3422_s6 + $0x620] sm:$0xff]  ;;  %751 = vst [vmem:[%s3427_s29 + $0x300] sm:$0xff] %v750_v32  ;;  %753 = vst [vmem:[%s3427_s29 + $0x308] sm:$0xff] %v752_v33  ;;  %v756_v35 = vld [vmem:[%s3422_s6 + $0x630] sm:$0xff] }
  0x56   : > { %755 = vst [vmem:[%s3427_s29 + $0x310] sm:$0xff] %v754_v34  ;;  %v758_v36 = vld [vmem:[%s3422_s6 + $0x640] sm:$0xff]  ;;  %v760_v37 = vld [vmem:[%s3422_s6 + $0x650] sm:$0xff]  ;;  %757 = vst [vmem:[%s3427_s29 + $0x318] sm:$0xff] %v756_v35 }
  0x57   : > { %759 = vst [vmem:[%s3427_s29 + $0x320] sm:$0xff] %v758_v36  ;;  %761 = vst [vmem:[%s3427_s29 + $0x328] sm:$0xff] %v760_v37  ;;  %v762_v38 = vld [vmem:[%s3422_s6 + $0x660] sm:$0xff]  ;;  %v764_v39 = vld [vmem:[%s3422_s6 + $0x670] sm:$0xff] }
  0x58   : > { %v766_v40 = vld [vmem:[%s3422_s6 + $0x680] sm:$0xff]  ;;  %763 = vst [vmem:[%s3427_s29 + $0x330] sm:$0xff] %v762_v38  ;;  %765 = vst [vmem:[%s3427_s29 + $0x338] sm:$0xff] %v764_v39  ;;  %v768_v41 = vld [vmem:[%s3422_s6 + $0x690] sm:$0xff] }
  0x59   : > { %767 = vst [vmem:[%s3427_s29 + $0x340] sm:$0xff] %v766_v40  ;;  %v770_v42 = vld [vmem:[%s3422_s6 + $0x6a0] sm:$0xff]  ;;  %v772_v43 = vld [vmem:[%s3422_s6 + $0x6b0] sm:$0xff]  ;;  %769 = vst [vmem:[%s3427_s29 + $0x348] sm:$0xff] %v768_v41 }
  0x5a   : > { %771 = vst [vmem:[%s3427_s29 + $0x350] sm:$0xff] %v770_v42  ;;  %773 = vst [vmem:[%s3427_s29 + $0x358] sm:$0xff] %v772_v43  ;;  %v774_v44 = vld [vmem:[%s3422_s6 + $0x6c0] sm:$0xff]  ;;  %v776_v45 = vld [vmem:[%s3422_s6 + $0x6d0] sm:$0xff] }
  0x5b   : > { %v778_v46 = vld [vmem:[%s3422_s6 + $0x6e0] sm:$0xff]  ;;  %775 = vst [vmem:[%s3427_s29 + $0x360] sm:$0xff] %v774_v44  ;;  %777 = vst [vmem:[%s3427_s29 + $0x368] sm:$0xff] %v776_v45  ;;  %v780_v47 = vld [vmem:[%s3422_s6 + $0x6f0] sm:$0xff] }
  0x5c   : > { %779 = vst [vmem:[%s3427_s29 + $0x370] sm:$0xff] %v778_v46  ;;  %v782_v48 = vld [vmem:[%s3422_s6 + $0x700] sm:$0xff]  ;;  %v784_v49 = vld [vmem:[%s3422_s6 + $0x710] sm:$0xff]  ;;  %781 = vst [vmem:[%s3427_s29 + $0x378] sm:$0xff] %v780_v47 }
  0x5d   : > { %783 = vst [vmem:[%s3427_s29 + $0x380] sm:$0xff] %v782_v48  ;;  %785 = vst [vmem:[%s3427_s29 + $0x388] sm:$0xff] %v784_v49  ;;  %v786_v50 = vld [vmem:[%s3422_s6 + $0x720] sm:$0xff]  ;;  %v788_v51 = vld [vmem:[%s3422_s6 + $0x730] sm:$0xff] }
  0x5e   : > { %v790_v52 = vld [vmem:[%s3422_s6 + $0x740] sm:$0xff]  ;;  %787 = vst [vmem:[%s3427_s29 + $0x390] sm:$0xff] %v786_v50  ;;  %789 = vst [vmem:[%s3427_s29 + $0x398] sm:$0xff] %v788_v51  ;;  %v792_v53 = vld [vmem:[%s3422_s6 + $0x750] sm:$0xff] }
  0x5f   : > { %791 = vst [vmem:[%s3427_s29 + $0x3a0] sm:$0xff] %v790_v52  ;;  %v794_v54 = vld [vmem:[%s3422_s6 + $0x760] sm:$0xff]  ;;  %v796_v55 = vld [vmem:[%s3422_s6 + $0x770] sm:$0xff]  ;;  %793 = vst [vmem:[%s3427_s29 + $0x3a8] sm:$0xff] %v792_v53 }
  0x60   : > { %795 = vst [vmem:[%s3427_s29 + $0x3b0] sm:$0xff] %v794_v54  ;;  %797 = vst [vmem:[%s3427_s29 + $0x3b8] sm:$0xff] %v796_v55  ;;  %v798_v56 = vld [vmem:[%s3422_s6 + $0x780] sm:$0xff]  ;;  %v800_v57 = vld [vmem:[%s3422_s6 + $0x790] sm:$0xff] }
  0x61   : > { %v802_v58 = vld [vmem:[%s3422_s6 + $0x7a0] sm:$0xff]  ;;  %799 = vst [vmem:[%s3427_s29 + $0x3c0] sm:$0xff] %v798_v56  ;;  %801 = vst [vmem:[%s3427_s29 + $0x3c8] sm:$0xff] %v800_v57  ;;  %v804_v59 = vld [vmem:[%s3422_s6 + $0x7b0] sm:$0xff] }
  0x62   : > { %803 = vst [vmem:[%s3427_s29 + $0x3d0] sm:$0xff] %v802_v58  ;;  %v806_v60 = vld [vmem:[%s3422_s6 + $0x7c0] sm:$0xff]  ;;  %v808_v61 = vld [vmem:[%s3422_s6 + $0x7d0] sm:$0xff]  ;;  %805 = vst [vmem:[%s3427_s29 + $0x3d8] sm:$0xff] %v804_v59 }
  0x63   : > { %807 = vst [vmem:[%s3427_s29 + $0x3e0] sm:$0xff] %v806_v60  ;;  %809 = vst [vmem:[%s3427_s29 + $0x3e8] sm:$0xff] %v808_v61  ;;  %v810_v62 = vld [vmem:[%s3422_s6 + $0x7e0] sm:$0xff]  ;;  %v812_v63 = vld [vmem:[%s3422_s6 + $0x7f0] sm:$0xff] }
  0x64   : > { %v814_v0 = vld [vmem:[%s3422_s6 + $0x800] sm:$0xff]  ;;  %811 = vst [vmem:[%s3427_s29 + $0x3f0] sm:$0xff] %v810_v62  ;;  %813 = vst [vmem:[%s3427_s29 + $0x3f8] sm:$0xff] %v812_v63  ;;  %v816_v1 = vld [vmem:[%s3422_s6 + $0x810] sm:$0xff] }
  0x65   : > { %815 = vst [vmem:[%s3427_s29 + $0x400] sm:$0xff] %v814_v0  ;;  %v818_v2 = vld [vmem:[%s3422_s6 + $0x820] sm:$0xff]  ;;  %v820_v3 = vld [vmem:[%s3422_s6 + $0x830] sm:$0xff]  ;;  %817 = vst [vmem:[%s3427_s29 + $0x408] sm:$0xff] %v816_v1 }
  0x66   : > { %819 = vst [vmem:[%s3427_s29 + $0x410] sm:$0xff] %v818_v2  ;;  %821 = vst [vmem:[%s3427_s29 + $0x418] sm:$0xff] %v820_v3  ;;  %v822_v4 = vld [vmem:[%s3422_s6 + $0x840] sm:$0xff]  ;;  %v824_v5 = vld [vmem:[%s3422_s6 + $0x850] sm:$0xff] }
  0x67   : > { %v826_v6 = vld [vmem:[%s3422_s6 + $0x860] sm:$0xff]  ;;  %823 = vst [vmem:[%s3427_s29 + $0x420] sm:$0xff] %v822_v4  ;;  %825 = vst [vmem:[%s3427_s29 + $0x428] sm:$0xff] %v824_v5  ;;  %v828_v7 = vld [vmem:[%s3422_s6 + $0x870] sm:$0xff] }
  0x68   : > { %827 = vst [vmem:[%s3427_s29 + $0x430] sm:$0xff] %v826_v6  ;;  %v830_v8 = vld [vmem:[%s3422_s6 + $0x880] sm:$0xff]  ;;  %v832_v9 = vld [vmem:[%s3422_s6 + $0x890] sm:$0xff]  ;;  %829 = vst [vmem:[%s3427_s29 + $0x438] sm:$0xff] %v828_v7 }
  0x69   : > { %831 = vst [vmem:[%s3427_s29 + $0x440] sm:$0xff] %v830_v8  ;;  %833 = vst [vmem:[%s3427_s29 + $0x448] sm:$0xff] %v832_v9  ;;  %v834_v10 = vld [vmem:[%s3422_s6 + $0x8a0] sm:$0xff]  ;;  %v836_v11 = vld [vmem:[%s3422_s6 + $0x8b0] sm:$0xff] }
  0x6a   : > { %v838_v12 = vld [vmem:[%s3422_s6 + $0x8c0] sm:$0xff]  ;;  %835 = vst [vmem:[%s3427_s29 + $0x450] sm:$0xff] %v834_v10  ;;  %837 = vst [vmem:[%s3427_s29 + $0x458] sm:$0xff] %v836_v11  ;;  %v840_v13 = vld [vmem:[%s3422_s6 + $0x8d0] sm:$0xff] }
  0x6b   : > { %839 = vst [vmem:[%s3427_s29 + $0x460] sm:$0xff] %v838_v12  ;;  %v842_v14 = vld [vmem:[%s3422_s6 + $0x8e0] sm:$0xff]  ;;  %v844_v15 = vld [vmem:[%s3422_s6 + $0x8f0] sm:$0xff]  ;;  %841 = vst [vmem:[%s3427_s29 + $0x468] sm:$0xff] %v840_v13 }
  0x6c   : > { %843 = vst [vmem:[%s3427_s29 + $0x470] sm:$0xff] %v842_v14  ;;  %845 = vst [vmem:[%s3427_s29 + $0x478] sm:$0xff] %v844_v15 }
  0x6d PF: > { %859 = sbr.rel (!%p3400_p6) target bundleno = 135 (0x87), region = 70  ;;  %s861_s10 = sand.u32 (%p3400_p6), 1, %s3275_s19  }
  0x6e   : > { %s2881_s13 = sshll.u32 (%p3400_p6), %s3299_s25, 3  ;;  %s2679_s14 = sshll.u32 (%p3400_p6), %s861_s10, 8 }
  0x6f   : > { %s4058_s4 = sld [smem:[#allocation6_spill]] (%p3400_p6)  ;;  %s3726_s7 = scalar_lea.vmem (%p3400_p6), [#allocation4], %s2679_s14 }
  0x75   : > { %s3721_s17 = scalar_lea.vmem %s4058_s4, %s2881_s13 }
  0x76   : > { %v956_v16 = vld [vmem:[%s3721_s17] sm:$0xff]  ;;  %v958_v17 = vld [vmem:[%s3721_s17 + $0x10] sm:$0xff] }
  0x77   : > { %v960_v18 = vld [vmem:[%s3721_s17 + $0x20] sm:$0xff]  ;;  %957 = vst [vmem:[%s3726_s7] sm:$0xff] %v956_v16  ;;  %959 = vst [vmem:[%s3726_s7 + $0x8] sm:$0xff] %v958_v17  ;;  %v962_v19 = vld [vmem:[%s3721_s17 + $0x30] sm:$0xff] }
  0x78   : > { %961 = vst [vmem:[%s3726_s7 + $0x10] sm:$0xff] %v960_v18  ;;  %v964_v20 = vld [vmem:[%s3721_s17 + $0x40] sm:$0xff]  ;;  %v966_v21 = vld [vmem:[%s3721_s17 + $0x50] sm:$0xff]  ;;  %963 = vst [vmem:[%s3726_s7 + $0x18] sm:$0xff] %v962_v19 }
  0x79   : > { %965 = vst [vmem:[%s3726_s7 + $0x20] sm:$0xff] %v964_v20  ;;  %967 = vst [vmem:[%s3726_s7 + $0x28] sm:$0xff] %v966_v21  ;;  %v968_v22 = vld [vmem:[%s3721_s17 + $0x60] sm:$0xff]  ;;  %v970_v23 = vld [vmem:[%s3721_s17 + $0x70] sm:$0xff] }
  0x7a   : > { %v972_v24 = vld [vmem:[%s3721_s17 + $0x80] sm:$0xff]  ;;  %969 = vst [vmem:[%s3726_s7 + $0x30] sm:$0xff] %v968_v22  ;;  %971 = vst [vmem:[%s3726_s7 + $0x38] sm:$0xff] %v970_v23  ;;  %v974_v25 = vld [vmem:[%s3721_s17 + $0x90] sm:$0xff] }
  0x7b   : > { %973 = vst [vmem:[%s3726_s7 + $0x40] sm:$0xff] %v972_v24  ;;  %v976_v26 = vld [vmem:[%s3721_s17 + $0xa0] sm:$0xff]  ;;  %v978_v27 = vld [vmem:[%s3721_s17 + $0xb0] sm:$0xff]  ;;  %975 = vst [vmem:[%s3726_s7 + $0x48] sm:$0xff] %v974_v25 }
  0x7c   : > { %977 = vst [vmem:[%s3726_s7 + $0x50] sm:$0xff] %v976_v26  ;;  %979 = vst [vmem:[%s3726_s7 + $0x58] sm:$0xff] %v978_v27  ;;  %v980_v28 = vld [vmem:[%s3721_s17 + $0xc0] sm:$0xff]  ;;  %v982_v29 = vld [vmem:[%s3721_s17 + $0xd0] sm:$0xff] }
  0x7d   : > { %v984_v30 = vld [vmem:[%s3721_s17 + $0xe0] sm:$0xff]  ;;  %981 = vst [vmem:[%s3726_s7 + $0x60] sm:$0xff] %v980_v28  ;;  %983 = vst [vmem:[%s3726_s7 + $0x68] sm:$0xff] %v982_v29  ;;  %v986_v31 = vld [vmem:[%s3721_s17 + $0xf0] sm:$0xff] }
  0x7e   : > { %985 = vst [vmem:[%s3726_s7 + $0x70] sm:$0xff] %v984_v30  ;;  %v988_v32 = vld [vmem:[%s3721_s17 + $0x100] sm:$0xff]  ;;  %v990_v33 = vld [vmem:[%s3721_s17 + $0x110] sm:$0xff]  ;;  %987 = vst [vmem:[%s3726_s7 + $0x78] sm:$0xff] %v986_v31 }
  0x7f   : > { %989 = vst [vmem:[%s3726_s7 + $0x80] sm:$0xff] %v988_v32  ;;  %991 = vst [vmem:[%s3726_s7 + $0x88] sm:$0xff] %v990_v33  ;;  %v992_v34 = vld [vmem:[%s3721_s17 + $0x120] sm:$0xff]  ;;  %v994_v35 = vld [vmem:[%s3721_s17 + $0x130] sm:$0xff] }
  0x80   : > { %v996_v36 = vld [vmem:[%s3721_s17 + $0x140] sm:$0xff]  ;;  %993 = vst [vmem:[%s3726_s7 + $0x90] sm:$0xff] %v992_v34  ;;  %995 = vst [vmem:[%s3726_s7 + $0x98] sm:$0xff] %v994_v35  ;;  %v998_v37 = vld [vmem:[%s3721_s17 + $0x150] sm:$0xff] }
  0x81   : > { %997 = vst [vmem:[%s3726_s7 + $0xa0] sm:$0xff] %v996_v36  ;;  %v1000_v38 = vld [vmem:[%s3721_s17 + $0x160] sm:$0xff]  ;;  %v1002_v39 = vld [vmem:[%s3721_s17 + $0x170] sm:$0xff]  ;;  %999 = vst [vmem:[%s3726_s7 + $0xa8] sm:$0xff] %v998_v37 }
  0x82   : > { %1001 = vst [vmem:[%s3726_s7 + $0xb0] sm:$0xff] %v1000_v38  ;;  %1003 = vst [vmem:[%s3726_s7 + $0xb8] sm:$0xff] %v1002_v39  ;;  %v1004_v40 = vld [vmem:[%s3721_s17 + $0x180] sm:$0xff]  ;;  %v1006_v41 = vld [vmem:[%s3721_s17 + $0x190] sm:$0xff] }
  0x83   : > { %v1008_v42 = vld [vmem:[%s3721_s17 + $0x1a0] sm:$0xff]  ;;  %1005 = vst [vmem:[%s3726_s7 + $0xc0] sm:$0xff] %v1004_v40  ;;  %1007 = vst [vmem:[%s3726_s7 + $0xc8] sm:$0xff] %v1006_v41  ;;  %v1010_v43 = vld [vmem:[%s3721_s17 + $0x1b0] sm:$0xff] }
  0x84   : > { %1009 = vst [vmem:[%s3726_s7 + $0xd0] sm:$0xff] %v1008_v42  ;;  %v1012_v44 = vld [vmem:[%s3721_s17 + $0x1c0] sm:$0xff]  ;;  %v1014_v45 = vld [vmem:[%s3721_s17 + $0x1d0] sm:$0xff]  ;;  %1011 = vst [vmem:[%s3726_s7 + $0xd8] sm:$0xff] %v1010_v43 }
  0x85   : > { %1013 = vst [vmem:[%s3726_s7 + $0xe0] sm:$0xff] %v1012_v44  ;;  %1015 = vst [vmem:[%s3726_s7 + $0xe8] sm:$0xff] %v1014_v45  ;;  %v1016_v46 = vld [vmem:[%s3721_s17 + $0x1e0] sm:$0xff]  ;;  %v1018_v47 = vld [vmem:[%s3721_s17 + $0x1f0] sm:$0xff] }
  0x86   : > { %1017 = vst [vmem:[%s3726_s7 + $0xf0] sm:$0xff] %v1016_v46  ;;  %1019 = vst [vmem:[%s3726_s7 + $0xf8] sm:$0xff] %v1018_v47 }
  0x87 PF: > { %p2682_p10 = scmp.ge.s32.totalorder %s3303_s26, 1  ;;  %p1024_p11 = scmp.lt.s32.totalorder %s3303_s26, 9 }
  0x89   : > { %p1025_p12 = pnand %p2682_p10, %p1024_p11 }
  0x8a   : > { %s1031_s30 = sand.u32 (!%p1025_p12), 1, %s3279_s20   ;;  %s1038_s8 = sand.u32 (!%p1025_p12), 1, %s3271_s18  }
  0x8b   : > { %1028 = sbr.rel (%p1025_p12) target bundleno = 819 (0x333), region = 108  ;;  %s2683_s6 = sshll.u32 (!%p1025_p12), %s1038_s8, 8 }
  0x8c   : > { %s2884_s9 = smul.u32 (!%p1025_p12), 1152, %s1031_s30  ;;  %s2685_s10 = sshll.u32 (!%p1025_p12), %s3291_s23, 1 }
  0x8d   : > { %s1091_s29 = smul.u32 (!%p1025_p12), 9, %s3287_s22  ;;  %p1104_p0 = scmp.lt.s32.totalorder (!%p1025_p12), %s2685_s10, 3 }
  0x8e   : > { %s3812_s1 = scalar_lea.vmem (!%p1025_p12), [#allocation3], %s2884_s9  ;;  %s3814_s4 = scalar_lea.vmem (!%p1025_p12), [#allocation4], %s2683_s6 }
  0x8f   : > { %p1094_p13 = scmp.lt.s32.totalorder (!%p1025_p12), %s1091_s29, 35  ;;  %p2688_p1 = scmp.ne.s32.totalorder (!%p1025_p12), %s3287_s22, 0 }
  0x92   : > { %s4074_s29 = smov (!%p1094_p13, %s1091_s29), 35  ;;  %s4076_s10 = smov (!%p1104_p0, %s2685_s10), 3 }
  0x93   : > { %s2684_s13 = sshll.u32 %s4074_s29, 2  ;;  %s1106_s18 = scalar_lea.vmem %s4049_s2, %s4076_s10  ;;  %v2958_v48 = vld [vmem:[%s3814_s4 + $0x4] ss:$8 sps:$4 sm:$0xff] (!%p2688_p1)   ;;  %v2960_v49 = vld [vmem:[%s3814_s4] ss:$8 sps:$4 sm:$0xff] (!%p2688_p1)   ;;  %v1141_v61 = vld [vmem:[%s4050_s3] sm:$0xff] (!%p2688_p1)  ;;  %v1131_v19 = vlaneseq (!%p2688_p1) }
  0x94   : > { %s3800_s16 = scalar_lea.vmem %s4047_s0, %s2684_s13  ;;  %s2687_s7 = sshll.u32 %s4076_s10, 2  ;;  %1341 = vmatprep.subr.bf16.mxu0 (!%p2688_p1), %v2958_v48  ;;  %v2961_v50 = vld [vmem:[%s3814_s4 + $0x14] ss:$8 sps:$4 sm:$0xff] (!%p2688_p1)   ;;  %v2963_v51 = vld [vmem:[%s3814_s4 + $0x10] ss:$8 sps:$4 sm:$0xff] (!%p2688_p1)   ;;  %v2690_v62 = vcombine.high (!%p2688_p1), %v1141_v61, %v1141_v61  ;;  %v2689_v18 = vcombine.low (!%p2688_p1), %v1141_v61, %v1141_v61 }
  0x95   : > { %s3810_s8 = scalar_lea.vmem %s4052_s5, %s2687_s7  ;;  %1128 = sbr.rel (%p2688_p1) target bundleno = 428 (0x1ac), region = 120  ;;  %1342 = vmatpush1.bf16.msra.mxu0 (!%p2688_p1), %v2960_v49  ;;  %v2964_v52 = vld [vmem:[%s3814_s4 + $0x24] ss:$8 sps:$4 sm:$0xff] (!%p2688_p1)   ;;  %v2966_v53 = vld [vmem:[%s3814_s4 + $0x20] ss:$8 sps:$4 sm:$0xff] (!%p2688_p1)   ;;  %v1132_v20 = vshrl.u32 (!%p2688_p1), %v1131_v19, 7 }
  0x96   : > { %1343 = vmatprep.subr.bf16.mxu0 (!%p2688_p1), %v2961_v50  ;;  %v2967_v54 = vld [vmem:[%s3814_s4 + $0x34] ss:$8 sps:$4 sm:$0xff] (!%p2688_p1)   ;;  %v2969_v55 = vld [vmem:[%s3814_s4 + $0x30] ss:$8 sps:$4 sm:$0xff] (!%p2688_p1)   ;;  %v2970_v56 = vld [vmem:[%s3814_s4 + $0x44] ss:$8 sps:$4 sm:$0xff] (!%p2688_p1)   ;;  %1373 = vmatprep.mubr.bf16.mxu0 (!%p2688_p1), %v2690_v62 }
  0x97   : > { %v2972_v57 = vld [vmem:[%s3814_s4 + $0x40] ss:$8 sps:$4 sm:$0xff] (!%p2688_p1)   ;;  %v2973_v58 = vld [vmem:[%s3814_s4 + $0x54] ss:$8 sps:$4 sm:$0xff] (!%p2688_p1)   ;;  %v2975_v59 = vld [vmem:[%s3814_s4 + $0x50] ss:$8 sps:$4 sm:$0xff] (!%p2688_p1)  }
  0x98   : > { %v2976_v60 = vld [vmem:[%s3814_s4 + $0x64] ss:$8 sps:$4 sm:$0xff] (!%p2688_p1)   ;;  %v2978_v63 = vld [vmem:[%s3814_s4 + $0x60] ss:$8 sps:$4 sm:$0xff] (!%p2688_p1)   ;;  %v2979_v0 = vld [vmem:[%s3814_s4 + $0x74] ss:$8 sps:$4 sm:$0xff] (!%p2688_p1)  }
  0x99   : > { %1344 = vmatpush1.bf16.msra.mxu0 (!%p2688_p1), %v2963_v51  ;;  %v2981_v1 = vld [vmem:[%s3814_s4 + $0x70] ss:$8 sps:$4 sm:$0xff] (!%p2688_p1)   ;;  %v2982_v2 = vld [vmem:[%s3814_s4 + $0x84] ss:$8 sps:$4 sm:$0xff] (!%p2688_p1)   ;;  %v2984_v3 = vld [vmem:[%s3814_s4 + $0x80] ss:$8 sps:$4 sm:$0xff] (!%p2688_p1)  }
  0x9a   : > { %1345 = vmatprep.subr.bf16.mxu0 (!%p2688_p1), %v2964_v52  ;;  %v2985_v4 = vld [vmem:[%s3814_s4 + $0x94] ss:$8 sps:$4 sm:$0xff] (!%p2688_p1)   ;;  %v2987_v5 = vld [vmem:[%s3814_s4 + $0x90] ss:$8 sps:$4 sm:$0xff] (!%p2688_p1)   ;;  %v2988_v6 = vld [vmem:[%s3814_s4 + $0xa4] ss:$8 sps:$4 sm:$0xff] (!%p2688_p1)  }
  0x9b   : > { %v2990_v7 = vld [vmem:[%s3814_s4 + $0xa0] ss:$8 sps:$4 sm:$0xff] (!%p2688_p1)   ;;  %v2991_v8 = vld [vmem:[%s3814_s4 + $0xb4] ss:$8 sps:$4 sm:$0xff] (!%p2688_p1)   ;;  %v2993_v9 = vld [vmem:[%s3814_s4 + $0xb0] ss:$8 sps:$4 sm:$0xff] (!%p2688_p1)  }
  0x9c   : > { %v2994_v10 = vld [vmem:[%s3814_s4 + $0xc4] ss:$8 sps:$4 sm:$0xff]   ;;  %v2996_v11 = vld [vmem:[%s3814_s4 + $0xc0] ss:$8 sps:$4 sm:$0xff]   ;;  %v2997_v12 = vld [vmem:[%s3814_s4 + $0xd4] ss:$8 sps:$4 sm:$0xff]  }
  0x9d   : > { %1346 = vmatpush1.bf16.msra.mxu0 %v2966_v53  ;;  %v2999_v13 = vld [vmem:[%s3814_s4 + $0xd0] ss:$8 sps:$4 sm:$0xff]   ;;  %v3000_v14 = vld [vmem:[%s3814_s4 + $0xe4] ss:$8 sps:$4 sm:$0xff]   ;;  %v3002_v15 = vld [vmem:[%s3814_s4 + $0xe0] ss:$8 sps:$4 sm:$0xff]  }
  0x9e   : > { %1347 = vmatprep.subr.bf16.mxu0 %v2967_v54  ;;  %v3003_v16 = vld [vmem:[%s3814_s4 + $0xf4] ss:$8 sps:$4 sm:$0xff]   ;;  %v3005_v17 = vld [vmem:[%s3814_s4 + $0xf0] ss:$8 sps:$4 sm:$0xff]   ;;  %v1133_v21 = vsub.s32 0, %v1132_v20  ;;  %v1137_v23 = vsub.s32 1, %v1132_v20 }
  0x9f   : > { %v1129_v22 = vld [vmem:[%s1106_s18] sm:$0x3] }
  0xa0   : > { %v1134_v24 = vrot.slane %v1129_v22, %v1133_v21  ;;  %v1138_v25 = vrot.slane %v1129_v22, %v1137_v23 }
  0xa1   : > { %1348 = vmatpush1.bf16.msra.mxu0 %v2969_v55 }
  0xa2   : > { %1349 = vmatprep.subr.bf16.mxu0 %v2970_v56 }
  0xa5   : > { %1350 = vmatpush1.bf16.msra.mxu0 %v2972_v57 }
  0xa6   : > { %1351 = vmatprep.subr.bf16.mxu0 %v2973_v58 }
  0xa9   : > { %1352 = vmatpush1.bf16.msra.mxu0 %v2975_v59 }
  0xaa   : > { %1353 = vmatprep.subr.bf16.mxu0 %v2976_v60 }
  0xad   : > { %1354 = vmatpush1.bf16.msra.mxu0 %v2978_v63 }
  0xae   : > { %1355 = vmatprep.subr.bf16.mxu0 %v2979_v0 }
  0xb1   : > { %1356 = vmatpush1.bf16.msra.mxu0 %v2981_v1 }
  0xb2   : > { %1357 = vmatprep.subr.bf16.mxu0 %v2982_v2 }
  0xb5   : > { %1358 = vmatpush1.bf16.msra.mxu0 %v2984_v3 }
  0xb6   : > { %1359 = vmatprep.subr.bf16.mxu0 %v2985_v4 }
  0xb9   : > { %1360 = vmatpush1.bf16.msra.mxu0 %v2987_v5 }
  0xba   : > { %1361 = vmatprep.subr.bf16.mxu0 %v2988_v6 }
  0xbd   : > { %1362 = vmatpush1.bf16.msra.mxu0 %v2990_v7 }
  0xbe   : > { %1363 = vmatprep.subr.bf16.mxu0 %v2991_v8 }
  0xc1   : > { %1364 = vmatpush1.bf16.msra.mxu0 %v2993_v9 }
  0xc2   : > { %1365 = vmatprep.subr.bf16.mxu0 %v2994_v10 }
  0xc5   : > { %1366 = vmatpush1.bf16.msra.mxu0 %v2996_v11 }
  0xc6   : > { %1367 = vmatprep.subr.bf16.mxu0 %v2997_v12 }
  0xc9   : > { %1368 = vmatpush1.bf16.msra.mxu0 %v2999_v13 }
  0xca   : > { %1369 = vmatprep.subr.bf16.mxu0 %v3000_v14 }
  0xcd   : > { %1370 = vmatpush1.bf16.msra.mxu0 %v3002_v15 }
  0xce   : > { %1371 = vmatprep.subr.bf16.mxu0 %v3003_v16 }
  0xd1   : > { %1372 = vmatpush1.bf16.msra.mxu0 %v3005_v17 }
  0xd4   : > { %1374 = vmatmul.mubr.bf16.vlgmr.msra.gmra.mrb[0].mxu0 %v2689_v18 }
 0x1a7   : > { %v1375_v26 = vpop.f32.mrb[0].mxu0 }
 0x1a8   : > { %v1382_v27 = vadd.f32 %v1375_v26, %v1134_v24  ;;  %v1377_v28 = vpop.f32.mrb[1].mxu0 }
 0x1a9   : > { %v1383_v29 = vadd.f32 %v1377_v28, %v1138_v25  ;;  %v1379_v30 = vpop.f32.mrb[2].mxu0 }
 0x1aa   : > { %1384 = vst [vmem:[#allocation2] sm:$0xff] %v1382_v27  ;;  %v1380_v31 = vpop.f32.mrb[3].mxu0 }
 0x1ab   : > { %1385 = vst [vmem:[#allocation2 + $0x8] sm:$0xff] %v1383_v29 }
 0x1ac PF: > { %v3008_v32 = vld [vmem:[%s3812_s1 + $0x4] ss:$8 sps:$4 sm:$0xff]   ;;  %v3012_v34 = vld [vmem:[%s3812_s1] ss:$8 sps:$4 sm:$0xff]   ;;  %v3014_v36 = vld [vmem:[%s3812_s1 + $0x14] ss:$8 sps:$4 sm:$0xff]  }
 0x1ad   : > { %v3010_v33 = vld [vmem:[%s3812_s1 + $0x104] ss:$8 sps:$4 sm:$0xff]   ;;  %2289 = vmatprep.subr.bf16.mxu0 %v3008_v32  ;;  %v3013_v35 = vld [vmem:[%s3812_s1 + $0x100] ss:$8 sps:$4 sm:$0xff]   ;;  %v3016_v37 = vld [vmem:[%s3812_s1 + $0x114] ss:$8 sps:$4 sm:$0xff]  }
 0x1ae   : > { %2330 = vmatprep.subr.bf16.mxu1 %v3010_v33  ;;  %2290 = vmatpush1.bf16.msra.mxu0 %v3012_v34  ;;  %v3018_v38 = vld [vmem:[%s3812_s1 + $0x10] ss:$8 sps:$4 sm:$0xff]   ;;  %v3020_v40 = vld [vmem:[%s3812_s1 + $0x24] ss:$8 sps:$4 sm:$0xff]   ;;  %v3024_v42 = vld [vmem:[%s3812_s1 + $0x20] ss:$8 sps:$4 sm:$0xff]  }
 0x1af   : > { %2331 = vmatpush1.bf16.msra.mxu1 %v3013_v35  ;;  %2291 = vmatprep.subr.bf16.mxu0 %v3014_v36  ;;  %v3019_v39 = vld [vmem:[%s3812_s1 + $0x110] ss:$8 sps:$4 sm:$0xff]   ;;  %v3022_v41 = vld [vmem:[%s3812_s1 + $0x124] ss:$8 sps:$4 sm:$0xff]   ;;  %v3025_v43 = vld [vmem:[%s3812_s1 + $0x120] ss:$8 sps:$4 sm:$0xff]  }
 0x1b0   : > { %2332 = vmatprep.subr.bf16.mxu1 %v3016_v37  ;;  %v3026_v44 = vld [vmem:[%s3812_s1 + $0x34] ss:$8 sps:$4 sm:$0xff]   ;;  %v3030_v46 = vld [vmem:[%s3812_s1 + $0x30] ss:$8 sps:$4 sm:$0xff]   ;;  %v3032_v48 = vld [vmem:[%s3812_s1 + $0x44] ss:$8 sps:$4 sm:$0xff]  }
 0x1b1   : > { %v3028_v45 = vld [vmem:[%s3812_s1 + $0x134] ss:$8 sps:$4 sm:$0xff]   ;;  %v3031_v47 = vld [vmem:[%s3812_s1 + $0x130] ss:$8 sps:$4 sm:$0xff]   ;;  %v3034_v49 = vld [vmem:[%s3812_s1 + $0x144] ss:$8 sps:$4 sm:$0xff]  }
 0x1b2   : > { %2292 = vmatpush1.bf16.msra.mxu0 %v3018_v38  ;;  %v3036_v50 = vld [vmem:[%s3812_s1 + $0x40] ss:$8 sps:$4 sm:$0xff]   ;;  %v3038_v52 = vld [vmem:[%s3812_s1 + $0x54] ss:$8 sps:$4 sm:$0xff]   ;;  %v3042_v54 = vld [vmem:[%s3812_s1 + $0x50] ss:$8 sps:$4 sm:$0xff]  }
 0x1b3   : > { %2333 = vmatpush1.bf16.msra.mxu1 %v3019_v39  ;;  %2293 = vmatprep.subr.bf16.mxu0 %v3020_v40  ;;  %v3037_v51 = vld [vmem:[%s3812_s1 + $0x140] ss:$8 sps:$4 sm:$0xff]   ;;  %v3040_v53 = vld [vmem:[%s3812_s1 + $0x154] ss:$8 sps:$4 sm:$0xff]   ;;  %v3043_v55 = vld [vmem:[%s3812_s1 + $0x150] ss:$8 sps:$4 sm:$0xff]  }
 0x1b4   : > { %2334 = vmatprep.subr.bf16.mxu1 %v3022_v41  ;;  %v3044_v56 = vld [vmem:[%s3812_s1 + $0x64] ss:$8 sps:$4 sm:$0xff]   ;;  %v3048_v58 = vld [vmem:[%s3812_s1 + $0x60] ss:$8 sps:$4 sm:$0xff]   ;;  %v3050_v60 = vld [vmem:[%s3812_s1 + $0x74] ss:$8 sps:$4 sm:$0xff]  }
 0x1b5   : > { %v3046_v57 = vld [vmem:[%s3812_s1 + $0x164] ss:$8 sps:$4 sm:$0xff]   ;;  %v3049_v59 = vld [vmem:[%s3812_s1 + $0x160] ss:$8 sps:$4 sm:$0xff]   ;;  %v3052_v61 = vld [vmem:[%s3812_s1 + $0x174] ss:$8 sps:$4 sm:$0xff]  }
 0x1b6   : > { %2294 = vmatpush1.bf16.msra.mxu0 %v3024_v42  ;;  %v3054_v62 = vld [vmem:[%s3812_s1 + $0x70] ss:$8 sps:$4 sm:$0xff]   ;;  %v3056_v0 = vld [vmem:[%s3812_s1 + $0x84] ss:$8 sps:$4 sm:$0xff]   ;;  %v3060_v2 = vld [vmem:[%s3812_s1 + $0x80] ss:$8 sps:$4 sm:$0xff]  }
 0x1b7   : > { %2335 = vmatpush1.bf16.msra.mxu1 %v3025_v43  ;;  %2295 = vmatprep.subr.bf16.mxu0 %v3026_v44  ;;  %v3055_v63 = vld [vmem:[%s3812_s1 + $0x170] ss:$8 sps:$4 sm:$0xff]   ;;  %v3058_v1 = vld [vmem:[%s3812_s1 + $0x184] ss:$8 sps:$4 sm:$0xff]   ;;  %v3061_v3 = vld [vmem:[%s3812_s1 + $0x180] ss:$8 sps:$4 sm:$0xff]  }
 0x1b8   : > { %2336 = vmatprep.subr.bf16.mxu1 %v3028_v45  ;;  %v3062_v4 = vld [vmem:[%s3812_s1 + $0x94] ss:$8 sps:$4 sm:$0xff]   ;;  %v3066_v6 = vld [vmem:[%s3812_s1 + $0x90] ss:$8 sps:$4 sm:$0xff]   ;;  %v3068_v8 = vld [vmem:[%s3812_s1 + $0xa4] ss:$8 sps:$4 sm:$0xff]  }
 0x1b9   : > { %v3064_v5 = vld [vmem:[%s3812_s1 + $0x194] ss:$8 sps:$4 sm:$0xff]   ;;  %v3067_v7 = vld [vmem:[%s3812_s1 + $0x190] ss:$8 sps:$4 sm:$0xff]   ;;  %v3070_v9 = vld [vmem:[%s3812_s1 + $0x1a4] ss:$8 sps:$4 sm:$0xff]  }
 0x1ba   : > { %2296 = vmatpush1.bf16.msra.mxu0 %v3030_v46  ;;  %v3072_v10 = vld [vmem:[%s3812_s1 + $0xa0] ss:$8 sps:$4 sm:$0xff]   ;;  %v3074_v12 = vld [vmem:[%s3812_s1 + $0xb4] ss:$8 sps:$4 sm:$0xff]   ;;  %v3078_v17 = vld [vmem:[%s3812_s1 + $0xb0] ss:$8 sps:$4 sm:$0xff]  }
 0x1bb   : > { %2337 = vmatpush1.bf16.msra.mxu1 %v3031_v47  ;;  %2297 = vmatprep.subr.bf16.mxu0 %v3032_v48  ;;  %v3073_v11 = vld [vmem:[%s3812_s1 + $0x1a0] ss:$8 sps:$4 sm:$0xff]   ;;  %v3076_v13 = vld [vmem:[%s3812_s1 + $0x1b4] ss:$8 sps:$4 sm:$0xff]   ;;  %v3079_v18 = vld [vmem:[%s3812_s1 + $0x1b0] ss:$8 sps:$4 sm:$0xff]  }
 0x1bc   : > { %2338 = vmatprep.subr.bf16.mxu1 %v3034_v49  ;;  %v1388_v14 = vld [vmem:[%s3800_s16] sm:$0xff]  ;;  %v1389_v16 = vld [vmem:[%s3800_s16 + $0x8] sm:$0xff]  ;;  %v3080_v20 = vld [vmem:[%s3812_s1 + $0xc4] ss:$8 sps:$4 sm:$0xff]   ;;  %p2876_p2 = scmp.ne.s32.totalorder %s3287_s22, 3 }
 0x1bd   : > { %v2724_v15 = vcombine.high %v1388_v14, %v1388_v14  ;;  %v2726_v19 = vcombine.high %v1389_v16, %v1389_v16  ;;  %v3082_v21 = vld [vmem:[%s3812_s1 + $0x1c4] ss:$8 sps:$4 sm:$0xff]   ;;  %v3084_v22 = vld [vmem:[%s3812_s1 + $0xc0] ss:$8 sps:$4 sm:$0xff]   ;;  %v3086_v24 = vld [vmem:[%s3812_s1 + $0xd4] ss:$8 sps:$4 sm:$0xff]   ;;  %v2723_v38 = vcombine.low %v1388_v14, %v1388_v14  ;;  %v2725_v39 = vcombine.low %v1389_v16, %v1389_v16 }
 0x1be   : > { %2298 = vmatpush1.bf16.msra.mxu0 %v3036_v50  ;;  %v3085_v23 = vld [vmem:[%s3812_s1 + $0x1c0] ss:$8 sps:$4 sm:$0xff]   ;;  %v3088_v25 = vld [vmem:[%s3812_s1 + $0x1d4] ss:$8 sps:$4 sm:$0xff]   ;;  %v3090_v26 = vld [vmem:[%s3812_s1 + $0xd0] ss:$8 sps:$4 sm:$0xff]  }
 0x1bf   : > { %2339 = vmatpush1.bf16.msra.mxu1 %v3037_v51  ;;  %2299 = vmatprep.subr.bf16.mxu0 %v3038_v52  ;;  %v3091_v27 = vld [vmem:[%s3812_s1 + $0x1d0] ss:$8 sps:$4 sm:$0xff]   ;;  %v3092_v28 = vld [vmem:[%s3812_s1 + $0xe4] ss:$8 sps:$4 sm:$0xff]   ;;  %v3096_v30 = vld [vmem:[%s3812_s1 + $0xe0] ss:$8 sps:$4 sm:$0xff]  }
 0x1c0   : > { %2340 = vmatprep.subr.bf16.mxu1 %v3040_v53  ;;  %2321 = vmatprep.mubr.bf16.mxu0 %v2724_v15  ;;  %v3094_v29 = vld [vmem:[%s3812_s1 + $0x1e4] ss:$8 sps:$4 sm:$0xff]   ;;  %v3097_v31 = vld [vmem:[%s3812_s1 + $0x1e0] ss:$8 sps:$4 sm:$0xff]   ;;  %v3098_v32 = vld [vmem:[%s3812_s1 + $0xf4] ss:$8 sps:$4 sm:$0xff]  }
 0x1c1   : > { %2362 = vmatprep.mubr.bf16.mxu1 %v2726_v19  ;;  %v3100_v33 = vld [vmem:[%s3812_s1 + $0x1f4] ss:$8 sps:$4 sm:$0xff]   ;;  %v3102_v34 = vld [vmem:[%s3812_s1 + $0xf0] ss:$8 sps:$4 sm:$0xff]   ;;  %v3110_v36 = vld [vmem:[%s3812_s1 + $0x204] ss:$8 sps:$4 sm:$0xff]  }
 0x1c2   : > { %2300 = vmatpush1.bf16.msra.mxu0 %v3042_v54  ;;  %v3103_v35 = vld [vmem:[%s3812_s1 + $0x1f0] ss:$8 sps:$4 sm:$0xff]   ;;  %v3113_v37 = vld [vmem:[%s3812_s1 + $0x304] ss:$8 sps:$4 sm:$0xff]   ;;  %v3108_v40 = vld [vmem:[%s3812_s1 + $0x200] ss:$8 sps:$4 sm:$0xff]  }
 0x1c3   : > { %2341 = vmatpush1.bf16.msra.mxu1 %v3043_v55  ;;  %2301 = vmatprep.subr.bf16.mxu0 %v3044_v56  ;;  %v3111_v41 = vld [vmem:[%s3812_s1 + $0x300] ss:$8 sps:$4 sm:$0xff]   ;;  %v3116_v42 = vld [vmem:[%s3812_s1 + $0x214] ss:$8 sps:$4 sm:$0xff]   ;;  %v3114_v44 = vld [vmem:[%s3812_s1 + $0x210] ss:$8 sps:$4 sm:$0xff]  }
 0x1c4   : > { %2342 = vmatprep.subr.bf16.mxu1 %v3046_v57  ;;  %v3119_v43 = vld [vmem:[%s3812_s1 + $0x314] ss:$8 sps:$4 sm:$0xff]   ;;  %v3117_v45 = vld [vmem:[%s3812_s1 + $0x310] ss:$8 sps:$4 sm:$0xff]   ;;  %v3122_v46 = vld [vmem:[%s3812_s1 + $0x224] ss:$8 sps:$4 sm:$0xff]  }
 0x1c5   : > { %v3125_v47 = vld [vmem:[%s3812_s1 + $0x324] ss:$8 sps:$4 sm:$0xff]   ;;  %v3120_v48 = vld [vmem:[%s3812_s1 + $0x220] ss:$8 sps:$4 sm:$0xff]   ;;  %v3128_v50 = vld [vmem:[%s3812_s1 + $0x234] ss:$8 sps:$4 sm:$0xff]  }
 0x1c6   : > { %2302 = vmatpush1.bf16.msra.mxu0 %v3048_v58  ;;  %v3123_v49 = vld [vmem:[%s3812_s1 + $0x320] ss:$8 sps:$4 sm:$0xff]   ;;  %v3131_v51 = vld [vmem:[%s3812_s1 + $0x334] ss:$8 sps:$4 sm:$0xff]   ;;  %v3126_v52 = vld [vmem:[%s3812_s1 + $0x230] ss:$8 sps:$4 sm:$0xff]  }
 0x1c7   : > { %2343 = vmatpush1.bf16.msra.mxu1 %v3049_v59  ;;  %2303 = vmatprep.subr.bf16.mxu0 %v3050_v60  ;;  %v3129_v53 = vld [vmem:[%s3812_s1 + $0x330] ss:$8 sps:$4 sm:$0xff]   ;;  %v3134_v54 = vld [vmem:[%s3812_s1 + $0x244] ss:$8 sps:$4 sm:$0xff]   ;;  %v3132_v56 = vld [vmem:[%s3812_s1 + $0x240] ss:$8 sps:$4 sm:$0xff]  }
 0x1c8   : > { %2344 = vmatprep.subr.bf16.mxu1 %v3052_v61  ;;  %v3137_v55 = vld [vmem:[%s3812_s1 + $0x344] ss:$8 sps:$4 sm:$0xff]   ;;  %v3135_v57 = vld [vmem:[%s3812_s1 + $0x340] ss:$8 sps:$4 sm:$0xff]   ;;  %v3140_v58 = vld [vmem:[%s3812_s1 + $0x254] ss:$8 sps:$4 sm:$0xff]  }
 0x1c9   : > { %v3143_v59 = vld [vmem:[%s3812_s1 + $0x354] ss:$8 sps:$4 sm:$0xff]   ;;  %v3138_v60 = vld [vmem:[%s3812_s1 + $0x250] ss:$8 sps:$4 sm:$0xff]   ;;  %v3173_v19 = vld [vmem:[%s3812_s1 + $0x3a4] ss:$8 sps:$4 sm:$0xff]  }
 0x1ca   : > { %2304 = vmatpush1.bf16.msra.mxu0 %v3054_v62  ;;  %v3141_v61 = vld [vmem:[%s3812_s1 + $0x350] ss:$8 sps:$4 sm:$0xff]   ;;  %v3146_v62 = vld [vmem:[%s3812_s1 + $0x264] ss:$8 sps:$4 sm:$0xff]   ;;  %v3164_v14 = vld [vmem:[%s3812_s1 + $0x294] ss:$8 sps:$4 sm:$0xff]  }
 0x1cb   : > { %2345 = vmatpush1.bf16.msra.mxu1 %v3055_v63  ;;  %2305 = vmatprep.subr.bf16.mxu0 %v3056_v0  ;;  %v3149_v63 = vld [vmem:[%s3812_s1 + $0x364] ss:$8 sps:$4 sm:$0xff]   ;;  %v3167_v15 = vld [vmem:[%s3812_s1 + $0x394] ss:$8 sps:$4 sm:$0xff]   ;;  %v3162_v16 = vld [vmem:[%s3812_s1 + $0x290] ss:$8 sps:$4 sm:$0xff]  }
 0x1cc   : > { %2346 = vmatprep.subr.bf16.mxu1 %v3058_v1  ;;  %v3950_v0 = vld [vmem:[%s3800_s16 + $0x10] sm:$0xff] }
 0x1cd   : > { %v3144_v1 = vld [vmem:[%s3812_s1 + $0x260] ss:$8 sps:$4 sm:$0xff]  }
 0x1ce   : > { %2306 = vmatpush1.bf16.msra.mxu0 %v3060_v2  ;;  %v3147_v2 = vld [vmem:[%s3812_s1 + $0x360] ss:$8 sps:$4 sm:$0xff]  }
 0x1cf   : > { %2347 = vmatpush1.bf16.msra.mxu1 %v3061_v3  ;;  %2307 = vmatprep.subr.bf16.mxu0 %v3062_v4  ;;  %v2728_v3 = vcombine.high %v3950_v0, %v3950_v0  ;;  %v3957_v4 = vld [vmem:[%s3800_s16 + $0x18] sm:$0xff] }
 0x1d0   : > { %2348 = vmatprep.subr.bf16.mxu1 %v3064_v5  ;;  %v3152_v5 = vld [vmem:[%s3812_s1 + $0x274] ss:$8 sps:$4 sm:$0xff]  }
 0x1d2   : > { %2308 = vmatpush1.bf16.msra.mxu0 %v3066_v6  ;;  %v2730_v6 = vcombine.high %v3957_v4, %v3957_v4 }
 0x1d3   : > { %2349 = vmatpush1.bf16.msra.mxu1 %v3067_v7  ;;  %2309 = vmatprep.subr.bf16.mxu0 %v3068_v8  ;;  %v3155_v7 = vld [vmem:[%s3812_s1 + $0x374] ss:$8 sps:$4 sm:$0xff]   ;;  %v3150_v8 = vld [vmem:[%s3812_s1 + $0x270] ss:$8 sps:$4 sm:$0xff]  }
 0x1d4   : > { %2350 = vmatprep.subr.bf16.mxu1 %v3070_v9  ;;  %v3153_v9 = vld [vmem:[%s3812_s1 + $0x370] ss:$8 sps:$4 sm:$0xff]  }
 0x1d6   : > { %2310 = vmatpush1.bf16.msra.mxu0 %v3072_v10  ;;  %v3158_v10 = vld [vmem:[%s3812_s1 + $0x284] ss:$8 sps:$4 sm:$0xff]  }
 0x1d7   : > { %2351 = vmatpush1.bf16.msra.mxu1 %v3073_v11  ;;  %2311 = vmatprep.subr.bf16.mxu0 %v3074_v12  ;;  %v3161_v11 = vld [vmem:[%s3812_s1 + $0x384] ss:$8 sps:$4 sm:$0xff]   ;;  %v3156_v12 = vld [vmem:[%s3812_s1 + $0x280] ss:$8 sps:$4 sm:$0xff]  }
 0x1d8   : > { %2352 = vmatprep.subr.bf16.mxu1 %v3076_v13  ;;  %v3159_v13 = vld [vmem:[%s3812_s1 + $0x380] ss:$8 sps:$4 sm:$0xff]  }
 0x1da   : > { %2312 = vmatpush1.bf16.msra.mxu0 %v3078_v17  ;;  %v3165_v17 = vld [vmem:[%s3812_s1 + $0x390] ss:$8 sps:$4 sm:$0xff]  }
 0x1db   : > { %2353 = vmatpush1.bf16.msra.mxu1 %v3079_v18  ;;  %2313 = vmatprep.subr.bf16.mxu0 %v3080_v20  ;;  %v3170_v18 = vld [vmem:[%s3812_s1 + $0x2a4] ss:$8 sps:$4 sm:$0xff]   ;;  %v3168_v20 = vld [vmem:[%s3812_s1 + $0x2a0] ss:$8 sps:$4 sm:$0xff]  }
 0x1dc   : > { %2354 = vmatprep.subr.bf16.mxu1 %v3082_v21  ;;  %v3171_v21 = vld [vmem:[%s3812_s1 + $0x3a0] ss:$8 sps:$4 sm:$0xff]  }
 0x1de   : > { %2314 = vmatpush1.bf16.msra.mxu0 %v3084_v22  ;;  %v3176_v22 = vld [vmem:[%s3812_s1 + $0x2b4] ss:$8 sps:$4 sm:$0xff]  }
 0x1df   : > { %2355 = vmatpush1.bf16.msra.mxu1 %v3085_v23  ;;  %2315 = vmatprep.subr.bf16.mxu0 %v3086_v24  ;;  %v3179_v23 = vld [vmem:[%s3812_s1 + $0x3b4] ss:$8 sps:$4 sm:$0xff]   ;;  %v3174_v24 = vld [vmem:[%s3812_s1 + $0x2b0] ss:$8 sps:$4 sm:$0xff]  }
 0x1e0   : > { %2356 = vmatprep.subr.bf16.mxu1 %v3088_v25  ;;  %v3177_v25 = vld [vmem:[%s3812_s1 + $0x3b0] ss:$8 sps:$4 sm:$0xff]  }
 0x1e2   : > { %2316 = vmatpush1.bf16.msra.mxu0 %v3090_v26  ;;  %v3182_v26 = vld [vmem:[%s3812_s1 + $0x2c4] ss:$8 sps:$4 sm:$0xff]  }
 0x1e3   : > { %2357 = vmatpush1.bf16.msra.mxu1 %v3091_v27  ;;  %2317 = vmatprep.subr.bf16.mxu0 %v3092_v28  ;;  %v3185_v27 = vld [vmem:[%s3812_s1 + $0x3c4] ss:$8 sps:$4 sm:$0xff]   ;;  %v3180_v28 = vld [vmem:[%s3812_s1 + $0x2c0] ss:$8 sps:$4 sm:$0xff]  }
 0x1e4   : > { %2358 = vmatprep.subr.bf16.mxu1 %v3094_v29  ;;  %v3183_v29 = vld [vmem:[%s3812_s1 + $0x3c0] ss:$8 sps:$4 sm:$0xff]  }
 0x1e6   : > { %2318 = vmatpush1.bf16.msra.mxu0 %v3096_v30  ;;  %v3188_v30 = vld [vmem:[%s3812_s1 + $0x2d4] ss:$8 sps:$4 sm:$0xff]  }
 0x1e7   : > { %2359 = vmatpush1.bf16.msra.mxu1 %v3097_v31  ;;  %2319 = vmatprep.subr.bf16.mxu0 %v3098_v32  ;;  %v3191_v31 = vld [vmem:[%s3812_s1 + $0x3d4] ss:$8 sps:$4 sm:$0xff]   ;;  %v3186_v32 = vld [vmem:[%s3812_s1 + $0x2d0] ss:$8 sps:$4 sm:$0xff]  }
 0x1e8   : > { %2360 = vmatprep.subr.bf16.mxu1 %v3100_v33  ;;  %v3189_v33 = vld [vmem:[%s3812_s1 + $0x3d0] ss:$8 sps:$4 sm:$0xff]  }
 0x1ea   : > { %2320 = vmatpush1.bf16.msra.mxu0 %v3102_v34  ;;  %v3194_v34 = vld [vmem:[%s3812_s1 + $0x2e4] ss:$8 sps:$4 sm:$0xff]  }
 0x1eb   : > { %2361 = vmatpush1.bf16.msra.mxu1 %v3103_v35  ;;  %2371 = vmatprep.subr.bf16.mxu0 %v3110_v36  ;;  %v3197_v35 = vld [vmem:[%s3812_s1 + $0x3e4] ss:$8 sps:$4 sm:$0xff]   ;;  %v3192_v36 = vld [vmem:[%s3812_s1 + $0x2e0] ss:$8 sps:$4 sm:$0xff]  }
 0x1ec   : > { %2412 = vmatprep.subr.bf16.mxu1 %v3113_v37  ;;  %v3195_v37 = vld [vmem:[%s3812_s1 + $0x3e0] ss:$8 sps:$4 sm:$0xff]  }
 0x1ed   : > { %2322 = vmatmul.mubr.bf16.vlgmr.msra.gmra.mrb[0].mxu0 %v2723_v38  ;;  %v3200_v38 = vld [vmem:[%s3812_s1 + $0x2f4] ss:$8 sps:$4 sm:$0xff]  }
 0x1ee   : > { %2363 = vmatmul.mubr.bf16.vlgmr.msra.gmra.mrb[0].mxu1 %v2725_v39  ;;  %2372 = vmatpush1.bf16.msra.mxu0 %v3108_v40  ;;  %v3203_v39 = vld [vmem:[%s3812_s1 + $0x3f4] ss:$8 sps:$4 sm:$0xff]   ;;  %v3198_v40 = vld [vmem:[%s3812_s1 + $0x2f0] ss:$8 sps:$4 sm:$0xff]  }
 0x1ef   : > { %2413 = vmatpush1.bf16.msra.mxu1 %v3111_v41  ;;  %2373 = vmatprep.subr.bf16.mxu0 %v3116_v42  ;;  %v3201_v41 = vld [vmem:[%s3812_s1 + $0x3f0] ss:$8 sps:$4 sm:$0xff]   ;;  %v3208_v42 = vld [vmem:[%s3812_s1 + $0x404] ss:$8 sps:$4 sm:$0xff]  }
 0x1f0   : > { %2414 = vmatprep.subr.bf16.mxu1 %v3119_v43  ;;  %2403 = vmatprep.mubr.bf16.mxu0 %v2728_v3  ;;  %v2727_v43 = vcombine.low %v3950_v0, %v3950_v0 }
 0x1f1   : > { %2444 = vmatprep.mubr.bf16.mxu1 %v2730_v6 }
 0x1f2   : > { %2374 = vmatpush1.bf16.msra.mxu0 %v3114_v44  ;;  %v2729_v44 = vcombine.low %v3957_v4, %v3957_v4 }
 0x1f3   : > { %2415 = vmatpush1.bf16.msra.mxu1 %v3117_v45  ;;  %2375 = vmatprep.subr.bf16.mxu0 %v3122_v46  ;;  %v3206_v45 = vld [vmem:[%s3812_s1 + $0x400] ss:$8 sps:$4 sm:$0xff]   ;;  %v3213_v46 = vld [vmem:[%s3812_s1 + $0x414] ss:$8 sps:$4 sm:$0xff]  }
 0x1f4   : > { %2416 = vmatprep.subr.bf16.mxu1 %v3125_v47  ;;  %v3211_v47 = vld [vmem:[%s3812_s1 + $0x410] ss:$8 sps:$4 sm:$0xff]  }
 0x1f6   : > { %2376 = vmatpush1.bf16.msra.mxu0 %v3120_v48  ;;  %v3305_v48 = vmov 0  }
 0x1f7   : > { %2417 = vmatpush1.bf16.msra.mxu1 %v3123_v49  ;;  %2377 = vmatprep.subr.bf16.mxu0 %v3128_v50  ;;  %v3216_v49 = vld [vmem:[%s3812_s1 + $0x424] ss:$8 sps:$4 sm:$0xff]   ;;  %v3214_v50 = vld [vmem:[%s3812_s1 + $0x420] ss:$8 sps:$4 sm:$0xff]  }
 0x1f8   : > { %2418 = vmatprep.subr.bf16.mxu1 %v3131_v51  ;;  %v3219_v51 = vld [vmem:[%s3812_s1 + $0x434] ss:$8 sps:$4 sm:$0xff]  }
 0x1fa   : > { %2378 = vmatpush1.bf16.msra.mxu0 %v3126_v52  ;;  %v3217_v52 = vld [vmem:[%s3812_s1 + $0x430] ss:$8 sps:$4 sm:$0xff]  }
 0x1fb   : > { %2419 = vmatpush1.bf16.msra.mxu1 %v3129_v53  ;;  %2379 = vmatprep.subr.bf16.mxu0 %v3134_v54  ;;  %v3222_v53 = vld [vmem:[%s3812_s1 + $0x444] ss:$8 sps:$4 sm:$0xff]   ;;  %v3220_v54 = vld [vmem:[%s3812_s1 + $0x440] ss:$8 sps:$4 sm:$0xff]  }
 0x1fc   : > { %2420 = vmatprep.subr.bf16.mxu1 %v3137_v55  ;;  %v3225_v55 = vld [vmem:[%s3812_s1 + $0x454] ss:$8 sps:$4 sm:$0xff]  }
 0x1fe   : > { %2380 = vmatpush1.bf16.msra.mxu0 %v3132_v56  ;;  %v3223_v56 = vld [vmem:[%s3812_s1 + $0x450] ss:$8 sps:$4 sm:$0xff]  }
 0x1ff   : > { %2421 = vmatpush1.bf16.msra.mxu1 %v3135_v57  ;;  %2381 = vmatprep.subr.bf16.mxu0 %v3140_v58  ;;  %v3228_v57 = vld [vmem:[%s3812_s1 + $0x464] ss:$8 sps:$4 sm:$0xff]   ;;  %v3226_v58 = vld [vmem:[%s3812_s1 + $0x460] ss:$8 sps:$4 sm:$0xff]  }
 0x200   : > { %2422 = vmatprep.subr.bf16.mxu1 %v3143_v59  ;;  %v3231_v59 = vld [vmem:[%s3812_s1 + $0x474] ss:$8 sps:$4 sm:$0xff]  }
 0x202   : > { %2382 = vmatpush1.bf16.msra.mxu0 %v3138_v60  ;;  %v3229_v60 = vld [vmem:[%s3812_s1 + $0x470] ss:$8 sps:$4 sm:$0xff]  }
 0x203   : > { %2423 = vmatpush1.bf16.msra.mxu1 %v3141_v61  ;;  %2383 = vmatprep.subr.bf16.mxu0 %v3146_v62  ;;  %v3232_v61 = vld [vmem:[%s3800_s16 + $0x20] ss:$0 sps:$4 sm:$0xff]  }
 0x204   : > { %2424 = vmatprep.subr.bf16.mxu1 %v3149_v63 }
 0x206   : > { %2384 = vmatpush1.bf16.msra.mxu0 %v3144_v1 }
 0x207   : > { %2425 = vmatpush1.bf16.msra.mxu1 %v3147_v2  ;;  %2385 = vmatprep.subr.bf16.mxu0 %v3152_v5 }
 0x208   : > { %2426 = vmatprep.subr.bf16.mxu1 %v3155_v7 }
 0x20a   : > { %2386 = vmatpush1.bf16.msra.mxu0 %v3150_v8 }
 0x20b   : > { %2427 = vmatpush1.bf16.msra.mxu1 %v3153_v9  ;;  %2387 = vmatprep.subr.bf16.mxu0 %v3158_v10 }
 0x20c   : > { %2428 = vmatprep.subr.bf16.mxu1 %v3161_v11 }
 0x20e   : > { %2388 = vmatpush1.bf16.msra.mxu0 %v3156_v12 }
 0x20f   : > { %2429 = vmatpush1.bf16.msra.mxu1 %v3159_v13  ;;  %2389 = vmatprep.subr.bf16.mxu0 %v3164_v14 }
 0x210   : > { %2430 = vmatprep.subr.bf16.mxu1 %v3167_v15 }
 0x212   : > { %2390 = vmatpush1.bf16.msra.mxu0 %v3162_v16 }
 0x213   : > { %2431 = vmatpush1.bf16.msra.mxu1 %v3165_v17  ;;  %2391 = vmatprep.subr.bf16.mxu0 %v3170_v18 }
 0x214   : > { %2432 = vmatprep.subr.bf16.mxu1 %v3173_v19 }
 0x216   : > { %2392 = vmatpush1.bf16.msra.mxu0 %v3168_v20  ;;  %v1386_v20 = vld [vmem:[#allocation2] sm:$0xff] }
 0x217   : > { %2433 = vmatpush1.bf16.msra.mxu1 %v3171_v21  ;;  %2393 = vmatprep.subr.bf16.mxu0 %v3176_v22 }
 0x218   : > { %2434 = vmatprep.subr.bf16.mxu1 %v3179_v23  ;;  %v1387_v23 = vld [vmem:[#allocation2 + $0x8] sm:$0xff] }
 0x21a   : > { %2394 = vmatpush1.bf16.msra.mxu0 %v3174_v24 }
 0x21b   : > { %2435 = vmatpush1.bf16.msra.mxu1 %v3177_v25  ;;  %2395 = vmatprep.subr.bf16.mxu0 %v3182_v26 }
 0x21c   : > { %2436 = vmatprep.subr.bf16.mxu1 %v3185_v27 }
 0x21e   : > { %2396 = vmatpush1.bf16.msra.mxu0 %v3180_v28 }
 0x21f   : > { %2437 = vmatpush1.bf16.msra.mxu1 %v3183_v29  ;;  %2397 = vmatprep.subr.bf16.mxu0 %v3188_v30 }
 0x220   : > { %2438 = vmatprep.subr.bf16.mxu1 %v3191_v31 }
 0x222   : > { %2398 = vmatpush1.bf16.msra.mxu0 %v3186_v32 }
 0x223   : > { %2439 = vmatpush1.bf16.msra.mxu1 %v3189_v33  ;;  %2399 = vmatprep.subr.bf16.mxu0 %v3194_v34 }
 0x224   : > { %2440 = vmatprep.subr.bf16.mxu1 %v3197_v35 }
 0x226   : > { %2400 = vmatpush1.bf16.msra.mxu0 %v3192_v36 }
 0x227   : > { %2441 = vmatpush1.bf16.msra.mxu1 %v3195_v37  ;;  %2401 = vmatprep.subr.bf16.mxu0 %v3200_v38 }
 0x228   : > { %2442 = vmatprep.subr.bf16.mxu1 %v3203_v39 }
 0x22a   : > { %2402 = vmatpush1.bf16.msra.mxu0 %v3198_v40 }
 0x22b   : > { %2443 = vmatpush1.bf16.msra.mxu1 %v3201_v41  ;;  %2453 = vmatprep.subr.bf16.mxu0 %v3208_v42 }
 0x22d   : > { %2404 = vmatmul.mubr.bf16.vlgmr.msra.gmra.mrb[4].mxu0 %v2727_v43 }
 0x22e   : > { %2445 = vmatmul.mubr.bf16.vlgmr.msra.gmra.mrb[4].mxu1 %v2729_v44  ;;  %2454 = vmatpush1.bf16.msra.mxu0 %v3206_v45 }
 0x22f   : > { %2485 = vmatprep.mubr.bf16.mxu0 %v3305_v48  ;;  %2455 = vmatprep.subr.bf16.mxu0 %v3213_v46 }
 0x232   : > { %2456 = vmatpush1.bf16.msra.mxu0 %v3211_v47 }
 0x233   : > { %2457 = vmatprep.subr.bf16.mxu0 %v3216_v49 }
 0x236   : > { %2458 = vmatpush1.bf16.msra.mxu0 %v3214_v50 }
 0x237   : > { %2459 = vmatprep.subr.bf16.mxu0 %v3219_v51 }
 0x23a   : > { %2460 = vmatpush1.bf16.msra.mxu0 %v3217_v52 }
 0x23b   : > { %2461 = vmatprep.subr.bf16.mxu0 %v3222_v53 }
 0x23e   : > { %2462 = vmatpush1.bf16.msra.mxu0 %v3220_v54 }
 0x23f   : > { %2463 = vmatprep.subr.bf16.mxu0 %v3225_v55 }
 0x242   : > { %2464 = vmatpush1.bf16.msra.mxu0 %v3223_v56 }
 0x243   : > { %2465 = vmatprep.subr.bf16.mxu0 %v3228_v57 }
 0x246   : > { %2466 = vmatpush1.bf16.msra.mxu0 %v3226_v58 }
 0x247   : > { %2467 = vmatprep.subr.bf16.mxu0 %v3231_v59 }
 0x24a   : > { %2468 = vmatpush1.bf16.msra.mxu0 %v3229_v60 }
 0x24d   : > { %2486 = vmatmul.mubr.bf16.vlgmr.msra.gmra.mrb[8].mxu0 %v3232_v61 }
 0x2c0   : > { %v2323_v62 = vpop.f32.mrb[0].mxu0 }
 0x2c1   : > { %v2364_v63 = vpop.f32.mrb[0].mxu1  ;;  %v2325_v1 = vpop.f32.mrb[1].mxu0 }
 0x2c2   : > { %v2365_v0 = vadd.f32 %v2364_v63, %v2323_v62  ;;  %v2366_v2 = vpop.f32.mrb[1].mxu1  ;;  %v2327_v4 = vpop.f32.mrb[2].mxu0 }
 0x2c3   : > { %v2367_v3 = vadd.f32 %v2366_v2, %v2325_v1  ;;  %v2368_v5 = vpop.f32.mrb[2].mxu1  ;;  %v2328_v6 = vpop.f32.mrb[3].mxu0 }
 0x2c4   : > { %v2369_v7 = vpop.f32.mrb[3].mxu1 }
 0x300   : > { %v2405_v8 = vpop.f32.mrb[4].mxu0 }
 0x301   : > { %v2446_v9 = vpop.f32.mrb[4].mxu1  ;;  %v2406_v10 = vadd.f32 %v2405_v8, %v2365_v0  ;;  %v2407_v11 = vpop.f32.mrb[5].mxu0 }
 0x302   : > { %v2448_v12 = vpop.f32.mrb[5].mxu1  ;;  %v2408_v13 = vadd.f32 %v2407_v11, %v2367_v3  ;;  %v2409_v14 = vpop.f32.mrb[6].mxu0 }
 0x303   : > { %v2450_v15 = vpop.f32.mrb[6].mxu1  ;;  %v2447_v16 = vadd.f32 %v2446_v9, %v2406_v10  ;;  %v2410_v17 = vpop.f32.mrb[7].mxu0 }
 0x304   : > { %v2451_v18 = vpop.f32.mrb[7].mxu1  ;;  %v2449_v19 = vadd.f32 %v2448_v12, %v2408_v13 }
 0x320   : > { %v2487_v21 = vpop.f32.mrb[8].mxu0  ;;  %2501 = sbr.rel (%p2876_p2) target bundleno = 819 (0x333), region = 124 }
 0x321   : > { %v2488_v22 = vadd.f32 %v2487_v21, %v2447_v16  ;;  %v2489_v24 = vpop.f32.mrb[9].mxu0 }
 0x322   : > { %v2490_v25 = vadd.f32 %v2489_v24, %v2449_v19  ;;  %v2491_v26 = vpop.f32.mrb[10].mxu0 }
 0x323   : > { %v2494_v27 = vadd.f32 %v2488_v22, %v1386_v20  ;;  %v2492_v28 = vpop.f32.mrb[11].mxu0 }
 0x324   : > { %v2495_v29 = vadd.f32 %v2490_v25, %v1387_v23 }
 0x325   : > { %2496 = vst [vmem:[#allocation2] sm:$0xff] %v2494_v27 }
 0x326   : > { %2497 = vst [vmem:[#allocation2 + $0x8] sm:$0xff] %v2495_v29 }
 0x32c   : > { %v2502_v30 = vld [vmem:[#allocation2] sm:$0xff] }
 0x32d   : > { %v2503_v31 = vld [vmem:[#allocation2 + $0x8] sm:$0xff]  ;;  %v2504_v32 = vmax.f32 %v2502_v30, 0.0 }
 0x32e   : > { %v2505_v33 = vmax.f32 %v2503_v31, 0.0 }
 0x330   : > { %v2882_v34 = vpack.c.bf16 %v2505_v33, %v2504_v32 }
 0x332   : > { %2514 = vst [vmem:[%s3810_s8] sm:$0xff] %v2882_v34 }
 0x333 PF: > { %s15_s26 = sadd.s32 1, %s3303_s26   ;;  %s4059_s18 = smov %s3275_s19 }
 0x334   : > { %p12_p3 = scmp.ge.s32.totalorder %s15_s26, 10   ;;  %s4060_s19 = smov %s3408_s11 }
 0x335   : > { %s4061_s20 = smov %s3283_s21  ;;  %s4062_s21 = smov %s3411_s12 }
 0x336   : > { %s4063_s22 = smov %s3295_s24  ;;  %s4064_s23 = smov %s3299_s25 }
 0x337   : > { %s4065_s24 = smov %s4068_s27  ;;  %s4066_s25 = smov %s4072_s28 }
 0x338   :  { %14 = sbr.rel (!%p12_p3) target bundleno = 8 (0x8), region = 176 }

// kernel: resnet18_forward.17
= control target key start
LH: loop header
LB: loop body
LE: loop exit
PB: predicated region body
PF: predicated region fallthrough
CT: control target
= control target key end

     0   :  { %s2674_s12 = smov 0   ;;  %s2676_s13 = smov 0   ;;  %s3231_s0 = inlined_call_operand.vmem [shape: bf16[8,4608], index: 0, kind: input, shape index: {}]   ;;  %s3232_s1 = inlined_call_operand.vmem [shape: bf16[4608,512], index: 1, kind: input, shape index: {}]   ;;  %s3233_s2 = inlined_call_operand.vmem [shape: f32[1,512], index: 2, kind: input, shape index: {}]   ;;  %s3234_s3 = inlined_call_operand.vmem [shape: bf16[8,512], index: 3, kind: output, shape index: {}]  }
   0x1   :  { %s2678_s14 = smov 0   ;;  %s2680_s15 = smov 0  }
   0x2   :  { %s2682_s16 = smov 0   ;;  %s2684_s17 = smov 0  }
   0x3   :  { %s2686_s18 = smov 0  }
   0x4 LB: > { %s25_s19 = sadd.s32 1, %s2643_s16  ;;  %s28_s20 = sadd.s32 1, %s2647_s17  ;;  %s2651_s18 = sphi %s2686_s18, %s13_s18   ;;  %s2647_s17 = sphi %s2684_s17, %s3240_s17   ;;  %s2643_s16 = sphi %s2682_s16, %s3239_s16   ;;  %s2639_s15 = sphi %s2680_s15, %s3238_s15   ;;  %s2635_s14 = sphi %s2678_s14, %s3237_s14   ;;  %s2631_s13 = sphi %s2676_s13, %s3236_s13   ;;  %s2627_s12 = sphi %s2674_s12, %s3235_s12  }
   0x5   : > { %p26_p0 = scmp.ge.s32.totalorder %s25_s19, 4  ;;  %p76_p1 = scmp.ne.s32.totalorder %s2631_s13, %s2627_s12 }
   0x6   : > { %p77_p2 = scmp.eq.s32.totalorder %s2651_s18, 0  ;;  %s69_s24 = sadd.s32 1, %s2631_s13 }
   0x7   : > { %s3242_s19 = smov (%p26_p0, %s25_s19), 0  ;;  %s3244_s20 = smov (!%p26_p0, %s28_s20), %s2647_s17 }
   0x8   : > { %p78_p3 = por %p77_p2, %p76_p1  ;;  %p30_p4 = scmp.ge.s32.totalorder %s3244_s20, 2 }
   0x9   : > { %s64_s21 = ssub.s32 %s2643_s16, %s3242_s19  ;;  %p2144_p6 = scmp.ge.s32.totalorder %s2651_s18, 8 }
   0xa   : > { %s3246_s20 = smov (%p30_p4, %s3244_s20), 0 }
   0xb   : > { %s65_s22 = ssub.s32 %s2647_s17, %s3246_s20  ;;  %156 = sbr.rel (%p2144_p6) target bundleno = 98 (0x62), region = 16 }
   0xc   : > { %s66_s23 = sor.u32 %s65_s22, %s64_s21 }
   0xd   : > { %p67_p5 = scmp.eq.s32.totalorder %s66_s23, 0 }
   0xf   : > { %s2725_s25 = scalar_select %p67_p5, %s2631_s13, %s69_s24  }
  0x12   : > { %172 = sbr.rel (!%p78_p3) target bundleno = 98 (0x62), region = 24  ;;  %s174_s26 = sand.u32 (%p78_p3), 1, %s2631_s13  }
  0x13   : > { %s2313_s27 = smul.u32 (%p78_p3), 1152, %s174_s26  ;;  %s2145_s28 = sshll.u32 (%p78_p3), %s2647_s17, 1 }
  0x14   : > { %s2311_s29 = smul.u32 (%p78_p3), 576, %s2643_s16 }
  0x15   : > { %s2739_s8 = scalar_lea.vmem (%p78_p3), [#allocation3], %s2313_s27 }
  0x16   : > { %s180_s30 = sadd.s32 (%p78_p3), %s2311_s29, %s2145_s28 }
  0x17   : > { %s2147_s4 = sshll.u32 (%p78_p3), %s180_s30, 2 }
  0x18   : > { %s2734_s7 = scalar_lea.vmem (%p78_p3), %s3232_s1, %s2147_s4 }
  0x19   : > { %v496_v0 = vld [vmem:[%s2734_s7] sm:$0xff]  ;;  %v498_v1 = vld [vmem:[%s2734_s7 + $0x10] sm:$0xff] }
  0x1a   : > { %v500_v2 = vld [vmem:[%s2734_s7 + $0x20] sm:$0xff]  ;;  %497 = vst [vmem:[%s2739_s8] sm:$0xff] %v496_v0  ;;  %499 = vst [vmem:[%s2739_s8 + $0x8] sm:$0xff] %v498_v1  ;;  %v502_v3 = vld [vmem:[%s2734_s7 + $0x30] sm:$0xff] }
  0x1b   : > { %501 = vst [vmem:[%s2739_s8 + $0x10] sm:$0xff] %v500_v2  ;;  %v504_v4 = vld [vmem:[%s2734_s7 + $0x40] sm:$0xff]  ;;  %v506_v5 = vld [vmem:[%s2734_s7 + $0x50] sm:$0xff]  ;;  %503 = vst [vmem:[%s2739_s8 + $0x18] sm:$0xff] %v502_v3 }
  0x1c   : > { %505 = vst [vmem:[%s2739_s8 + $0x20] sm:$0xff] %v504_v4  ;;  %507 = vst [vmem:[%s2739_s8 + $0x28] sm:$0xff] %v506_v5  ;;  %v508_v6 = vld [vmem:[%s2734_s7 + $0x60] sm:$0xff]  ;;  %v510_v7 = vld [vmem:[%s2734_s7 + $0x70] sm:$0xff] }
  0x1d   : > { %v512_v8 = vld [vmem:[%s2734_s7 + $0x80] sm:$0xff]  ;;  %509 = vst [vmem:[%s2739_s8 + $0x30] sm:$0xff] %v508_v6  ;;  %511 = vst [vmem:[%s2739_s8 + $0x38] sm:$0xff] %v510_v7  ;;  %v514_v9 = vld [vmem:[%s2734_s7 + $0x90] sm:$0xff] }
  0x1e   : > { %513 = vst [vmem:[%s2739_s8 + $0x40] sm:$0xff] %v512_v8  ;;  %v516_v10 = vld [vmem:[%s2734_s7 + $0xa0] sm:$0xff]  ;;  %v518_v11 = vld [vmem:[%s2734_s7 + $0xb0] sm:$0xff]  ;;  %515 = vst [vmem:[%s2739_s8 + $0x48] sm:$0xff] %v514_v9 }
  0x1f   : > { %517 = vst [vmem:[%s2739_s8 + $0x50] sm:$0xff] %v516_v10  ;;  %519 = vst [vmem:[%s2739_s8 + $0x58] sm:$0xff] %v518_v11  ;;  %v520_v12 = vld [vmem:[%s2734_s7 + $0xc0] sm:$0xff]  ;;  %v522_v13 = vld [vmem:[%s2734_s7 + $0xd0] sm:$0xff] }
  0x20   : > { %v524_v14 = vld [vmem:[%s2734_s7 + $0xe0] sm:$0xff]  ;;  %521 = vst [vmem:[%s2739_s8 + $0x60] sm:$0xff] %v520_v12  ;;  %523 = vst [vmem:[%s2739_s8 + $0x68] sm:$0xff] %v522_v13  ;;  %v526_v15 = vld [vmem:[%s2734_s7 + $0xf0] sm:$0xff] }
  0x21   : > { %525 = vst [vmem:[%s2739_s8 + $0x70] sm:$0xff] %v524_v14  ;;  %v528_v16 = vld [vmem:[%s2734_s7 + $0x100] sm:$0xff]  ;;  %v530_v17 = vld [vmem:[%s2734_s7 + $0x110] sm:$0xff]  ;;  %527 = vst [vmem:[%s2739_s8 + $0x78] sm:$0xff] %v526_v15 }
  0x22   : > { %529 = vst [vmem:[%s2739_s8 + $0x80] sm:$0xff] %v528_v16  ;;  %531 = vst [vmem:[%s2739_s8 + $0x88] sm:$0xff] %v530_v17  ;;  %v532_v18 = vld [vmem:[%s2734_s7 + $0x120] sm:$0xff]  ;;  %v534_v19 = vld [vmem:[%s2734_s7 + $0x130] sm:$0xff] }
  0x23   : > { %v536_v20 = vld [vmem:[%s2734_s7 + $0x140] sm:$0xff]  ;;  %533 = vst [vmem:[%s2739_s8 + $0x90] sm:$0xff] %v532_v18  ;;  %535 = vst [vmem:[%s2739_s8 + $0x98] sm:$0xff] %v534_v19  ;;  %v538_v21 = vld [vmem:[%s2734_s7 + $0x150] sm:$0xff] }
  0x24   : > { %537 = vst [vmem:[%s2739_s8 + $0xa0] sm:$0xff] %v536_v20  ;;  %v540_v22 = vld [vmem:[%s2734_s7 + $0x160] sm:$0xff]  ;;  %v542_v23 = vld [vmem:[%s2734_s7 + $0x170] sm:$0xff]  ;;  %539 = vst [vmem:[%s2739_s8 + $0xa8] sm:$0xff] %v538_v21 }
  0x25   : > { %541 = vst [vmem:[%s2739_s8 + $0xb0] sm:$0xff] %v540_v22  ;;  %543 = vst [vmem:[%s2739_s8 + $0xb8] sm:$0xff] %v542_v23  ;;  %v544_v24 = vld [vmem:[%s2734_s7 + $0x180] sm:$0xff]  ;;  %v546_v25 = vld [vmem:[%s2734_s7 + $0x190] sm:$0xff] }
  0x26   : > { %v548_v26 = vld [vmem:[%s2734_s7 + $0x1a0] sm:$0xff]  ;;  %545 = vst [vmem:[%s2739_s8 + $0xc0] sm:$0xff] %v544_v24  ;;  %547 = vst [vmem:[%s2739_s8 + $0xc8] sm:$0xff] %v546_v25  ;;  %v550_v27 = vld [vmem:[%s2734_s7 + $0x1b0] sm:$0xff] }
  0x27   : > { %549 = vst [vmem:[%s2739_s8 + $0xd0] sm:$0xff] %v548_v26  ;;  %v552_v28 = vld [vmem:[%s2734_s7 + $0x1c0] sm:$0xff]  ;;  %v554_v29 = vld [vmem:[%s2734_s7 + $0x1d0] sm:$0xff]  ;;  %551 = vst [vmem:[%s2739_s8 + $0xd8] sm:$0xff] %v550_v27 }
  0x28   : > { %553 = vst [vmem:[%s2739_s8 + $0xe0] sm:$0xff] %v552_v28  ;;  %555 = vst [vmem:[%s2739_s8 + $0xe8] sm:$0xff] %v554_v29  ;;  %v556_v30 = vld [vmem:[%s2734_s7 + $0x1e0] sm:$0xff]  ;;  %v558_v31 = vld [vmem:[%s2734_s7 + $0x1f0] sm:$0xff] }
  0x29   : > { %v560_v32 = vld [vmem:[%s2734_s7 + $0x200] sm:$0xff]  ;;  %557 = vst [vmem:[%s2739_s8 + $0xf0] sm:$0xff] %v556_v30  ;;  %559 = vst [vmem:[%s2739_s8 + $0xf8] sm:$0xff] %v558_v31  ;;  %v562_v33 = vld [vmem:[%s2734_s7 + $0x210] sm:$0xff] }
  0x2a   : > { %561 = vst [vmem:[%s2739_s8 + $0x100] sm:$0xff] %v560_v32  ;;  %v564_v34 = vld [vmem:[%s2734_s7 + $0x220] sm:$0xff]  ;;  %v566_v35 = vld [vmem:[%s2734_s7 + $0x230] sm:$0xff]  ;;  %563 = vst [vmem:[%s2739_s8 + $0x108] sm:$0xff] %v562_v33 }
  0x2b   : > { %565 = vst [vmem:[%s2739_s8 + $0x110] sm:$0xff] %v564_v34  ;;  %567 = vst [vmem:[%s2739_s8 + $0x118] sm:$0xff] %v566_v35  ;;  %v568_v36 = vld [vmem:[%s2734_s7 + $0x240] sm:$0xff]  ;;  %v570_v37 = vld [vmem:[%s2734_s7 + $0x250] sm:$0xff] }
  0x2c   : > { %v572_v38 = vld [vmem:[%s2734_s7 + $0x260] sm:$0xff]  ;;  %569 = vst [vmem:[%s2739_s8 + $0x120] sm:$0xff] %v568_v36  ;;  %571 = vst [vmem:[%s2739_s8 + $0x128] sm:$0xff] %v570_v37  ;;  %v574_v39 = vld [vmem:[%s2734_s7 + $0x270] sm:$0xff] }
  0x2d   : > { %573 = vst [vmem:[%s2739_s8 + $0x130] sm:$0xff] %v572_v38  ;;  %v576_v40 = vld [vmem:[%s2734_s7 + $0x280] sm:$0xff]  ;;  %v578_v41 = vld [vmem:[%s2734_s7 + $0x290] sm:$0xff]  ;;  %575 = vst [vmem:[%s2739_s8 + $0x138] sm:$0xff] %v574_v39 }
  0x2e   : > { %577 = vst [vmem:[%s2739_s8 + $0x140] sm:$0xff] %v576_v40  ;;  %579 = vst [vmem:[%s2739_s8 + $0x148] sm:$0xff] %v578_v41  ;;  %v580_v42 = vld [vmem:[%s2734_s7 + $0x2a0] sm:$0xff]  ;;  %v582_v43 = vld [vmem:[%s2734_s7 + $0x2b0] sm:$0xff] }
  0x2f   : > { %v584_v44 = vld [vmem:[%s2734_s7 + $0x2c0] sm:$0xff]  ;;  %581 = vst [vmem:[%s2739_s8 + $0x150] sm:$0xff] %v580_v42  ;;  %583 = vst [vmem:[%s2739_s8 + $0x158] sm:$0xff] %v582_v43  ;;  %v586_v45 = vld [vmem:[%s2734_s7 + $0x2d0] sm:$0xff] }
  0x30   : > { %585 = vst [vmem:[%s2739_s8 + $0x160] sm:$0xff] %v584_v44  ;;  %v588_v46 = vld [vmem:[%s2734_s7 + $0x2e0] sm:$0xff]  ;;  %v590_v47 = vld [vmem:[%s2734_s7 + $0x2f0] sm:$0xff]  ;;  %587 = vst [vmem:[%s2739_s8 + $0x168] sm:$0xff] %v586_v45 }
  0x31   : > { %589 = vst [vmem:[%s2739_s8 + $0x170] sm:$0xff] %v588_v46  ;;  %591 = vst [vmem:[%s2739_s8 + $0x178] sm:$0xff] %v590_v47  ;;  %v592_v48 = vld [vmem:[%s2734_s7 + $0x300] sm:$0xff]  ;;  %v594_v49 = vld [vmem:[%s2734_s7 + $0x310] sm:$0xff] }
  0x32   : > { %v596_v50 = vld [vmem:[%s2734_s7 + $0x320] sm:$0xff]  ;;  %593 = vst [vmem:[%s2739_s8 + $0x180] sm:$0xff] %v592_v48  ;;  %595 = vst [vmem:[%s2739_s8 + $0x188] sm:$0xff] %v594_v49  ;;  %v598_v51 = vld [vmem:[%s2734_s7 + $0x330] sm:$0xff] }
  0x33   : > { %597 = vst [vmem:[%s2739_s8 + $0x190] sm:$0xff] %v596_v50  ;;  %v600_v52 = vld [vmem:[%s2734_s7 + $0x340] sm:$0xff]  ;;  %v602_v53 = vld [vmem:[%s2734_s7 + $0x350] sm:$0xff]  ;;  %599 = vst [vmem:[%s2739_s8 + $0x198] sm:$0xff] %v598_v51 }
  0x34   : > { %601 = vst [vmem:[%s2739_s8 + $0x1a0] sm:$0xff] %v600_v52  ;;  %603 = vst [vmem:[%s2739_s8 + $0x1a8] sm:$0xff] %v602_v53  ;;  %v604_v54 = vld [vmem:[%s2734_s7 + $0x360] sm:$0xff]  ;;  %v606_v55 = vld [vmem:[%s2734_s7 + $0x370] sm:$0xff] }
  0x35   : > { %v608_v56 = vld [vmem:[%s2734_s7 + $0x380] sm:$0xff]  ;;  %605 = vst [vmem:[%s2739_s8 + $0x1b0] sm:$0xff] %v604_v54  ;;  %607 = vst [vmem:[%s2739_s8 + $0x1b8] sm:$0xff] %v606_v55  ;;  %v610_v57 = vld [vmem:[%s2734_s7 + $0x390] sm:$0xff] }
  0x36   : > { %609 = vst [vmem:[%s2739_s8 + $0x1c0] sm:$0xff] %v608_v56  ;;  %v612_v58 = vld [vmem:[%s2734_s7 + $0x3a0] sm:$0xff]  ;;  %v614_v59 = vld [vmem:[%s2734_s7 + $0x3b0] sm:$0xff]  ;;  %611 = vst [vmem:[%s2739_s8 + $0x1c8] sm:$0xff] %v610_v57 }
  0x37   : > { %613 = vst [vmem:[%s2739_s8 + $0x1d0] sm:$0xff] %v612_v58  ;;  %615 = vst [vmem:[%s2739_s8 + $0x1d8] sm:$0xff] %v614_v59  ;;  %v616_v60 = vld [vmem:[%s2734_s7 + $0x3c0] sm:$0xff]  ;;  %v618_v61 = vld [vmem:[%s2734_s7 + $0x3d0] sm:$0xff] }
  0x38   : > { %v620_v62 = vld [vmem:[%s2734_s7 + $0x3e0] sm:$0xff]  ;;  %617 = vst [vmem:[%s2739_s8 + $0x1e0] sm:$0xff] %v616_v60  ;;  %619 = vst [vmem:[%s2739_s8 + $0x1e8] sm:$0xff] %v618_v61  ;;  %v622_v63 = vld [vmem:[%s2734_s7 + $0x3f0] sm:$0xff] }
  0x39   : > { %621 = vst [vmem:[%s2739_s8 + $0x1f0] sm:$0xff] %v620_v62  ;;  %v624_v0 = vld [vmem:[%s2734_s7 + $0x400] sm:$0xff]  ;;  %v626_v1 = vld [vmem:[%s2734_s7 + $0x410] sm:$0xff]  ;;  %623 = vst [vmem:[%s2739_s8 + $0x1f8] sm:$0xff] %v622_v63 }
  0x3a   : > { %625 = vst [vmem:[%s2739_s8 + $0x200] sm:$0xff] %v624_v0  ;;  %627 = vst [vmem:[%s2739_s8 + $0x208] sm:$0xff] %v626_v1  ;;  %v628_v2 = vld [vmem:[%s2734_s7 + $0x420] sm:$0xff]  ;;  %v630_v3 = vld [vmem:[%s2734_s7 + $0x430] sm:$0xff] }
  0x3b   : > { %v632_v4 = vld [vmem:[%s2734_s7 + $0x440] sm:$0xff]  ;;  %629 = vst [vmem:[%s2739_s8 + $0x210] sm:$0xff] %v628_v2  ;;  %631 = vst [vmem:[%s2739_s8 + $0x218] sm:$0xff] %v630_v3  ;;  %v634_v5 = vld [vmem:[%s2734_s7 + $0x450] sm:$0xff] }
  0x3c   : > { %633 = vst [vmem:[%s2739_s8 + $0x220] sm:$0xff] %v632_v4  ;;  %v636_v6 = vld [vmem:[%s2734_s7 + $0x460] sm:$0xff]  ;;  %v638_v7 = vld [vmem:[%s2734_s7 + $0x470] sm:$0xff]  ;;  %635 = vst [vmem:[%s2739_s8 + $0x228] sm:$0xff] %v634_v5 }
  0x3d   : > { %637 = vst [vmem:[%s2739_s8 + $0x230] sm:$0xff] %v636_v6  ;;  %639 = vst [vmem:[%s2739_s8 + $0x238] sm:$0xff] %v638_v7  ;;  %v640_v8 = vld [vmem:[%s2734_s7 + $0x480] sm:$0xff]  ;;  %v642_v9 = vld [vmem:[%s2734_s7 + $0x490] sm:$0xff] }
  0x3e   : > { %v644_v10 = vld [vmem:[%s2734_s7 + $0x4a0] sm:$0xff]  ;;  %641 = vst [vmem:[%s2739_s8 + $0x240] sm:$0xff] %v640_v8  ;;  %643 = vst [vmem:[%s2739_s8 + $0x248] sm:$0xff] %v642_v9  ;;  %v646_v11 = vld [vmem:[%s2734_s7 + $0x4b0] sm:$0xff] }
  0x3f   : > { %645 = vst [vmem:[%s2739_s8 + $0x250] sm:$0xff] %v644_v10  ;;  %v648_v12 = vld [vmem:[%s2734_s7 + $0x4c0] sm:$0xff]  ;;  %v650_v13 = vld [vmem:[%s2734_s7 + $0x4d0] sm:$0xff]  ;;  %647 = vst [vmem:[%s2739_s8 + $0x258] sm:$0xff] %v646_v11 }
  0x40   : > { %649 = vst [vmem:[%s2739_s8 + $0x260] sm:$0xff] %v648_v12  ;;  %651 = vst [vmem:[%s2739_s8 + $0x268] sm:$0xff] %v650_v13  ;;  %v652_v14 = vld [vmem:[%s2734_s7 + $0x4e0] sm:$0xff]  ;;  %v654_v15 = vld [vmem:[%s2734_s7 + $0x4f0] sm:$0xff] }
  0x41   : > { %v656_v16 = vld [vmem:[%s2734_s7 + $0x500] sm:$0xff]  ;;  %653 = vst [vmem:[%s2739_s8 + $0x270] sm:$0xff] %v652_v14  ;;  %655 = vst [vmem:[%s2739_s8 + $0x278] sm:$0xff] %v654_v15  ;;  %v658_v17 = vld [vmem:[%s2734_s7 + $0x510] sm:$0xff] }
  0x42   : > { %657 = vst [vmem:[%s2739_s8 + $0x280] sm:$0xff] %v656_v16  ;;  %v660_v18 = vld [vmem:[%s2734_s7 + $0x520] sm:$0xff]  ;;  %v662_v19 = vld [vmem:[%s2734_s7 + $0x530] sm:$0xff]  ;;  %659 = vst [vmem:[%s2739_s8 + $0x288] sm:$0xff] %v658_v17 }
  0x43   : > { %661 = vst [vmem:[%s2739_s8 + $0x290] sm:$0xff] %v660_v18  ;;  %663 = vst [vmem:[%s2739_s8 + $0x298] sm:$0xff] %v662_v19  ;;  %v664_v20 = vld [vmem:[%s2734_s7 + $0x540] sm:$0xff]  ;;  %v666_v21 = vld [vmem:[%s2734_s7 + $0x550] sm:$0xff] }
  0x44   : > { %v668_v22 = vld [vmem:[%s2734_s7 + $0x560] sm:$0xff]  ;;  %665 = vst [vmem:[%s2739_s8 + $0x2a0] sm:$0xff] %v664_v20  ;;  %667 = vst [vmem:[%s2739_s8 + $0x2a8] sm:$0xff] %v666_v21  ;;  %v670_v23 = vld [vmem:[%s2734_s7 + $0x570] sm:$0xff] }
  0x45   : > { %669 = vst [vmem:[%s2739_s8 + $0x2b0] sm:$0xff] %v668_v22  ;;  %v672_v24 = vld [vmem:[%s2734_s7 + $0x580] sm:$0xff]  ;;  %v674_v25 = vld [vmem:[%s2734_s7 + $0x590] sm:$0xff]  ;;  %671 = vst [vmem:[%s2739_s8 + $0x2b8] sm:$0xff] %v670_v23 }
  0x46   : > { %673 = vst [vmem:[%s2739_s8 + $0x2c0] sm:$0xff] %v672_v24  ;;  %675 = vst [vmem:[%s2739_s8 + $0x2c8] sm:$0xff] %v674_v25  ;;  %v676_v26 = vld [vmem:[%s2734_s7 + $0x5a0] sm:$0xff]  ;;  %v678_v27 = vld [vmem:[%s2734_s7 + $0x5b0] sm:$0xff] }
  0x47   : > { %v680_v28 = vld [vmem:[%s2734_s7 + $0x5c0] sm:$0xff]  ;;  %677 = vst [vmem:[%s2739_s8 + $0x2d0] sm:$0xff] %v676_v26  ;;  %679 = vst [vmem:[%s2739_s8 + $0x2d8] sm:$0xff] %v678_v27  ;;  %v682_v29 = vld [vmem:[%s2734_s7 + $0x5d0] sm:$0xff] }
  0x48   : > { %681 = vst [vmem:[%s2739_s8 + $0x2e0] sm:$0xff] %v680_v28  ;;  %v684_v30 = vld [vmem:[%s2734_s7 + $0x5e0] sm:$0xff]  ;;  %v686_v31 = vld [vmem:[%s2734_s7 + $0x5f0] sm:$0xff]  ;;  %683 = vst [vmem:[%s2739_s8 + $0x2e8] sm:$0xff] %v682_v29 }
  0x49   : > { %685 = vst [vmem:[%s2739_s8 + $0x2f0] sm:$0xff] %v684_v30  ;;  %687 = vst [vmem:[%s2739_s8 + $0x2f8] sm:$0xff] %v686_v31  ;;  %v688_v32 = vld [vmem:[%s2734_s7 + $0x600] sm:$0xff]  ;;  %v690_v33 = vld [vmem:[%s2734_s7 + $0x610] sm:$0xff] }
  0x4a   : > { %v692_v34 = vld [vmem:[%s2734_s7 + $0x620] sm:$0xff]  ;;  %689 = vst [vmem:[%s2739_s8 + $0x300] sm:$0xff] %v688_v32  ;;  %691 = vst [vmem:[%s2739_s8 + $0x308] sm:$0xff] %v690_v33  ;;  %v694_v35 = vld [vmem:[%s2734_s7 + $0x630] sm:$0xff] }
  0x4b   : > { %693 = vst [vmem:[%s2739_s8 + $0x310] sm:$0xff] %v692_v34  ;;  %v696_v36 = vld [vmem:[%s2734_s7 + $0x640] sm:$0xff]  ;;  %v698_v37 = vld [vmem:[%s2734_s7 + $0x650] sm:$0xff]  ;;  %695 = vst [vmem:[%s2739_s8 + $0x318] sm:$0xff] %v694_v35 }
  0x4c   : > { %697 = vst [vmem:[%s2739_s8 + $0x320] sm:$0xff] %v696_v36  ;;  %699 = vst [vmem:[%s2739_s8 + $0x328] sm:$0xff] %v698_v37  ;;  %v700_v38 = vld [vmem:[%s2734_s7 + $0x660] sm:$0xff]  ;;  %v702_v39 = vld [vmem:[%s2734_s7 + $0x670] sm:$0xff] }
  0x4d   : > { %v704_v40 = vld [vmem:[%s2734_s7 + $0x680] sm:$0xff]  ;;  %701 = vst [vmem:[%s2739_s8 + $0x330] sm:$0xff] %v700_v38  ;;  %703 = vst [vmem:[%s2739_s8 + $0x338] sm:$0xff] %v702_v39  ;;  %v706_v41 = vld [vmem:[%s2734_s7 + $0x690] sm:$0xff] }
  0x4e   : > { %705 = vst [vmem:[%s2739_s8 + $0x340] sm:$0xff] %v704_v40  ;;  %v708_v42 = vld [vmem:[%s2734_s7 + $0x6a0] sm:$0xff]  ;;  %v710_v43 = vld [vmem:[%s2734_s7 + $0x6b0] sm:$0xff]  ;;  %707 = vst [vmem:[%s2739_s8 + $0x348] sm:$0xff] %v706_v41 }
  0x4f   : > { %709 = vst [vmem:[%s2739_s8 + $0x350] sm:$0xff] %v708_v42  ;;  %711 = vst [vmem:[%s2739_s8 + $0x358] sm:$0xff] %v710_v43  ;;  %v712_v44 = vld [vmem:[%s2734_s7 + $0x6c0] sm:$0xff]  ;;  %v714_v45 = vld [vmem:[%s2734_s7 + $0x6d0] sm:$0xff] }
  0x50   : > { %v716_v46 = vld [vmem:[%s2734_s7 + $0x6e0] sm:$0xff]  ;;  %713 = vst [vmem:[%s2739_s8 + $0x360] sm:$0xff] %v712_v44  ;;  %715 = vst [vmem:[%s2739_s8 + $0x368] sm:$0xff] %v714_v45  ;;  %v718_v47 = vld [vmem:[%s2734_s7 + $0x6f0] sm:$0xff] }
  0x51   : > { %717 = vst [vmem:[%s2739_s8 + $0x370] sm:$0xff] %v716_v46  ;;  %v720_v48 = vld [vmem:[%s2734_s7 + $0x700] sm:$0xff]  ;;  %v722_v49 = vld [vmem:[%s2734_s7 + $0x710] sm:$0xff]  ;;  %719 = vst [vmem:[%s2739_s8 + $0x378] sm:$0xff] %v718_v47 }
  0x52   : > { %721 = vst [vmem:[%s2739_s8 + $0x380] sm:$0xff] %v720_v48  ;;  %723 = vst [vmem:[%s2739_s8 + $0x388] sm:$0xff] %v722_v49  ;;  %v724_v50 = vld [vmem:[%s2734_s7 + $0x720] sm:$0xff]  ;;  %v726_v51 = vld [vmem:[%s2734_s7 + $0x730] sm:$0xff] }
  0x53   : > { %v728_v52 = vld [vmem:[%s2734_s7 + $0x740] sm:$0xff]  ;;  %725 = vst [vmem:[%s2739_s8 + $0x390] sm:$0xff] %v724_v50  ;;  %727 = vst [vmem:[%s2739_s8 + $0x398] sm:$0xff] %v726_v51  ;;  %v730_v53 = vld [vmem:[%s2734_s7 + $0x750] sm:$0xff] }
  0x54   : > { %729 = vst [vmem:[%s2739_s8 + $0x3a0] sm:$0xff] %v728_v52  ;;  %v732_v54 = vld [vmem:[%s2734_s7 + $0x760] sm:$0xff]  ;;  %v734_v55 = vld [vmem:[%s2734_s7 + $0x770] sm:$0xff]  ;;  %731 = vst [vmem:[%s2739_s8 + $0x3a8] sm:$0xff] %v730_v53 }
  0x55   : > { %733 = vst [vmem:[%s2739_s8 + $0x3b0] sm:$0xff] %v732_v54  ;;  %735 = vst [vmem:[%s2739_s8 + $0x3b8] sm:$0xff] %v734_v55  ;;  %v736_v56 = vld [vmem:[%s2734_s7 + $0x780] sm:$0xff]  ;;  %v738_v57 = vld [vmem:[%s2734_s7 + $0x790] sm:$0xff] }
  0x56   : > { %v740_v58 = vld [vmem:[%s2734_s7 + $0x7a0] sm:$0xff]  ;;  %737 = vst [vmem:[%s2739_s8 + $0x3c0] sm:$0xff] %v736_v56  ;;  %739 = vst [vmem:[%s2739_s8 + $0x3c8] sm:$0xff] %v738_v57  ;;  %v742_v59 = vld [vmem:[%s2734_s7 + $0x7b0] sm:$0xff] }
  0x57   : > { %741 = vst [vmem:[%s2739_s8 + $0x3d0] sm:$0xff] %v740_v58  ;;  %v744_v60 = vld [vmem:[%s2734_s7 + $0x7c0] sm:$0xff]  ;;  %v746_v61 = vld [vmem:[%s2734_s7 + $0x7d0] sm:$0xff]  ;;  %743 = vst [vmem:[%s2739_s8 + $0x3d8] sm:$0xff] %v742_v59 }
  0x58   : > { %745 = vst [vmem:[%s2739_s8 + $0x3e0] sm:$0xff] %v744_v60  ;;  %747 = vst [vmem:[%s2739_s8 + $0x3e8] sm:$0xff] %v746_v61  ;;  %v748_v62 = vld [vmem:[%s2734_s7 + $0x7e0] sm:$0xff]  ;;  %v750_v63 = vld [vmem:[%s2734_s7 + $0x7f0] sm:$0xff] }
  0x59   : > { %v752_v0 = vld [vmem:[%s2734_s7 + $0x800] sm:$0xff]  ;;  %749 = vst [vmem:[%s2739_s8 + $0x3f0] sm:$0xff] %v748_v62  ;;  %751 = vst [vmem:[%s2739_s8 + $0x3f8] sm:$0xff] %v750_v63  ;;  %v754_v1 = vld [vmem:[%s2734_s7 + $0x810] sm:$0xff] }
  0x5a   : > { %753 = vst [vmem:[%s2739_s8 + $0x400] sm:$0xff] %v752_v0  ;;  %v756_v2 = vld [vmem:[%s2734_s7 + $0x820] sm:$0xff]  ;;  %v758_v3 = vld [vmem:[%s2734_s7 + $0x830] sm:$0xff]  ;;  %755 = vst [vmem:[%s2739_s8 + $0x408] sm:$0xff] %v754_v1 }
  0x5b   : > { %757 = vst [vmem:[%s2739_s8 + $0x410] sm:$0xff] %v756_v2  ;;  %759 = vst [vmem:[%s2739_s8 + $0x418] sm:$0xff] %v758_v3  ;;  %v760_v4 = vld [vmem:[%s2734_s7 + $0x840] sm:$0xff]  ;;  %v762_v5 = vld [vmem:[%s2734_s7 + $0x850] sm:$0xff] }
  0x5c   : > { %v764_v6 = vld [vmem:[%s2734_s7 + $0x860] sm:$0xff]  ;;  %761 = vst [vmem:[%s2739_s8 + $0x420] sm:$0xff] %v760_v4  ;;  %763 = vst [vmem:[%s2739_s8 + $0x428] sm:$0xff] %v762_v5  ;;  %v766_v7 = vld [vmem:[%s2734_s7 + $0x870] sm:$0xff] }
  0x5d   : > { %765 = vst [vmem:[%s2739_s8 + $0x430] sm:$0xff] %v764_v6  ;;  %v768_v8 = vld [vmem:[%s2734_s7 + $0x880] sm:$0xff]  ;;  %v770_v9 = vld [vmem:[%s2734_s7 + $0x890] sm:$0xff]  ;;  %767 = vst [vmem:[%s2739_s8 + $0x438] sm:$0xff] %v766_v7 }
  0x5e   : > { %769 = vst [vmem:[%s2739_s8 + $0x440] sm:$0xff] %v768_v8  ;;  %771 = vst [vmem:[%s2739_s8 + $0x448] sm:$0xff] %v770_v9  ;;  %v772_v10 = vld [vmem:[%s2734_s7 + $0x8a0] sm:$0xff]  ;;  %v774_v11 = vld [vmem:[%s2734_s7 + $0x8b0] sm:$0xff] }
  0x5f   : > { %v776_v12 = vld [vmem:[%s2734_s7 + $0x8c0] sm:$0xff]  ;;  %773 = vst [vmem:[%s2739_s8 + $0x450] sm:$0xff] %v772_v10  ;;  %775 = vst [vmem:[%s2739_s8 + $0x458] sm:$0xff] %v774_v11  ;;  %v778_v13 = vld [vmem:[%s2734_s7 + $0x8d0] sm:$0xff] }
  0x60   : > { %777 = vst [vmem:[%s2739_s8 + $0x460] sm:$0xff] %v776_v12  ;;  %v780_v14 = vld [vmem:[%s2734_s7 + $0x8e0] sm:$0xff]  ;;  %v782_v15 = vld [vmem:[%s2734_s7 + $0x8f0] sm:$0xff]  ;;  %779 = vst [vmem:[%s2739_s8 + $0x468] sm:$0xff] %v778_v13 }
  0x61   : > { %781 = vst [vmem:[%s2739_s8 + $0x470] sm:$0xff] %v780_v14  ;;  %783 = vst [vmem:[%s2739_s8 + $0x478] sm:$0xff] %v782_v15 }
  0x62 PF: > { %p2148_p7 = scmp.ge.s32.totalorder %s2651_s18, 1  ;;  %p796_p8 = scmp.lt.s32.totalorder %s2651_s18, 9 }
  0x64   : > { %p797_p9 = pnand %p2148_p7, %p796_p8 }
  0x65   : > { %s803_s9 = sand.u32 (!%p797_p9), 1, %s2627_s12   ;;  %s843_s10 = smul.u32 (!%p797_p9), 9, %s2635_s14 }
  0x66   : > { %800 = sbr.rel (%p797_p9) target bundleno = 510 (0x1fe), region = 66  ;;  %s2150_s21 = sshll.u32 (!%p797_p9), %s2639_s15, 1 }
  0x67   : > { %s2314_s11 = smul.u32 (!%p797_p9), 1152, %s803_s9  ;;  %p846_p10 = scmp.lt.s32.totalorder (!%p797_p9), %s843_s10, 35 }
  0x68   : > { %p856_p11 = scmp.lt.s32.totalorder (!%p797_p9), %s2150_s21, 3  ;;  %p2153_p12 = scmp.ne.s32.totalorder (!%p797_p9), %s2635_s14, 0 }
  0x69   : > { %s3044_s15 = scalar_lea.vmem (!%p797_p9), [#allocation3], %s2314_s11 }
  0x6d   : > { %s3248_s10 = smov (!%p846_p10, %s843_s10), 35  ;;  %s3250_s21 = smov (!%p856_p11, %s2150_s21), 3 }
  0x6e   : > { %s2149_s22 = sshll.u32 %s3248_s10, 2  ;;  %s858_s29 = scalar_lea.vmem %s3233_s2, %s3250_s21  ;;  %v877_v16 = vlaneseq (!%p2153_p12) }
  0x6f   : > { %s3034_s26 = scalar_lea.vmem %s3231_s0, %s2149_s22  ;;  %s2152_s30 = sshll.u32 %s3250_s21, 2  ;;  %v875_v18 = vld [vmem:[%s858_s29] sm:$0x3] (!%p2153_p12) }
  0x70   : > { %s3042_s5 = scalar_lea.vmem %s3234_s3, %s2152_s30  ;;  %874 = sbr.rel (%p2153_p12) target bundleno = 119 (0x77), region = 74  ;;  %v878_v17 = vshrl.u32 (!%p2153_p12), %v877_v16, 7 }
  0x72   : > { %v879_v19 = vsub.s32 (!%p2153_p12), 0, %v878_v17  ;;  %v883_v20 = vsub.s32 (!%p2153_p12), 1, %v878_v17 }
  0x74   : > { %v880_v21 = vrot.slane (!%p2153_p12), %v875_v18, %v879_v19  ;;  %v884_v22 = vrot.slane (!%p2153_p12), %v875_v18, %v883_v20 }
  0x76   : > { %887 = vst [vmem:[#allocation2] sm:$0xff] (!%p2153_p12), %v880_v21  ;;  %888 = vst [vmem:[#allocation2 + $0x8] sm:$0xff] (!%p2153_p12), %v884_v22 }
  0x77 PF: > { %v2372_v23 = vld [vmem:[%s3044_s15 + $0x4] ss:$8 sps:$4 sm:$0xff]   ;;  %v2376_v25 = vld [vmem:[%s3044_s15] ss:$8 sps:$4 sm:$0xff]   ;;  %v2378_v27 = vld [vmem:[%s3044_s15 + $0x14] ss:$8 sps:$4 sm:$0xff]  }
  0x78   : > { %v2374_v24 = vld [vmem:[%s3044_s15 + $0x104] ss:$8 sps:$4 sm:$0xff]   ;;  %1792 = vmatprep.subr.bf16.mxu0 %v2372_v23  ;;  %v2377_v26 = vld [vmem:[%s3044_s15 + $0x100] ss:$8 sps:$4 sm:$0xff]   ;;  %v2380_v28 = vld [vmem:[%s3044_s15 + $0x114] ss:$8 sps:$4 sm:$0xff]  }
  0x79   : > { %1833 = vmatprep.subr.bf16.mxu1 %v2374_v24  ;;  %1793 = vmatpush1.bf16.msra.mxu0 %v2376_v25  ;;  %v2382_v29 = vld [vmem:[%s3044_s15 + $0x10] ss:$8 sps:$4 sm:$0xff]   ;;  %v2384_v31 = vld [vmem:[%s3044_s15 + $0x24] ss:$8 sps:$4 sm:$0xff]   ;;  %v2388_v33 = vld [vmem:[%s3044_s15 + $0x20] ss:$8 sps:$4 sm:$0xff]  }
  0x7a   : > { %1834 = vmatpush1.bf16.msra.mxu1 %v2377_v26  ;;  %1794 = vmatprep.subr.bf16.mxu0 %v2378_v27  ;;  %v2383_v30 = vld [vmem:[%s3044_s15 + $0x110] ss:$8 sps:$4 sm:$0xff]   ;;  %v2386_v32 = vld [vmem:[%s3044_s15 + $0x124] ss:$8 sps:$4 sm:$0xff]   ;;  %v2389_v34 = vld [vmem:[%s3044_s15 + $0x120] ss:$8 sps:$4 sm:$0xff]  }
  0x7b   : > { %1835 = vmatprep.subr.bf16.mxu1 %v2380_v28  ;;  %v2390_v35 = vld [vmem:[%s3044_s15 + $0x34] ss:$8 sps:$4 sm:$0xff]   ;;  %v2394_v37 = vld [vmem:[%s3044_s15 + $0x30] ss:$8 sps:$4 sm:$0xff]   ;;  %v2396_v39 = vld [vmem:[%s3044_s15 + $0x44] ss:$8 sps:$4 sm:$0xff]  }
  0x7c   : > { %v2392_v36 = vld [vmem:[%s3044_s15 + $0x134] ss:$8 sps:$4 sm:$0xff]   ;;  %v2395_v38 = vld [vmem:[%s3044_s15 + $0x130] ss:$8 sps:$4 sm:$0xff]   ;;  %v2398_v40 = vld [vmem:[%s3044_s15 + $0x144] ss:$8 sps:$4 sm:$0xff]  }
  0x7d   : > { %1795 = vmatpush1.bf16.msra.mxu0 %v2382_v29  ;;  %v2400_v41 = vld [vmem:[%s3044_s15 + $0x40] ss:$8 sps:$4 sm:$0xff]   ;;  %v2402_v43 = vld [vmem:[%s3044_s15 + $0x54] ss:$8 sps:$4 sm:$0xff]   ;;  %v2406_v45 = vld [vmem:[%s3044_s15 + $0x50] ss:$8 sps:$4 sm:$0xff]  }
  0x7e   : > { %1836 = vmatpush1.bf16.msra.mxu1 %v2383_v30  ;;  %1796 = vmatprep.subr.bf16.mxu0 %v2384_v31  ;;  %v2401_v42 = vld [vmem:[%s3044_s15 + $0x140] ss:$8 sps:$4 sm:$0xff]   ;;  %v2404_v44 = vld [vmem:[%s3044_s15 + $0x154] ss:$8 sps:$4 sm:$0xff]   ;;  %v2407_v46 = vld [vmem:[%s3044_s15 + $0x150] ss:$8 sps:$4 sm:$0xff]  }
  0x7f   : > { %1837 = vmatprep.subr.bf16.mxu1 %v2386_v32  ;;  %v2408_v47 = vld [vmem:[%s3044_s15 + $0x64] ss:$8 sps:$4 sm:$0xff]   ;;  %v2412_v49 = vld [vmem:[%s3044_s15 + $0x60] ss:$8 sps:$4 sm:$0xff]   ;;  %v2414_v51 = vld [vmem:[%s3044_s15 + $0x74] ss:$8 sps:$4 sm:$0xff]  }
  0x80   : > { %v2410_v48 = vld [vmem:[%s3044_s15 + $0x164] ss:$8 sps:$4 sm:$0xff]   ;;  %v2413_v50 = vld [vmem:[%s3044_s15 + $0x160] ss:$8 sps:$4 sm:$0xff]   ;;  %v2416_v52 = vld [vmem:[%s3044_s15 + $0x174] ss:$8 sps:$4 sm:$0xff]  }
  0x81   : > { %1797 = vmatpush1.bf16.msra.mxu0 %v2388_v33  ;;  %v2418_v53 = vld [vmem:[%s3044_s15 + $0x70] ss:$8 sps:$4 sm:$0xff]   ;;  %v2420_v55 = vld [vmem:[%s3044_s15 + $0x84] ss:$8 sps:$4 sm:$0xff]   ;;  %v2424_v57 = vld [vmem:[%s3044_s15 + $0x80] ss:$8 sps:$4 sm:$0xff]  }
  0x82   : > { %1838 = vmatpush1.bf16.msra.mxu1 %v2389_v34  ;;  %1798 = vmatprep.subr.bf16.mxu0 %v2390_v35  ;;  %v2419_v54 = vld [vmem:[%s3044_s15 + $0x170] ss:$8 sps:$4 sm:$0xff]   ;;  %v2422_v56 = vld [vmem:[%s3044_s15 + $0x184] ss:$8 sps:$4 sm:$0xff]   ;;  %v2425_v58 = vld [vmem:[%s3044_s15 + $0x180] ss:$8 sps:$4 sm:$0xff]  }
  0x83   : > { %1839 = vmatprep.subr.bf16.mxu1 %v2392_v36  ;;  %v2426_v59 = vld [vmem:[%s3044_s15 + $0x94] ss:$8 sps:$4 sm:$0xff]   ;;  %v2430_v61 = vld [vmem:[%s3044_s15 + $0x90] ss:$8 sps:$4 sm:$0xff]   ;;  %v2432_v63 = vld [vmem:[%s3044_s15 + $0xa4] ss:$8 sps:$4 sm:$0xff]  }
  0x84   : > { %v2428_v60 = vld [vmem:[%s3044_s15 + $0x194] ss:$8 sps:$4 sm:$0xff]   ;;  %v2431_v62 = vld [vmem:[%s3044_s15 + $0x190] ss:$8 sps:$4 sm:$0xff]   ;;  %v2434_v0 = vld [vmem:[%s3044_s15 + $0x1a4] ss:$8 sps:$4 sm:$0xff]  }
  0x85   : > { %1799 = vmatpush1.bf16.msra.mxu0 %v2394_v37  ;;  %v2436_v1 = vld [vmem:[%s3044_s15 + $0xa0] ss:$8 sps:$4 sm:$0xff]   ;;  %v2438_v3 = vld [vmem:[%s3044_s15 + $0xb4] ss:$8 sps:$4 sm:$0xff]   ;;  %v2442_v8 = vld [vmem:[%s3044_s15 + $0xb0] ss:$8 sps:$4 sm:$0xff]  }
  0x86   : > { %1840 = vmatpush1.bf16.msra.mxu1 %v2395_v38  ;;  %1800 = vmatprep.subr.bf16.mxu0 %v2396_v39  ;;  %v2437_v2 = vld [vmem:[%s3044_s15 + $0x1a0] ss:$8 sps:$4 sm:$0xff]   ;;  %v2440_v4 = vld [vmem:[%s3044_s15 + $0x1b4] ss:$8 sps:$4 sm:$0xff]   ;;  %v2443_v9 = vld [vmem:[%s3044_s15 + $0x1b0] ss:$8 sps:$4 sm:$0xff]  }
  0x87   : > { %1841 = vmatprep.subr.bf16.mxu1 %v2398_v40  ;;  %v891_v5 = vld [vmem:[%s3034_s26] sm:$0xff]  ;;  %v892_v7 = vld [vmem:[%s3034_s26 + $0x8] sm:$0xff]  ;;  %v2444_v11 = vld [vmem:[%s3044_s15 + $0xc4] ss:$8 sps:$4 sm:$0xff]   ;;  %p2307_p13 = scmp.ne.s32.totalorder %s2635_s14, 3 }
  0x88   : > { %v2155_v6 = vcombine.high %v891_v5, %v891_v5  ;;  %v2157_v10 = vcombine.high %v892_v7, %v892_v7  ;;  %v2446_v12 = vld [vmem:[%s3044_s15 + $0x1c4] ss:$8 sps:$4 sm:$0xff]   ;;  %v2448_v13 = vld [vmem:[%s3044_s15 + $0xc0] ss:$8 sps:$4 sm:$0xff]   ;;  %v2450_v15 = vld [vmem:[%s3044_s15 + $0xd4] ss:$8 sps:$4 sm:$0xff]   ;;  %v2154_v29 = vcombine.low %v891_v5, %v891_v5  ;;  %v2156_v30 = vcombine.low %v892_v7, %v892_v7 }
  0x89   : > { %1801 = vmatpush1.bf16.msra.mxu0 %v2400_v41  ;;  %v2449_v14 = vld [vmem:[%s3044_s15 + $0x1c0] ss:$8 sps:$4 sm:$0xff]   ;;  %v2452_v16 = vld [vmem:[%s3044_s15 + $0x1d4] ss:$8 sps:$4 sm:$0xff]   ;;  %v2454_v17 = vld [vmem:[%s3044_s15 + $0xd0] ss:$8 sps:$4 sm:$0xff]  }
  0x8a   : > { %1842 = vmatpush1.bf16.msra.mxu1 %v2401_v42  ;;  %1802 = vmatprep.subr.bf16.mxu0 %v2402_v43  ;;  %v2455_v18 = vld [vmem:[%s3044_s15 + $0x1d0] ss:$8 sps:$4 sm:$0xff]   ;;  %v2456_v19 = vld [vmem:[%s3044_s15 + $0xe4] ss:$8 sps:$4 sm:$0xff]   ;;  %v2460_v21 = vld [vmem:[%s3044_s15 + $0xe0] ss:$8 sps:$4 sm:$0xff]  }
  0x8b   : > { %1843 = vmatprep.subr.bf16.mxu1 %v2404_v44  ;;  %1824 = vmatprep.mubr.bf16.mxu0 %v2155_v6  ;;  %v2458_v20 = vld [vmem:[%s3044_s15 + $0x1e4] ss:$8 sps:$4 sm:$0xff]   ;;  %v2461_v22 = vld [vmem:[%s3044_s15 + $0x1e0] ss:$8 sps:$4 sm:$0xff]   ;;  %v2462_v23 = vld [vmem:[%s3044_s15 + $0xf4] ss:$8 sps:$4 sm:$0xff]  }
  0x8c   : > { %1865 = vmatprep.mubr.bf16.mxu1 %v2157_v10  ;;  %v2464_v24 = vld [vmem:[%s3044_s15 + $0x1f4] ss:$8 sps:$4 sm:$0xff]   ;;  %v2466_v25 = vld [vmem:[%s3044_s15 + $0xf0] ss:$8 sps:$4 sm:$0xff]   ;;  %v2474_v27 = vld [vmem:[%s3044_s15 + $0x204] ss:$8 sps:$4 sm:$0xff]  }
  0x8d   : > { %1803 = vmatpush1.bf16.msra.mxu0 %v2406_v45  ;;  %v2467_v26 = vld [vmem:[%s3044_s15 + $0x1f0] ss:$8 sps:$4 sm:$0xff]   ;;  %v2477_v28 = vld [vmem:[%s3044_s15 + $0x304] ss:$8 sps:$4 sm:$0xff]   ;;  %v2472_v31 = vld [vmem:[%s3044_s15 + $0x200] ss:$8 sps:$4 sm:$0xff]  }
  0x8e   : > { %1844 = vmatpush1.bf16.msra.mxu1 %v2407_v46  ;;  %1804 = vmatprep.subr.bf16.mxu0 %v2408_v47  ;;  %v2475_v32 = vld [vmem:[%s3044_s15 + $0x300] ss:$8 sps:$4 sm:$0xff]   ;;  %v2480_v33 = vld [vmem:[%s3044_s15 + $0x214] ss:$8 sps:$4 sm:$0xff]   ;;  %v2478_v35 = vld [vmem:[%s3044_s15 + $0x210] ss:$8 sps:$4 sm:$0xff]  }
  0x8f   : > { %1845 = vmatprep.subr.bf16.mxu1 %v2410_v48  ;;  %v2483_v34 = vld [vmem:[%s3044_s15 + $0x314] ss:$8 sps:$4 sm:$0xff]   ;;  %v2481_v36 = vld [vmem:[%s3044_s15 + $0x310] ss:$8 sps:$4 sm:$0xff]   ;;  %v2486_v37 = vld [vmem:[%s3044_s15 + $0x224] ss:$8 sps:$4 sm:$0xff]  }
  0x90   : > { %v2489_v38 = vld [vmem:[%s3044_s15 + $0x324] ss:$8 sps:$4 sm:$0xff]   ;;  %v2484_v39 = vld [vmem:[%s3044_s15 + $0x220] ss:$8 sps:$4 sm:$0xff]   ;;  %v2492_v41 = vld [vmem:[%s3044_s15 + $0x234] ss:$8 sps:$4 sm:$0xff]  }
  0x91   : > { %1805 = vmatpush1.bf16.msra.mxu0 %v2412_v49  ;;  %v2487_v40 = vld [vmem:[%s3044_s15 + $0x320] ss:$8 sps:$4 sm:$0xff]   ;;  %v2495_v42 = vld [vmem:[%s3044_s15 + $0x334] ss:$8 sps:$4 sm:$0xff]   ;;  %v2490_v43 = vld [vmem:[%s3044_s15 + $0x230] ss:$8 sps:$4 sm:$0xff]  }
  0x92   : > { %1846 = vmatpush1.bf16.msra.mxu1 %v2413_v50  ;;  %1806 = vmatprep.subr.bf16.mxu0 %v2414_v51  ;;  %v2493_v44 = vld [vmem:[%s3044_s15 + $0x330] ss:$8 sps:$4 sm:$0xff]   ;;  %v2498_v45 = vld [vmem:[%s3044_s15 + $0x244] ss:$8 sps:$4 sm:$0xff]   ;;  %v2496_v47 = vld [vmem:[%s3044_s15 + $0x240] ss:$8 sps:$4 sm:$0xff]  }
  0x93   : > { %1847 = vmatprep.subr.bf16.mxu1 %v2416_v52  ;;  %v2501_v46 = vld [vmem:[%s3044_s15 + $0x344] ss:$8 sps:$4 sm:$0xff]   ;;  %v2499_v48 = vld [vmem:[%s3044_s15 + $0x340] ss:$8 sps:$4 sm:$0xff]   ;;  %v2504_v49 = vld [vmem:[%s3044_s15 + $0x254] ss:$8 sps:$4 sm:$0xff]  }
  0x94   : > { %v2507_v50 = vld [vmem:[%s3044_s15 + $0x354] ss:$8 sps:$4 sm:$0xff]   ;;  %v2502_v51 = vld [vmem:[%s3044_s15 + $0x250] ss:$8 sps:$4 sm:$0xff]   ;;  %v2537_v10 = vld [vmem:[%s3044_s15 + $0x3a4] ss:$8 sps:$4 sm:$0xff]  }
  0x95   : > { %1807 = vmatpush1.bf16.msra.mxu0 %v2418_v53  ;;  %v2505_v52 = vld [vmem:[%s3044_s15 + $0x350] ss:$8 sps:$4 sm:$0xff]   ;;  %v2510_v53 = vld [vmem:[%s3044_s15 + $0x264] ss:$8 sps:$4 sm:$0xff]   ;;  %v2528_v5 = vld [vmem:[%s3044_s15 + $0x294] ss:$8 sps:$4 sm:$0xff]  }
  0x96   : > { %1848 = vmatpush1.bf16.msra.mxu1 %v2419_v54  ;;  %1808 = vmatprep.subr.bf16.mxu0 %v2420_v55  ;;  %v2513_v54 = vld [vmem:[%s3044_s15 + $0x364] ss:$8 sps:$4 sm:$0xff]   ;;  %v2531_v6 = vld [vmem:[%s3044_s15 + $0x394] ss:$8 sps:$4 sm:$0xff]   ;;  %v2526_v7 = vld [vmem:[%s3044_s15 + $0x290] ss:$8 sps:$4 sm:$0xff]  }
  0x97   : > { %1849 = vmatprep.subr.bf16.mxu1 %v2422_v56  ;;  %v3140_v55 = vld [vmem:[%s3034_s26 + $0x10] sm:$0xff] }
  0x98   : > { %v2508_v56 = vld [vmem:[%s3044_s15 + $0x260] ss:$8 sps:$4 sm:$0xff]  }
  0x99   : > { %1809 = vmatpush1.bf16.msra.mxu0 %v2424_v57  ;;  %v2511_v57 = vld [vmem:[%s3044_s15 + $0x360] ss:$8 sps:$4 sm:$0xff]  }
  0x9a   : > { %1850 = vmatpush1.bf16.msra.mxu1 %v2425_v58  ;;  %1810 = vmatprep.subr.bf16.mxu0 %v2426_v59  ;;  %v2159_v58 = vcombine.high %v3140_v55, %v3140_v55  ;;  %v3147_v59 = vld [vmem:[%s3034_s26 + $0x18] sm:$0xff] }
  0x9b   : > { %1851 = vmatprep.subr.bf16.mxu1 %v2428_v60  ;;  %v2516_v60 = vld [vmem:[%s3044_s15 + $0x274] ss:$8 sps:$4 sm:$0xff]  }
  0x9d   : > { %1811 = vmatpush1.bf16.msra.mxu0 %v2430_v61  ;;  %v2161_v61 = vcombine.high %v3147_v59, %v3147_v59 }
  0x9e   : > { %1852 = vmatpush1.bf16.msra.mxu1 %v2431_v62  ;;  %1812 = vmatprep.subr.bf16.mxu0 %v2432_v63  ;;  %v2519_v62 = vld [vmem:[%s3044_s15 + $0x374] ss:$8 sps:$4 sm:$0xff]   ;;  %v2514_v63 = vld [vmem:[%s3044_s15 + $0x270] ss:$8 sps:$4 sm:$0xff]  }
  0x9f   : > { %1853 = vmatprep.subr.bf16.mxu1 %v2434_v0  ;;  %v2517_v0 = vld [vmem:[%s3044_s15 + $0x370] ss:$8 sps:$4 sm:$0xff]  }
  0xa1   : > { %1813 = vmatpush1.bf16.msra.mxu0 %v2436_v1  ;;  %v2522_v1 = vld [vmem:[%s3044_s15 + $0x284] ss:$8 sps:$4 sm:$0xff]  }
  0xa2   : > { %1854 = vmatpush1.bf16.msra.mxu1 %v2437_v2  ;;  %1814 = vmatprep.subr.bf16.mxu0 %v2438_v3  ;;  %v2525_v2 = vld [vmem:[%s3044_s15 + $0x384] ss:$8 sps:$4 sm:$0xff]   ;;  %v2520_v3 = vld [vmem:[%s3044_s15 + $0x280] ss:$8 sps:$4 sm:$0xff]  }
  0xa3   : > { %1855 = vmatprep.subr.bf16.mxu1 %v2440_v4  ;;  %v2523_v4 = vld [vmem:[%s3044_s15 + $0x380] ss:$8 sps:$4 sm:$0xff]  }
  0xa5   : > { %1815 = vmatpush1.bf16.msra.mxu0 %v2442_v8  ;;  %v2529_v8 = vld [vmem:[%s3044_s15 + $0x390] ss:$8 sps:$4 sm:$0xff]  }
  0xa6   : > { %1856 = vmatpush1.bf16.msra.mxu1 %v2443_v9  ;;  %1816 = vmatprep.subr.bf16.mxu0 %v2444_v11  ;;  %v2534_v9 = vld [vmem:[%s3044_s15 + $0x2a4] ss:$8 sps:$4 sm:$0xff]   ;;  %v2532_v11 = vld [vmem:[%s3044_s15 + $0x2a0] ss:$8 sps:$4 sm:$0xff]  }
  0xa7   : > { %1857 = vmatprep.subr.bf16.mxu1 %v2446_v12  ;;  %v2535_v12 = vld [vmem:[%s3044_s15 + $0x3a0] ss:$8 sps:$4 sm:$0xff]  }
  0xa9   : > { %1817 = vmatpush1.bf16.msra.mxu0 %v2448_v13  ;;  %v2540_v13 = vld [vmem:[%s3044_s15 + $0x2b4] ss:$8 sps:$4 sm:$0xff]  }
  0xaa   : > { %1858 = vmatpush1.bf16.msra.mxu1 %v2449_v14  ;;  %1818 = vmatprep.subr.bf16.mxu0 %v2450_v15  ;;  %v2543_v14 = vld [vmem:[%s3044_s15 + $0x3b4] ss:$8 sps:$4 sm:$0xff]   ;;  %v2538_v15 = vld [vmem:[%s3044_s15 + $0x2b0] ss:$8 sps:$4 sm:$0xff]  }
  0xab   : > { %1859 = vmatprep.subr.bf16.mxu1 %v2452_v16  ;;  %v2541_v16 = vld [vmem:[%s3044_s15 + $0x3b0] ss:$8 sps:$4 sm:$0xff]  }
  0xad   : > { %1819 = vmatpush1.bf16.msra.mxu0 %v2454_v17  ;;  %v2546_v17 = vld [vmem:[%s3044_s15 + $0x2c4] ss:$8 sps:$4 sm:$0xff]  }
  0xae   : > { %1860 = vmatpush1.bf16.msra.mxu1 %v2455_v18  ;;  %1820 = vmatprep.subr.bf16.mxu0 %v2456_v19  ;;  %v2549_v18 = vld [vmem:[%s3044_s15 + $0x3c4] ss:$8 sps:$4 sm:$0xff]   ;;  %v2544_v19 = vld [vmem:[%s3044_s15 + $0x2c0] ss:$8 sps:$4 sm:$0xff]  }
  0xaf   : > { %1861 = vmatprep.subr.bf16.mxu1 %v2458_v20  ;;  %v2547_v20 = vld [vmem:[%s3044_s15 + $0x3c0] ss:$8 sps:$4 sm:$0xff]  }
  0xb1   : > { %1821 = vmatpush1.bf16.msra.mxu0 %v2460_v21  ;;  %v2552_v21 = vld [vmem:[%s3044_s15 + $0x2d4] ss:$8 sps:$4 sm:$0xff]  }
  0xb2   : > { %1862 = vmatpush1.bf16.msra.mxu1 %v2461_v22  ;;  %1822 = vmatprep.subr.bf16.mxu0 %v2462_v23  ;;  %v2555_v22 = vld [vmem:[%s3044_s15 + $0x3d4] ss:$8 sps:$4 sm:$0xff]   ;;  %v2550_v23 = vld [vmem:[%s3044_s15 + $0x2d0] ss:$8 sps:$4 sm:$0xff]  }
  0xb3   : > { %1863 = vmatprep.subr.bf16.mxu1 %v2464_v24  ;;  %v2553_v24 = vld [vmem:[%s3044_s15 + $0x3d0] ss:$8 sps:$4 sm:$0xff]  }
  0xb5   : > { %1823 = vmatpush1.bf16.msra.mxu0 %v2466_v25  ;;  %v2558_v25 = vld [vmem:[%s3044_s15 + $0x2e4] ss:$8 sps:$4 sm:$0xff]  }
  0xb6   : > { %1864 = vmatpush1.bf16.msra.mxu1 %v2467_v26  ;;  %1874 = vmatprep.subr.bf16.mxu0 %v2474_v27  ;;  %v2561_v26 = vld [vmem:[%s3044_s15 + $0x3e4] ss:$8 sps:$4 sm:$0xff]   ;;  %v2556_v27 = vld [vmem:[%s3044_s15 + $0x2e0] ss:$8 sps:$4 sm:$0xff]  }
  0xb7   : > { %1915 = vmatprep.subr.bf16.mxu1 %v2477_v28  ;;  %v2559_v28 = vld [vmem:[%s3044_s15 + $0x3e0] ss:$8 sps:$4 sm:$0xff]  }
  0xb8   : > { %1825 = vmatmul.mubr.bf16.vlgmr.msra.gmra.mrb[0].mxu0 %v2154_v29  ;;  %v2564_v29 = vld [vmem:[%s3044_s15 + $0x2f4] ss:$8 sps:$4 sm:$0xff]  }
  0xb9   : > { %1866 = vmatmul.mubr.bf16.vlgmr.msra.gmra.mrb[0].mxu1 %v2156_v30  ;;  %1875 = vmatpush1.bf16.msra.mxu0 %v2472_v31  ;;  %v2567_v30 = vld [vmem:[%s3044_s15 + $0x3f4] ss:$8 sps:$4 sm:$0xff]   ;;  %v2562_v31 = vld [vmem:[%s3044_s15 + $0x2f0] ss:$8 sps:$4 sm:$0xff]  }
  0xba   : > { %1916 = vmatpush1.bf16.msra.mxu1 %v2475_v32  ;;  %1876 = vmatprep.subr.bf16.mxu0 %v2480_v33  ;;  %v2565_v32 = vld [vmem:[%s3044_s15 + $0x3f0] ss:$8 sps:$4 sm:$0xff]   ;;  %v2572_v33 = vld [vmem:[%s3044_s15 + $0x404] ss:$8 sps:$4 sm:$0xff]  }
  0xbb   : > { %1917 = vmatprep.subr.bf16.mxu1 %v2483_v34  ;;  %1906 = vmatprep.mubr.bf16.mxu0 %v2159_v58  ;;  %v2158_v34 = vcombine.low %v3140_v55, %v3140_v55 }
  0xbc   : > { %1947 = vmatprep.mubr.bf16.mxu1 %v2161_v61 }
  0xbd   : > { %1877 = vmatpush1.bf16.msra.mxu0 %v2478_v35  ;;  %v2160_v35 = vcombine.low %v3147_v59, %v3147_v59 }
  0xbe   : > { %1918 = vmatpush1.bf16.msra.mxu1 %v2481_v36  ;;  %1878 = vmatprep.subr.bf16.mxu0 %v2486_v37  ;;  %v2570_v36 = vld [vmem:[%s3044_s15 + $0x400] ss:$8 sps:$4 sm:$0xff]   ;;  %v2577_v37 = vld [vmem:[%s3044_s15 + $0x414] ss:$8 sps:$4 sm:$0xff]  }
  0xbf   : > { %1919 = vmatprep.subr.bf16.mxu1 %v2489_v38  ;;  %v2575_v38 = vld [vmem:[%s3044_s15 + $0x410] ss:$8 sps:$4 sm:$0xff]  }
  0xc1   : > { %1879 = vmatpush1.bf16.msra.mxu0 %v2484_v39  ;;  %v2653_v39 = vmov 0  }
  0xc2   : > { %1920 = vmatpush1.bf16.msra.mxu1 %v2487_v40  ;;  %1880 = vmatprep.subr.bf16.mxu0 %v2492_v41  ;;  %v2580_v40 = vld [vmem:[%s3044_s15 + $0x424] ss:$8 sps:$4 sm:$0xff]   ;;  %v2578_v41 = vld [vmem:[%s3044_s15 + $0x420] ss:$8 sps:$4 sm:$0xff]  }
  0xc3   : > { %1921 = vmatprep.subr.bf16.mxu1 %v2495_v42  ;;  %v2583_v42 = vld [vmem:[%s3044_s15 + $0x434] ss:$8 sps:$4 sm:$0xff]  }
  0xc5   : > { %1881 = vmatpush1.bf16.msra.mxu0 %v2490_v43  ;;  %v2581_v43 = vld [vmem:[%s3044_s15 + $0x430] ss:$8 sps:$4 sm:$0xff]  }
  0xc6   : > { %1922 = vmatpush1.bf16.msra.mxu1 %v2493_v44  ;;  %1882 = vmatprep.subr.bf16.mxu0 %v2498_v45  ;;  %v2586_v44 = vld [vmem:[%s3044_s15 + $0x444] ss:$8 sps:$4 sm:$0xff]   ;;  %v2584_v45 = vld [vmem:[%s3044_s15 + $0x440] ss:$8 sps:$4 sm:$0xff]  }
  0xc7   : > { %1923 = vmatprep.subr.bf16.mxu1 %v2501_v46  ;;  %v2589_v46 = vld [vmem:[%s3044_s15 + $0x454] ss:$8 sps:$4 sm:$0xff]  }
  0xc9   : > { %1883 = vmatpush1.bf16.msra.mxu0 %v2496_v47  ;;  %v2587_v47 = vld [vmem:[%s3044_s15 + $0x450] ss:$8 sps:$4 sm:$0xff]  }
  0xca   : > { %1924 = vmatpush1.bf16.msra.mxu1 %v2499_v48  ;;  %1884 = vmatprep.subr.bf16.mxu0 %v2504_v49  ;;  %v2592_v48 = vld [vmem:[%s3044_s15 + $0x464] ss:$8 sps:$4 sm:$0xff]   ;;  %v2590_v49 = vld [vmem:[%s3044_s15 + $0x460] ss:$8 sps:$4 sm:$0xff]  }
  0xcb   : > { %1925 = vmatprep.subr.bf16.mxu1 %v2507_v50  ;;  %v2595_v50 = vld [vmem:[%s3044_s15 + $0x474] ss:$8 sps:$4 sm:$0xff]  }
  0xcd   : > { %1885 = vmatpush1.bf16.msra.mxu0 %v2502_v51  ;;  %v2593_v51 = vld [vmem:[%s3044_s15 + $0x470] ss:$8 sps:$4 sm:$0xff]  }
  0xce   : > { %1926 = vmatpush1.bf16.msra.mxu1 %v2505_v52  ;;  %1886 = vmatprep.subr.bf16.mxu0 %v2510_v53  ;;  %v2596_v52 = vld [vmem:[%s3034_s26 + $0x20] ss:$0 sps:$4 sm:$0xff]  }
  0xcf   : > { %1927 = vmatprep.subr.bf16.mxu1 %v2513_v54 }
  0xd1   : > { %1887 = vmatpush1.bf16.msra.mxu0 %v2508_v56 }
  0xd2   : > { %1928 = vmatpush1.bf16.msra.mxu1 %v2511_v57  ;;  %1888 = vmatprep.subr.bf16.mxu0 %v2516_v60 }
  0xd3   : > { %1929 = vmatprep.subr.bf16.mxu1 %v2519_v62 }
  0xd5   : > { %1889 = vmatpush1.bf16.msra.mxu0 %v2514_v63 }
  0xd6   : > { %1930 = vmatpush1.bf16.msra.mxu1 %v2517_v0  ;;  %1890 = vmatprep.subr.bf16.mxu0 %v2522_v1 }
  0xd7   : > { %1931 = vmatprep.subr.bf16.mxu1 %v2525_v2 }
  0xd9   : > { %1891 = vmatpush1.bf16.msra.mxu0 %v2520_v3 }
  0xda   : > { %1932 = vmatpush1.bf16.msra.mxu1 %v2523_v4  ;;  %1892 = vmatprep.subr.bf16.mxu0 %v2528_v5 }
  0xdb   : > { %1933 = vmatprep.subr.bf16.mxu1 %v2531_v6 }
  0xdd   : > { %1893 = vmatpush1.bf16.msra.mxu0 %v2526_v7 }
  0xde   : > { %1934 = vmatpush1.bf16.msra.mxu1 %v2529_v8  ;;  %1894 = vmatprep.subr.bf16.mxu0 %v2534_v9 }
  0xdf   : > { %1935 = vmatprep.subr.bf16.mxu1 %v2537_v10 }
  0xe1   : > { %1895 = vmatpush1.bf16.msra.mxu0 %v2532_v11  ;;  %v889_v11 = vld [vmem:[#allocation2] sm:$0xff] }
  0xe2   : > { %1936 = vmatpush1.bf16.msra.mxu1 %v2535_v12  ;;  %1896 = vmatprep.subr.bf16.mxu0 %v2540_v13 }
  0xe3   : > { %1937 = vmatprep.subr.bf16.mxu1 %v2543_v14  ;;  %v890_v14 = vld [vmem:[#allocation2 + $0x8] sm:$0xff] }
  0xe5   : > { %1897 = vmatpush1.bf16.msra.mxu0 %v2538_v15 }
  0xe6   : > { %1938 = vmatpush1.bf16.msra.mxu1 %v2541_v16  ;;  %1898 = vmatprep.subr.bf16.mxu0 %v2546_v17 }
  0xe7   : > { %1939 = vmatprep.subr.bf16.mxu1 %v2549_v18 }
  0xe9   : > { %1899 = vmatpush1.bf16.msra.mxu0 %v2544_v19 }
  0xea   : > { %1940 = vmatpush1.bf16.msra.mxu1 %v2547_v20  ;;  %1900 = vmatprep.subr.bf16.mxu0 %v2552_v21 }
  0xeb   : > { %1941 = vmatprep.subr.bf16.mxu1 %v2555_v22 }
  0xed   : > { %1901 = vmatpush1.bf16.msra.mxu0 %v2550_v23 }
  0xee   : > { %1942 = vmatpush1.bf16.msra.mxu1 %v2553_v24  ;;  %1902 = vmatprep.subr.bf16.mxu0 %v2558_v25 }
  0xef   : > { %1943 = vmatprep.subr.bf16.mxu1 %v2561_v26 }
  0xf1   : > { %1903 = vmatpush1.bf16.msra.mxu0 %v2556_v27 }
  0xf2   : > { %1944 = vmatpush1.bf16.msra.mxu1 %v2559_v28  ;;  %1904 = vmatprep.subr.bf16.mxu0 %v2564_v29 }
  0xf3   : > { %1945 = vmatprep.subr.bf16.mxu1 %v2567_v30 }
  0xf5   : > { %1905 = vmatpush1.bf16.msra.mxu0 %v2562_v31 }
  0xf6   : > { %1946 = vmatpush1.bf16.msra.mxu1 %v2565_v32  ;;  %1956 = vmatprep.subr.bf16.mxu0 %v2572_v33 }
  0xf8   : > { %1907 = vmatmul.mubr.bf16.vlgmr.msra.gmra.mrb[4].mxu0 %v2158_v34 }
  0xf9   : > { %1948 = vmatmul.mubr.bf16.vlgmr.msra.gmra.mrb[4].mxu1 %v2160_v35  ;;  %1957 = vmatpush1.bf16.msra.mxu0 %v2570_v36 }
  0xfa   : > { %1988 = vmatprep.mubr.bf16.mxu0 %v2653_v39  ;;  %1958 = vmatprep.subr.bf16.mxu0 %v2577_v37 }
  0xfd   : > { %1959 = vmatpush1.bf16.msra.mxu0 %v2575_v38 }
  0xfe   : > { %1960 = vmatprep.subr.bf16.mxu0 %v2580_v40 }
 0x101   : > { %1961 = vmatpush1.bf16.msra.mxu0 %v2578_v41 }
 0x102   : > { %1962 = vmatprep.subr.bf16.mxu0 %v2583_v42 }
 0x105   : > { %1963 = vmatpush1.bf16.msra.mxu0 %v2581_v43 }
 0x106   : > { %1964 = vmatprep.subr.bf16.mxu0 %v2586_v44 }
 0x109   : > { %1965 = vmatpush1.bf16.msra.mxu0 %v2584_v45 }
 0x10a   : > { %1966 = vmatprep.subr.bf16.mxu0 %v2589_v46 }
 0x10d   : > { %1967 = vmatpush1.bf16.msra.mxu0 %v2587_v47 }
 0x10e   : > { %1968 = vmatprep.subr.bf16.mxu0 %v2592_v48 }
 0x111   : > { %1969 = vmatpush1.bf16.msra.mxu0 %v2590_v49 }
 0x112   : > { %1970 = vmatprep.subr.bf16.mxu0 %v2595_v50 }
 0x115   : > { %1971 = vmatpush1.bf16.msra.mxu0 %v2593_v51 }
 0x118   : > { %1989 = vmatmul.mubr.bf16.vlgmr.msra.gmra.mrb[8].mxu0 %v2596_v52 }
 0x18b   : > { %v1826_v53 = vpop.f32.mrb[0].mxu0 }
 0x18c   : > { %v1867_v54 = vpop.f32.mrb[0].mxu1  ;;  %v1828_v56 = vpop.f32.mrb[1].mxu0 }
 0x18d   : > { %v1868_v55 = vadd.f32 %v1867_v54, %v1826_v53  ;;  %v1869_v57 = vpop.f32.mrb[1].mxu1  ;;  %v1830_v59 = vpop.f32.mrb[2].mxu0 }
 0x18e   : > { %v1870_v58 = vadd.f32 %v1869_v57, %v1828_v56  ;;  %v1871_v60 = vpop.f32.mrb[2].mxu1  ;;  %v1831_v61 = vpop.f32.mrb[3].mxu0 }
 0x18f   : > { %v1872_v62 = vpop.f32.mrb[3].mxu1 }
 0x1cb   : > { %v1908_v63 = vpop.f32.mrb[4].mxu0 }
 0x1cc   : > { %v1949_v0 = vpop.f32.mrb[4].mxu1  ;;  %v1909_v1 = vadd.f32 %v1908_v63, %v1868_v55  ;;  %v1910_v2 = vpop.f32.mrb[5].mxu0 }
 0x1cd   : > { %v1951_v3 = vpop.f32.mrb[5].mxu1  ;;  %v1911_v4 = vadd.f32 %v1910_v2, %v1870_v58  ;;  %v1912_v5 = vpop.f32.mrb[6].mxu0 }
 0x1ce   : > { %v1953_v6 = vpop.f32.mrb[6].mxu1  ;;  %v1950_v7 = vadd.f32 %v1949_v0, %v1909_v1  ;;  %v1913_v8 = vpop.f32.mrb[7].mxu0 }
 0x1cf   : > { %v1954_v9 = vpop.f32.mrb[7].mxu1  ;;  %v1952_v10 = vadd.f32 %v1951_v3, %v1911_v4 }
 0x1eb   : > { %v1990_v12 = vpop.f32.mrb[8].mxu0  ;;  %2004 = sbr.rel (%p2307_p13) target bundleno = 510 (0x1fe), region = 78 }
 0x1ec   : > { %v1991_v13 = vadd.f32 %v1990_v12, %v1950_v7  ;;  %v1992_v15 = vpop.f32.mrb[9].mxu0 }
 0x1ed   : > { %v1993_v16 = vadd.f32 %v1992_v15, %v1952_v10  ;;  %v1994_v17 = vpop.f32.mrb[10].mxu0 }
 0x1ee   : > { %v1997_v18 = vadd.f32 %v1991_v13, %v889_v11  ;;  %v1995_v19 = vpop.f32.mrb[11].mxu0 }
 0x1ef   : > { %v1998_v20 = vadd.f32 %v1993_v16, %v890_v14 }
 0x1f0   : > { %1999 = vst [vmem:[#allocation2] sm:$0xff] %v1997_v18 }
 0x1f1   : > { %2000 = vst [vmem:[#allocation2 + $0x8] sm:$0xff] %v1998_v20 }
 0x1f7   : > { %v2005_v21 = vld [vmem:[#allocation2] sm:$0xff] }
 0x1f8   : > { %v2006_v22 = vld [vmem:[#allocation2 + $0x8] sm:$0xff]  ;;  %v2007_v23 = vmax.f32 %v2005_v21, 0.0 }
 0x1f9   : > { %v2008_v24 = vmax.f32 %v2006_v22, 0.0 }
 0x1fb   : > { %v2312_v25 = vpack.c.bf16 %v2008_v24, %v2007_v23 }
 0x1fd   : > { %2017 = vst [vmem:[%s3042_s5] sm:$0xff] %v2312_v25 }
 0x1fe PF: > { %s13_s18 = sadd.s32 1, %s2651_s18   ;;  %s3235_s12 = smov %s2631_s13 }
 0x1ff   : > { %p10_p0 = scmp.ge.s32.totalorder %s13_s18, 10   ;;  %s3236_s13 = smov %s2725_s25 }
 0x200   : > { %s3237_s14 = smov %s2643_s16  ;;  %s3238_s15 = smov %s2647_s17 }
 0x201   : > { %s3239_s16 = smov %s3242_s19  ;;  %s3240_s17 = smov %s3246_s20 }
 0x202   :  { %12 = sbr.rel (!%p10_p0) target bundleno = 4 (0x4), region = 119 }

// kernel: resnet18_forward.18
= control target key start
LH: loop header
LB: loop body
LE: loop exit
PB: predicated region body
PF: predicated region fallthrough
CT: control target
= control target key end

     0   :  { %s2767_s15 = smov 0   ;;  %s2769_s16 = smov 0   ;;  %s3327_s0 = inlined_call_operand.vmem [shape: bf16[8,4608], index: 0, kind: input, shape index: {}]   ;;  %s3328_s1 = inlined_call_operand.vmem [shape: bf16[4608,512], index: 1, kind: input, shape index: {}]   ;;  %s3329_s2 = inlined_call_operand.vmem [shape: f32[1,512], index: 2, kind: input, shape index: {}]   ;;  %s3330_s3 = inlined_call_operand.vmem [shape: bf16[8,512], index: 3, kind: input, shape index: {}]   ;;  %s3331_s4 = inlined_call_operand.vmem [shape: bf16[8,512], index: 4, kind: output, shape index: {}]  }
   0x1   :  { %s2771_s17 = smov 0   ;;  %s2773_s18 = smov 0  }
   0x2   :  { %s2775_s19 = smov 0   ;;  %s2777_s20 = smov 0  }
   0x3   :  { %s2779_s21 = smov 0  }
   0x4 LB: > { %s26_s22 = sadd.s32 1, %s2731_s19  ;;  %s29_s23 = sadd.s32 1, %s2735_s20  ;;  %s2739_s21 = sphi %s2779_s21, %s14_s21   ;;  %s2735_s20 = sphi %s2777_s20, %s3337_s20   ;;  %s2731_s19 = sphi %s2775_s19, %s3336_s19   ;;  %s2727_s18 = sphi %s2773_s18, %s3335_s18   ;;  %s2723_s17 = sphi %s2771_s17, %s3334_s17   ;;  %s2719_s16 = sphi %s2769_s16, %s3333_s16   ;;  %s2715_s15 = sphi %s2767_s15, %s3332_s15  }
   0x5   : > { %p27_p0 = scmp.ge.s32.totalorder %s26_s22, 4  ;;  %p77_p1 = scmp.ne.s32.totalorder %s2719_s16, %s2715_s15 }
   0x6   : > { %p78_p2 = scmp.eq.s32.totalorder %s2739_s21, 0  ;;  %s70_s27 = sadd.s32 1, %s2719_s16 }
   0x7   : > { %s3339_s22 = smov (%p27_p0, %s26_s22), 0  ;;  %s3341_s23 = smov (!%p27_p0, %s29_s23), %s2735_s20 }
   0x8   : > { %p79_p3 = por %p78_p2, %p77_p1  ;;  %p31_p4 = scmp.ge.s32.totalorder %s3341_s23, 2 }
   0x9   : > { %s65_s24 = ssub.s32 %s2731_s19, %s3339_s22  ;;  %p2230_p6 = scmp.ge.s32.totalorder %s2739_s21, 8 }
   0xa   : > { %s3343_s23 = smov (%p31_p4, %s3341_s23), 0 }
   0xb   : > { %s66_s25 = ssub.s32 %s2735_s20, %s3343_s23  ;;  %185 = sbr.rel (%p2230_p6) target bundleno = 98 (0x62), region = 16 }
   0xc   : > { %s67_s26 = sor.u32 %s66_s25, %s65_s24 }
   0xd   : > { %p68_p5 = scmp.eq.s32.totalorder %s67_s26, 0 }
   0xf   : > { %s2818_s28 = scalar_select %p68_p5, %s2719_s16, %s70_s27  }
  0x12   : > { %201 = sbr.rel (!%p79_p3) target bundleno = 98 (0x62), region = 24  ;;  %s203_s29 = sand.u32 (%p79_p3), 1, %s2719_s16  }
  0x13   : > { %s2401_s30 = smul.u32 (%p79_p3), 1152, %s203_s29  ;;  %s2231_s5 = sshll.u32 (%p79_p3), %s2735_s20, 1 }
  0x14   : > { %s2399_s6 = smul.u32 (%p79_p3), 576, %s2731_s19 }
  0x15   : > { %s2832_s12 = scalar_lea.vmem (%p79_p3), [#allocation3], %s2401_s30 }
  0x16   : > { %s209_s7 = sadd.s32 (%p79_p3), %s2399_s6, %s2231_s5 }
  0x17   : > { %s2233_s8 = sshll.u32 (%p79_p3), %s209_s7, 2 }
  0x18   : > { %s2827_s11 = scalar_lea.vmem (%p79_p3), %s3328_s1, %s2233_s8 }
  0x19   : > { %v525_v0 = vld [vmem:[%s2827_s11] sm:$0xff]  ;;  %v527_v1 = vld [vmem:[%s2827_s11 + $0x10] sm:$0xff] }
  0x1a   : > { %v529_v2 = vld [vmem:[%s2827_s11 + $0x20] sm:$0xff]  ;;  %526 = vst [vmem:[%s2832_s12] sm:$0xff] %v525_v0  ;;  %528 = vst [vmem:[%s2832_s12 + $0x8] sm:$0xff] %v527_v1  ;;  %v531_v3 = vld [vmem:[%s2827_s11 + $0x30] sm:$0xff] }
  0x1b   : > { %530 = vst [vmem:[%s2832_s12 + $0x10] sm:$0xff] %v529_v2  ;;  %v533_v4 = vld [vmem:[%s2827_s11 + $0x40] sm:$0xff]  ;;  %v535_v5 = vld [vmem:[%s2827_s11 + $0x50] sm:$0xff]  ;;  %532 = vst [vmem:[%s2832_s12 + $0x18] sm:$0xff] %v531_v3 }
  0x1c   : > { %534 = vst [vmem:[%s2832_s12 + $0x20] sm:$0xff] %v533_v4  ;;  %536 = vst [vmem:[%s2832_s12 + $0x28] sm:$0xff] %v535_v5  ;;  %v537_v6 = vld [vmem:[%s2827_s11 + $0x60] sm:$0xff]  ;;  %v539_v7 = vld [vmem:[%s2827_s11 + $0x70] sm:$0xff] }
  0x1d   : > { %v541_v8 = vld [vmem:[%s2827_s11 + $0x80] sm:$0xff]  ;;  %538 = vst [vmem:[%s2832_s12 + $0x30] sm:$0xff] %v537_v6  ;;  %540 = vst [vmem:[%s2832_s12 + $0x38] sm:$0xff] %v539_v7  ;;  %v543_v9 = vld [vmem:[%s2827_s11 + $0x90] sm:$0xff] }
  0x1e   : > { %542 = vst [vmem:[%s2832_s12 + $0x40] sm:$0xff] %v541_v8  ;;  %v545_v10 = vld [vmem:[%s2827_s11 + $0xa0] sm:$0xff]  ;;  %v547_v11 = vld [vmem:[%s2827_s11 + $0xb0] sm:$0xff]  ;;  %544 = vst [vmem:[%s2832_s12 + $0x48] sm:$0xff] %v543_v9 }
  0x1f   : > { %546 = vst [vmem:[%s2832_s12 + $0x50] sm:$0xff] %v545_v10  ;;  %548 = vst [vmem:[%s2832_s12 + $0x58] sm:$0xff] %v547_v11  ;;  %v549_v12 = vld [vmem:[%s2827_s11 + $0xc0] sm:$0xff]  ;;  %v551_v13 = vld [vmem:[%s2827_s11 + $0xd0] sm:$0xff] }
  0x20   : > { %v553_v14 = vld [vmem:[%s2827_s11 + $0xe0] sm:$0xff]  ;;  %550 = vst [vmem:[%s2832_s12 + $0x60] sm:$0xff] %v549_v12  ;;  %552 = vst [vmem:[%s2832_s12 + $0x68] sm:$0xff] %v551_v13  ;;  %v555_v15 = vld [vmem:[%s2827_s11 + $0xf0] sm:$0xff] }
  0x21   : > { %554 = vst [vmem:[%s2832_s12 + $0x70] sm:$0xff] %v553_v14  ;;  %v557_v16 = vld [vmem:[%s2827_s11 + $0x100] sm:$0xff]  ;;  %v559_v17 = vld [vmem:[%s2827_s11 + $0x110] sm:$0xff]  ;;  %556 = vst [vmem:[%s2832_s12 + $0x78] sm:$0xff] %v555_v15 }
  0x22   : > { %558 = vst [vmem:[%s2832_s12 + $0x80] sm:$0xff] %v557_v16  ;;  %560 = vst [vmem:[%s2832_s12 + $0x88] sm:$0xff] %v559_v17  ;;  %v561_v18 = vld [vmem:[%s2827_s11 + $0x120] sm:$0xff]  ;;  %v563_v19 = vld [vmem:[%s2827_s11 + $0x130] sm:$0xff] }
  0x23   : > { %v565_v20 = vld [vmem:[%s2827_s11 + $0x140] sm:$0xff]  ;;  %562 = vst [vmem:[%s2832_s12 + $0x90] sm:$0xff] %v561_v18  ;;  %564 = vst [vmem:[%s2832_s12 + $0x98] sm:$0xff] %v563_v19  ;;  %v567_v21 = vld [vmem:[%s2827_s11 + $0x150] sm:$0xff] }
  0x24   : > { %566 = vst [vmem:[%s2832_s12 + $0xa0] sm:$0xff] %v565_v20  ;;  %v569_v22 = vld [vmem:[%s2827_s11 + $0x160] sm:$0xff]  ;;  %v571_v23 = vld [vmem:[%s2827_s11 + $0x170] sm:$0xff]  ;;  %568 = vst [vmem:[%s2832_s12 + $0xa8] sm:$0xff] %v567_v21 }
  0x25   : > { %570 = vst [vmem:[%s2832_s12 + $0xb0] sm:$0xff] %v569_v22  ;;  %572 = vst [vmem:[%s2832_s12 + $0xb8] sm:$0xff] %v571_v23  ;;  %v573_v24 = vld [vmem:[%s2827_s11 + $0x180] sm:$0xff]  ;;  %v575_v25 = vld [vmem:[%s2827_s11 + $0x190] sm:$0xff] }
  0x26   : > { %v577_v26 = vld [vmem:[%s2827_s11 + $0x1a0] sm:$0xff]  ;;  %574 = vst [vmem:[%s2832_s12 + $0xc0] sm:$0xff] %v573_v24  ;;  %576 = vst [vmem:[%s2832_s12 + $0xc8] sm:$0xff] %v575_v25  ;;  %v579_v27 = vld [vmem:[%s2827_s11 + $0x1b0] sm:$0xff] }
  0x27   : > { %578 = vst [vmem:[%s2832_s12 + $0xd0] sm:$0xff] %v577_v26  ;;  %v581_v28 = vld [vmem:[%s2827_s11 + $0x1c0] sm:$0xff]  ;;  %v583_v29 = vld [vmem:[%s2827_s11 + $0x1d0] sm:$0xff]  ;;  %580 = vst [vmem:[%s2832_s12 + $0xd8] sm:$0xff] %v579_v27 }
  0x28   : > { %582 = vst [vmem:[%s2832_s12 + $0xe0] sm:$0xff] %v581_v28  ;;  %584 = vst [vmem:[%s2832_s12 + $0xe8] sm:$0xff] %v583_v29  ;;  %v585_v30 = vld [vmem:[%s2827_s11 + $0x1e0] sm:$0xff]  ;;  %v587_v31 = vld [vmem:[%s2827_s11 + $0x1f0] sm:$0xff] }
  0x29   : > { %v589_v32 = vld [vmem:[%s2827_s11 + $0x200] sm:$0xff]  ;;  %586 = vst [vmem:[%s2832_s12 + $0xf0] sm:$0xff] %v585_v30  ;;  %588 = vst [vmem:[%s2832_s12 + $0xf8] sm:$0xff] %v587_v31  ;;  %v591_v33 = vld [vmem:[%s2827_s11 + $0x210] sm:$0xff] }
  0x2a   : > { %590 = vst [vmem:[%s2832_s12 + $0x100] sm:$0xff] %v589_v32  ;;  %v593_v34 = vld [vmem:[%s2827_s11 + $0x220] sm:$0xff]  ;;  %v595_v35 = vld [vmem:[%s2827_s11 + $0x230] sm:$0xff]  ;;  %592 = vst [vmem:[%s2832_s12 + $0x108] sm:$0xff] %v591_v33 }
  0x2b   : > { %594 = vst [vmem:[%s2832_s12 + $0x110] sm:$0xff] %v593_v34  ;;  %596 = vst [vmem:[%s2832_s12 + $0x118] sm:$0xff] %v595_v35  ;;  %v597_v36 = vld [vmem:[%s2827_s11 + $0x240] sm:$0xff]  ;;  %v599_v37 = vld [vmem:[%s2827_s11 + $0x250] sm:$0xff] }
  0x2c   : > { %v601_v38 = vld [vmem:[%s2827_s11 + $0x260] sm:$0xff]  ;;  %598 = vst [vmem:[%s2832_s12 + $0x120] sm:$0xff] %v597_v36  ;;  %600 = vst [vmem:[%s2832_s12 + $0x128] sm:$0xff] %v599_v37  ;;  %v603_v39 = vld [vmem:[%s2827_s11 + $0x270] sm:$0xff] }
  0x2d   : > { %602 = vst [vmem:[%s2832_s12 + $0x130] sm:$0xff] %v601_v38  ;;  %v605_v40 = vld [vmem:[%s2827_s11 + $0x280] sm:$0xff]  ;;  %v607_v41 = vld [vmem:[%s2827_s11 + $0x290] sm:$0xff]  ;;  %604 = vst [vmem:[%s2832_s12 + $0x138] sm:$0xff] %v603_v39 }
  0x2e   : > { %606 = vst [vmem:[%s2832_s12 + $0x140] sm:$0xff] %v605_v40  ;;  %608 = vst [vmem:[%s2832_s12 + $0x148] sm:$0xff] %v607_v41  ;;  %v609_v42 = vld [vmem:[%s2827_s11 + $0x2a0] sm:$0xff]  ;;  %v611_v43 = vld [vmem:[%s2827_s11 + $0x2b0] sm:$0xff] }
  0x2f   : > { %v613_v44 = vld [vmem:[%s2827_s11 + $0x2c0] sm:$0xff]  ;;  %610 = vst [vmem:[%s2832_s12 + $0x150] sm:$0xff] %v609_v42  ;;  %612 = vst [vmem:[%s2832_s12 + $0x158] sm:$0xff] %v611_v43  ;;  %v615_v45 = vld [vmem:[%s2827_s11 + $0x2d0] sm:$0xff] }
  0x30   : > { %614 = vst [vmem:[%s2832_s12 + $0x160] sm:$0xff] %v613_v44  ;;  %v617_v46 = vld [vmem:[%s2827_s11 + $0x2e0] sm:$0xff]  ;;  %v619_v47 = vld [vmem:[%s2827_s11 + $0x2f0] sm:$0xff]  ;;  %616 = vst [vmem:[%s2832_s12 + $0x168] sm:$0xff] %v615_v45 }
  0x31   : > { %618 = vst [vmem:[%s2832_s12 + $0x170] sm:$0xff] %v617_v46  ;;  %620 = vst [vmem:[%s2832_s12 + $0x178] sm:$0xff] %v619_v47  ;;  %v621_v48 = vld [vmem:[%s2827_s11 + $0x300] sm:$0xff]  ;;  %v623_v49 = vld [vmem:[%s2827_s11 + $0x310] sm:$0xff] }
  0x32   : > { %v625_v50 = vld [vmem:[%s2827_s11 + $0x320] sm:$0xff]  ;;  %622 = vst [vmem:[%s2832_s12 + $0x180] sm:$0xff] %v621_v48  ;;  %624 = vst [vmem:[%s2832_s12 + $0x188] sm:$0xff] %v623_v49  ;;  %v627_v51 = vld [vmem:[%s2827_s11 + $0x330] sm:$0xff] }
  0x33   : > { %626 = vst [vmem:[%s2832_s12 + $0x190] sm:$0xff] %v625_v50  ;;  %v629_v52 = vld [vmem:[%s2827_s11 + $0x340] sm:$0xff]  ;;  %v631_v53 = vld [vmem:[%s2827_s11 + $0x350] sm:$0xff]  ;;  %628 = vst [vmem:[%s2832_s12 + $0x198] sm:$0xff] %v627_v51 }
  0x34   : > { %630 = vst [vmem:[%s2832_s12 + $0x1a0] sm:$0xff] %v629_v52  ;;  %632 = vst [vmem:[%s2832_s12 + $0x1a8] sm:$0xff] %v631_v53  ;;  %v633_v54 = vld [vmem:[%s2827_s11 + $0x360] sm:$0xff]  ;;  %v635_v55 = vld [vmem:[%s2827_s11 + $0x370] sm:$0xff] }
  0x35   : > { %v637_v56 = vld [vmem:[%s2827_s11 + $0x380] sm:$0xff]  ;;  %634 = vst [vmem:[%s2832_s12 + $0x1b0] sm:$0xff] %v633_v54  ;;  %636 = vst [vmem:[%s2832_s12 + $0x1b8] sm:$0xff] %v635_v55  ;;  %v639_v57 = vld [vmem:[%s2827_s11 + $0x390] sm:$0xff] }
  0x36   : > { %638 = vst [vmem:[%s2832_s12 + $0x1c0] sm:$0xff] %v637_v56  ;;  %v641_v58 = vld [vmem:[%s2827_s11 + $0x3a0] sm:$0xff]  ;;  %v643_v59 = vld [vmem:[%s2827_s11 + $0x3b0] sm:$0xff]  ;;  %640 = vst [vmem:[%s2832_s12 + $0x1c8] sm:$0xff] %v639_v57 }
  0x37   : > { %642 = vst [vmem:[%s2832_s12 + $0x1d0] sm:$0xff] %v641_v58  ;;  %644 = vst [vmem:[%s2832_s12 + $0x1d8] sm:$0xff] %v643_v59  ;;  %v645_v60 = vld [vmem:[%s2827_s11 + $0x3c0] sm:$0xff]  ;;  %v647_v61 = vld [vmem:[%s2827_s11 + $0x3d0] sm:$0xff] }
  0x38   : > { %v649_v62 = vld [vmem:[%s2827_s11 + $0x3e0] sm:$0xff]  ;;  %646 = vst [vmem:[%s2832_s12 + $0x1e0] sm:$0xff] %v645_v60  ;;  %648 = vst [vmem:[%s2832_s12 + $0x1e8] sm:$0xff] %v647_v61  ;;  %v651_v63 = vld [vmem:[%s2827_s11 + $0x3f0] sm:$0xff] }
  0x39   : > { %650 = vst [vmem:[%s2832_s12 + $0x1f0] sm:$0xff] %v649_v62  ;;  %v653_v0 = vld [vmem:[%s2827_s11 + $0x400] sm:$0xff]  ;;  %v655_v1 = vld [vmem:[%s2827_s11 + $0x410] sm:$0xff]  ;;  %652 = vst [vmem:[%s2832_s12 + $0x1f8] sm:$0xff] %v651_v63 }
  0x3a   : > { %654 = vst [vmem:[%s2832_s12 + $0x200] sm:$0xff] %v653_v0  ;;  %656 = vst [vmem:[%s2832_s12 + $0x208] sm:$0xff] %v655_v1  ;;  %v657_v2 = vld [vmem:[%s2827_s11 + $0x420] sm:$0xff]  ;;  %v659_v3 = vld [vmem:[%s2827_s11 + $0x430] sm:$0xff] }
  0x3b   : > { %v661_v4 = vld [vmem:[%s2827_s11 + $0x440] sm:$0xff]  ;;  %658 = vst [vmem:[%s2832_s12 + $0x210] sm:$0xff] %v657_v2  ;;  %660 = vst [vmem:[%s2832_s12 + $0x218] sm:$0xff] %v659_v3  ;;  %v663_v5 = vld [vmem:[%s2827_s11 + $0x450] sm:$0xff] }
  0x3c   : > { %662 = vst [vmem:[%s2832_s12 + $0x220] sm:$0xff] %v661_v4  ;;  %v665_v6 = vld [vmem:[%s2827_s11 + $0x460] sm:$0xff]  ;;  %v667_v7 = vld [vmem:[%s2827_s11 + $0x470] sm:$0xff]  ;;  %664 = vst [vmem:[%s2832_s12 + $0x228] sm:$0xff] %v663_v5 }
  0x3d   : > { %666 = vst [vmem:[%s2832_s12 + $0x230] sm:$0xff] %v665_v6  ;;  %668 = vst [vmem:[%s2832_s12 + $0x238] sm:$0xff] %v667_v7  ;;  %v669_v8 = vld [vmem:[%s2827_s11 + $0x480] sm:$0xff]  ;;  %v671_v9 = vld [vmem:[%s2827_s11 + $0x490] sm:$0xff] }
  0x3e   : > { %v673_v10 = vld [vmem:[%s2827_s11 + $0x4a0] sm:$0xff]  ;;  %670 = vst [vmem:[%s2832_s12 + $0x240] sm:$0xff] %v669_v8  ;;  %672 = vst [vmem:[%s2832_s12 + $0x248] sm:$0xff] %v671_v9  ;;  %v675_v11 = vld [vmem:[%s2827_s11 + $0x4b0] sm:$0xff] }
  0x3f   : > { %674 = vst [vmem:[%s2832_s12 + $0x250] sm:$0xff] %v673_v10  ;;  %v677_v12 = vld [vmem:[%s2827_s11 + $0x4c0] sm:$0xff]  ;;  %v679_v13 = vld [vmem:[%s2827_s11 + $0x4d0] sm:$0xff]  ;;  %676 = vst [vmem:[%s2832_s12 + $0x258] sm:$0xff] %v675_v11 }
  0x40   : > { %678 = vst [vmem:[%s2832_s12 + $0x260] sm:$0xff] %v677_v12  ;;  %680 = vst [vmem:[%s2832_s12 + $0x268] sm:$0xff] %v679_v13  ;;  %v681_v14 = vld [vmem:[%s2827_s11 + $0x4e0] sm:$0xff]  ;;  %v683_v15 = vld [vmem:[%s2827_s11 + $0x4f0] sm:$0xff] }
  0x41   : > { %v685_v16 = vld [vmem:[%s2827_s11 + $0x500] sm:$0xff]  ;;  %682 = vst [vmem:[%s2832_s12 + $0x270] sm:$0xff] %v681_v14  ;;  %684 = vst [vmem:[%s2832_s12 + $0x278] sm:$0xff] %v683_v15  ;;  %v687_v17 = vld [vmem:[%s2827_s11 + $0x510] sm:$0xff] }
  0x42   : > { %686 = vst [vmem:[%s2832_s12 + $0x280] sm:$0xff] %v685_v16  ;;  %v689_v18 = vld [vmem:[%s2827_s11 + $0x520] sm:$0xff]  ;;  %v691_v19 = vld [vmem:[%s2827_s11 + $0x530] sm:$0xff]  ;;  %688 = vst [vmem:[%s2832_s12 + $0x288] sm:$0xff] %v687_v17 }
  0x43   : > { %690 = vst [vmem:[%s2832_s12 + $0x290] sm:$0xff] %v689_v18  ;;  %692 = vst [vmem:[%s2832_s12 + $0x298] sm:$0xff] %v691_v19  ;;  %v693_v20 = vld [vmem:[%s2827_s11 + $0x540] sm:$0xff]  ;;  %v695_v21 = vld [vmem:[%s2827_s11 + $0x550] sm:$0xff] }
  0x44   : > { %v697_v22 = vld [vmem:[%s2827_s11 + $0x560] sm:$0xff]  ;;  %694 = vst [vmem:[%s2832_s12 + $0x2a0] sm:$0xff] %v693_v20  ;;  %696 = vst [vmem:[%s2832_s12 + $0x2a8] sm:$0xff] %v695_v21  ;;  %v699_v23 = vld [vmem:[%s2827_s11 + $0x570] sm:$0xff] }
  0x45   : > { %698 = vst [vmem:[%s2832_s12 + $0x2b0] sm:$0xff] %v697_v22  ;;  %v701_v24 = vld [vmem:[%s2827_s11 + $0x580] sm:$0xff]  ;;  %v703_v25 = vld [vmem:[%s2827_s11 + $0x590] sm:$0xff]  ;;  %700 = vst [vmem:[%s2832_s12 + $0x2b8] sm:$0xff] %v699_v23 }
  0x46   : > { %702 = vst [vmem:[%s2832_s12 + $0x2c0] sm:$0xff] %v701_v24  ;;  %704 = vst [vmem:[%s2832_s12 + $0x2c8] sm:$0xff] %v703_v25  ;;  %v705_v26 = vld [vmem:[%s2827_s11 + $0x5a0] sm:$0xff]  ;;  %v707_v27 = vld [vmem:[%s2827_s11 + $0x5b0] sm:$0xff] }
  0x47   : > { %v709_v28 = vld [vmem:[%s2827_s11 + $0x5c0] sm:$0xff]  ;;  %706 = vst [vmem:[%s2832_s12 + $0x2d0] sm:$0xff] %v705_v26  ;;  %708 = vst [vmem:[%s2832_s12 + $0x2d8] sm:$0xff] %v707_v27  ;;  %v711_v29 = vld [vmem:[%s2827_s11 + $0x5d0] sm:$0xff] }
  0x48   : > { %710 = vst [vmem:[%s2832_s12 + $0x2e0] sm:$0xff] %v709_v28  ;;  %v713_v30 = vld [vmem:[%s2827_s11 + $0x5e0] sm:$0xff]  ;;  %v715_v31 = vld [vmem:[%s2827_s11 + $0x5f0] sm:$0xff]  ;;  %712 = vst [vmem:[%s2832_s12 + $0x2e8] sm:$0xff] %v711_v29 }
  0x49   : > { %714 = vst [vmem:[%s2832_s12 + $0x2f0] sm:$0xff] %v713_v30  ;;  %716 = vst [vmem:[%s2832_s12 + $0x2f8] sm:$0xff] %v715_v31  ;;  %v717_v32 = vld [vmem:[%s2827_s11 + $0x600] sm:$0xff]  ;;  %v719_v33 = vld [vmem:[%s2827_s11 + $0x610] sm:$0xff] }
  0x4a   : > { %v721_v34 = vld [vmem:[%s2827_s11 + $0x620] sm:$0xff]  ;;  %718 = vst [vmem:[%s2832_s12 + $0x300] sm:$0xff] %v717_v32  ;;  %720 = vst [vmem:[%s2832_s12 + $0x308] sm:$0xff] %v719_v33  ;;  %v723_v35 = vld [vmem:[%s2827_s11 + $0x630] sm:$0xff] }
  0x4b   : > { %722 = vst [vmem:[%s2832_s12 + $0x310] sm:$0xff] %v721_v34  ;;  %v725_v36 = vld [vmem:[%s2827_s11 + $0x640] sm:$0xff]  ;;  %v727_v37 = vld [vmem:[%s2827_s11 + $0x650] sm:$0xff]  ;;  %724 = vst [vmem:[%s2832_s12 + $0x318] sm:$0xff] %v723_v35 }
  0x4c   : > { %726 = vst [vmem:[%s2832_s12 + $0x320] sm:$0xff] %v725_v36  ;;  %728 = vst [vmem:[%s2832_s12 + $0x328] sm:$0xff] %v727_v37  ;;  %v729_v38 = vld [vmem:[%s2827_s11 + $0x660] sm:$0xff]  ;;  %v731_v39 = vld [vmem:[%s2827_s11 + $0x670] sm:$0xff] }
  0x4d   : > { %v733_v40 = vld [vmem:[%s2827_s11 + $0x680] sm:$0xff]  ;;  %730 = vst [vmem:[%s2832_s12 + $0x330] sm:$0xff] %v729_v38  ;;  %732 = vst [vmem:[%s2832_s12 + $0x338] sm:$0xff] %v731_v39  ;;  %v735_v41 = vld [vmem:[%s2827_s11 + $0x690] sm:$0xff] }
  0x4e   : > { %734 = vst [vmem:[%s2832_s12 + $0x340] sm:$0xff] %v733_v40  ;;  %v737_v42 = vld [vmem:[%s2827_s11 + $0x6a0] sm:$0xff]  ;;  %v739_v43 = vld [vmem:[%s2827_s11 + $0x6b0] sm:$0xff]  ;;  %736 = vst [vmem:[%s2832_s12 + $0x348] sm:$0xff] %v735_v41 }
  0x4f   : > { %738 = vst [vmem:[%s2832_s12 + $0x350] sm:$0xff] %v737_v42  ;;  %740 = vst [vmem:[%s2832_s12 + $0x358] sm:$0xff] %v739_v43  ;;  %v741_v44 = vld [vmem:[%s2827_s11 + $0x6c0] sm:$0xff]  ;;  %v743_v45 = vld [vmem:[%s2827_s11 + $0x6d0] sm:$0xff] }
  0x50   : > { %v745_v46 = vld [vmem:[%s2827_s11 + $0x6e0] sm:$0xff]  ;;  %742 = vst [vmem:[%s2832_s12 + $0x360] sm:$0xff] %v741_v44  ;;  %744 = vst [vmem:[%s2832_s12 + $0x368] sm:$0xff] %v743_v45  ;;  %v747_v47 = vld [vmem:[%s2827_s11 + $0x6f0] sm:$0xff] }
  0x51   : > { %746 = vst [vmem:[%s2832_s12 + $0x370] sm:$0xff] %v745_v46  ;;  %v749_v48 = vld [vmem:[%s2827_s11 + $0x700] sm:$0xff]  ;;  %v751_v49 = vld [vmem:[%s2827_s11 + $0x710] sm:$0xff]  ;;  %748 = vst [vmem:[%s2832_s12 + $0x378] sm:$0xff] %v747_v47 }
  0x52   : > { %750 = vst [vmem:[%s2832_s12 + $0x380] sm:$0xff] %v749_v48  ;;  %752 = vst [vmem:[%s2832_s12 + $0x388] sm:$0xff] %v751_v49  ;;  %v753_v50 = vld [vmem:[%s2827_s11 + $0x720] sm:$0xff]  ;;  %v755_v51 = vld [vmem:[%s2827_s11 + $0x730] sm:$0xff] }
  0x53   : > { %v757_v52 = vld [vmem:[%s2827_s11 + $0x740] sm:$0xff]  ;;  %754 = vst [vmem:[%s2832_s12 + $0x390] sm:$0xff] %v753_v50  ;;  %756 = vst [vmem:[%s2832_s12 + $0x398] sm:$0xff] %v755_v51  ;;  %v759_v53 = vld [vmem:[%s2827_s11 + $0x750] sm:$0xff] }
  0x54   : > { %758 = vst [vmem:[%s2832_s12 + $0x3a0] sm:$0xff] %v757_v52  ;;  %v761_v54 = vld [vmem:[%s2827_s11 + $0x760] sm:$0xff]  ;;  %v763_v55 = vld [vmem:[%s2827_s11 + $0x770] sm:$0xff]  ;;  %760 = vst [vmem:[%s2832_s12 + $0x3a8] sm:$0xff] %v759_v53 }
  0x55   : > { %762 = vst [vmem:[%s2832_s12 + $0x3b0] sm:$0xff] %v761_v54  ;;  %764 = vst [vmem:[%s2832_s12 + $0x3b8] sm:$0xff] %v763_v55  ;;  %v765_v56 = vld [vmem:[%s2827_s11 + $0x780] sm:$0xff]  ;;  %v767_v57 = vld [vmem:[%s2827_s11 + $0x790] sm:$0xff] }
  0x56   : > { %v769_v58 = vld [vmem:[%s2827_s11 + $0x7a0] sm:$0xff]  ;;  %766 = vst [vmem:[%s2832_s12 + $0x3c0] sm:$0xff] %v765_v56  ;;  %768 = vst [vmem:[%s2832_s12 + $0x3c8] sm:$0xff] %v767_v57  ;;  %v771_v59 = vld [vmem:[%s2827_s11 + $0x7b0] sm:$0xff] }
  0x57   : > { %770 = vst [vmem:[%s2832_s12 + $0x3d0] sm:$0xff] %v769_v58  ;;  %v773_v60 = vld [vmem:[%s2827_s11 + $0x7c0] sm:$0xff]  ;;  %v775_v61 = vld [vmem:[%s2827_s11 + $0x7d0] sm:$0xff]  ;;  %772 = vst [vmem:[%s2832_s12 + $0x3d8] sm:$0xff] %v771_v59 }
  0x58   : > { %774 = vst [vmem:[%s2832_s12 + $0x3e0] sm:$0xff] %v773_v60  ;;  %776 = vst [vmem:[%s2832_s12 + $0x3e8] sm:$0xff] %v775_v61  ;;  %v777_v62 = vld [vmem:[%s2827_s11 + $0x7e0] sm:$0xff]  ;;  %v779_v63 = vld [vmem:[%s2827_s11 + $0x7f0] sm:$0xff] }
  0x59   : > { %v781_v0 = vld [vmem:[%s2827_s11 + $0x800] sm:$0xff]  ;;  %778 = vst [vmem:[%s2832_s12 + $0x3f0] sm:$0xff] %v777_v62  ;;  %780 = vst [vmem:[%s2832_s12 + $0x3f8] sm:$0xff] %v779_v63  ;;  %v783_v1 = vld [vmem:[%s2827_s11 + $0x810] sm:$0xff] }
  0x5a   : > { %782 = vst [vmem:[%s2832_s12 + $0x400] sm:$0xff] %v781_v0  ;;  %v785_v2 = vld [vmem:[%s2827_s11 + $0x820] sm:$0xff]  ;;  %v787_v3 = vld [vmem:[%s2827_s11 + $0x830] sm:$0xff]  ;;  %784 = vst [vmem:[%s2832_s12 + $0x408] sm:$0xff] %v783_v1 }
  0x5b   : > { %786 = vst [vmem:[%s2832_s12 + $0x410] sm:$0xff] %v785_v2  ;;  %788 = vst [vmem:[%s2832_s12 + $0x418] sm:$0xff] %v787_v3  ;;  %v789_v4 = vld [vmem:[%s2827_s11 + $0x840] sm:$0xff]  ;;  %v791_v5 = vld [vmem:[%s2827_s11 + $0x850] sm:$0xff] }
  0x5c   : > { %v793_v6 = vld [vmem:[%s2827_s11 + $0x860] sm:$0xff]  ;;  %790 = vst [vmem:[%s2832_s12 + $0x420] sm:$0xff] %v789_v4  ;;  %792 = vst [vmem:[%s2832_s12 + $0x428] sm:$0xff] %v791_v5  ;;  %v795_v7 = vld [vmem:[%s2827_s11 + $0x870] sm:$0xff] }
  0x5d   : > { %794 = vst [vmem:[%s2832_s12 + $0x430] sm:$0xff] %v793_v6  ;;  %v797_v8 = vld [vmem:[%s2827_s11 + $0x880] sm:$0xff]  ;;  %v799_v9 = vld [vmem:[%s2827_s11 + $0x890] sm:$0xff]  ;;  %796 = vst [vmem:[%s2832_s12 + $0x438] sm:$0xff] %v795_v7 }
  0x5e   : > { %798 = vst [vmem:[%s2832_s12 + $0x440] sm:$0xff] %v797_v8  ;;  %800 = vst [vmem:[%s2832_s12 + $0x448] sm:$0xff] %v799_v9  ;;  %v801_v10 = vld [vmem:[%s2827_s11 + $0x8a0] sm:$0xff]  ;;  %v803_v11 = vld [vmem:[%s2827_s11 + $0x8b0] sm:$0xff] }
  0x5f   : > { %v805_v12 = vld [vmem:[%s2827_s11 + $0x8c0] sm:$0xff]  ;;  %802 = vst [vmem:[%s2832_s12 + $0x450] sm:$0xff] %v801_v10  ;;  %804 = vst [vmem:[%s2832_s12 + $0x458] sm:$0xff] %v803_v11  ;;  %v807_v13 = vld [vmem:[%s2827_s11 + $0x8d0] sm:$0xff] }
  0x60   : > { %806 = vst [vmem:[%s2832_s12 + $0x460] sm:$0xff] %v805_v12  ;;  %v809_v14 = vld [vmem:[%s2827_s11 + $0x8e0] sm:$0xff]  ;;  %v811_v15 = vld [vmem:[%s2827_s11 + $0x8f0] sm:$0xff]  ;;  %808 = vst [vmem:[%s2832_s12 + $0x468] sm:$0xff] %v807_v13 }
  0x61   : > { %810 = vst [vmem:[%s2832_s12 + $0x470] sm:$0xff] %v809_v14  ;;  %812 = vst [vmem:[%s2832_s12 + $0x478] sm:$0xff] %v811_v15 }
  0x62 PF: > { %p2234_p7 = scmp.ge.s32.totalorder %s2739_s21, 1  ;;  %p838_p8 = scmp.lt.s32.totalorder %s2739_s21, 9 }
  0x64   : > { %p839_p9 = pnand %p2234_p7, %p838_p8 }
  0x65   : > { %s845_s13 = sand.u32 (!%p839_p9), 1, %s2715_s15   ;;  %s896_s14 = smul.u32 (!%p839_p9), 9, %s2723_s17 }
  0x66   : > { %842 = sbr.rel (%p839_p9) target bundleno = 512 (0x200), region = 70  ;;  %s2236_s25 = sshll.u32 (!%p839_p9), %s2727_s18, 1 }
  0x67   : > { %s2402_s24 = smul.u32 (!%p839_p9), 1152, %s845_s13  ;;  %p899_p10 = scmp.lt.s32.totalorder (!%p839_p9), %s896_s14, 35 }
  0x68   : > { %p909_p11 = scmp.lt.s32.totalorder (!%p839_p9), %s2236_s25, 3  ;;  %p2241_p12 = scmp.ne.s32.totalorder (!%p839_p9), %s2723_s17, 0 }
  0x69   : > { %s3140_s13 = scalar_lea.vmem (!%p839_p9), [#allocation3], %s2402_s24 }
  0x6d   : > { %s3345_s14 = smov (!%p899_p10, %s896_s14), 35  ;;  %s3347_s25 = smov (!%p909_p11, %s2236_s25), 3 }
  0x6e   : > { %s2235_s26 = sshll.u32 %s3345_s14, 2  ;;  %s911_s7 = scalar_lea.vmem %s3329_s2, %s3347_s25  ;;  %v940_v16 = vlaneseq (!%p2241_p12) }
  0x6f   : > { %s3127_s30 = scalar_lea.vmem %s3327_s0, %s2235_s26  ;;  %s2238_s8 = sshll.u32 %s3347_s25, 2  ;;  %v938_v19 = vld [vmem:[%s911_s7] sm:$0x3] (!%p2241_p12) }
  0x70   : > { %s921_s10 = scalar_lea.vmem %s3330_s3, %s2238_s8  ;;  %s3138_s12 = scalar_lea.vmem %s3331_s4, %s2238_s8  ;;  %v941_v18 = vshrl.u32 (!%p2241_p12), %v940_v16, 7 }
  0x71   : > { %937 = sbr.rel (%p2241_p12) target bundleno = 121 (0x79), region = 78  ;;  %v950_v17 = vld [vmem:[%s921_s10] sm:$0xff] (!%p2241_p12) }
  0x72   : > { %v942_v20 = vsub.s32 (!%p2241_p12), 0, %v941_v18  ;;  %v951_v21 = vunpack.c.l.bf16 (!%p2241_p12), %v950_v17  ;;  %v946_v22 = vsub.s32 (!%p2241_p12), 1, %v941_v18  ;;  %v952_v23 = vunpack.c.h.bf16 (!%p2241_p12), %v950_v17 }
  0x74   : > { %v943_v24 = vrot.slane (!%p2241_p12), %v938_v19, %v942_v20  ;;  %v947_v25 = vrot.slane (!%p2241_p12), %v938_v19, %v946_v22 }
  0x76   : > { %v953_v26 = vadd.f32 (!%p2241_p12), %v951_v21, %v943_v24  ;;  %v954_v27 = vadd.f32 (!%p2241_p12), %v952_v23, %v947_v25 }
  0x78   : > { %955 = vst [vmem:[#allocation2] sm:$0xff] %v953_v26  ;;  %956 = vst [vmem:[#allocation2 + $0x8] sm:$0xff] %v954_v27 }
  0x79 PF: > { %v2460_v28 = vld [vmem:[%s3140_s13 + $0x4] ss:$8 sps:$4 sm:$0xff]   ;;  %v2464_v30 = vld [vmem:[%s3140_s13] ss:$8 sps:$4 sm:$0xff]   ;;  %v2466_v32 = vld [vmem:[%s3140_s13 + $0x14] ss:$8 sps:$4 sm:$0xff]  }
  0x7a   : > { %v2462_v29 = vld [vmem:[%s3140_s13 + $0x104] ss:$8 sps:$4 sm:$0xff]   ;;  %1860 = vmatprep.subr.bf16.mxu0 %v2460_v28  ;;  %v2465_v31 = vld [vmem:[%s3140_s13 + $0x100] ss:$8 sps:$4 sm:$0xff]   ;;  %v2468_v33 = vld [vmem:[%s3140_s13 + $0x114] ss:$8 sps:$4 sm:$0xff]  }
  0x7b   : > { %1901 = vmatprep.subr.bf16.mxu1 %v2462_v29  ;;  %1861 = vmatpush1.bf16.msra.mxu0 %v2464_v30  ;;  %v2470_v34 = vld [vmem:[%s3140_s13 + $0x10] ss:$8 sps:$4 sm:$0xff]   ;;  %v2472_v36 = vld [vmem:[%s3140_s13 + $0x24] ss:$8 sps:$4 sm:$0xff]   ;;  %v2476_v38 = vld [vmem:[%s3140_s13 + $0x20] ss:$8 sps:$4 sm:$0xff]  }
  0x7c   : > { %1902 = vmatpush1.bf16.msra.mxu1 %v2465_v31  ;;  %1862 = vmatprep.subr.bf16.mxu0 %v2466_v32  ;;  %v2471_v35 = vld [vmem:[%s3140_s13 + $0x110] ss:$8 sps:$4 sm:$0xff]   ;;  %v2474_v37 = vld [vmem:[%s3140_s13 + $0x124] ss:$8 sps:$4 sm:$0xff]   ;;  %v2477_v39 = vld [vmem:[%s3140_s13 + $0x120] ss:$8 sps:$4 sm:$0xff]  }
  0x7d   : > { %1903 = vmatprep.subr.bf16.mxu1 %v2468_v33  ;;  %v2478_v40 = vld [vmem:[%s3140_s13 + $0x34] ss:$8 sps:$4 sm:$0xff]   ;;  %v2482_v42 = vld [vmem:[%s3140_s13 + $0x30] ss:$8 sps:$4 sm:$0xff]   ;;  %v2484_v44 = vld [vmem:[%s3140_s13 + $0x44] ss:$8 sps:$4 sm:$0xff]  }
  0x7e   : > { %v2480_v41 = vld [vmem:[%s3140_s13 + $0x134] ss:$8 sps:$4 sm:$0xff]   ;;  %v2483_v43 = vld [vmem:[%s3140_s13 + $0x130] ss:$8 sps:$4 sm:$0xff]   ;;  %v2486_v45 = vld [vmem:[%s3140_s13 + $0x144] ss:$8 sps:$4 sm:$0xff]  }
  0x7f   : > { %1863 = vmatpush1.bf16.msra.mxu0 %v2470_v34  ;;  %v2488_v46 = vld [vmem:[%s3140_s13 + $0x40] ss:$8 sps:$4 sm:$0xff]   ;;  %v2490_v48 = vld [vmem:[%s3140_s13 + $0x54] ss:$8 sps:$4 sm:$0xff]   ;;  %v2494_v50 = vld [vmem:[%s3140_s13 + $0x50] ss:$8 sps:$4 sm:$0xff]  }
  0x80   : > { %1904 = vmatpush1.bf16.msra.mxu1 %v2471_v35  ;;  %1864 = vmatprep.subr.bf16.mxu0 %v2472_v36  ;;  %v2489_v47 = vld [vmem:[%s3140_s13 + $0x140] ss:$8 sps:$4 sm:$0xff]   ;;  %v2492_v49 = vld [vmem:[%s3140_s13 + $0x154] ss:$8 sps:$4 sm:$0xff]   ;;  %v2495_v51 = vld [vmem:[%s3140_s13 + $0x150] ss:$8 sps:$4 sm:$0xff]  }
  0x81   : > { %1905 = vmatprep.subr.bf16.mxu1 %v2474_v37  ;;  %v2496_v52 = vld [vmem:[%s3140_s13 + $0x64] ss:$8 sps:$4 sm:$0xff]   ;;  %v2500_v54 = vld [vmem:[%s3140_s13 + $0x60] ss:$8 sps:$4 sm:$0xff]   ;;  %v2502_v56 = vld [vmem:[%s3140_s13 + $0x74] ss:$8 sps:$4 sm:$0xff]  }
  0x82   : > { %v2498_v53 = vld [vmem:[%s3140_s13 + $0x164] ss:$8 sps:$4 sm:$0xff]   ;;  %v2501_v55 = vld [vmem:[%s3140_s13 + $0x160] ss:$8 sps:$4 sm:$0xff]   ;;  %v2504_v57 = vld [vmem:[%s3140_s13 + $0x174] ss:$8 sps:$4 sm:$0xff]  }
  0x83   : > { %1865 = vmatpush1.bf16.msra.mxu0 %v2476_v38  ;;  %v2506_v58 = vld [vmem:[%s3140_s13 + $0x70] ss:$8 sps:$4 sm:$0xff]   ;;  %v2508_v60 = vld [vmem:[%s3140_s13 + $0x84] ss:$8 sps:$4 sm:$0xff]   ;;  %v2512_v62 = vld [vmem:[%s3140_s13 + $0x80] ss:$8 sps:$4 sm:$0xff]  }
  0x84   : > { %1906 = vmatpush1.bf16.msra.mxu1 %v2477_v39  ;;  %1866 = vmatprep.subr.bf16.mxu0 %v2478_v40  ;;  %v2507_v59 = vld [vmem:[%s3140_s13 + $0x170] ss:$8 sps:$4 sm:$0xff]   ;;  %v2510_v61 = vld [vmem:[%s3140_s13 + $0x184] ss:$8 sps:$4 sm:$0xff]   ;;  %v2513_v63 = vld [vmem:[%s3140_s13 + $0x180] ss:$8 sps:$4 sm:$0xff]  }
  0x85   : > { %1907 = vmatprep.subr.bf16.mxu1 %v2480_v41  ;;  %v2514_v0 = vld [vmem:[%s3140_s13 + $0x94] ss:$8 sps:$4 sm:$0xff]   ;;  %v2518_v2 = vld [vmem:[%s3140_s13 + $0x90] ss:$8 sps:$4 sm:$0xff]   ;;  %v2520_v4 = vld [vmem:[%s3140_s13 + $0xa4] ss:$8 sps:$4 sm:$0xff]  }
  0x86   : > { %v2516_v1 = vld [vmem:[%s3140_s13 + $0x194] ss:$8 sps:$4 sm:$0xff]   ;;  %v2519_v3 = vld [vmem:[%s3140_s13 + $0x190] ss:$8 sps:$4 sm:$0xff]   ;;  %v2522_v5 = vld [vmem:[%s3140_s13 + $0x1a4] ss:$8 sps:$4 sm:$0xff]  }
  0x87   : > { %1867 = vmatpush1.bf16.msra.mxu0 %v2482_v42  ;;  %v2524_v6 = vld [vmem:[%s3140_s13 + $0xa0] ss:$8 sps:$4 sm:$0xff]   ;;  %v2526_v8 = vld [vmem:[%s3140_s13 + $0xb4] ss:$8 sps:$4 sm:$0xff]   ;;  %v2530_v13 = vld [vmem:[%s3140_s13 + $0xb0] ss:$8 sps:$4 sm:$0xff]  }
  0x88   : > { %1908 = vmatpush1.bf16.msra.mxu1 %v2483_v43  ;;  %1868 = vmatprep.subr.bf16.mxu0 %v2484_v44  ;;  %v2525_v7 = vld [vmem:[%s3140_s13 + $0x1a0] ss:$8 sps:$4 sm:$0xff]   ;;  %v2528_v9 = vld [vmem:[%s3140_s13 + $0x1b4] ss:$8 sps:$4 sm:$0xff]   ;;  %v2531_v14 = vld [vmem:[%s3140_s13 + $0x1b0] ss:$8 sps:$4 sm:$0xff]  }
  0x89   : > { %1909 = vmatprep.subr.bf16.mxu1 %v2486_v45  ;;  %v959_v10 = vld [vmem:[%s3127_s30] sm:$0xff]  ;;  %v960_v12 = vld [vmem:[%s3127_s30 + $0x8] sm:$0xff]  ;;  %v2532_v16 = vld [vmem:[%s3140_s13 + $0xc4] ss:$8 sps:$4 sm:$0xff]   ;;  %p2395_p13 = scmp.ne.s32.totalorder %s2723_s17, 3 }
  0x8a   : > { %v2243_v11 = vcombine.high %v959_v10, %v959_v10  ;;  %v2245_v15 = vcombine.high %v960_v12, %v960_v12  ;;  %v2534_v17 = vld [vmem:[%s3140_s13 + $0x1c4] ss:$8 sps:$4 sm:$0xff]   ;;  %v2536_v18 = vld [vmem:[%s3140_s13 + $0xc0] ss:$8 sps:$4 sm:$0xff]   ;;  %v2538_v20 = vld [vmem:[%s3140_s13 + $0xd4] ss:$8 sps:$4 sm:$0xff]   ;;  %v2242_v34 = vcombine.low %v959_v10, %v959_v10  ;;  %v2244_v35 = vcombine.low %v960_v12, %v960_v12 }
  0x8b   : > { %1869 = vmatpush1.bf16.msra.mxu0 %v2488_v46  ;;  %v2537_v19 = vld [vmem:[%s3140_s13 + $0x1c0] ss:$8 sps:$4 sm:$0xff]   ;;  %v2540_v21 = vld [vmem:[%s3140_s13 + $0x1d4] ss:$8 sps:$4 sm:$0xff]   ;;  %v2542_v22 = vld [vmem:[%s3140_s13 + $0xd0] ss:$8 sps:$4 sm:$0xff]  }
  0x8c   : > { %1910 = vmatpush1.bf16.msra.mxu1 %v2489_v47  ;;  %1870 = vmatprep.subr.bf16.mxu0 %v2490_v48  ;;  %v2543_v23 = vld [vmem:[%s3140_s13 + $0x1d0] ss:$8 sps:$4 sm:$0xff]   ;;  %v2544_v24 = vld [vmem:[%s3140_s13 + $0xe4] ss:$8 sps:$4 sm:$0xff]   ;;  %v2548_v26 = vld [vmem:[%s3140_s13 + $0xe0] ss:$8 sps:$4 sm:$0xff]  }
  0x8d   : > { %1911 = vmatprep.subr.bf16.mxu1 %v2492_v49  ;;  %1892 = vmatprep.mubr.bf16.mxu0 %v2243_v11  ;;  %v2546_v25 = vld [vmem:[%s3140_s13 + $0x1e4] ss:$8 sps:$4 sm:$0xff]   ;;  %v2549_v27 = vld [vmem:[%s3140_s13 + $0x1e0] ss:$8 sps:$4 sm:$0xff]   ;;  %v2550_v28 = vld [vmem:[%s3140_s13 + $0xf4] ss:$8 sps:$4 sm:$0xff]  }
  0x8e   : > { %1933 = vmatprep.mubr.bf16.mxu1 %v2245_v15  ;;  %v2552_v29 = vld [vmem:[%s3140_s13 + $0x1f4] ss:$8 sps:$4 sm:$0xff]   ;;  %v2554_v30 = vld [vmem:[%s3140_s13 + $0xf0] ss:$8 sps:$4 sm:$0xff]   ;;  %v2562_v32 = vld [vmem:[%s3140_s13 + $0x204] ss:$8 sps:$4 sm:$0xff]  }
  0x8f   : > { %1871 = vmatpush1.bf16.msra.mxu0 %v2494_v50  ;;  %v2555_v31 = vld [vmem:[%s3140_s13 + $0x1f0] ss:$8 sps:$4 sm:$0xff]   ;;  %v2565_v33 = vld [vmem:[%s3140_s13 + $0x304] ss:$8 sps:$4 sm:$0xff]   ;;  %v2560_v36 = vld [vmem:[%s3140_s13 + $0x200] ss:$8 sps:$4 sm:$0xff]  }
  0x90   : > { %1912 = vmatpush1.bf16.msra.mxu1 %v2495_v51  ;;  %1872 = vmatprep.subr.bf16.mxu0 %v2496_v52  ;;  %v2563_v37 = vld [vmem:[%s3140_s13 + $0x300] ss:$8 sps:$4 sm:$0xff]   ;;  %v2568_v38 = vld [vmem:[%s3140_s13 + $0x214] ss:$8 sps:$4 sm:$0xff]   ;;  %v2566_v40 = vld [vmem:[%s3140_s13 + $0x210] ss:$8 sps:$4 sm:$0xff]  }
  0x91   : > { %1913 = vmatprep.subr.bf16.mxu1 %v2498_v53  ;;  %v2571_v39 = vld [vmem:[%s3140_s13 + $0x314] ss:$8 sps:$4 sm:$0xff]   ;;  %v2569_v41 = vld [vmem:[%s3140_s13 + $0x310] ss:$8 sps:$4 sm:$0xff]   ;;  %v2574_v42 = vld [vmem:[%s3140_s13 + $0x224] ss:$8 sps:$4 sm:$0xff]  }
  0x92   : > { %v2577_v43 = vld [vmem:[%s3140_s13 + $0x324] ss:$8 sps:$4 sm:$0xff]   ;;  %v2572_v44 = vld [vmem:[%s3140_s13 + $0x220] ss:$8 sps:$4 sm:$0xff]   ;;  %v2580_v46 = vld [vmem:[%s3140_s13 + $0x234] ss:$8 sps:$4 sm:$0xff]  }
  0x93   : > { %1873 = vmatpush1.bf16.msra.mxu0 %v2500_v54  ;;  %v2575_v45 = vld [vmem:[%s3140_s13 + $0x320] ss:$8 sps:$4 sm:$0xff]   ;;  %v2583_v47 = vld [vmem:[%s3140_s13 + $0x334] ss:$8 sps:$4 sm:$0xff]   ;;  %v2578_v48 = vld [vmem:[%s3140_s13 + $0x230] ss:$8 sps:$4 sm:$0xff]  }
  0x94   : > { %1914 = vmatpush1.bf16.msra.mxu1 %v2501_v55  ;;  %1874 = vmatprep.subr.bf16.mxu0 %v2502_v56  ;;  %v2581_v49 = vld [vmem:[%s3140_s13 + $0x330] ss:$8 sps:$4 sm:$0xff]   ;;  %v2586_v50 = vld [vmem:[%s3140_s13 + $0x244] ss:$8 sps:$4 sm:$0xff]   ;;  %v2584_v52 = vld [vmem:[%s3140_s13 + $0x240] ss:$8 sps:$4 sm:$0xff]  }
  0x95   : > { %1915 = vmatprep.subr.bf16.mxu1 %v2504_v57  ;;  %v2589_v51 = vld [vmem:[%s3140_s13 + $0x344] ss:$8 sps:$4 sm:$0xff]   ;;  %v2587_v53 = vld [vmem:[%s3140_s13 + $0x340] ss:$8 sps:$4 sm:$0xff]   ;;  %v2592_v54 = vld [vmem:[%s3140_s13 + $0x254] ss:$8 sps:$4 sm:$0xff]  }
  0x96   : > { %v2595_v55 = vld [vmem:[%s3140_s13 + $0x354] ss:$8 sps:$4 sm:$0xff]   ;;  %v2590_v56 = vld [vmem:[%s3140_s13 + $0x250] ss:$8 sps:$4 sm:$0xff]   ;;  %v2625_v15 = vld [vmem:[%s3140_s13 + $0x3a4] ss:$8 sps:$4 sm:$0xff]  }
  0x97   : > { %1875 = vmatpush1.bf16.msra.mxu0 %v2506_v58  ;;  %v2593_v57 = vld [vmem:[%s3140_s13 + $0x350] ss:$8 sps:$4 sm:$0xff]   ;;  %v2598_v58 = vld [vmem:[%s3140_s13 + $0x264] ss:$8 sps:$4 sm:$0xff]   ;;  %v2616_v10 = vld [vmem:[%s3140_s13 + $0x294] ss:$8 sps:$4 sm:$0xff]  }
  0x98   : > { %1916 = vmatpush1.bf16.msra.mxu1 %v2507_v59  ;;  %1876 = vmatprep.subr.bf16.mxu0 %v2508_v60  ;;  %v2601_v59 = vld [vmem:[%s3140_s13 + $0x364] ss:$8 sps:$4 sm:$0xff]   ;;  %v2619_v11 = vld [vmem:[%s3140_s13 + $0x394] ss:$8 sps:$4 sm:$0xff]   ;;  %v2614_v12 = vld [vmem:[%s3140_s13 + $0x290] ss:$8 sps:$4 sm:$0xff]  }
  0x99   : > { %1917 = vmatprep.subr.bf16.mxu1 %v2510_v61  ;;  %v3236_v60 = vld [vmem:[%s3127_s30 + $0x10] sm:$0xff] }
  0x9a   : > { %v2596_v61 = vld [vmem:[%s3140_s13 + $0x260] ss:$8 sps:$4 sm:$0xff]  }
  0x9b   : > { %1877 = vmatpush1.bf16.msra.mxu0 %v2512_v62  ;;  %v2599_v62 = vld [vmem:[%s3140_s13 + $0x360] ss:$8 sps:$4 sm:$0xff]  }
  0x9c   : > { %1918 = vmatpush1.bf16.msra.mxu1 %v2513_v63  ;;  %1878 = vmatprep.subr.bf16.mxu0 %v2514_v0  ;;  %v2247_v63 = vcombine.high %v3236_v60, %v3236_v60  ;;  %v3243_v0 = vld [vmem:[%s3127_s30 + $0x18] sm:$0xff] }
  0x9d   : > { %1919 = vmatprep.subr.bf16.mxu1 %v2516_v1  ;;  %v2604_v1 = vld [vmem:[%s3140_s13 + $0x274] ss:$8 sps:$4 sm:$0xff]  }
  0x9f   : > { %1879 = vmatpush1.bf16.msra.mxu0 %v2518_v2  ;;  %v2249_v2 = vcombine.high %v3243_v0, %v3243_v0 }
  0xa0   : > { %1920 = vmatpush1.bf16.msra.mxu1 %v2519_v3  ;;  %1880 = vmatprep.subr.bf16.mxu0 %v2520_v4  ;;  %v2607_v3 = vld [vmem:[%s3140_s13 + $0x374] ss:$8 sps:$4 sm:$0xff]   ;;  %v2602_v4 = vld [vmem:[%s3140_s13 + $0x270] ss:$8 sps:$4 sm:$0xff]  }
  0xa1   : > { %1921 = vmatprep.subr.bf16.mxu1 %v2522_v5  ;;  %v2605_v5 = vld [vmem:[%s3140_s13 + $0x370] ss:$8 sps:$4 sm:$0xff]  }
  0xa3   : > { %1881 = vmatpush1.bf16.msra.mxu0 %v2524_v6  ;;  %v2610_v6 = vld [vmem:[%s3140_s13 + $0x284] ss:$8 sps:$4 sm:$0xff]  }
  0xa4   : > { %1922 = vmatpush1.bf16.msra.mxu1 %v2525_v7  ;;  %1882 = vmatprep.subr.bf16.mxu0 %v2526_v8  ;;  %v2613_v7 = vld [vmem:[%s3140_s13 + $0x384] ss:$8 sps:$4 sm:$0xff]   ;;  %v2608_v8 = vld [vmem:[%s3140_s13 + $0x280] ss:$8 sps:$4 sm:$0xff]  }
  0xa5   : > { %1923 = vmatprep.subr.bf16.mxu1 %v2528_v9  ;;  %v2611_v9 = vld [vmem:[%s3140_s13 + $0x380] ss:$8 sps:$4 sm:$0xff]  }
  0xa7   : > { %1883 = vmatpush1.bf16.msra.mxu0 %v2530_v13  ;;  %v2617_v13 = vld [vmem:[%s3140_s13 + $0x390] ss:$8 sps:$4 sm:$0xff]  }
  0xa8   : > { %1924 = vmatpush1.bf16.msra.mxu1 %v2531_v14  ;;  %1884 = vmatprep.subr.bf16.mxu0 %v2532_v16  ;;  %v2622_v14 = vld [vmem:[%s3140_s13 + $0x2a4] ss:$8 sps:$4 sm:$0xff]   ;;  %v2620_v16 = vld [vmem:[%s3140_s13 + $0x2a0] ss:$8 sps:$4 sm:$0xff]  }
  0xa9   : > { %1925 = vmatprep.subr.bf16.mxu1 %v2534_v17  ;;  %v2623_v17 = vld [vmem:[%s3140_s13 + $0x3a0] ss:$8 sps:$4 sm:$0xff]  }
  0xab   : > { %1885 = vmatpush1.bf16.msra.mxu0 %v2536_v18  ;;  %v2628_v18 = vld [vmem:[%s3140_s13 + $0x2b4] ss:$8 sps:$4 sm:$0xff]  }
  0xac   : > { %1926 = vmatpush1.bf16.msra.mxu1 %v2537_v19  ;;  %1886 = vmatprep.subr.bf16.mxu0 %v2538_v20  ;;  %v2631_v19 = vld [vmem:[%s3140_s13 + $0x3b4] ss:$8 sps:$4 sm:$0xff]   ;;  %v2626_v20 = vld [vmem:[%s3140_s13 + $0x2b0] ss:$8 sps:$4 sm:$0xff]  }
  0xad   : > { %1927 = vmatprep.subr.bf16.mxu1 %v2540_v21  ;;  %v2629_v21 = vld [vmem:[%s3140_s13 + $0x3b0] ss:$8 sps:$4 sm:$0xff]  }
  0xaf   : > { %1887 = vmatpush1.bf16.msra.mxu0 %v2542_v22  ;;  %v2634_v22 = vld [vmem:[%s3140_s13 + $0x2c4] ss:$8 sps:$4 sm:$0xff]  }
  0xb0   : > { %1928 = vmatpush1.bf16.msra.mxu1 %v2543_v23  ;;  %1888 = vmatprep.subr.bf16.mxu0 %v2544_v24  ;;  %v2637_v23 = vld [vmem:[%s3140_s13 + $0x3c4] ss:$8 sps:$4 sm:$0xff]   ;;  %v2632_v24 = vld [vmem:[%s3140_s13 + $0x2c0] ss:$8 sps:$4 sm:$0xff]  }
  0xb1   : > { %1929 = vmatprep.subr.bf16.mxu1 %v2546_v25  ;;  %v2635_v25 = vld [vmem:[%s3140_s13 + $0x3c0] ss:$8 sps:$4 sm:$0xff]  }
  0xb3   : > { %1889 = vmatpush1.bf16.msra.mxu0 %v2548_v26  ;;  %v2640_v26 = vld [vmem:[%s3140_s13 + $0x2d4] ss:$8 sps:$4 sm:$0xff]  }
  0xb4   : > { %1930 = vmatpush1.bf16.msra.mxu1 %v2549_v27  ;;  %1890 = vmatprep.subr.bf16.mxu0 %v2550_v28  ;;  %v2643_v27 = vld [vmem:[%s3140_s13 + $0x3d4] ss:$8 sps:$4 sm:$0xff]   ;;  %v2638_v28 = vld [vmem:[%s3140_s13 + $0x2d0] ss:$8 sps:$4 sm:$0xff]  }
  0xb5   : > { %1931 = vmatprep.subr.bf16.mxu1 %v2552_v29  ;;  %v2641_v29 = vld [vmem:[%s3140_s13 + $0x3d0] ss:$8 sps:$4 sm:$0xff]  }
  0xb7   : > { %1891 = vmatpush1.bf16.msra.mxu0 %v2554_v30  ;;  %v2646_v30 = vld [vmem:[%s3140_s13 + $0x2e4] ss:$8 sps:$4 sm:$0xff]  }
  0xb8   : > { %1932 = vmatpush1.bf16.msra.mxu1 %v2555_v31  ;;  %1942 = vmatprep.subr.bf16.mxu0 %v2562_v32  ;;  %v2649_v31 = vld [vmem:[%s3140_s13 + $0x3e4] ss:$8 sps:$4 sm:$0xff]   ;;  %v2644_v32 = vld [vmem:[%s3140_s13 + $0x2e0] ss:$8 sps:$4 sm:$0xff]  }
  0xb9   : > { %1983 = vmatprep.subr.bf16.mxu1 %v2565_v33  ;;  %v2647_v33 = vld [vmem:[%s3140_s13 + $0x3e0] ss:$8 sps:$4 sm:$0xff]  }
  0xba   : > { %1893 = vmatmul.mubr.bf16.vlgmr.msra.gmra.mrb[0].mxu0 %v2242_v34  ;;  %v2652_v34 = vld [vmem:[%s3140_s13 + $0x2f4] ss:$8 sps:$4 sm:$0xff]  }
  0xbb   : > { %1934 = vmatmul.mubr.bf16.vlgmr.msra.gmra.mrb[0].mxu1 %v2244_v35  ;;  %1943 = vmatpush1.bf16.msra.mxu0 %v2560_v36  ;;  %v2655_v35 = vld [vmem:[%s3140_s13 + $0x3f4] ss:$8 sps:$4 sm:$0xff]   ;;  %v2650_v36 = vld [vmem:[%s3140_s13 + $0x2f0] ss:$8 sps:$4 sm:$0xff]  }
  0xbc   : > { %1984 = vmatpush1.bf16.msra.mxu1 %v2563_v37  ;;  %1944 = vmatprep.subr.bf16.mxu0 %v2568_v38  ;;  %v2653_v37 = vld [vmem:[%s3140_s13 + $0x3f0] ss:$8 sps:$4 sm:$0xff]   ;;  %v2660_v38 = vld [vmem:[%s3140_s13 + $0x404] ss:$8 sps:$4 sm:$0xff]  }
  0xbd   : > { %1985 = vmatprep.subr.bf16.mxu1 %v2571_v39  ;;  %1974 = vmatprep.mubr.bf16.mxu0 %v2247_v63  ;;  %v2246_v39 = vcombine.low %v3236_v60, %v3236_v60 }
  0xbe   : > { %2015 = vmatprep.mubr.bf16.mxu1 %v2249_v2 }
  0xbf   : > { %1945 = vmatpush1.bf16.msra.mxu0 %v2566_v40  ;;  %v2248_v40 = vcombine.low %v3243_v0, %v3243_v0 }
  0xc0   : > { %1986 = vmatpush1.bf16.msra.mxu1 %v2569_v41  ;;  %1946 = vmatprep.subr.bf16.mxu0 %v2574_v42  ;;  %v2658_v41 = vld [vmem:[%s3140_s13 + $0x400] ss:$8 sps:$4 sm:$0xff]   ;;  %v2665_v42 = vld [vmem:[%s3140_s13 + $0x414] ss:$8 sps:$4 sm:$0xff]  }
  0xc1   : > { %1987 = vmatprep.subr.bf16.mxu1 %v2577_v43  ;;  %v2663_v43 = vld [vmem:[%s3140_s13 + $0x410] ss:$8 sps:$4 sm:$0xff]  }
  0xc3   : > { %1947 = vmatpush1.bf16.msra.mxu0 %v2572_v44  ;;  %v2741_v44 = vmov 0  }
  0xc4   : > { %1988 = vmatpush1.bf16.msra.mxu1 %v2575_v45  ;;  %1948 = vmatprep.subr.bf16.mxu0 %v2580_v46  ;;  %v2668_v45 = vld [vmem:[%s3140_s13 + $0x424] ss:$8 sps:$4 sm:$0xff]   ;;  %v2666_v46 = vld [vmem:[%s3140_s13 + $0x420] ss:$8 sps:$4 sm:$0xff]  }
  0xc5   : > { %1989 = vmatprep.subr.bf16.mxu1 %v2583_v47  ;;  %v2671_v47 = vld [vmem:[%s3140_s13 + $0x434] ss:$8 sps:$4 sm:$0xff]  }
  0xc7   : > { %1949 = vmatpush1.bf16.msra.mxu0 %v2578_v48  ;;  %v2669_v48 = vld [vmem:[%s3140_s13 + $0x430] ss:$8 sps:$4 sm:$0xff]  }
  0xc8   : > { %1990 = vmatpush1.bf16.msra.mxu1 %v2581_v49  ;;  %1950 = vmatprep.subr.bf16.mxu0 %v2586_v50  ;;  %v2674_v49 = vld [vmem:[%s3140_s13 + $0x444] ss:$8 sps:$4 sm:$0xff]   ;;  %v2672_v50 = vld [vmem:[%s3140_s13 + $0x440] ss:$8 sps:$4 sm:$0xff]  }
  0xc9   : > { %1991 = vmatprep.subr.bf16.mxu1 %v2589_v51  ;;  %v2677_v51 = vld [vmem:[%s3140_s13 + $0x454] ss:$8 sps:$4 sm:$0xff]  }
  0xcb   : > { %1951 = vmatpush1.bf16.msra.mxu0 %v2584_v52  ;;  %v2675_v52 = vld [vmem:[%s3140_s13 + $0x450] ss:$8 sps:$4 sm:$0xff]  }
  0xcc   : > { %1992 = vmatpush1.bf16.msra.mxu1 %v2587_v53  ;;  %1952 = vmatprep.subr.bf16.mxu0 %v2592_v54  ;;  %v2680_v53 = vld [vmem:[%s3140_s13 + $0x464] ss:$8 sps:$4 sm:$0xff]   ;;  %v2678_v54 = vld [vmem:[%s3140_s13 + $0x460] ss:$8 sps:$4 sm:$0xff]  }
  0xcd   : > { %1993 = vmatprep.subr.bf16.mxu1 %v2595_v55  ;;  %v2683_v55 = vld [vmem:[%s3140_s13 + $0x474] ss:$8 sps:$4 sm:$0xff]  }
  0xcf   : > { %1953 = vmatpush1.bf16.msra.mxu0 %v2590_v56  ;;  %v2681_v56 = vld [vmem:[%s3140_s13 + $0x470] ss:$8 sps:$4 sm:$0xff]  }
  0xd0   : > { %1994 = vmatpush1.bf16.msra.mxu1 %v2593_v57  ;;  %1954 = vmatprep.subr.bf16.mxu0 %v2598_v58  ;;  %v2684_v57 = vld [vmem:[%s3127_s30 + $0x20] ss:$0 sps:$4 sm:$0xff]  }
  0xd1   : > { %1995 = vmatprep.subr.bf16.mxu1 %v2601_v59 }
  0xd3   : > { %1955 = vmatpush1.bf16.msra.mxu0 %v2596_v61 }
  0xd4   : > { %1996 = vmatpush1.bf16.msra.mxu1 %v2599_v62  ;;  %1956 = vmatprep.subr.bf16.mxu0 %v2604_v1 }
  0xd5   : > { %1997 = vmatprep.subr.bf16.mxu1 %v2607_v3 }
  0xd7   : > { %1957 = vmatpush1.bf16.msra.mxu0 %v2602_v4 }
  0xd8   : > { %1998 = vmatpush1.bf16.msra.mxu1 %v2605_v5  ;;  %1958 = vmatprep.subr.bf16.mxu0 %v2610_v6 }
  0xd9   : > { %1999 = vmatprep.subr.bf16.mxu1 %v2613_v7 }
  0xdb   : > { %1959 = vmatpush1.bf16.msra.mxu0 %v2608_v8 }
  0xdc   : > { %2000 = vmatpush1.bf16.msra.mxu1 %v2611_v9  ;;  %1960 = vmatprep.subr.bf16.mxu0 %v2616_v10 }
  0xdd   : > { %2001 = vmatprep.subr.bf16.mxu1 %v2619_v11 }
  0xdf   : > { %1961 = vmatpush1.bf16.msra.mxu0 %v2614_v12 }
  0xe0   : > { %2002 = vmatpush1.bf16.msra.mxu1 %v2617_v13  ;;  %1962 = vmatprep.subr.bf16.mxu0 %v2622_v14 }
  0xe1   : > { %2003 = vmatprep.subr.bf16.mxu1 %v2625_v15 }
  0xe3   : > { %1963 = vmatpush1.bf16.msra.mxu0 %v2620_v16  ;;  %v957_v16 = vld [vmem:[#allocation2] sm:$0xff] }
  0xe4   : > { %2004 = vmatpush1.bf16.msra.mxu1 %v2623_v17  ;;  %1964 = vmatprep.subr.bf16.mxu0 %v2628_v18 }
  0xe5   : > { %2005 = vmatprep.subr.bf16.mxu1 %v2631_v19  ;;  %v958_v19 = vld [vmem:[#allocation2 + $0x8] sm:$0xff] }
  0xe7   : > { %1965 = vmatpush1.bf16.msra.mxu0 %v2626_v20 }
  0xe8   : > { %2006 = vmatpush1.bf16.msra.mxu1 %v2629_v21  ;;  %1966 = vmatprep.subr.bf16.mxu0 %v2634_v22 }
  0xe9   : > { %2007 = vmatprep.subr.bf16.mxu1 %v2637_v23 }
  0xeb   : > { %1967 = vmatpush1.bf16.msra.mxu0 %v2632_v24 }
  0xec   : > { %2008 = vmatpush1.bf16.msra.mxu1 %v2635_v25  ;;  %1968 = vmatprep.subr.bf16.mxu0 %v2640_v26 }
  0xed   : > { %2009 = vmatprep.subr.bf16.mxu1 %v2643_v27 }
  0xef   : > { %1969 = vmatpush1.bf16.msra.mxu0 %v2638_v28 }
  0xf0   : > { %2010 = vmatpush1.bf16.msra.mxu1 %v2641_v29  ;;  %1970 = vmatprep.subr.bf16.mxu0 %v2646_v30 }
  0xf1   : > { %2011 = vmatprep.subr.bf16.mxu1 %v2649_v31 }
  0xf3   : > { %1971 = vmatpush1.bf16.msra.mxu0 %v2644_v32 }
  0xf4   : > { %2012 = vmatpush1.bf16.msra.mxu1 %v2647_v33  ;;  %1972 = vmatprep.subr.bf16.mxu0 %v2652_v34 }
  0xf5   : > { %2013 = vmatprep.subr.bf16.mxu1 %v2655_v35 }
  0xf7   : > { %1973 = vmatpush1.bf16.msra.mxu0 %v2650_v36 }
  0xf8   : > { %2014 = vmatpush1.bf16.msra.mxu1 %v2653_v37  ;;  %2024 = vmatprep.subr.bf16.mxu0 %v2660_v38 }
  0xfa   : > { %1975 = vmatmul.mubr.bf16.vlgmr.msra.gmra.mrb[4].mxu0 %v2246_v39 }
  0xfb   : > { %2016 = vmatmul.mubr.bf16.vlgmr.msra.gmra.mrb[4].mxu1 %v2248_v40  ;;  %2025 = vmatpush1.bf16.msra.mxu0 %v2658_v41 }
  0xfc   : > { %2056 = vmatprep.mubr.bf16.mxu0 %v2741_v44  ;;  %2026 = vmatprep.subr.bf16.mxu0 %v2665_v42 }
  0xff   : > { %2027 = vmatpush1.bf16.msra.mxu0 %v2663_v43 }
 0x100   : > { %2028 = vmatprep.subr.bf16.mxu0 %v2668_v45 }
 0x103   : > { %2029 = vmatpush1.bf16.msra.mxu0 %v2666_v46 }
 0x104   : > { %2030 = vmatprep.subr.bf16.mxu0 %v2671_v47 }
 0x107   : > { %2031 = vmatpush1.bf16.msra.mxu0 %v2669_v48 }
 0x108   : > { %2032 = vmatprep.subr.bf16.mxu0 %v2674_v49 }
 0x10b   : > { %2033 = vmatpush1.bf16.msra.mxu0 %v2672_v50 }
 0x10c   : > { %2034 = vmatprep.subr.bf16.mxu0 %v2677_v51 }
 0x10f   : > { %2035 = vmatpush1.bf16.msra.mxu0 %v2675_v52 }
 0x110   : > { %2036 = vmatprep.subr.bf16.mxu0 %v2680_v53 }
 0x113   : > { %2037 = vmatpush1.bf16.msra.mxu0 %v2678_v54 }
 0x114   : > { %2038 = vmatprep.subr.bf16.mxu0 %v2683_v55 }
 0x117   : > { %2039 = vmatpush1.bf16.msra.mxu0 %v2681_v56 }
 0x11a   : > { %2057 = vmatmul.mubr.bf16.vlgmr.msra.gmra.mrb[8].mxu0 %v2684_v57 }
 0x18d   : > { %v1894_v58 = vpop.f32.mrb[0].mxu0 }
 0x18e   : > { %v1935_v59 = vpop.f32.mrb[0].mxu1  ;;  %v1896_v61 = vpop.f32.mrb[1].mxu0 }
 0x18f   : > { %v1936_v60 = vadd.f32 %v1935_v59, %v1894_v58  ;;  %v1937_v62 = vpop.f32.mrb[1].mxu1  ;;  %v1898_v0 = vpop.f32.mrb[2].mxu0 }
 0x190   : > { %v1938_v63 = vadd.f32 %v1937_v62, %v1896_v61  ;;  %v1939_v1 = vpop.f32.mrb[2].mxu1  ;;  %v1899_v2 = vpop.f32.mrb[3].mxu0 }
 0x191   : > { %v1940_v3 = vpop.f32.mrb[3].mxu1 }
 0x1cd   : > { %v1976_v4 = vpop.f32.mrb[4].mxu0 }
 0x1ce   : > { %v2017_v5 = vpop.f32.mrb[4].mxu1  ;;  %v1977_v6 = vadd.f32 %v1976_v4, %v1936_v60  ;;  %v1978_v7 = vpop.f32.mrb[5].mxu0 }
 0x1cf   : > { %v2019_v8 = vpop.f32.mrb[5].mxu1  ;;  %v1979_v9 = vadd.f32 %v1978_v7, %v1938_v63  ;;  %v1980_v10 = vpop.f32.mrb[6].mxu0 }
 0x1d0   : > { %v2021_v11 = vpop.f32.mrb[6].mxu1  ;;  %v2018_v12 = vadd.f32 %v2017_v5, %v1977_v6  ;;  %v1981_v13 = vpop.f32.mrb[7].mxu0 }
 0x1d1   : > { %v2022_v14 = vpop.f32.mrb[7].mxu1  ;;  %v2020_v15 = vadd.f32 %v2019_v8, %v1979_v9 }
 0x1ed   : > { %v2058_v17 = vpop.f32.mrb[8].mxu0  ;;  %2072 = sbr.rel (%p2395_p13) target bundleno = 512 (0x200), region = 82 }
 0x1ee   : > { %v2059_v18 = vadd.f32 %v2058_v17, %v2018_v12  ;;  %v2060_v20 = vpop.f32.mrb[9].mxu0 }
 0x1ef   : > { %v2061_v21 = vadd.f32 %v2060_v20, %v2020_v15  ;;  %v2062_v22 = vpop.f32.mrb[10].mxu0 }
 0x1f0   : > { %v2065_v23 = vadd.f32 %v2059_v18, %v957_v16  ;;  %v2063_v24 = vpop.f32.mrb[11].mxu0 }
 0x1f1   : > { %v2066_v25 = vadd.f32 %v2061_v21, %v958_v19 }
 0x1f2   : > { %2067 = vst [vmem:[#allocation2] sm:$0xff] %v2065_v23 }
 0x1f3   : > { %2068 = vst [vmem:[#allocation2 + $0x8] sm:$0xff] %v2066_v25 }
 0x1f9   : > { %v2073_v26 = vld [vmem:[#allocation2] sm:$0xff] }
 0x1fa   : > { %v2074_v27 = vld [vmem:[#allocation2 + $0x8] sm:$0xff]  ;;  %v2075_v28 = vmax.f32 %v2073_v26, 0.0 }
 0x1fb   : > { %v2076_v29 = vmax.f32 %v2074_v27, 0.0 }
 0x1fd   : > { %v2400_v30 = vpack.c.bf16 %v2076_v29, %v2075_v28 }
 0x1ff   : > { %2085 = vst [vmem:[%s3138_s12] sm:$0xff] %v2400_v30 }
 0x200 PF: > { %s14_s21 = sadd.s32 1, %s2739_s21   ;;  %s3332_s15 = smov %s2719_s16 }
 0x201   : > { %p11_p0 = scmp.ge.s32.totalorder %s14_s21, 10   ;;  %s3333_s16 = smov %s2818_s28 }
 0x202   : > { %s3334_s17 = smov %s2731_s19  ;;  %s3335_s18 = smov %s2735_s20 }
 0x203   : > { %s3336_s19 = smov %s3339_s22  ;;  %s3337_s20 = smov %s3343_s23 }
 0x204   :  { %13 = sbr.rel (!%p11_p0) target bundleno = 4 (0x4), region = 126 }

// kernel: resnet18_forward.19
= control target key start
LH: loop header
LB: loop body
LE: loop exit
PB: predicated region body
PF: predicated region fallthrough
CT: control target
= control target key end

     0   :  { %s636_s1 = inlined_call_operand.vmem [shape: bf16[512,128], index: 1, kind: input, shape index: {}]   ;;  %s637_s0 = inlined_call_operand.vmem [shape: bf16[8,512], index: 0, kind: input, shape index: {}]   ;;  %s638_s2 = inlined_call_operand.vmem [shape: f32[1,128], index: 2, kind: input, shape index: {}]   ;;  %s639_s3 = inlined_call_operand.vmem [shape: f32[8,128], index: 3, kind: output, shape index: {}]  }
   0x1   :  { %v472_v0 = vld [vmem:[%s636_s1 + $0x40] sm:$0xff]   ;;  %v476_v4 = vld [vmem:[%s636_s1 + $0x48] sm:$0xff]   ;;  %v480_v8 = vld [vmem:[%s636_s1 + $0x50] sm:$0xff]  }
   0x2   :  { %v473_v1 = vld [vmem:[%s636_s1 + $0xc0] sm:$0xff]   ;;  %428 = vmatprep.subr.bf16.mxu0 %v472_v0  ;;  %v477_v5 = vld [vmem:[%s636_s1 + $0xc8] sm:$0xff]   ;;  %v481_v9 = vld [vmem:[%s636_s1 + $0xd0] sm:$0xff]  }
   0x3   :  { %v474_v2 = vld [vmem:[%s636_s1] sm:$0xff]   ;;  %450 = vmatprep.subr.bf16.mxu1 %v473_v1  ;;  %v478_v6 = vld [vmem:[%s636_s1 + $0x8] sm:$0xff]   ;;  %v482_v10 = vld [vmem:[%s636_s1 + $0x10] sm:$0xff]  }
   0x4   :  { %v475_v3 = vld [vmem:[%s636_s1 + $0x80] sm:$0xff]   ;;  %429 = vmatpush3.bf16.msra.mxu0 %v474_v2  ;;  %v479_v7 = vld [vmem:[%s636_s1 + $0x88] sm:$0xff]   ;;  %v483_v11 = vld [vmem:[%s636_s1 + $0x90] sm:$0xff]  }
   0x5   :  { %451 = vmatpush3.bf16.msra.mxu1 %v475_v3  ;;  %430 = vmatprep.subr.bf16.mxu0 %v476_v4  ;;  %v484_v12 = vld [vmem:[%s636_s1 + $0x58] sm:$0xff]   ;;  %v488_v16 = vld [vmem:[%s636_s1 + $0x60] sm:$0xff]   ;;  %v492_v20 = vld [vmem:[%s636_s1 + $0x68] sm:$0xff]  }
   0x6   :  { %452 = vmatprep.subr.bf16.mxu1 %v477_v5  ;;  %v485_v13 = vld [vmem:[%s636_s1 + $0xd8] sm:$0xff]   ;;  %v489_v17 = vld [vmem:[%s636_s1 + $0xe0] sm:$0xff]   ;;  %v493_v21 = vld [vmem:[%s636_s1 + $0xe8] sm:$0xff]  }
   0x7   :  { %v486_v14 = vld [vmem:[%s636_s1 + $0x18] sm:$0xff]   ;;  %v490_v18 = vld [vmem:[%s636_s1 + $0x20] sm:$0xff]   ;;  %v494_v22 = vld [vmem:[%s636_s1 + $0x28] sm:$0xff]  }
   0x8   :  { %431 = vmatpush3.bf16.msra.mxu0 %v478_v6  ;;  %v487_v15 = vld [vmem:[%s636_s1 + $0x98] sm:$0xff]   ;;  %v491_v19 = vld [vmem:[%s636_s1 + $0xa0] sm:$0xff]   ;;  %v495_v23 = vld [vmem:[%s636_s1 + $0xa8] sm:$0xff]  }
   0x9   :  { %453 = vmatpush3.bf16.msra.mxu1 %v479_v7  ;;  %432 = vmatprep.subr.bf16.mxu0 %v480_v8  ;;  %v496_v24 = vld [vmem:[%s636_s1 + $0x70] sm:$0xff]   ;;  %v500_v28 = vld [vmem:[%s636_s1 + $0x78] sm:$0xff]   ;;  %v28_v32 = vld [vmem:[%s637_s0] sm:$0xff] }
   0xa   :  { %454 = vmatprep.subr.bf16.mxu1 %v481_v9  ;;  %v497_v25 = vld [vmem:[%s636_s1 + $0xf0] sm:$0xff]   ;;  %v501_v29 = vld [vmem:[%s636_s1 + $0xf8] sm:$0xff]   ;;  %v29_v33 = vld [vmem:[%s637_s0 + $0x8] sm:$0xff]  ;;  %v392_v34 = vcombine.low %v28_v32, %v28_v32  ;;  %v393_v35 = vcombine.high %v28_v32, %v28_v32 }
   0xb   :  { %v498_v26 = vld [vmem:[%s636_s1 + $0x30] sm:$0xff]   ;;  %v502_v30 = vld [vmem:[%s636_s1 + $0x38] sm:$0xff]   ;;  %v394_v36 = vcombine.low %v29_v33, %v29_v33  ;;  %v395_v37 = vcombine.high %v29_v33, %v29_v33  ;;  %v391_v46 = vld [vmem:[%s638_s2] ss:$0 sm:$0xff] }
   0xc   :  { %433 = vmatpush3.bf16.msra.mxu0 %v482_v10  ;;  %v499_v27 = vld [vmem:[%s636_s1 + $0xb0] sm:$0xff]   ;;  %v503_v31 = vld [vmem:[%s636_s1 + $0xb8] sm:$0xff]   ;;  %332 = vmatprep.mubr.bf16.mxu0 %v393_v35 }
   0xd   :  { %455 = vmatpush3.bf16.msra.mxu1 %v483_v11  ;;  %434 = vmatprep.subr.bf16.mxu0 %v484_v12 }
   0xe   :  { %456 = vmatprep.subr.bf16.mxu1 %v485_v13  ;;  %372 = vmatprep.mubr.bf16.mxu1 %v395_v37 }
  0x10   :  { %435 = vmatpush3.bf16.msra.mxu0 %v486_v14 }
  0x11   :  { %457 = vmatpush3.bf16.msra.mxu1 %v487_v15  ;;  %436 = vmatprep.subr.bf16.mxu0 %v488_v16 }
  0x12   :  { %458 = vmatprep.subr.bf16.mxu1 %v489_v17 }
  0x14   :  { %437 = vmatpush3.bf16.msra.mxu0 %v490_v18 }
  0x15   :  { %459 = vmatpush3.bf16.msra.mxu1 %v491_v19  ;;  %438 = vmatprep.subr.bf16.mxu0 %v492_v20 }
  0x16   :  { %460 = vmatprep.subr.bf16.mxu1 %v493_v21 }
  0x18   :  { %439 = vmatpush3.bf16.msra.mxu0 %v494_v22 }
  0x19   :  { %461 = vmatpush3.bf16.msra.mxu1 %v495_v23  ;;  %440 = vmatprep.subr.bf16.mxu0 %v496_v24 }
  0x1a   :  { %462 = vmatprep.subr.bf16.mxu1 %v497_v25 }
  0x1c   :  { %441 = vmatpush3.bf16.msra.mxu0 %v498_v26 }
  0x1d   :  { %463 = vmatpush3.bf16.msra.mxu1 %v499_v27  ;;  %442 = vmatprep.subr.bf16.mxu0 %v500_v28 }
  0x1e   :  { %464 = vmatprep.subr.bf16.mxu1 %v501_v29 }
  0x20   :  { %443 = vmatpush3.bf16.msra.mxu0 %v502_v30 }
  0x21   :  { %465 = vmatpush3.bf16.msra.mxu1 %v503_v31 }
  0x23   :  { %333 = vmatmul.mubr.bf16.vlgmr.msra.gmra.mrb[0].mxu0 %v392_v34 }
  0x24   :  { %373 = vmatmul.mubr.bf16.vlgmr.msra.gmra.mrb[0].mxu1 %v394_v36 }
  0xf6   :  { %v444_v38 = vpop.f32.mrb[0].mxu0 }
  0xf7   :  { %v466_v39 = vpop.f32.mrb[0].mxu1  ;;  %v445_v40 = vpop.f32.mrb[1].mxu0 }
  0xf8   :  { %v467_v41 = vpop.f32.mrb[1].mxu1  ;;  %v446_v42 = vadd.f32 %v445_v40, %v444_v38  ;;  %v447_v44 = vpop.f32.mrb[2].mxu0 }
  0xf9   :  { %v468_v43 = vadd.f32 %v467_v41, %v466_v39  ;;  %v469_v45 = vpop.f32.mrb[2].mxu1  ;;  %v448_v47 = vpop.f32.mrb[3].mxu0 }
  0xfa   :  { %v470_v48 = vpop.f32.mrb[3].mxu1 }
  0xfb   :  { %v375_v49 = vadd.f32 %v468_v43, %v446_v42 }
  0xfd   :  { %v380_v50 = vadd.f32 %v391_v46, %v375_v49 }
  0xff   :  { %386 = vst [vmem:[%s639_s3] sm:$0xff] %v380_v50 }

</bundles_post_ra>
